<compile_context>
chip_gen: v7x
topology: tpu7x:2x2x1
jax: 0.10.0
libtpu: 0.0.40
codegen_flags: <defaults>
</compile_context>

<pallas_src>
import functools

import jax
import jax.numpy as jnp
import numpy as np
from jax.experimental import pallas as pl
from jax.experimental.pallas import tpu as pltpu


def _silu(x):
    return x * jax.nn.sigmoid(x)


def _round_up(x, m):
    return ((x + m - 1) // m) * m


# Review guidance: <= ~56 MiB keeps the resident-W1 variant safe on v7x (64 MiB
# physical); plenty of headroom on v5e/v6e (128 MiB).
_VMEM_LIMIT = 56 * 1024 * 1024


# ----------------------------- Pallas kernel -----------------------------

def fused_model_kernel(p_ref, w0_ref, b0_ref, w1t_ref, b1_ref, o_ref,
                       h0_ref, v6_ref):
    """Fully fused conv0+SiLU, pw1+SiLU, pw2+SiLU; channel-major throughout.

    grid = (Mp//tm, C//tn).  The LAST grid axis (j) varies fastest, so the
    h0/v6 scratches written at j==0 stay valid for all j of the same row
    block i.  Do NOT reorder the grid or mark the j axis "parallel".

    p_ref  : (kdim_p, tm)  bf16  im2col patch column tile (changes with i)
    w0_ref : (C, kdim_p)   bf16  conv0 weight matrix, VMEM-resident
    b0_ref : (C, 1)        f32
    w1t_ref: (C, C)        bf16  shared 1x1 weight (transposed), VMEM-resident
    b1_ref : (C, 1)        f32
    o_ref  : (tn, tm)      f32   output row tile of channel-major v9
    h0_ref : (C, tm)       bf16  scratch: silu(conv0(x))
    v6_ref : (C, tm)       bf16  scratch: silu(pw1(h0))
    """
    j = pl.program_id(1)
    n_ct = pl.num_programs(1)          # number of channel row tiles
    tn = o_ref.shape[0]

    @pl.when(j == 0)
    def _():
        # --- layer 0: conv0 (im2col matmul) + SiLU, row-tiled to bound temps ---
        def conv0_tile(jj, carry):
            r = pl.multiple_of(jj * tn, tn)
            acc = jnp.dot(w0_ref[pl.ds(r, tn), :], p_ref[...],
                          preferred_element_type=jnp.float32)
            h0_ref[pl.ds(r, tn), :] = _silu(
                acc + b0_ref[pl.ds(r, tn), :]).astype(h0_ref.dtype)
            return carry

        jax.lax.fori_loop(0, n_ct, conv0_tile, 0)

        # --- layer 1: first shared 1x1 + SiLU (needs the full h0), row-tiled ---
        def pw1_tile(jj, carry):
            r = pl.multiple_of(jj * tn, tn)
            acc = jnp.dot(w1t_ref[pl.ds(r, tn), :], h0_ref[...],
                          preferred_element_type=jnp.float32)
            v6_ref[pl.ds(r, tn), :] = _silu(
                acc + b1_ref[pl.ds(r, tn), :]).astype(v6_ref.dtype)
            return carry

        jax.lax.fori_loop(0, n_ct, pw1_tile, 0)

    # --- layer 2: second shared 1x1 + SiLU for this grid step's row tile ---
    r = pl.multiple_of(j * tn, tn)
    acc = jnp.dot(w1t_ref[pl.ds(r, tn), :], v6_ref[...],
                  preferred_element_type=jnp.float32)
    o_ref[...] = _silu(acc + b1_ref[pl.ds(r, tn), :]).astype(o_ref.dtype)


# ----------------------------- pallas_call wrapper -----------------------------

def _fused_forward(patches, w0_cm, b0c, w1t, b1c, *, tm, tn):
    kdim_p, Mp = patches.shape
    C = w1t.shape[0]
    assert Mp % tm == 0 and C % tn == 0
    grid = (Mp // tm, C // tn)
    # Single-buffer the blocks whose index never changes (weights / biases).
    resident = pl.Buffered(buffer_count=1)
    return pl.pallas_call(
        fused_model_kernel,
        out_shape=jax.ShapeDtypeStruct((C, Mp), jnp.float32),
        grid_spec=pltpu.PrefetchScalarGridSpec(
            num_scalar_prefetch=0,
            grid=grid,
            in_specs=[
                pl.BlockSpec((kdim_p, tm), lambda i, j: (0, i)),
                pl.BlockSpec((C, kdim_p), lambda i, j: (0, 0),
                             pipeline_mode=resident),
                pl.BlockSpec((C, 1), lambda i, j: (0, 0),
                             pipeline_mode=resident),
                pl.BlockSpec((C, C), lambda i, j: (0, 0),
                             pipeline_mode=resident),
                pl.BlockSpec((C, 1), lambda i, j: (0, 0),
                             pipeline_mode=resident),
            ],
            out_specs=pl.BlockSpec((tn, tm), lambda i, j: (j, i)),
            scratch_shapes=[
                pltpu.VMEM((C, tm), jnp.bfloat16),   # h0 = silu(conv0(x))
                pltpu.VMEM((C, tm), jnp.bfloat16),   # v6 = silu(pw1(h0))
            ],
        ),
        compiler_params=pltpu.CompilerParams(
            # j carries the h0/v6 scratch dependency -> must stay "arbitrary";
            # i is independent -> megacore parallel.
            dimension_semantics=("parallel", "arbitrary"),
            vmem_limit_bytes=_VMEM_LIMIT,
        ),
    )(patches, w0_cm, b0c, w1t, b1c)


# ----------------------------- JAX glue (layout / im2col) -----------------------------

def convtranspose_im2col_cm(x, K, stride, padding, dtype=jnp.bfloat16):
    """ConvTranspose2d(K, stride, padding) == zero-dilate + pad + correlate(flip(W)).

    Builds CHANNEL-MAJOR patches [Cin*K*K, N*Hout*Wout] directly from the NCHW
    input; the only transpose moves the size-N axis (free for N=1), so no
    full-size patch-matrix transpose is materialized in XLA.
    """
    N, Cin, H, W = x.shape
    Hout = (H - 1) * stride - 2 * padding + K
    Wout = (W - 1) * stride - 2 * padding + K
    Hd = (H - 1) * stride + 1
    Wd = (W - 1) * stride + 1
    xd = jnp.zeros((N, Cin, Hd, Wd), x.dtype).at[:, :, ::stride, ::stride].set(x)
    P = K - 1 - padding
    xp = jnp.pad(xd, ((0, 0), (0, 0), (P, P), (P, P))).astype(dtype)
    cols = [xp[:, :, kh:kh + Hout, kw:kw + Wout]
            for kh in range(K) for kw in range(K)]
    pat = jnp.stack(cols, axis=2)                       # (N, Cin, K*K, Hout, Wout)
    pat = pat.transpose(1, 2, 0, 3, 4).reshape(Cin * K * K, N * Hout * Wout)
    return pat, (N, Hout, Wout)


def make_conv0_wmat_cm(w0):
    # w0: ConvTranspose2d weight [Cin, Cout, K, K]; flip spatially, rows = Cout.
    Cin, Cout, K, _ = w0.shape
    wflip = w0[:, :, ::-1, ::-1]
    return wflip.transpose(1, 0, 2, 3).reshape(Cout, Cin * K * K)


@functools.partial(jax.jit, static_argnames=("stride", "padding", "tm", "tn"))
def model_forward(x1, w0, b0, w1, b1, *, stride=2, padding=3, tm=512, tn=256):
    Cin, Cmid, K, _ = w0.shape
    assert Cmid % tn == 0 and tn % 128 == 0 and tm % 128 == 0
    assert K - 1 - padding >= 0

    patches, (N, Hout, Wout) = convtranspose_im2col_cm(x1, K, stride, padding)
    kdim, M = patches.shape
    kdim_p = _round_up(kdim, 32)           # 147 -> 160: bf16/MXU-friendly contraction
    Mp = _round_up(M, tm)
    patches = jnp.pad(patches, ((0, kdim_p - kdim), (0, Mp - M)))

    w0_cm = jnp.pad(make_conv0_wmat_cm(w0),
                    ((0, 0), (0, kdim_p - kdim))).astype(jnp.bfloat16)
    w1t = w1[:, :, 0, 0].T.astype(jnp.bfloat16)     # shared 1x1 weight, channel-major
    b0c = b0.reshape(Cmid, 1).astype(jnp.float32)
    b1c = b1.reshape(Cmid, 1).astype(jnp.float32)

    # Fused kernel: channel-major v9 [Cmid, Mp] f32.
    # (bf16 output would halve the final HBM write if the accuracy contract allows.)
    v9_cm = _fused_forward(patches, w0_cm, b0c, w1t, b1c, tm=tm, tn=tn)

    # Channel-major -> NCHW: slice + reshape (+ a size-N-axis transpose, free for N=1).
    out = v9_cm[:, :M].reshape(Cmid, N, Hout, Wout).transpose(1, 0, 2, 3)
    return out


# ----------------------------- independent reference -----------------------------

def _convT_ref(x, w, b, stride, padding):
    """Independent ConvTranspose2d (PyTorch semantics) via lax.conv_general_dilated."""
    K = w.shape[2]
    kern = jnp.flip(w, (2, 3)).transpose(1, 0, 2, 3)     # [Cin,Cout,K,K] -> OIHW
    y = jax.lax.conv_general_dilated(
        x, kern,
        window_strides=(1, 1),
        padding=[(K - 1 - padding, K - 1 - padding)] * 2,
        lhs_dilation=(stride, stride),
        dimension_numbers=("NCHW", "OIHW", "NCHW"))
    return y + b[None, :, None, None]


def _ref_forward(x1, w0, b0, w1, b1, *, stride, padding):
    v3 = _silu(_convT_ref(x1, w0, b0, stride, padding))
    v6 = _silu(_convT_ref(v3, w1, b1, 1, 0))
    return _silu(_convT_ref(v6, w1, b1, 1, 0))


# ----------------------------- main -----------------------------

if __name__ == "__main__":
    key = jax.random.PRNGKey(0)
    # Small shapes consistent with the module (original: 1x3x224x224, 4096 channels).
    N, Cin, H, W = 1, 3, 16, 16
    Cmid = 512                       # stand-in for 4096 (multiple of tn)
    K, stride, padding = 7, 2, 3
    tm, tn = 512, 256

    k1, k2, k3, k4, k5 = jax.random.split(key, 5)
    x1 = jax.random.normal(k1, (N, Cin, H, W), jnp.float32)
    w0 = jax.random.normal(k2, (Cin, Cmid, K, K), jnp.float32) * 0.05
    b0 = jax.random.normal(k3, (Cmid,), jnp.float32) * 0.05
    w1 = jax.random.normal(k4, (Cmid, Cmid, 1, 1), jnp.float32) * 0.05
    b1 = jax.random.normal(k5, (Cmid,), jnp.float32) * 0.05

    out = jax.block_until_ready(
        model_forward(x1, w0, b0, w1, b1,
                      stride=stride, padding=padding, tm=tm, tn=tn))

    ref = _ref_forward(x1, w0, b0, w1, b1, stride=stride, padding=padding)

    Hout = (H - 1) * stride - 2 * padding + K
    Wout = (W - 1) * stride - 2 * padding + K
    assert out.shape == (N, Cmid, Hout, Wout)
    # Pallas pipeline uses bf16 MXU operands (f32 accumulation); compare against
    # the fully independent f32 lax reference with a bf16-level tolerance.
    np.testing.assert_allclose(np.asarray(out), np.asarray(ref), rtol=3e-2, atol=3e-2)
    print("KERNEL_OK")
</pallas_src>

<mosaic_0001>
module attributes {stable_mosaic.version = 11 : i64} {
  func.func @fused_model_kernel(%arg0: i32, %arg1: i32, %arg2: memref<160x512xbf16, #tpu.memory_space<vmem>>, %arg3: memref<512x160xbf16, #tpu.memory_space<vmem>>, %arg4: memref<512x1xf32, #tpu.memory_space<vmem>>, %arg5: memref<512x512xbf16, #tpu.memory_space<vmem>>, %arg6: memref<512x1xf32, #tpu.memory_space<vmem>>, %arg7: memref<256x512xf32, #tpu.memory_space<vmem>>, %arg8: memref<512x512xbf16, #tpu.memory_space<vmem>>, %arg9: memref<512x512xbf16, #tpu.memory_space<vmem>>) attributes {dimension_semantics = [#tpu.dimension_semantics<parallel>, #tpu.dimension_semantics<arbitrary>], iteration_bounds = array<i64: 2, 2>, scalar_prefetch = 0 : i64, scratch_operands = 2 : i64, tpu.core_type = #tpu.core_type<tc>, window_params = [{transform_indices = @transform_0, window_bounds = array<i64: 160, 512>}, {pipeline_mode = #tpu.pipeline_mode<synchronous>, transform_indices = @transform_1, window_bounds = array<i64: 512, 160>}, {pipeline_mode = #tpu.pipeline_mode<synchronous>, transform_indices = @transform_2, window_bounds = array<i64: 512, 1>}, {pipeline_mode = #tpu.pipeline_mode<synchronous>, transform_indices = @transform_3, window_bounds = array<i64: 512, 512>}, {pipeline_mode = #tpu.pipeline_mode<synchronous>, transform_indices = @transform_4, window_bounds = array<i64: 512, 1>}, {transform_indices = @transform_5, window_bounds = array<i64: 256, 512>}]} {
    %c0_i32 = arith.constant 0 : i32
    %0 = arith.cmpi eq, %arg1, %c0_i32 : i32
    %1 = arith.extui %0 : i1 to i32
    %c0_i32_0 = arith.constant 0 : i32
    %2 = arith.cmpi ne, %1, %c0_i32_0 : i32
    scf.if %2 {
      %c0_i32_7 = arith.constant 0 : i32
      %c2_i32 = arith.constant 2 : i32
      %20 = arith.addi %c0_i32_7, %c2_i32 : i32
      %c1_i32 = arith.constant 1 : i32
      scf.for %arg10 = %c0_i32_7 to %20 step %c1_i32  : i32 {
        %c256_i32_13 = arith.constant 256 : i32
        %22 = arith.muli %arg10, %c256_i32_13 : i32
        %23 = tpu.assume_multiple %22, 256 : i32
        %24 = arith.index_cast %23 : i32 to index
        %c0_14 = arith.constant 0 : index
        %25 = vector.load %arg3[%24, %c0_14] : memref<512x160xbf16, #tpu.memory_space<vmem>>, vector<256x160xbf16>
        %c0_15 = arith.constant 0 : index
        %c0_16 = arith.constant 0 : index
        %26 = vector.load %arg2[%c0_15, %c0_16] : memref<160x512xbf16, #tpu.memory_space<vmem>>, vector<160x512xbf16>
        %cst_17 = arith.constant dense<0.000000e+00> : vector<256x512xf32>
        %27 = tpu.matmul %25, %26, %cst_17 {dimension_numbers = #tpu.dot_dimension_numbers<[1], [0], [0], [1], [0, 0, 1, 1], [], []>} : vector<256x160xbf16>, vector<160x512xbf16>, vector<256x512xf32> -> vector<256x512xf32>
        %28 = arith.index_cast %23 : i32 to index
        %c0_18 = arith.constant 0 : index
        %29 = vector.load %arg4[%28, %c0_18] : memref<512x1xf32, #tpu.memory_space<vmem>>, vector<256x1xf32>
        %30 = vector.broadcast %29 : vector<256x1xf32> to vector<256x512xf32>
        %31 = arith.addf %27, %30 : vector<256x512xf32>
        %32 = arith.negf %31 : vector<256x512xf32>
        %33 = math.exp %32 : vector<256x512xf32>
        %cst_19 = arith.constant 1.000000e+00 : f32
        %34 = vector.broadcast %cst_19 : f32 to vector<256x512xf32>
        %35 = arith.addf %34, %33 : vector<256x512xf32>
        %36 = arith.divf %34, %35 : vector<256x512xf32>
        %37 = arith.mulf %31, %36 : vector<256x512xf32>
        %38 = arith.truncf %37 : vector<256x512xf32> to vector<256x512xbf16>
        %39 = arith.index_cast %23 : i32 to index
        %c0_20 = arith.constant 0 : index
        %40 = vector.load %arg8[%39, %c0_20] : memref<512x512xbf16, #tpu.memory_space<vmem>>, vector<256x512xbf16>
        tpu.vector_store %arg8[%39, %c0_20], %38 {strides = array<i32>} : memref<512x512xbf16, #tpu.memory_space<vmem>>, vector<256x512xbf16>,
      }
      %c2_i32_8 = arith.constant 2 : i32
      %c0_i32_9 = arith.constant 0 : i32
      %c2_i32_10 = arith.constant 2 : i32
      %21 = arith.addi %c0_i32_9, %c2_i32_10 : i32
      %c1_i32_11 = arith.constant 1 : i32
      scf.for %arg10 = %c0_i32_9 to %21 step %c1_i32_11  : i32 {
        %c256_i32_13 = arith.constant 256 : i32
        %22 = arith.muli %arg10, %c256_i32_13 : i32
        %23 = tpu.assume_multiple %22, 256 : i32
        %24 = arith.index_cast %23 : i32 to index
        %c0_14 = arith.constant 0 : index
        %25 = vector.load %arg5[%24, %c0_14] : memref<512x512xbf16, #tpu.memory_space<vmem>>, vector<256x512xbf16>
        %c0_15 = arith.constant 0 : index
        %c0_16 = arith.constant 0 : index
        %26 = vector.load %arg8[%c0_15, %c0_16] : memref<512x512xbf16, #tpu.memory_space<vmem>>, vector<512x512xbf16>
        %cst_17 = arith.constant dense<0.000000e+00> : vector<256x512xf32>
        %27 = tpu.matmul %25, %26, %cst_17 {dimension_numbers = #tpu.dot_dimension_numbers<[1], [0], [0], [1], [0, 0, 1, 1], [], []>} : vector<256x512xbf16>, vector<512x512xbf16>, vector<256x512xf32> -> vector<256x512xf32>
        %28 = arith.index_cast %23 : i32 to index
        %c0_18 = arith.constant 0 : index
        %29 = vector.load %arg6[%28, %c0_18] : memref<512x1xf32, #tpu.memory_space<vmem>>, vector<256x1xf32>
        %30 = vector.broadcast %29 : vector<256x1xf32> to vector<256x512xf32>
        %31 = arith.addf %27, %30 : vector<256x512xf32>
        %32 = arith.negf %31 : vector<256x512xf32>
        %33 = math.exp %32 : vector<256x512xf32>
        %cst_19 = arith.constant 1.000000e+00 : f32
        %34 = vector.broadcast %cst_19 : f32 to vector<256x512xf32>
        %35 = arith.addf %34, %33 : vector<256x512xf32>
        %36 = arith.divf %34, %35 : vector<256x512xf32>
        %37 = arith.mulf %31, %36 : vector<256x512xf32>
        %38 = arith.truncf %37 : vector<256x512xf32> to vector<256x512xbf16>
        %39 = arith.index_cast %23 : i32 to index
        %c0_20 = arith.constant 0 : index
        %40 = vector.load %arg9[%39, %c0_20] : memref<512x512xbf16, #tpu.memory_space<vmem>>, vector<256x512xbf16>
        tpu.vector_store %arg9[%39, %c0_20], %38 {strides = array<i32>} : memref<512x512xbf16, #tpu.memory_space<vmem>>, vector<256x512xbf16>,
      }
      %c2_i32_12 = arith.constant 2 : i32
    } else {
    }
    %c256_i32 = arith.constant 256 : i32
    %3 = arith.muli %arg1, %c256_i32 : i32
    %4 = tpu.assume_multiple %3, 256 : i32
    %5 = arith.index_cast %4 : i32 to index
    %c0 = arith.constant 0 : index
    %6 = vector.load %arg5[%5, %c0] : memref<512x512xbf16, #tpu.memory_space<vmem>>, vector<256x512xbf16>
    %c0_1 = arith.constant 0 : index
    %c0_2 = arith.constant 0 : index
    %7 = vector.load %arg9[%c0_1, %c0_2] : memref<512x512xbf16, #tpu.memory_space<vmem>>, vector<512x512xbf16>
    %cst = arith.constant dense<0.000000e+00> : vector<256x512xf32>
    %8 = tpu.matmul %6, %7, %cst {dimension_numbers = #tpu.dot_dimension_numbers<[1], [0], [0], [1], [0, 0, 1, 1], [], []>} : vector<256x512xbf16>, vector<512x512xbf16>, vector<256x512xf32> -> vector<256x512xf32>
    %9 = arith.index_cast %4 : i32 to index
    %c0_3 = arith.constant 0 : index
    %10 = vector.load %arg6[%9, %c0_3] : memref<512x1xf32, #tpu.memory_space<vmem>>, vector<256x1xf32>
    %11 = vector.broadcast %10 : vector<256x1xf32> to vector<256x512xf32>
    %12 = arith.addf %8, %11 : vector<256x512xf32>
    %13 = arith.negf %12 : vector<256x512xf32>
    %14 = math.exp %13 : vector<256x512xf32>
    %cst_4 = arith.constant 1.000000e+00 : f32
    %15 = vector.broadcast %cst_4 : f32 to vector<256x512xf32>
    %16 = arith.addf %15, %14 : vector<256x512xf32>
    %17 = arith.divf %15, %16 : vector<256x512xf32>
    %18 = arith.mulf %12, %17 : vector<256x512xf32>
    %c0_5 = arith.constant 0 : index
    %c0_6 = arith.constant 0 : index
    %19 = vector.load %arg7[%c0_5, %c0_6] : memref<256x512xf32, #tpu.memory_space<vmem>>, vector<256x512xf32>
    tpu.vector_store %arg7[%c0_5, %c0_6], %18 {strides = array<i32>} : memref<256x512xf32, #tpu.memory_space<vmem>>, vector<256x512xf32>,
    return
  }
  func.func @transform_0(%arg0: i32, %arg1: i32) -> (i32, i32) {
    %c0_i32 = arith.constant 0 : i32
    %c0_i32_0 = arith.constant 0 : i32
    return %c0_i32, %arg0 : i32, i32
  }
  func.func @transform_1(%arg0: i32, %arg1: i32) -> (i32, i32) {
    %c0_i32 = arith.constant 0 : i32
    %c0_i32_0 = arith.constant 0 : i32
    %c0_i32_1 = arith.constant 0 : i32
    return %c0_i32, %c0_i32_0 : i32, i32
  }
  func.func @transform_2(%arg0: i32, %arg1: i32) -> (i32, i32) {
    %c0_i32 = arith.constant 0 : i32
    %c0_i32_0 = arith.constant 0 : i32
    %c0_i32_1 = arith.constant 0 : i32
    return %c0_i32, %c0_i32_0 : i32, i32
  }
  func.func @transform_3(%arg0: i32, %arg1: i32) -> (i32, i32) {
    %c0_i32 = arith.constant 0 : i32
    %c0_i32_0 = arith.constant 0 : i32
    %c0_i32_1 = arith.constant 0 : i32
    return %c0_i32, %c0_i32_0 : i32, i32
  }
  func.func @transform_4(%arg0: i32, %arg1: i32) -> (i32, i32) {
    %c0_i32 = arith.constant 0 : i32
    %c0_i32_0 = arith.constant 0 : i32
    %c0_i32_1 = arith.constant 0 : i32
    return %c0_i32, %c0_i32_0 : i32, i32
  }
  func.func @transform_5(%arg0: i32, %arg1: i32) -> (i32, i32) {
    %c0_i32 = arith.constant 0 : i32
    return %arg1, %arg0 : i32, i32
  }
}

</mosaic_0001>

<bundles_post_ra>
// kernel: model_forward.1
= control target key start
LH: loop header
LB: loop body
LE: loop exit
PB: predicated region body
PF: predicated region fallthrough
CT: control target
= control target key end

     0   :  { %s11050_s18 = smov 0   ;;  %s11052_s19 = smov 0   ;;  %s14887_s0 = inlined_call_operand.vmem [shape: bf16[160,1024], index: 0, kind: input, shape index: {}]   ;;  %s14888_s1 = inlined_call_operand.vmem [shape: bf16[512,160], index: 1, kind: input, shape index: {}]   ;;  %s14889_s2 = inlined_call_operand.vmem [shape: f32[512,1], index: 2, kind: input, shape index: {}]   ;;  %s14890_s3 = inlined_call_operand.vmem [shape: bf16[512,512], index: 3, kind: input, shape index: {}]   ;;  %s14891_s4 = inlined_call_operand.vmem [shape: f32[512,1], index: 4, kind: input, shape index: {}]   ;;  %s14892_s5 = inlined_call_operand.vmem [shape: f32[512,1024], index: 5, kind: output, shape index: {}]  }
   0x1   :  { %s11054_s20 = smov 0   ;;  %s11056_s21 = smov 0  }
   0x2   :  { %s11058_s22 = smov 0   ;;  %s11060_s23 = smov 0  }
   0x3   :  { %s11062_s24 = smov 0   ;;  %s11064_s25 = smov 0  }
   0x4   :  { %s11066_s26 = smov 0  }
   0x5 LB: > { %s24_s27 = sadd.s32 1, %s10999_s24  ;;  %s27_s28 = sadd.s32 1, %s11003_s25  ;;  %s11007_s26 = sphi %s11066_s26, %s15_s26   ;;  %s11003_s25 = sphi %s11064_s25, %s15164_s25   ;;  %s10999_s24 = sphi %s11062_s24, %s15163_s24   ;;  %s10995_s23 = sphi %s11060_s23, %s15162_s23   ;;  %s10991_s22 = sphi %s11058_s22, %s15161_s22   ;;  %s10987_s21 = sphi %s11056_s21, %s15160_s21   ;;  %s10983_s20 = sphi %s11054_s20, %s15159_s20   ;;  %s10979_s19 = sphi %s11052_s19, %s15158_s19   ;;  %s10975_s18 = sphi %s11050_s18, %s15157_s18  }
   0x6   : > { %p25_p0 = scmp.ge.s32.totalorder %s24_s27, 2  ;;  %p41_p1 = scmp.ne.s32.totalorder %s10987_s21, %s10983_s20 }
   0x7   : > { %s7830_s29 = sadd.s32 4294967295, %s11007_s26   ;;  %p42_p2 = scmp.eq.s32.totalorder %s11007_s26, 0 }
   0x8   : > { %s15166_s27 = smov (%p25_p0, %s24_s27), 0  ;;  %s15168_s28 = smov (!%p25_p0, %s27_s28), %s11003_s25 }
   0x9   : > { %p29_p3 = scmp.ge.s32.totalorder %s15168_s28, 2  ;;  %s141_s30 = ssub.s32 %s10999_s24, %s15166_s27 }
   0xa   : > { %p11106_p4 = por %p42_p2, %p41_p1  ;;  %p156_p5 = scmp.ne.s32.totalorder %s10979_s19, %s10975_s18 }
   0xb   : > { %s15170_s28 = smov (%p29_p3, %s15168_s28), 0  ;;  %s34_s7 = sadd.s32 1, %s10987_s21 }
   0xc   : > { %p157_p6 = scmp.eq.s32.totalorder %s7830_s29, 3  ;;  %s31_s8 = ssub.s32 %s11003_s25, %s15170_s28 }
   0xd   : > { %s146_s9 = sadd.s32 1, %s10979_s19  ;;  %p32_p7 = scmp.eq.s32.totalorder %s31_s8, 0 }
   0xe   : > { %s143_s10 = sor.u32 %s141_s30, %s31_s8  ;;  %p11118_p9 = por %p157_p6, %p156_p5 }
   0xf   : > { %p144_p8 = scmp.eq.s32.totalorder %s143_s10, 0  ;;  %p7833_p10 = scmp.ge.s32.totalorder %s11007_s26, 4 }
  0x10   : > { %s11123_s12 = scalar_select %p32_p7, %s10987_s21, %s34_s7  }
  0x11   : > { %s11126_s13 = scalar_select %p144_p8, %s10979_s19, %s146_s9  }
  0x12   : > { %191 = sbr.rel (%p7833_p10) target bundleno = 49 (0x31), region = 32 }
  0x19   : > { %194 = sbr.rel (!%p11106_p4) target bundleno = 49 (0x31), region = 36  ;;  %s196_s14 = sand.u32 (%p11106_p4), 1, %s10987_s21  }
  0x1a   : > { %s8475_s15 = sshll.u32 (%p11106_p4), %s11003_s25, 4  ;;  %s8994_s16 = smul.u32 (%p11106_p4), 320, %s196_s14 }
  0x1b   : > { %s11136_s30 = scalar_lea.vmem (%p11106_p4), %s14887_s0, %s8475_s15 }
  0x1c   : > { %v214_v0 = vld [vmem:[%s11136_s30] sm:$0xff] (%p11106_p4)  ;;  %v216_v1 = vld [vmem:[%s11136_s30 + $0x8] sm:$0xff] (%p11106_p4)  ;;  %s11144_s6 = scalar_lea.vmem (%p11106_p4), [#allocation4], %s8994_s16 }
  0x1d   : > { %v218_v2 = vld [vmem:[%s11136_s30 + $0x20] sm:$0xff] (%p11106_p4)  ;;  %v220_v3 = vld [vmem:[%s11136_s30 + $0x28] sm:$0xff] (%p11106_p4)  ;;  %215 = vst [vmem:[%s11144_s6] sm:$0xff] (%p11106_p4), %v214_v0  ;;  %217 = vst [vmem:[%s11144_s6 + $0x8] sm:$0xff] (%p11106_p4), %v216_v1 }
  0x1e   : > { %v222_v4 = vld [vmem:[%s11136_s30 + $0x40] sm:$0xff] (%p11106_p4)  ;;  %v224_v5 = vld [vmem:[%s11136_s30 + $0x48] sm:$0xff] (%p11106_p4)  ;;  %219 = vst [vmem:[%s11144_s6 + $0x10] sm:$0xff] (%p11106_p4), %v218_v2  ;;  %221 = vst [vmem:[%s11144_s6 + $0x18] sm:$0xff] (%p11106_p4), %v220_v3 }
  0x1f   : > { %223 = vst [vmem:[%s11144_s6 + $0x20] sm:$0xff] (%p11106_p4), %v222_v4  ;;  %225 = vst [vmem:[%s11144_s6 + $0x28] sm:$0xff] (%p11106_p4), %v224_v5  ;;  %v226_v6 = vld [vmem:[%s11136_s30 + $0x60] sm:$0xff] (%p11106_p4)  ;;  %v228_v7 = vld [vmem:[%s11136_s30 + $0x68] sm:$0xff] (%p11106_p4) }
  0x20   : > { %v230_v8 = vld [vmem:[%s11136_s30 + $0x80] sm:$0xff]  ;;  %227 = vst [vmem:[%s11144_s6 + $0x30] sm:$0xff] %v226_v6  ;;  %229 = vst [vmem:[%s11144_s6 + $0x38] sm:$0xff] %v228_v7  ;;  %v232_v9 = vld [vmem:[%s11136_s30 + $0x88] sm:$0xff] }
  0x21   : > { %231 = vst [vmem:[%s11144_s6 + $0x40] sm:$0xff] %v230_v8  ;;  %v234_v10 = vld [vmem:[%s11136_s30 + $0xa0] sm:$0xff]  ;;  %v236_v11 = vld [vmem:[%s11136_s30 + $0xa8] sm:$0xff]  ;;  %233 = vst [vmem:[%s11144_s6 + $0x48] sm:$0xff] %v232_v9 }
  0x22   : > { %235 = vst [vmem:[%s11144_s6 + $0x50] sm:$0xff] %v234_v10  ;;  %237 = vst [vmem:[%s11144_s6 + $0x58] sm:$0xff] %v236_v11  ;;  %v238_v12 = vld [vmem:[%s11136_s30 + $0xc0] sm:$0xff]  ;;  %v240_v13 = vld [vmem:[%s11136_s30 + $0xc8] sm:$0xff] }
  0x23   : > { %v242_v14 = vld [vmem:[%s11136_s30 + $0xe0] sm:$0xff]  ;;  %239 = vst [vmem:[%s11144_s6 + $0x60] sm:$0xff] %v238_v12  ;;  %241 = vst [vmem:[%s11144_s6 + $0x68] sm:$0xff] %v240_v13  ;;  %v244_v15 = vld [vmem:[%s11136_s30 + $0xe8] sm:$0xff] }
  0x24   : > { %243 = vst [vmem:[%s11144_s6 + $0x70] sm:$0xff] %v242_v14  ;;  %v246_v16 = vld [vmem:[%s11136_s30 + $0x100] sm:$0xff]  ;;  %v248_v17 = vld [vmem:[%s11136_s30 + $0x108] sm:$0xff]  ;;  %245 = vst [vmem:[%s11144_s6 + $0x78] sm:$0xff] %v244_v15 }
  0x25   : > { %247 = vst [vmem:[%s11144_s6 + $0x80] sm:$0xff] %v246_v16  ;;  %249 = vst [vmem:[%s11144_s6 + $0x88] sm:$0xff] %v248_v17  ;;  %v250_v18 = vld [vmem:[%s11136_s30 + $0x120] sm:$0xff]  ;;  %v252_v19 = vld [vmem:[%s11136_s30 + $0x128] sm:$0xff] }
  0x26   : > { %v254_v20 = vld [vmem:[%s11136_s30 + $0x140] sm:$0xff]  ;;  %251 = vst [vmem:[%s11144_s6 + $0x90] sm:$0xff] %v250_v18  ;;  %253 = vst [vmem:[%s11144_s6 + $0x98] sm:$0xff] %v252_v19  ;;  %v256_v21 = vld [vmem:[%s11136_s30 + $0x148] sm:$0xff] }
  0x27   : > { %255 = vst [vmem:[%s11144_s6 + $0xa0] sm:$0xff] %v254_v20  ;;  %v258_v22 = vld [vmem:[%s11136_s30 + $0x160] sm:$0xff]  ;;  %v260_v23 = vld [vmem:[%s11136_s30 + $0x168] sm:$0xff]  ;;  %257 = vst [vmem:[%s11144_s6 + $0xa8] sm:$0xff] %v256_v21 }
  0x28   : > { %259 = vst [vmem:[%s11144_s6 + $0xb0] sm:$0xff] %v258_v22  ;;  %261 = vst [vmem:[%s11144_s6 + $0xb8] sm:$0xff] %v260_v23  ;;  %v262_v24 = vld [vmem:[%s11136_s30 + $0x180] sm:$0xff]  ;;  %v264_v25 = vld [vmem:[%s11136_s30 + $0x188] sm:$0xff] }
  0x29   : > { %v266_v26 = vld [vmem:[%s11136_s30 + $0x1a0] sm:$0xff]  ;;  %263 = vst [vmem:[%s11144_s6 + $0xc0] sm:$0xff] %v262_v24  ;;  %265 = vst [vmem:[%s11144_s6 + $0xc8] sm:$0xff] %v264_v25  ;;  %v268_v27 = vld [vmem:[%s11136_s30 + $0x1a8] sm:$0xff] }
  0x2a   : > { %267 = vst [vmem:[%s11144_s6 + $0xd0] sm:$0xff] %v266_v26  ;;  %v270_v28 = vld [vmem:[%s11136_s30 + $0x1c0] sm:$0xff]  ;;  %v272_v29 = vld [vmem:[%s11136_s30 + $0x1c8] sm:$0xff]  ;;  %269 = vst [vmem:[%s11144_s6 + $0xd8] sm:$0xff] %v268_v27 }
  0x2b   : > { %271 = vst [vmem:[%s11144_s6 + $0xe0] sm:$0xff] %v270_v28  ;;  %273 = vst [vmem:[%s11144_s6 + $0xe8] sm:$0xff] %v272_v29  ;;  %v274_v30 = vld [vmem:[%s11136_s30 + $0x1e0] sm:$0xff]  ;;  %v276_v31 = vld [vmem:[%s11136_s30 + $0x1e8] sm:$0xff] }
  0x2c   : > { %v278_v32 = vld [vmem:[%s11136_s30 + $0x200] sm:$0xff]  ;;  %275 = vst [vmem:[%s11144_s6 + $0xf0] sm:$0xff] %v274_v30  ;;  %277 = vst [vmem:[%s11144_s6 + $0xf8] sm:$0xff] %v276_v31  ;;  %v280_v33 = vld [vmem:[%s11136_s30 + $0x208] sm:$0xff] }
  0x2d   : > { %279 = vst [vmem:[%s11144_s6 + $0x100] sm:$0xff] %v278_v32  ;;  %v282_v34 = vld [vmem:[%s11136_s30 + $0x220] sm:$0xff]  ;;  %v284_v35 = vld [vmem:[%s11136_s30 + $0x228] sm:$0xff]  ;;  %281 = vst [vmem:[%s11144_s6 + $0x108] sm:$0xff] %v280_v33 }
  0x2e   : > { %283 = vst [vmem:[%s11144_s6 + $0x110] sm:$0xff] %v282_v34  ;;  %285 = vst [vmem:[%s11144_s6 + $0x118] sm:$0xff] %v284_v35  ;;  %v286_v36 = vld [vmem:[%s11136_s30 + $0x240] sm:$0xff]  ;;  %v288_v37 = vld [vmem:[%s11136_s30 + $0x248] sm:$0xff] }
  0x2f   : > { %v290_v38 = vld [vmem:[%s11136_s30 + $0x260] sm:$0xff]  ;;  %287 = vst [vmem:[%s11144_s6 + $0x120] sm:$0xff] %v286_v36  ;;  %289 = vst [vmem:[%s11144_s6 + $0x128] sm:$0xff] %v288_v37  ;;  %v292_v39 = vld [vmem:[%s11136_s30 + $0x268] sm:$0xff] }
  0x30   : > { %291 = vst [vmem:[%s11144_s6 + $0x130] sm:$0xff] %v290_v38  ;;  %293 = vst [vmem:[%s11144_s6 + $0x138] sm:$0xff] %v292_v39 }
  0x31 PF: > { %p7836_p11 = scmp.ge.s32.totalorder %s11007_s26, 1  ;;  %p298_p12 = scmp.lt.s32.totalorder %s11007_s26, 5 }
  0x33   : > { %p299_p13 = pnand %p7836_p11, %p298_p12 }
  0x35   : > { %302 = sbr.rel (%p299_p13) target bundleno = 2043 (0x7fb), region = 59 }
  0x3c   : > { %s305_s7 = sand.u32 1, %s10983_s20   ;;  %s328_s8 = sand.u32 1, %s10975_s18  }
  0x3d   : > { %s8995_s9 = smul.u32 320, %s305_s7  ;;  %s7837_s10 = sshll.u32 %s328_s8, 10 }
  0x3e   : > { %s11226_s15 = scalar_lea.vmem [#allocation5], %s7837_s10  ;;  %p7838_p0 = scmp.ne.s32.totalorder %s10991_s22, 0 }
  0x3f   : > { %s11224_s14 = scalar_lea.vmem [#allocation4], %s8995_s9  ;;  %s11229_s16 = smov (!%p7838_p0), 0  }
  0x40   : > { %338 = sbr.rel (%p7838_p0) target bundleno = 1306 (0x51a), region = 67 }
  0x47 LB: >> { %v9089_v40 = vld [vmem:[%s11224_s14 + $0x4] ss:$16 sps:$4 sm:$0xff]   ;;  %v9091_v41 = vld [vmem:[%s11224_s14 + $0xc] ss:$16 sps:$4 sm:$0xff]   ;;  %v11017_v42 = vmov 0   ;;  %s11261_s18 = sshll.u32 %s11011_s16, 8  ;;  %s11011_s16 = sphi %s11229_s16, %s344_s16  }
  0x48   : >> { %9087 = vset.pattern.permute.xlu0 %v11017_v42  ;;  %9088 = vset.pattern.permute.xlu1 %v11017_v42  ;;  %v9093_v43 = vld [vmem:[%s11224_s14] ss:$16 sps:$4 sm:$0xff]   ;;  %v9094_v44 = vld [vmem:[%s11224_s14 + $0x8] ss:$16 sps:$4 sm:$0xff]   ;;  %v9095_v45 = vld [vmem:[%s11224_s14 + $0x24] ss:$16 sps:$4 sm:$0xff]   ;;  %s11270_s29 = scalar_lea.vmem %s14888_s1, %s11261_s18  ;;  %s11290_s7 = scalar_lea.vmem %s14889_s2, %s11261_s18 }
  0x49   : >> { %1009 = vmatprep.subr.bf16.mxu0 %v9089_v40  ;;  %1202 = vmatprep.subr.bf16.mxu1 %v9091_v41  ;;  %v9097_v46 = vld [vmem:[%s11224_s14 + $0x2c] ss:$16 sps:$4 sm:$0xff]   ;;  %v9099_v47 = vld [vmem:[%s11224_s14 + $0x20] ss:$16 sps:$4 sm:$0xff]   ;;  %v9100_v48 = vld [vmem:[%s11224_s14 + $0x28] ss:$16 sps:$4 sm:$0xff]  }
  0x4a   : >> { %1010 = vmatpush1.bf16.msra.mxu0 %v9093_v43  ;;  %1203 = vmatpush1.bf16.msra.mxu1 %v9094_v44  ;;  %v9101_v49 = vld [vmem:[%s11224_s14 + $0x44] ss:$16 sps:$4 sm:$0xff]   ;;  %v9103_v50 = vld [vmem:[%s11224_s14 + $0x4c] ss:$16 sps:$4 sm:$0xff]   ;;  %v9105_v51 = vld [vmem:[%s11224_s14 + $0x40] ss:$16 sps:$4 sm:$0xff]  }
  0x4b   : >> { %1011 = vmatprep.subr.bf16.mxu0 %v9095_v45  ;;  %1204 = vmatprep.subr.bf16.mxu1 %v9097_v46  ;;  %v9106_v52 = vld [vmem:[%s11224_s14 + $0x48] ss:$16 sps:$4 sm:$0xff]   ;;  %v9107_v53 = vld [vmem:[%s11224_s14 + $0x64] ss:$16 sps:$4 sm:$0xff]   ;;  %v9109_v54 = vld [vmem:[%s11224_s14 + $0x6c] ss:$16 sps:$4 sm:$0xff]  }
  0x4c   : >> { %v9111_v55 = vld [vmem:[%s11224_s14 + $0x60] ss:$16 sps:$4 sm:$0xff]   ;;  %v9112_v56 = vld [vmem:[%s11224_s14 + $0x68] ss:$16 sps:$4 sm:$0xff]   ;;  %v9113_v57 = vld [vmem:[%s11224_s14 + $0x84] ss:$16 sps:$4 sm:$0xff]  }
  0x4d   : >> { %v9115_v58 = vld [vmem:[%s11224_s14 + $0x8c] ss:$16 sps:$4 sm:$0xff]   ;;  %v9117_v59 = vld [vmem:[%s11224_s14 + $0x80] ss:$16 sps:$4 sm:$0xff]   ;;  %v9118_v60 = vld [vmem:[%s11224_s14 + $0x88] ss:$16 sps:$4 sm:$0xff]  }
  0x4e   : >> { %1012 = vmatpush1.bf16.msra.mxu0 %v9099_v47  ;;  %1205 = vmatpush1.bf16.msra.mxu1 %v9100_v48  ;;  %v9119_v61 = vld [vmem:[%s11224_s14 + $0xa4] ss:$16 sps:$4 sm:$0xff]   ;;  %v9121_v62 = vld [vmem:[%s11224_s14 + $0xac] ss:$16 sps:$4 sm:$0xff]   ;;  %v9123_v63 = vld [vmem:[%s11224_s14 + $0xa0] ss:$16 sps:$4 sm:$0xff]  }
  0x4f   : >> { %1013 = vmatprep.subr.bf16.mxu0 %v9101_v49  ;;  %1206 = vmatprep.subr.bf16.mxu1 %v9103_v50  ;;  %v9124_v0 = vld [vmem:[%s11224_s14 + $0xa8] ss:$16 sps:$4 sm:$0xff]   ;;  %v9125_v1 = vld [vmem:[%s11224_s14 + $0xc4] ss:$16 sps:$4 sm:$0xff]   ;;  %v9127_v2 = vld [vmem:[%s11224_s14 + $0xcc] ss:$16 sps:$4 sm:$0xff]  }
  0x50   : >> { %v9129_v3 = vld [vmem:[%s11224_s14 + $0xc0] ss:$16 sps:$4 sm:$0xff]   ;;  %v9130_v4 = vld [vmem:[%s11224_s14 + $0xc8] ss:$16 sps:$4 sm:$0xff]   ;;  %v9131_v5 = vld [vmem:[%s11224_s14 + $0xe4] ss:$16 sps:$4 sm:$0xff]  }
  0x51   : >> { %v9133_v6 = vld [vmem:[%s11224_s14 + $0xec] ss:$16 sps:$4 sm:$0xff]   ;;  %v9135_v7 = vld [vmem:[%s11224_s14 + $0xe0] ss:$16 sps:$4 sm:$0xff]   ;;  %v9136_v8 = vld [vmem:[%s11224_s14 + $0xe8] ss:$16 sps:$4 sm:$0xff]  }
  0x52   : >> { %1014 = vmatpush1.bf16.msra.mxu0 %v9105_v51  ;;  %1207 = vmatpush1.bf16.msra.mxu1 %v9106_v52  ;;  %v9151_v9 = vld [vmem:[%s11270_s29 + $0x4] ss:$8 sps:$4 sm:$0xff]   ;;  %vm960_vm0 = vcmask 261120   ;;  %v9141_v12 = vld [vmem:[%s11224_s14 + $0x100] ss:$16 sps:$4 sm:$0xff]   ;;  %v427_v24 = vld [vmem:[%s11290_s7 + $0x18] sm:$0xff] }
  0x53   : >> { %1015 = vmatprep.subr.bf16.mxu0 %v9107_v53  ;;  %1208 = vmatprep.subr.bf16.mxu1 %v9109_v54  ;;  %v9137_v10 = vld [vmem:[%s11224_s14 + $0x104] ss:$16 sps:$4 sm:$0xff]   ;;  %v9139_v11 = vld [vmem:[%s11224_s14 + $0x10c] ss:$16 sps:$4 sm:$0xff]   ;;  %v9142_v13 = vld [vmem:[%s11224_s14 + $0x108] ss:$16 sps:$4 sm:$0xff]  }
  0x54   : >> { %7914 = vmatprep.mubr.msk.bf16.mxu0 %vm960_vm0, %v9151_v9  ;;  %7930 = vmatprep.mubr.msk.bf16.mxu1 %vm960_vm0, %v9151_v9  ;;  %v9143_v14 = vld [vmem:[%s11224_s14 + $0x124] ss:$16 sps:$4 sm:$0xff]   ;;  %v9145_v15 = vld [vmem:[%s11224_s14 + $0x12c] ss:$16 sps:$4 sm:$0xff]   ;;  %v9147_v16 = vld [vmem:[%s11224_s14 + $0x120] ss:$16 sps:$4 sm:$0xff]  }
  0x55   : >> { %v9148_v17 = vld [vmem:[%s11224_s14 + $0x128] ss:$16 sps:$4 sm:$0xff]   ;;  %v9152_v19 = vld [vmem:[%s11270_s29 + $0x14] ss:$8 sps:$4 sm:$0xff]   ;;  %v424_v20 = vld [vmem:[%s11290_s7] sm:$0xff]  ;;  %s2355_s8 = sshra.s32 %s11261_s18, 4 }
  0x56   : >> { %1016 = vmatpush1.bf16.msra.mxu0 %v9111_v55  ;;  %1209 = vmatpush1.bf16.msra.mxu1 %v9112_v56  ;;  %v9149_v18 = vld [vmem:[%s11270_s29] ss:$8 sps:$4 sm:$0xff]   ;;  %v426_v21 = vld [vmem:[%s11290_s7 + $0x10] sm:$0xff]  ;;  %v9155_v26 = vld [vmem:[%s11270_s29 + $0x24] ss:$8 sps:$4 sm:$0xff]   ;;  %s11468_s9 = sshll.u32 %s2355_s8, 5 }
  0x57   : >> { %1017 = vmatprep.subr.bf16.mxu0 %v9113_v57  ;;  %1210 = vmatprep.subr.bf16.mxu1 %v9115_v58  ;;  %v425_v22 = vld [vmem:[%s11290_s7 + $0x8] sm:$0xff]  ;;  %v9154_v23 = vld [vmem:[%s11270_s29 + $0x10] ss:$8 sps:$4 sm:$0xff]   ;;  %v428_v25 = vld [vmem:[%s11290_s7 + $0x20] sm:$0xff]  ;;  %s11515_s10 = scalar_lea.vmem [#allocation2], %s11468_s9  ;;  %s344_s16 = sadd.s32 1, %s11011_s16  }
  0x58   : >> { %458 = vperm.xlu0 %9087, %v424_v20   ;;  %468 = vperm.xlu1 %9088, %v426_v21   ;;  %v429_v27 = vld [vmem:[%s11290_s7 + $0x28] sm:$0xff]  ;;  %v430_v28 = vld [vmem:[%s11290_s7 + $0x30] sm:$0xff]  ;;  %v431_v29 = vld [vmem:[%s11290_s7 + $0x38] sm:$0xff]  ;;  %p341_p1 = scmp.ge.s32.totalorder %s344_s16, 2  }
  0x59   : >> { %v9157_v30 = vld [vmem:[%s11270_s29 + $0x20] ss:$8 sps:$4 sm:$0xff]   ;;  %v9158_v32 = vld [vmem:[%s11270_s29 + $0x34] ss:$8 sps:$4 sm:$0xff]   ;;  %v9160_v36 = vld [vmem:[%s11270_s29 + $0x30] ss:$8 sps:$4 sm:$0xff]  }
  0x5a   : >> { %1018 = vmatpush1.bf16.msra.mxu0 %v9117_v59  ;;  %1211 = vmatpush1.bf16.msra.mxu1 %v9118_v60  ;;  %v432_v31 = vld [vmem:[%s11290_s7 + $0x40] sm:$0xff]  ;;  %v433_v33 = vld [vmem:[%s11290_s7 + $0x48] sm:$0xff]  ;;  %v434_v34 = vld [vmem:[%s11290_s7 + $0x50] sm:$0xff]  ;;  %s12375_s18 = smov (%p341_p1), 0  }
  0x5b   : >> { %1019 = vmatprep.subr.bf16.mxu0 %v9119_v61  ;;  %1212 = vmatprep.subr.bf16.mxu1 %v9121_v62  ;;  %v435_v35 = vld [vmem:[%s11290_s7 + $0x58] sm:$0xff]  ;;  %v436_v37 = vld [vmem:[%s11290_s7 + $0x60] sm:$0xff]  ;;  %v437_v39 = vld [vmem:[%s11290_s7 + $0x68] sm:$0xff] }
  0x5c   : >> { %463 = vperm.xlu0 %9087, %v425_v22   ;;  %473 = vperm.xlu1 %9088, %v427_v24   ;;  %v9161_v38 = vld [vmem:[%s11270_s29 + $0x44] ss:$8 sps:$4 sm:$0xff]   ;;  %v438_v40 = vld [vmem:[%s11290_s7 + $0x70] sm:$0xff]  ;;  %v439_v41 = vld [vmem:[%s11290_s7 + $0x78] sm:$0xff] }
  0x5d   : >> { %v9163_v42 = vld [vmem:[%s11270_s29 + $0x40] ss:$8 sps:$4 sm:$0xff]   ;;  %v9164_v44 = vld [vmem:[%s11270_s29 + $0x54] ss:$8 sps:$4 sm:$0xff]   ;;  %v9166_v48 = vld [vmem:[%s11270_s29 + $0x50] ss:$8 sps:$4 sm:$0xff]  }
  0x5e   : >> { %1020 = vmatpush1.bf16.msra.mxu0 %v9123_v63  ;;  %1213 = vmatpush1.bf16.msra.mxu1 %v9124_v0  ;;  %v440_v43 = vld [vmem:[%s11290_s7 + $0x80] sm:$0xff]  ;;  %v441_v45 = vld [vmem:[%s11290_s7 + $0x88] sm:$0xff]  ;;  %v442_v46 = vld [vmem:[%s11290_s7 + $0x90] sm:$0xff] }
  0x5f   : >> { %1021 = vmatprep.subr.bf16.mxu0 %v9125_v1  ;;  %1214 = vmatprep.subr.bf16.mxu1 %v9127_v2  ;;  %v443_v47 = vld [vmem:[%s11290_s7 + $0x98] sm:$0xff]  ;;  %v444_v49 = vld [vmem:[%s11290_s7 + $0xa0] sm:$0xff]  ;;  %v445_v51 = vld [vmem:[%s11290_s7 + $0xa8] sm:$0xff] }
  0x60   : >> { %478 = vperm.xlu0 %9087, %v428_v25   ;;  %483 = vperm.xlu1 %9088, %v429_v27   ;;  %v9167_v50 = vld [vmem:[%s11270_s29 + $0x64] ss:$8 sps:$4 sm:$0xff]   ;;  %v446_v52 = vld [vmem:[%s11290_s7 + $0xb0] sm:$0xff]  ;;  %v447_v53 = vld [vmem:[%s11290_s7 + $0xb8] sm:$0xff] }
  0x61   : >> { %v9169_v54 = vld [vmem:[%s11270_s29 + $0x60] ss:$8 sps:$4 sm:$0xff]   ;;  %v9170_v56 = vld [vmem:[%s11270_s29 + $0x74] ss:$8 sps:$4 sm:$0xff]   ;;  %v9172_v60 = vld [vmem:[%s11270_s29 + $0x70] ss:$8 sps:$4 sm:$0xff]  }
  0x62   : >> { %1022 = vmatpush1.bf16.msra.mxu0 %v9129_v3  ;;  %1215 = vmatpush1.bf16.msra.mxu1 %v9130_v4  ;;  %v448_v55 = vld [vmem:[%s11290_s7 + $0xc0] sm:$0xff]  ;;  %v449_v57 = vld [vmem:[%s11290_s7 + $0xc8] sm:$0xff]  ;;  %v450_v58 = vld [vmem:[%s11290_s7 + $0xd0] sm:$0xff] }
  0x63   : >> { %1023 = vmatprep.subr.bf16.mxu0 %v9131_v5  ;;  %1216 = vmatprep.subr.bf16.mxu1 %v9133_v6  ;;  %v451_v59 = vld [vmem:[%s11290_s7 + $0xd8] sm:$0xff]  ;;  %v452_v61 = vld [vmem:[%s11290_s7 + $0xe0] sm:$0xff]  ;;  %v453_v63 = vld [vmem:[%s11290_s7 + $0xe8] sm:$0xff] }
  0x64   : >> { %488 = vperm.xlu0 %9087, %v430_v28   ;;  %493 = vperm.xlu1 %9088, %v431_v29   ;;  %v9173_v62 = vld [vmem:[%s11270_s29 + $0x84] ss:$8 sps:$4 sm:$0xff]   ;;  %v454_v0 = vld [vmem:[%s11290_s7 + $0xf0] sm:$0xff]  ;;  %v455_v1 = vld [vmem:[%s11290_s7 + $0xf8] sm:$0xff] }
  0x65   : >> { %v9175_v2 = vld [vmem:[%s11270_s29 + $0x80] ss:$8 sps:$4 sm:$0xff]   ;;  %v9176_v3 = vld [vmem:[%s11270_s29 + $0x94] ss:$8 sps:$4 sm:$0xff]   ;;  %v9178_v4 = vld [vmem:[%s11270_s29 + $0x90] ss:$8 sps:$4 sm:$0xff]  }
  0x66   : >> { %1024 = vmatpush1.bf16.msra.mxu0 %v9135_v7  ;;  %1217 = vmatpush1.bf16.msra.mxu1 %v9136_v8  ;;  %v9179_v5 = vld [vmem:[%s11270_s29 + $0xa4] ss:$8 sps:$4 sm:$0xff]   ;;  %v9181_v6 = vld [vmem:[%s11270_s29 + $0xa0] ss:$8 sps:$4 sm:$0xff]   ;;  %v9182_v7 = vld [vmem:[%s11270_s29 + $0xb4] ss:$8 sps:$4 sm:$0xff]  }
  0x67   : >> { %1025 = vmatprep.subr.bf16.mxu0 %v9137_v10  ;;  %1218 = vmatprep.subr.bf16.mxu1 %v9139_v11  ;;  %v9184_v8 = vld [vmem:[%s11270_s29 + $0xb0] ss:$8 sps:$4 sm:$0xff]   ;;  %v9185_v9 = vld [vmem:[%s11270_s29 + $0xc4] ss:$8 sps:$4 sm:$0xff]   ;;  %v9187_v10 = vld [vmem:[%s11270_s29 + $0xc0] ss:$8 sps:$4 sm:$0xff]  }
  0x68   : >> { %498 = vperm.xlu0 %9087, %v432_v31   ;;  %503 = vperm.xlu1 %9088, %v433_v33   ;;  %v9188_v11 = vld [vmem:[%s11270_s29 + $0xd4] ss:$8 sps:$4 sm:$0xff]  }
  0x6a   : >> { %1026 = vmatpush1.bf16.msra.mxu0 %v9141_v12  ;;  %1219 = vmatpush1.bf16.msra.mxu1 %v9142_v13  ;;  %v9190_v12 = vld [vmem:[%s11270_s29 + $0xd0] ss:$8 sps:$4 sm:$0xff]   ;;  %v9191_v13 = vld [vmem:[%s11270_s29 + $0xe4] ss:$8 sps:$4 sm:$0xff]  }
  0x6b   : >> { %1027 = vmatprep.subr.bf16.mxu0 %v9143_v14  ;;  %1220 = vmatprep.subr.bf16.mxu1 %v9145_v15  ;;  %v9193_v14 = vld [vmem:[%s11270_s29 + $0xe0] ss:$8 sps:$4 sm:$0xff]   ;;  %v9194_v15 = vld [vmem:[%s11270_s29 + $0xf4] ss:$8 sps:$4 sm:$0xff]  }
  0x6c   : >> { %508 = vperm.xlu0 %9087, %v434_v34   ;;  %513 = vperm.xlu1 %9088, %v435_v35  }
  0x6e   : >> { %1028 = vmatpush1.bf16.msra.mxu0 %v9147_v16  ;;  %1221 = vmatpush1.bf16.msra.mxu1 %v9148_v17  ;;  %v9196_v16 = vld [vmem:[%s11270_s29 + $0xf0] ss:$8 sps:$4 sm:$0xff]  }
  0x70   : >> { %518 = vperm.xlu0 %9087, %v436_v37   ;;  %523 = vperm.xlu1 %9088, %v437_v39  }
  0x71   : >> { %1042 = vmatmul.mubr.bf16.vlgmr.msra.gmra.mrb[0].mxu0 %v9149_v18  ;;  %1235 = vmatmul.mubr.bf16.vlgmr.msra.gmra.mrb[0].mxu1 %v9149_v18 }
  0x72   : >> { %7915 = vmatprep.mubr.msk.bf16.mxu0 %vm960_vm0, %v9152_v19  ;;  %7931 = vmatprep.mubr.msk.bf16.mxu1 %vm960_vm0, %v9152_v19 }
  0x74   : >> { %528 = vperm.xlu0 %9087, %v438_v40   ;;  %533 = vperm.xlu1 %9088, %v439_v41  }
  0x78   : >> { %538 = vperm.xlu0 %9087, %v440_v43   ;;  %543 = vperm.xlu1 %9088, %v441_v45  }
  0x79   : >> { %1052 = vmatmul.mubr.bf16.gmra.mrb[4].mxu0 %v9154_v23  ;;  %1245 = vmatmul.mubr.bf16.gmra.mrb[4].mxu1 %v9154_v23 }
  0x7a   : >> { %7916 = vmatprep.mubr.msk.bf16.mxu0 %vm960_vm0, %v9155_v26  ;;  %7932 = vmatprep.mubr.msk.bf16.mxu1 %vm960_vm0, %v9155_v26 }
  0x7c   : >> { %548 = vperm.xlu0 %9087, %v442_v46   ;;  %553 = vperm.xlu1 %9088, %v443_v47  }
  0x80   : >> { %558 = vperm.xlu0 %9087, %v444_v49   ;;  %563 = vperm.xlu1 %9088, %v445_v51  }
  0x81   : >> { %1062 = vmatmul.mubr.bf16.gmra.mrb[8].mxu0 %v9157_v30  ;;  %1255 = vmatmul.mubr.bf16.gmra.mrb[8].mxu1 %v9157_v30 }
  0x82   : >> { %7917 = vmatprep.mubr.msk.bf16.mxu0 %vm960_vm0, %v9158_v32  ;;  %7933 = vmatprep.mubr.msk.bf16.mxu1 %vm960_vm0, %v9158_v32 }
  0x84   : >> { %568 = vperm.xlu0 %9087, %v446_v52   ;;  %573 = vperm.xlu1 %9088, %v447_v53  }
  0x88   : >> { %578 = vperm.xlu0 %9087, %v448_v55   ;;  %583 = vperm.xlu1 %9088, %v449_v57  }
  0x89   : >> { %1072 = vmatmul.mubr.bf16.gmra.mrb[12].mxu0 %v9160_v36  ;;  %1265 = vmatmul.mubr.bf16.gmra.mrb[12].mxu1 %v9160_v36 }
  0x8a   : >> { %7918 = vmatprep.mubr.msk.bf16.mxu0 %vm960_vm0, %v9161_v38  ;;  %7934 = vmatprep.mubr.msk.bf16.mxu1 %vm960_vm0, %v9161_v38 }
  0x8c   : >> { %588 = vperm.xlu0 %9087, %v450_v58   ;;  %593 = vperm.xlu1 %9088, %v451_v59  }
  0x90   : >> { %598 = vperm.xlu0 %9087, %v452_v61   ;;  %603 = vperm.xlu1 %9088, %v453_v63  }
  0x91   : >> { %1082 = vmatmul.mubr.bf16.gmra.mrb[16].mxu0 %v9163_v42  ;;  %1275 = vmatmul.mubr.bf16.gmra.mrb[16].mxu1 %v9163_v42 }
  0x92   : >> { %7919 = vmatprep.mubr.msk.bf16.mxu0 %vm960_vm0, %v9164_v44  ;;  %7935 = vmatprep.mubr.msk.bf16.mxu1 %vm960_vm0, %v9164_v44 }
  0x94   : >> { %608 = vperm.xlu0 %9087, %v454_v0   ;;  %613 = vperm.xlu1 %9088, %v455_v1  }
  0x99   : >> { %1092 = vmatmul.mubr.bf16.gmra.mrb[20].mxu0 %v9166_v48  ;;  %1285 = vmatmul.mubr.bf16.gmra.mrb[20].mxu1 %v9166_v48 }
  0x9a   : >> { %7920 = vmatprep.mubr.msk.bf16.mxu0 %vm960_vm0, %v9167_v50  ;;  %7936 = vmatprep.mubr.msk.bf16.mxu1 %vm960_vm0, %v9167_v50 }
  0xa1   : >> { %1102 = vmatmul.mubr.bf16.gmra.mrb[24].mxu0 %v9169_v54  ;;  %1295 = vmatmul.mubr.bf16.gmra.mrb[24].mxu1 %v9169_v54 }
  0xa2   : >> { %7921 = vmatprep.mubr.msk.bf16.mxu0 %vm960_vm0, %v9170_v56  ;;  %7937 = vmatprep.mubr.msk.bf16.mxu1 %vm960_vm0, %v9170_v56 }
  0xa9   : >> { %1112 = vmatmul.mubr.bf16.gmra.mrb[28].mxu0 %v9172_v60  ;;  %1305 = vmatmul.mubr.bf16.gmra.mrb[28].mxu1 %v9172_v60 }
  0xaa   : >> { %7922 = vmatprep.mubr.msk.bf16.mxu0 %vm960_vm0, %v9173_v62  ;;  %7938 = vmatprep.mubr.msk.bf16.mxu1 %vm960_vm0, %v9173_v62 }
  0xb1   : >> { %1122 = vmatmul.mubr.bf16.gmra.mrb[32].mxu0 %v9175_v2  ;;  %1315 = vmatmul.mubr.bf16.gmra.mrb[32].mxu1 %v9175_v2 }
  0xb2   : >> { %7923 = vmatprep.mubr.msk.bf16.mxu0 %vm960_vm0, %v9176_v3  ;;  %7939 = vmatprep.mubr.msk.bf16.mxu1 %vm960_vm0, %v9176_v3 }
  0xb9   : >> { %1132 = vmatmul.mubr.bf16.gmra.mrb[36].mxu0 %v9178_v4  ;;  %1325 = vmatmul.mubr.bf16.gmra.mrb[36].mxu1 %v9178_v4 }
  0xba   : >> { %7924 = vmatprep.mubr.msk.bf16.mxu0 %vm960_vm0, %v9179_v5  ;;  %7940 = vmatprep.mubr.msk.bf16.mxu1 %vm960_vm0, %v9179_v5 }
  0xc1   : >> { %1142 = vmatmul.mubr.bf16.gmra.mrb[40].mxu0 %v9181_v6  ;;  %1335 = vmatmul.mubr.bf16.gmra.mrb[40].mxu1 %v9181_v6 }
  0xc2   : >> { %7925 = vmatprep.mubr.msk.bf16.mxu0 %vm960_vm0, %v9182_v7  ;;  %7941 = vmatprep.mubr.msk.bf16.mxu1 %vm960_vm0, %v9182_v7 }
  0xc9   : >> { %1152 = vmatmul.mubr.bf16.gmra.mrb[44].mxu0 %v9184_v8  ;;  %1345 = vmatmul.mubr.bf16.gmra.mrb[44].mxu1 %v9184_v8 }
  0xca   : >> { %7926 = vmatprep.mubr.msk.bf16.mxu0 %vm960_vm0, %v9185_v9  ;;  %7942 = vmatprep.mubr.msk.bf16.mxu1 %vm960_vm0, %v9185_v9 }
  0xd1   : >> { %1162 = vmatmul.mubr.bf16.gmra.mrb[48].mxu0 %v9187_v10  ;;  %1355 = vmatmul.mubr.bf16.gmra.mrb[48].mxu1 %v9187_v10 }
  0xd2   : >> { %7927 = vmatprep.mubr.msk.bf16.mxu0 %vm960_vm0, %v9188_v11  ;;  %7943 = vmatprep.mubr.msk.bf16.mxu1 %vm960_vm0, %v9188_v11 }
  0xd7   : >> { %v459_v17 = vpop.permute.xlu0 %458  ;;  %v469_v19 = vpop.permute.xlu1 %468 }
  0xd9   : >> { %1172 = vmatmul.mubr.bf16.gmra.mrb[52].mxu0 %v9190_v12  ;;  %1365 = vmatmul.mubr.bf16.gmra.mrb[52].mxu1 %v9190_v12 }
  0xda   : >> { %7928 = vmatprep.mubr.msk.bf16.mxu0 %vm960_vm0, %v9191_v13  ;;  %7944 = vmatprep.mubr.msk.bf16.mxu1 %vm960_vm0, %v9191_v13 }
  0xdb   : >> { %v464_v18 = vpop.permute.xlu0 %463  ;;  %v11408_v43 = vpop.permute.xlu1 %473 }
  0xe1   : >> { %1182 = vmatmul.mubr.bf16.gmra.mrb[56].mxu0 %v9193_v14  ;;  %1375 = vmatmul.mubr.bf16.gmra.mrb[56].mxu1 %v9193_v14 }
  0xe2   : >> { %7929 = vmatprep.mubr.msk.bf16.mxu0 %vm960_vm0, %v9194_v15  ;;  %7945 = vmatprep.mubr.msk.bf16.mxu1 %vm960_vm0, %v9194_v15 }
  0xe9   : >> { %1192 = vmatmul.mubr.bf16.gmra.mrb[60].mxu0 %v9196_v16  ;;  %1385 = vmatmul.mubr.bf16.gmra.mrb[60].mxu1 %v9196_v16 }
 0x144   : >> { %v1043_v20 = vpop.f32.mrb[0].mxu0  ;;  %v1236_v21 = vpop.f32.mrb[0].mxu1 }
 0x145   : >> { %v11385_v22 = vadd.f32 %v1043_v20, %v459_v17  ;;  %v11387_v23 = vadd.f32 %v1236_v21, %v459_v17  ;;  %v1045_v24 = vpop.f32.mrb[1].mxu0  ;;  %v1238_v25 = vpop.f32.mrb[1].mxu1 }
 0x146   : >> { %v11389_v26 = vadd.f32 %v1045_v24, %v459_v17  ;;  %v11391_v27 = vadd.f32 %v1238_v25, %v459_v17  ;;  %v1047_v28 = vpop.f32.mrb[2].mxu0  ;;  %v1240_v29 = vpop.f32.mrb[2].mxu1 }
 0x147   : >> { %v7946_v30 = vmul.f32 -1.442695, %v11385_v22  ;;  %v7948_v31 = vmul.f32 -1.442695, %v11387_v23  ;;  %v11395_v32 = vadd.f32 %v1047_v28, %v464_v18  ;;  %v11397_v33 = vadd.f32 %v1240_v29, %v464_v18  ;;  %v1049_v34 = vpop.f32.mrb[3].mxu0  ;;  %v1242_v35 = vpop.f32.mrb[3].mxu1 }
 0x148   : >> { %v7947_v36 = vmul.f32 -1.442695, %v11389_v26  ;;  %v7949_v37 = vmul.f32 -1.442695, %v11391_v27  ;;  %v11401_v38 = vadd.f32 %v1049_v34, %v464_v18  ;;  %v11403_v39 = vadd.f32 %v1242_v35, %v464_v18 }
 0x149   : >> { %9197 = vpow2.f32 %v7946_v30  ;;  %v7950_v40 = vmul.f32 -1.442695, %v11395_v32  ;;  %v7952_v41 = vmul.f32 -1.442695, %v11397_v33  ;;  %v479_v30 = vpop.permute.xlu0 %478 }
 0x14a   : >> { %9199 = vpow2.f32 %v7948_v31  ;;  %v7951_v42 = vmul.f32 -1.442695, %v11401_v38  ;;  %v7953_v44 = vmul.f32 -1.442695, %v11403_v39 }
 0x14b   : >> { %9201 = vpow2.f32 %v7947_v36  ;;  %v484_v36 = vpop.permute.xlu1 %483 }
 0x14c   : >> { %9203 = vpow2.f32 %v7949_v37  ;;  %v1053_v45 = vpop.f32.mrb[4].mxu0  ;;  %v1246_v46 = vpop.f32.mrb[4].mxu1 }
 0x14d   : >> { %9205 = vpow2.f32 %v7950_v40  ;;  %v11411_v47 = vadd.f32 %v1053_v45, %v469_v19  ;;  %v11413_v48 = vadd.f32 %v1246_v46, %v469_v19  ;;  %v1055_v49 = vpop.f32.mrb[5].mxu0  ;;  %v1248_v50 = vpop.f32.mrb[5].mxu1 }
 0x14e   : >> { %9207 = vpow2.f32 %v7952_v41  ;;  %v11415_v51 = vadd.f32 %v1055_v49, %v469_v19  ;;  %v11417_v52 = vadd.f32 %v1248_v50, %v469_v19  ;;  %v1057_v53 = vpop.f32.mrb[6].mxu0  ;;  %v1250_v54 = vpop.f32.mrb[6].mxu1 }
 0x14f   : >> { %9209 = vpow2.f32 %v7951_v42  ;;  %v7954_v55 = vmul.f32 -1.442695, %v11411_v47  ;;  %v7956_v56 = vmul.f32 -1.442695, %v11413_v48  ;;  %v11422_v57 = vadd.f32 %v1057_v53, %v11408_v43  ;;  %v1059_v58 = vpop.f32.mrb[7].mxu0  ;;  %v1252_v59 = vpop.f32.mrb[7].mxu1 }
 0x150   : >> { %9211 = vpow2.f32 %v7953_v44  ;;  %v7955_v60 = vmul.f32 -1.442695, %v11415_v51  ;;  %v7957_v61 = vmul.f32 -1.442695, %v11417_v52  ;;  %v11428_v17 = vadd.f32 %v1250_v54, %v11408_v43 }
 0x151   : >> { %9213 = vpow2.f32 %v7954_v55  ;;  %v7958_v62 = vmul.f32 -1.442695, %v11422_v57  ;;  %v11433_v21 = vadd.f32 %v1059_v58, %v11408_v43  ;;  %v11437_v37 = vadd.f32 %v1252_v59, %v11408_v43 }
 0x152   : >> { %9215 = vpow2.f32 %v7956_v56  ;;  %v7960_v35 = vmul.f32 -1.442695, %v11428_v17 }
 0x153   : >> { %v9198_v63 = vpop.eup %9197  ;;  %9217 = vpow2.f32 %v7955_v60  ;;  %v7959_v44 = vmul.f32 -1.442695, %v11433_v21 }
 0x154   : >> { %v9200_v0 = vpop.eup %9199  ;;  %v1779_v1 = vadd.f32 1.0, %v9198_v63  ;;  %9219 = vpow2.f32 %v7957_v61  ;;  %v1063_v2 = vpop.f32.mrb[8].mxu0 }
 0x155   : >> { %v1256_v3 = vpop.f32.mrb[8].mxu1  ;;  %v9202_v4 = vpop.eup %9201  ;;  %v1781_v5 = vadd.f32 1.0, %v9200_v0  ;;  %9221 = vpow2.f32 %v7958_v62  ;;  %v11440_v45 = vadd.f32 %v1063_v2, %v479_v30 }
 0x156   : >> { %v1065_v6 = vpop.f32.mrb[9].mxu0  ;;  %v1258_v7 = vpop.f32.mrb[9].mxu1  ;;  %9223 = vrcp.f32 %v1779_v1  ;;  %v1780_v9 = vadd.f32 1.0, %v9202_v4  ;;  %v11444_v54 = vadd.f32 %v1256_v3, %v479_v30 }
 0x157   : >> { %v9204_v8 = vpop.eup %9203  ;;  %v1067_v10 = vpop.f32.mrb[10].mxu0  ;;  %9225 = vrcp.f32 %v1781_v5  ;;  %v11446_v55 = vadd.f32 %v1065_v6, %v479_v30  ;;  %v11453_v60 = vadd.f32 %v1258_v7, %v479_v30  ;;  %v7961_v6 = vmul.f32 -1.442695, %v11437_v37 }
 0x158   : >> { %v1260_v11 = vpop.f32.mrb[10].mxu1  ;;  %v9206_v12 = vpop.eup %9205  ;;  %v1782_v13 = vadd.f32 1.0, %v9204_v8  ;;  %9227 = vrcp.f32 %v1780_v9  ;;  %v11455_v61 = vadd.f32 %v1067_v10, %v484_v36  ;;  %v7962_v8 = vmul.f32 -1.442695, %v11440_v45 }
 0x159   : >> { %v1069_v14 = vpop.f32.mrb[11].mxu0  ;;  %v9208_v15 = vpop.eup %9207  ;;  %v1783_v16 = vadd.f32 1.0, %v9206_v12  ;;  %v11461_v2 = vadd.f32 %v1260_v11, %v484_v36  ;;  %v7964_v9 = vmul.f32 -1.442695, %v11444_v54  ;;  %v7963_v12 = vmul.f32 -1.442695, %v11446_v55 }
 0x15a   : >> { %v11430_v18 = vpop.f32.mrb[11].mxu1  ;;  %v9210_v19 = vpop.eup %9209  ;;  %9229 = vrcp.f32 %v1782_v13  ;;  %v1785_v20 = vadd.f32 1.0, %v9208_v15  ;;  %v11463_v3 = vadd.f32 %v1069_v14, %v484_v36  ;;  %v7965_v13 = vmul.f32 -1.442695, %v11453_v60 }
 0x15b   : >> { %v9212_v24 = vpop.eup %9211  ;;  %9231 = vrcp.f32 %v1783_v16  ;;  %v1784_v25 = vadd.f32 1.0, %v9210_v19  ;;  %v11472_v11 = vpop.permute.xlu0 %488  ;;  %v7966_v14 = vmul.f32 -1.442695, %v11455_v61  ;;  %v7968_v16 = vmul.f32 -1.442695, %v11461_v2 }
 0x15c   : >> { %v9214_v28 = vpop.eup %9213  ;;  %9233 = vrcp.f32 %v1785_v20  ;;  %v1786_v29 = vadd.f32 1.0, %v9212_v24  ;;  %v1073_v40 = vpop.f32.mrb[12].mxu0  ;;  %v7967_v19 = vmul.f32 -1.442695, %v11463_v3  ;;  %v11480_v20 = vadd.f32 %v11430_v18, %v484_v36 }
 0x15d   : >> { %v9216_v31 = vpop.eup %9215  ;;  %9235 = vrcp.f32 %v1784_v25  ;;  %v1787_v34 = vadd.f32 1.0, %v9214_v28  ;;  %v1266_v46 = vpop.f32.mrb[12].mxu1 }
 0x15e   : >> { %v9218_v41 = vpop.eup %9217  ;;  %9237 = vrcp.f32 %v1786_v29  ;;  %v1789_v42 = vadd.f32 1.0, %v9216_v31  ;;  %v11442_v49 = vpop.f32.mrb[13].mxu0  ;;  %v11489_v31 = vadd.f32 %v1073_v40, %v11472_v11 }
 0x15f   : >> { %v9220_v50 = vpop.eup %9219  ;;  %9239 = vrcp.f32 %v1787_v34  ;;  %v1788_v53 = vadd.f32 1.0, %v9218_v41  ;;  %v11448_v43 = vpop.f32.mrb[13].mxu1 }
 0x160   : >> { %v11450_v56 = vpop.f32.mrb[14].mxu0  ;;  %v9222_v58 = vpop.eup %9221  ;;  %9241 = vrcp.f32 %v1789_v42  ;;  %v1790_v59 = vadd.f32 1.0, %v9220_v50  ;;  %v11498_v42 = vadd.f32 %v1266_v46, %v11472_v11 }
 0x161   : >> { %v11457_v62 = vpop.f32.mrb[14].mxu1  ;;  %v11459_v63 = vpop.f32.mrb[15].mxu0  ;;  %9243 = vrcp.f32 %v1788_v53  ;;  %v1791_v1 = vadd.f32 1.0, %v9222_v58 }
 0x162   : >> { %v9224_v0 = vpop.eup %9223  ;;  %v11465_v4 = vpop.f32.mrb[15].mxu1  ;;  %9245 = vrcp.f32 %v1790_v59 }
 0x163   : >> { %v9226_v5 = vpop.eup %9225  ;;  %9247 = vrcp.f32 %v1791_v1  ;;  %v2163_v29 = vmul.f32 %v9224_v0, %v11385_v22 }
 0x164   : >> { %v9228_v7 = vpop.eup %9227  ;;  %9249 = vpow2.f32 %v7960_v35  ;;  %v11482_v24 = vpop.f32.mrb[16].mxu0  ;;  %v2165_v18 = vmul.f32 %v9226_v5, %v11387_v23 }
 0x165   : >> { %v9230_v10 = vpop.eup %9229  ;;  %9251 = vpow2.f32 %v7959_v44  ;;  %v11484_v25 = vpop.f32.mrb[16].mxu1  ;;  %v2164_v44 = vmul.f32 %v9228_v7, %v11389_v26  ;;  %v7972_v7 = vmul.f32 -1.442695, %v11498_v42 }
 0x166   : >> { %v9232_v15 = vpop.eup %9231  ;;  %9253 = vpow2.f32 %v7961_v6  ;;  %v11491_v34 = vpop.f32.mrb[17].mxu0  ;;  %v2166_v46 = vmul.f32 %v9230_v10, %v11391_v27 }
 0x167   : >> { %v9234_v28 = vpop.eup %9233  ;;  %v2167_v30 = vmul.f32 %v9232_v15, %v11395_v32  ;;  %v11493_v35 = vpop.f32.mrb[17].mxu1  ;;  %9255 = vpow2.f32 %v7962_v8 }
 0x168   : >> { %v9236_v41 = vpop.eup %9235  ;;  %v2169_v36 = vmul.f32 %v9234_v28, %v11397_v33  ;;  %v11500_v22 = vpop.f32.mrb[18].mxu0  ;;  %9257 = vpow2.f32 %v7964_v9 }
 0x169   : >> { %v11502_v32 = vpop.f32.mrb[18].mxu1  ;;  %v9238_v40 = vpop.eup %9237  ;;  %v2291_v50 = vpack.c.bf16 %v2167_v30, %v2163_v29  ;;  %v2168_v53 = vmul.f32 %v9236_v41, %v11401_v38  ;;  %9259 = vpow2.f32 %v7963_v12  ;;  %v7969_v38 = vmul.f32 -1.442695, %v11480_v20 }
 0x16a   : >> { %v11506_v58 = vpop.f32.mrb[19].mxu0  ;;  %v11508_v23 = vpop.f32.mrb[19].mxu1  ;;  %v2293_v59 = vpack.c.bf16 %v2169_v36, %v2165_v18  ;;  %v2170_v0 = vmul.f32 %v9238_v40, %v11403_v39  ;;  %9261 = vpow2.f32 %v7965_v13  ;;  %v7970_v39 = vmul.f32 -1.442695, %v11489_v31 }
 0x16b   : >> { %v9240_v33 = vpop.eup %9239  ;;  %2360 = vst [vmem:[%s11515_s10] sm:$0xff] %v2291_v50  ;;  %v2292_v26 = vpack.c.bf16 %v2168_v53, %v2164_v44  ;;  %9263 = vpow2.f32 %v7966_v14 }
 0x16c   : >> { %v11512_v1 = vpop.eup %9241  ;;  %2362 = vst [vmem:[%s11515_s10 + $0x10] sm:$0xff] %v2293_v59  ;;  %v2294_v27 = vpack.c.bf16 %v2170_v0, %v2166_v46  ;;  %9265 = vpow2.f32 %v7968_v16  ;;  %v11528_v9 = vpop.f32.mrb[20].mxu0  ;;  %v2171_v13 = vmul.f32 %v9240_v33, %v11411_v47  ;;  %v11549_v33 = vadd.f32 %v11442_v49, %v11472_v11 }
 0x16d   : >> { %v11519_v5 = vpop.eup %9243  ;;  %2361 = vst [vmem:[%s11515_s10 + $0x8] sm:$0xff] %v2292_v26  ;;  %9267 = vpow2.f32 %v7967_v19  ;;  %v11530_v10 = vpop.f32.mrb[20].mxu1  ;;  %v11553_v26 = vadd.f32 %v11448_v43, %v11472_v11 }
 0x16e   : >> { %v11523_v6 = vpop.eup %9245  ;;  %2363 = vst [vmem:[%s11515_s10 + $0x18] sm:$0xff] %v2294_v27  ;;  %9269 = vpow2.f32 %v7969_v38  ;;  %v11534_v15 = vpop.f32.mrb[21].mxu0  ;;  %v7971_v11 = vmul.f32 -1.442695, %v11549_v33 }
 0x16f   : >> { %v9248_v8 = vpop.eup %9247  ;;  %v11536_v28 = vpop.f32.mrb[21].mxu1  ;;  %9271 = vpow2.f32 %v7970_v39 }
 0x170   : >> { %v9250_v12 = vpop.eup %9249  ;;  %v2175_v14 = vmul.f32 %v9248_v8, %v11422_v57  ;;  %v11538_v30 = vpop.f32.mrb[22].mxu0  ;;  %9273 = vpow2.f32 %v7972_v7 }
 0x171   : >> { %v9252_v16 = vpop.eup %9251  ;;  %v1793_v29 = vadd.f32 1.0, %v9250_v12  ;;  %v11540_v19 = vpop.f32.mrb[22].mxu1 }
 0x172   : >> { %v9254_v41 = vpop.eup %9253  ;;  %v2295_v18 = vpack.c.bf16 %v2175_v14, %v2171_v13  ;;  %v1792_v36 = vadd.f32 1.0, %v9252_v16  ;;  %v11542_v47 = vpop.f32.mrb[23].mxu0 }
 0x173   : >> { %v11544_v57 = vpop.f32.mrb[23].mxu1  ;;  %v9256_v40 = vpop.eup %9255  ;;  %9275 = vrcp.f32 %v1793_v29  ;;  %v1794_v44 = vadd.f32 1.0, %v9254_v41 }
 0x174   : >> { %v9258_v50 = vpop.eup %9257  ;;  %2364 = vst [vmem:[%s11515_s10 + $0x20] sm:$0xff] %v2295_v18  ;;  %9277 = vrcp.f32 %v1792_v36  ;;  %v1795_v53 = vadd.f32 1.0, %v9256_v40  ;;  %v494_v59 = vpop.permute.xlu1 %493  ;;  %v7973_v18 = vmul.f32 -1.442695, %v11553_v26 }
 0x175   : >> { %v9260_v46 = vpop.eup %9259  ;;  %9279 = vrcp.f32 %v1794_v44  ;;  %v1797_v0 = vadd.f32 1.0, %v9258_v50  ;;  %v11556_v39 = vadd.f32 %v11450_v56, %v494_v59  ;;  %v11559_v49 = vadd.f32 %v11457_v62, %v494_v59  ;;  %v11561_v12 = vpop.f32.mrb[24].mxu0 }
 0x176   : >> { %v9262_v38 = vpop.eup %9261  ;;  %9281 = vrcp.f32 %v1795_v53  ;;  %v1796_v27 = vadd.f32 1.0, %v9260_v46  ;;  %v11563_v13 = vpop.f32.mrb[24].mxu1  ;;  %v11567_v16 = vadd.f32 %v11459_v63, %v494_v59 }
 0x177   : >> { %v9264_v7 = vpop.eup %9263  ;;  %9283 = vrcp.f32 %v1797_v0  ;;  %v1798_v8 = vadd.f32 1.0, %v9262_v38  ;;  %v11569_v56 = vpop.f32.mrb[25].mxu0  ;;  %v7974_v53 = vmul.f32 -1.442695, %v11556_v39 }
 0x178   : >> { %v9266_v14 = vpop.eup %9265  ;;  %9285 = vrcp.f32 %v1796_v27  ;;  %v1799_v43 = vadd.f32 1.0, %v9264_v7  ;;  %v11571_v29 = vpop.f32.mrb[25].mxu1  ;;  %v7976_v7 = vmul.f32 -1.442695, %v11559_v49 }
 0x179   : >> { %v9268_v41 = vpop.eup %9267  ;;  %9287 = vrcp.f32 %v1798_v8  ;;  %v1801_v62 = vadd.f32 1.0, %v9266_v14  ;;  %v11574_v36 = vpop.f32.mrb[26].mxu0  ;;  %v11585_v8 = vadd.f32 %v11465_v4, %v494_v59  ;;  %v2173_v4 = vmul.f32 %v11512_v1, %v11413_v48 }
 0x17a   : >> { %14895 = vst [vmem:[#allocation6_spill] sm:$0xff] %v11574_v36  ;;  %v11576_v40 = vpop.f32.mrb[26].mxu1  ;;  %v9270_v44 = vpop.eup %9269  ;;  %9289 = vrcp.f32 %v1799_v43  ;;  %v1800_v50 = vadd.f32 1.0, %v9268_v41  ;;  %v7975_v43 = vmul.f32 -1.442695, %v11567_v16 }
 0x17b   : >> { %14896 = vst [vmem:[#allocation7_spill] sm:$0xff] %v11576_v40  ;;  %v11579_v63 = vpop.f32.mrb[27].mxu0  ;;  %v11581_v46 = vpop.f32.mrb[27].mxu1  ;;  %9291 = vrcp.f32 %v1801_v62  ;;  %v1802_v27 = vadd.f32 1.0, %v9270_v44 }
 0x17c   : >> { %14897 = vst [vmem:[#allocation8_spill] sm:$0xff] %v11579_v63  ;;  %14898 = vst [vmem:[#allocation9_spill] sm:$0xff] %v11581_v46  ;;  %v9272_v0 = vpop.eup %9271  ;;  %v499_v38 = vpop.permute.xlu0 %498  ;;  %9293 = vrcp.f32 %v1800_v50 }
 0x17d   : >> { %v9274_v14 = vpop.eup %9273  ;;  %v1803_v40 = vadd.f32 1.0, %v9272_v0  ;;  %v11589_v41 = vadd.f32 %v11482_v24, %v499_v38  ;;  %9295 = vrcp.f32 %v1802_v27  ;;  %v11592_v62 = vadd.f32 %v11484_v25, %v499_v38  ;;  %v11600_v50 = vpop.permute.xlu1 %503 }
 0x17e   : >> { %v9276_v63 = vpop.eup %9275  ;;  %v1805_v46 = vadd.f32 1.0, %v9274_v14  ;;  %v11595_v44 = vadd.f32 %v11491_v34, %v499_v38  ;;  %v11603_v24 = vadd.f32 %v11493_v35, %v499_v38  ;;  %v2172_v25 = vmul.f32 %v11519_v5, %v11415_v51  ;;  %v11612_v48 = vpop.f32.mrb[28].mxu0 }
 0x17f   : >> { %v9278_v36 = vpop.eup %9277  ;;  %v2177_v59 = vmul.f32 %v9276_v63, %v11428_v17  ;;  %9297 = vrcp.f32 %v1803_v40  ;;  %v11610_v34 = vadd.f32 %v11500_v22, %v11600_v50  ;;  %v11614_v17 = vpop.f32.mrb[28].mxu1  ;;  %v2174_v35 = vmul.f32 %v11523_v6, %v11417_v52 }
 0x180   : >> { %v9280_v0 = vpop.eup %9279  ;;  %v2176_v27 = vmul.f32 %v9278_v36, %v11433_v21  ;;  %9299 = vrcp.f32 %v1805_v46  ;;  %v11619_v51 = vpop.f32.mrb[29].mxu0  ;;  %v7977_v36 = vmul.f32 -1.442695, %v11585_v8  ;;  %v11626_v46 = vadd.f32 %v11502_v32, %v11600_v50 }
 0x181   : >> { %v9282_v1 = vpop.eup %9281  ;;  %v2297_v40 = vpack.c.bf16 %v2177_v59, %v2173_v4  ;;  %v2178_v63 = vmul.f32 %v9280_v0, %v11437_v37  ;;  %9301 = vpow2.f32 %v7971_v11  ;;  %v11621_v21 = vpop.f32.mrb[29].mxu1  ;;  %v7978_v38 = vmul.f32 -1.442695, %v11589_v41 }
 0x182   : >> { %v9284_v5 = vpop.eup %9283  ;;  %v2296_v22 = vpack.c.bf16 %v2176_v27, %v2172_v25  ;;  %9303 = vpow2.f32 %v7973_v18  ;;  %v11628_v52 = vpop.f32.mrb[30].mxu0  ;;  %v11636_v18 = vadd.f32 %v11506_v58, %v11600_v50  ;;  %v7980_v59 = vmul.f32 -1.442695, %v11592_v62 }
 0x183   : >> { %v11630_v6 = vpop.f32.mrb[30].mxu1  ;;  %v9286_v37 = vpop.eup %9285  ;;  %2366 = vst [vmem:[%s11515_s10 + $0x30] sm:$0xff] %v2297_v40  ;;  %v2298_v11 = vpack.c.bf16 %v2178_v63, %v2174_v35  ;;  %9305 = vpow2.f32 %v7974_v53  ;;  %v7979_v53 = vmul.f32 -1.442695, %v11595_v44  ;;  %v7981_v25 = vmul.f32 -1.442695, %v11603_v24 }
 0x184   : >> { %14899 = vst [vmem:[#allocation10_spill] sm:$0xff] %v11630_v6  ;;  %v11638_v14 = vpop.f32.mrb[31].mxu0  ;;  %v11640_v4 = vpop.f32.mrb[31].mxu1  ;;  %2365 = vst [vmem:[%s11515_s10 + $0x28] sm:$0xff] %v2296_v22  ;;  %9307 = vpow2.f32 %v7976_v7  ;;  %v7982_v27 = vmul.f32 -1.442695, %v11610_v34  ;;  %v2179_v35 = vmul.f32 %v9282_v1, %v11440_v45  ;;  %v2181_v22 = vmul.f32 %v9284_v5, %v11444_v54 }
 0x185   : >> { %14900 = vst [vmem:[#allocation11_spill] sm:$0xff] %v11638_v14  ;;  %14901 = vst [vmem:[#allocation12_spill] sm:$0xff] %v11640_v4  ;;  %v9288_v32 = vpop.eup %9287  ;;  %9309 = vpow2.f32 %v7975_v43  ;;  %v7984_v63 = vmul.f32 -1.442695, %v11626_v46  ;;  %v7983_v43 = vmul.f32 -1.442695, %v11636_v18  ;;  %v2180_v14 = vmul.f32 %v9286_v37, %v11446_v55 }
 0x186   : >> { %v9290_v0 = vpop.eup %9289  ;;  %2367 = vst [vmem:[%s11515_s10 + $0x38] sm:$0xff] %v2298_v11  ;;  %9311 = vpow2.f32 %v7977_v36  ;;  %v11658_v1 = vpop.f32.mrb[32].mxu1  ;;  %v2182_v54 = vmul.f32 %v9288_v32, %v11453_v60 }
 0x187   : >> { %v9292_v58 = vpop.eup %9291  ;;  %v2183_v40 = vmul.f32 %v9290_v0, %v11455_v61  ;;  %9313 = vpow2.f32 %v7978_v38  ;;  %v11656_v61 = vpop.f32.mrb[32].mxu0 }
 0x188   : >> { %v9294_v7 = vpop.eup %9293  ;;  %v2185_v11 = vmul.f32 %v9292_v58, %v11461_v2  ;;  %9315 = vpow2.f32 %v7980_v59  ;;  %v11664_v38 = vpop.f32.mrb[33].mxu0 }
 0x189   : >> { %v9296_v4 = vpop.eup %9295  ;;  %v2299_v6 = vpack.c.bf16 %v2183_v40, %v2179_v35  ;;  %v2184_v45 = vmul.f32 %v9294_v7, %v11463_v3  ;;  %9317 = vpow2.f32 %v7979_v53  ;;  %v11666_v55 = vpop.f32.mrb[33].mxu1 }
 0x18a   : >> { %v11660_v36 = vpop.eup %9297  ;;  %v2301_v2 = vpack.c.bf16 %v2185_v11, %v2181_v22  ;;  %v2186_v5 = vmul.f32 %v9296_v4, %v11480_v20  ;;  %9319 = vpow2.f32 %v7981_v25  ;;  %v11671_v59 = vpop.f32.mrb[34].mxu0 }
 0x18b   : >> { %v11668_v3 = vpop.eup %9299  ;;  %2368 = vst [vmem:[%s11515_s10 + $0x40] sm:$0xff] %v2299_v6  ;;  %v2300_v37 = vpack.c.bf16 %v2184_v45, %v2180_v14  ;;  %v11673_v0 = vpop.f32.mrb[34].mxu1  ;;  %9321 = vpow2.f32 %v7982_v27  ;;  %v11684_v45 = vadd.f32 %v11508_v23, %v11600_v50 }
 0x18c   : >> { %v9302_v60 = vpop.eup %9301  ;;  %2370 = vst [vmem:[%s11515_s10 + $0x50] sm:$0xff] %v2301_v2  ;;  %v2302_v32 = vpack.c.bf16 %v2186_v5, %v2182_v54  ;;  %v11676_v20 = vpop.f32.mrb[35].mxu0  ;;  %9323 = vpow2.f32 %v7984_v63 }
 0x18d   : >> { %v11678_v4 = vpop.f32.mrb[35].mxu1  ;;  %v9304_v53 = vpop.eup %9303  ;;  %2369 = vst [vmem:[%s11515_s10 + $0x48] sm:$0xff] %v2300_v37  ;;  %v1804_v58 = vadd.f32 1.0, %v9302_v60  ;;  %9325 = vpow2.f32 %v7983_v43 }
 0x18e   : >> { %14902 = vst [vmem:[#allocation13_spill] sm:$0xff] %v11678_v4  ;;  %v9306_v6 = vpop.eup %9305  ;;  %2371 = vst [vmem:[%s11515_s10 + $0x58] sm:$0xff] %v2302_v32  ;;  %v1806_v14 = vadd.f32 1.0, %v9304_v53  ;;  %v509_v7 = vpop.permute.xlu0 %508 }
 0x18f   : >> { %v9308_v25 = vpop.eup %9307  ;;  %9327 = vrcp.f32 %v1804_v58  ;;  %v1807_v35 = vadd.f32 1.0, %v9306_v6  ;;  %v11686_v54 = vpop.f32.mrb[36].mxu0  ;;  %v11695_v53 = vadd.f32 %v11528_v9, %v509_v7  ;;  %v11700_v6 = vadd.f32 %v11530_v10, %v509_v7 }
 0x190   : >> { %v9310_v40 = vpop.eup %9309  ;;  %9329 = vrcp.f32 %v1806_v14  ;;  %v1809_v22 = vadd.f32 1.0, %v9308_v25  ;;  %14903 = vst [vmem:[#allocation14_spill] sm:$0xff] %v11686_v54  ;;  %v11688_v63 = vpop.f32.mrb[36].mxu1  ;;  %v11703_v14 = vadd.f32 %v11534_v15, %v509_v7 }
 0x191   : >> { %v9312_v27 = vpop.eup %9311  ;;  %9331 = vrcp.f32 %v1807_v35  ;;  %v1808_v11 = vadd.f32 1.0, %v9310_v40  ;;  %14904 = vst [vmem:[#allocation15_spill] sm:$0xff] %v11688_v63  ;;  %v11690_v5 = vpop.f32.mrb[37].mxu0 }
 0x192   : >> { %v9314_v2 = vpop.eup %9313  ;;  %9333 = vrcp.f32 %v1809_v22  ;;  %v1810_v43 = vadd.f32 1.0, %v9312_v27  ;;  %14905 = vst [vmem:[#allocation16_spill] sm:$0xff] %v11690_v5  ;;  %v11692_v37 = vpop.f32.mrb[37].mxu1  ;;  %v7985_v27 = vmul.f32 -1.442695, %v11684_v45 }
 0x193   : >> { %14906 = vst [vmem:[#allocation17_spill] sm:$0xff] %v11692_v37  ;;  %v9316_v60 = vpop.eup %9315  ;;  %9335 = vrcp.f32 %v1808_v11  ;;  %v1811_v32 = vadd.f32 1.0, %v9314_v2  ;;  %v11697_v58 = vpop.f32.mrb[38].mxu0  ;;  %v11711_v11 = vadd.f32 %v11536_v28, %v509_v7 }
 0x194   : >> { %14907 = vst [vmem:[#allocation18_spill] sm:$0xff] %v11697_v58  ;;  %v9318_v23 = vpop.eup %9317  ;;  %9337 = vrcp.f32 %v1810_v43  ;;  %v1813_v50 = vadd.f32 1.0, %v9316_v60  ;;  %v11705_v25 = vpop.f32.mrb[38].mxu1 }
 0x195   : >> { %14908 = vst [vmem:[#allocation19_spill] sm:$0xff] %v11705_v25  ;;  %v11707_v35 = vpop.f32.mrb[39].mxu0  ;;  %v9320_v40 = vpop.eup %9319  ;;  %9339 = vrcp.f32 %v1811_v32  ;;  %v1812_v9 = vadd.f32 1.0, %v9318_v23  ;;  %v7986_v23 = vmul.f32 -1.442695, %v11695_v53 }
 0x196   : >> { %14909 = vst [vmem:[#allocation20_spill] sm:$0xff] %v11707_v35  ;;  %v514_v22 = vpop.permute.xlu1 %513  ;;  %v11713_v2 = vpop.f32.mrb[39].mxu1  ;;  %9341 = vrcp.f32 %v1813_v50  ;;  %v1814_v43 = vadd.f32 1.0, %v9320_v40  ;;  %v7988_v50 = vmul.f32 -1.442695, %v11700_v6 }
 0x197   : >> { %14910 = vst [vmem:[#allocation21_spill] sm:$0xff] %v11713_v2  ;;  %v9322_v10 = vpop.eup %9321  ;;  %v11716_v15 = vadd.f32 %v11538_v30, %v514_v22  ;;  %v11719_v60 = vadd.f32 %v11540_v19, %v514_v22  ;;  %9343 = vrcp.f32 %v1812_v9  ;;  %v11723_v25 = vadd.f32 %v11542_v47, %v514_v22  ;;  %v519_v7 = vpop.permute.xlu0 %518 }
 0x198   : >> { %v9324_v35 = vpop.eup %9323  ;;  %v1815_v32 = vadd.f32 1.0, %v9322_v10  ;;  %9345 = vrcp.f32 %v1814_v43  ;;  %v7987_v30 = vmul.f32 -1.442695, %v11703_v14  ;;  %v7989_v58 = vmul.f32 -1.442695, %v11711_v11  ;;  %v11728_v9 = vpop.f32.mrb[40].mxu0 }
 0x199   : >> { %v9326_v28 = vpop.eup %9325  ;;  %v1817_v2 = vadd.f32 1.0, %v9324_v35  ;;  %14911 = vst [vmem:[#allocation22_spill] sm:$0xff] %v11728_v9  ;;  %v11730_v10 = vpop.f32.mrb[40].mxu1  ;;  %v7990_v47 = vmul.f32 -1.442695, %v11716_v15  ;;  %v11743_v9 = vadd.f32 %v11561_v12, %v519_v7 }
 0x19a   : >> { %v9328_v40 = vpop.eup %9327  ;;  %9347 = vrcp.f32 %v1815_v32  ;;  %v1816_v19 = vadd.f32 1.0, %v9326_v28  ;;  %14912 = vst [vmem:[#allocation23_spill] sm:$0xff] %v11730_v10  ;;  %v7992_v43 = vmul.f32 -1.442695, %v11719_v60  ;;  %v11734_v35 = vpop.f32.mrb[41].mxu0  ;;  %v11740_v28 = vadd.f32 %v11544_v57, %v514_v22 }
 0x19b   : >> { %v9330_v37 = vpop.eup %9329  ;;  %9349 = vrcp.f32 %v1817_v2  ;;  %14913 = vst [vmem:[#allocation24_spill] sm:$0xff] %v11734_v35  ;;  %v11736_v5 = vpop.f32.mrb[41].mxu1  ;;  %v7991_v32 = vmul.f32 -1.442695, %v11723_v25  ;;  %v2187_v35 = vmul.f32 %v11660_v36, %v11489_v31  ;;  %v2189_v22 = vmul.f32 %v11668_v3, %v11498_v42 }
 0x19c   : >> { %14914 = vst [vmem:[#allocation25_spill] sm:$0xff] %v11736_v5  ;;  %v9332_v63 = vpop.eup %9331  ;;  %9351 = vrcp.f32 %v1816_v19  ;;  %v11745_v10 = vpop.f32.mrb[42].mxu0  ;;  %v11753_v19 = vadd.f32 %v11563_v13, %v519_v7  ;;  %v11763_v31 = vadd.f32 %v11569_v56, %v519_v7  ;;  %v2188_v36 = vmul.f32 %v9328_v40, %v11549_v33 }
 0x19d   : >> { %v11747_v2 = vpop.f32.mrb[42].mxu1  ;;  %v9334_v54 = vpop.eup %9333  ;;  %v2191_v5 = vmul.f32 %v9332_v63, %v11556_v39  ;;  %9353 = vpow2.f32 %v7985_v27  ;;  %v7993_v3 = vmul.f32 -1.442695, %v11740_v28  ;;  %v11772_v33 = vadd.f32 %v11571_v29, %v519_v7 }
 0x19e   : >> { %14915 = vst [vmem:[#allocation26_spill] sm:$0xff] %v11747_v2  ;;  %v11755_v4 = vpop.f32.mrb[43].mxu0  ;;  %v11757_v57 = vpop.f32.mrb[43].mxu1  ;;  %v2193_v2 = vmul.f32 %v9334_v54, %v11559_v49  ;;  %9355 = vpow2.f32 %v7986_v23 }
 0x19f   : >> { %14916 = vst [vmem:[#allocation27_spill] sm:$0xff] %v11755_v4  ;;  %14917 = vst [vmem:[#allocation28_spill] sm:$0xff] %v11757_v57  ;;  %v9336_v12 = vpop.eup %9335  ;;  %v2303_v13 = vpack.c.bf16 %v2191_v5, %v2187_v35  ;;  %9357 = vpow2.f32 %v7988_v50  ;;  %v2190_v57 = vmul.f32 %v9330_v37, %v11553_v26  ;;  %v7994_v26 = vmul.f32 -1.442695, %v11743_v9  ;;  %v11776_v5 = vpop.f32.mrb[44].mxu0 }
 0x1a0   : >> { %v9338_v39 = vpop.eup %9337  ;;  %v2192_v63 = vmul.f32 %v9336_v12, %v11567_v16  ;;  %v2305_v4 = vpack.c.bf16 %v2193_v2, %v2189_v22  ;;  %9359 = vpow2.f32 %v7987_v30  ;;  %v11784_v23 = vpop.f32.mrb[45].mxu0  ;;  %v7997_v35 = vmul.f32 -1.442695, %v11772_v33 }
 0x1a1   : >> { %v9340_v27 = vpop.eup %9339  ;;  %v2194_v42 = vmul.f32 %v9338_v39, %v11585_v8  ;;  %2372 = vst [vmem:[%s11515_s10 + $0x60] sm:$0xff] %v2303_v13  ;;  %9361 = vpow2.f32 %v7989_v58  ;;  %v11778_v8 = vpop.f32.mrb[44].mxu1  ;;  %v7996_v58 = vmul.f32 -1.442695, %v11753_v19 }
 0x1a2   : >> { %v9342_v49 = vpop.eup %9341  ;;  %v2304_v56 = vpack.c.bf16 %v2192_v63, %v2188_v36  ;;  %2374 = vst [vmem:[%s11515_s10 + $0x70] sm:$0xff] %v2305_v4  ;;  %9363 = vpow2.f32 %v7990_v47  ;;  %v11786_v29 = vpop.f32.mrb[45].mxu1  ;;  %v7995_v4 = vmul.f32 -1.442695, %v11763_v31  ;;  %v2195_v47 = vmul.f32 %v9340_v27, %v11589_v41 }
 0x1a3   : >> { %v9344_v16 = vpop.eup %9343  ;;  %v2306_v54 = vpack.c.bf16 %v2194_v42, %v2190_v57  ;;  %9365 = vpow2.f32 %v7992_v43  ;;  %v11790_v50 = vpop.f32.mrb[46].mxu0  ;;  %v2197_v12 = vmul.f32 %v9342_v49, %v11592_v62 }
 0x1a4   : >> { %v11780_v37 = vpop.eup %9345  ;;  %2373 = vst [vmem:[%s11515_s10 + $0x68] sm:$0xff] %v2304_v56  ;;  %9367 = vpow2.f32 %v7991_v32  ;;  %v11792_v30 = vpop.f32.mrb[46].mxu1  ;;  %v2196_v41 = vmul.f32 %v9344_v16, %v11595_v44 }
 0x1a5   : >> { %v9348_v7 = vpop.eup %9347  ;;  %2375 = vst [vmem:[%s11515_s10 + $0x78] sm:$0xff] %v2306_v54  ;;  %9369 = vpow2.f32 %v7993_v3  ;;  %v11797_v2 = vpop.f32.mrb[47].mxu0 }
 0x1a6   : >> { %v9350_v40 = vpop.eup %9349  ;;  %v2199_v43 = vmul.f32 %v9348_v7, %v11610_v34  ;;  %v11799_v57 = vpop.f32.mrb[47].mxu1  ;;  %9371 = vpow2.f32 %v7994_v26 }
 0x1a7   : >> { %v9352_v32 = vpop.eup %9351  ;;  %v2201_v22 = vmul.f32 %v9350_v40, %v11626_v46  ;;  %9373 = vpow2.f32 %v7996_v58  ;;  %v524_v56 = vpop.permute.xlu1 %523  ;;  %v14922_v40 = vld [vmem:[#allocation6_spill] sm:$0xff] }
 0x1a8   : >> { %v9354_v39 = vpop.eup %9353  ;;  %v2307_v36 = vpack.c.bf16 %v2199_v43, %v2195_v47  ;;  %v2200_v34 = vmul.f32 %v9352_v32, %v11636_v18  ;;  %9375 = vpow2.f32 %v7995_v4  ;;  %v11807_v44 = vpop.f32.mrb[48].mxu0  ;;  %v11817_v47 = vadd.f32 %v14922_v40, %v524_v56 }
 0x1a9   : >> { %v9356_v13 = vpop.eup %9355  ;;  %v2309_v63 = vpack.c.bf16 %v2201_v22, %v2197_v12  ;;  %v1818_v27 = vadd.f32 1.0, %v9354_v39  ;;  %9377 = vpow2.f32 %v7997_v35  ;;  %14918 = vst [vmem:[#allocation29_spill] sm:$0xff] %v11807_v44  ;;  %v11809_v16 = vpop.f32.mrb[48].mxu1  ;;  %v14924_v12 = vld [vmem:[#allocation7_spill] sm:$0xff] }
 0x1aa   : >> { %v9358_v42 = vpop.eup %9357  ;;  %2376 = vst [vmem:[%s11515_s10 + $0x80] sm:$0xff] %v2307_v36  ;;  %v2308_v62 = vpack.c.bf16 %v2200_v34, %v2196_v41  ;;  %v1819_v49 = vadd.f32 1.0, %v9356_v13  ;;  %14919 = vst [vmem:[#allocation30_spill] sm:$0xff] %v11809_v16  ;;  %v11812_v26 = vpop.f32.mrb[49].mxu0  ;;  %v11822_v22 = vadd.f32 %v14924_v12, %v524_v56  ;;  %v14926_v34 = vld [vmem:[#allocation8_spill] sm:$0xff] }
 0x1ab   : >> { %v9360_v46 = vpop.eup %9359  ;;  %2378 = vst [vmem:[%s11515_s10 + $0x90] sm:$0xff] %v2309_v63  ;;  %9379 = vrcp.f32 %v1818_v27  ;;  %v1821_v3 = vadd.f32 1.0, %v9358_v42  ;;  %14920 = vst [vmem:[#allocation31_spill] sm:$0xff] %v11812_v26  ;;  %v11814_v58 = vpop.f32.mrb[49].mxu1  ;;  %v11827_v13 = vadd.f32 %v14926_v34, %v524_v56 }
 0x1ac   : >> { %v9362_v18 = vpop.eup %9361  ;;  %2377 = vst [vmem:[%s11515_s10 + $0x88] sm:$0xff] %v2308_v62  ;;  %9381 = vrcp.f32 %v1819_v49  ;;  %v1820_v54 = vadd.f32 1.0, %v9360_v46  ;;  %14921 = vst [vmem:[#allocation32_spill] sm:$0xff] %v11814_v58  ;;  %v11819_v43 = vpop.f32.mrb[50].mxu0  ;;  %v8000_v40 = vmul.f32 -1.442695, %v11822_v22 }
 0x1ad   : >> { %v9364_v7 = vpop.eup %9363  ;;  %9383 = vrcp.f32 %v1821_v3  ;;  %v1822_v4 = vadd.f32 1.0, %v9362_v18  ;;  %14923 = vst [vmem:[#allocation6_spill] sm:$0xff] %v11819_v43  ;;  %v11824_v39 = vpop.f32.mrb[50].mxu1  ;;  %v7998_v3 = vmul.f32 -1.442695, %v11817_v47 }
 0x1ae   : >> { %v9366_v35 = vpop.eup %9365  ;;  %9385 = vrcp.f32 %v1820_v54  ;;  %v1823_v32 = vadd.f32 1.0, %v9364_v7  ;;  %14925 = vst [vmem:[#allocation7_spill] sm:$0xff] %v11824_v39  ;;  %v11829_v63 = vpop.f32.mrb[51].mxu0 }
 0x1af   : >> { %v9368_v41 = vpop.eup %9367  ;;  %9387 = vrcp.f32 %v1822_v4  ;;  %v1825_v36 = vadd.f32 1.0, %v9366_v35  ;;  %14927 = vst [vmem:[#allocation8_spill] sm:$0xff] %v11829_v63  ;;  %v11831_v27 = vpop.f32.mrb[51].mxu1  ;;  %v14929_v35 = vld [vmem:[#allocation9_spill] sm:$0xff] }
 0x1b0   : >> { %14928 = vst [vmem:[#allocation33_spill] sm:$0xff] %v11831_v27  ;;  %v9370_v42 = vpop.eup %9369  ;;  %9389 = vrcp.f32 %v1823_v32  ;;  %v1824_v62 = vadd.f32 1.0, %v9368_v41  ;;  %v534_v54 = vpop.permute.xlu1 %533  ;;  %v11836_v12 = vadd.f32 %v14929_v35, %v524_v56  ;;  %v7999_v32 = vmul.f32 -1.442695, %v11827_v13 }
 0x1b1   : >> { %v9372_v49 = vpop.eup %9371  ;;  %9391 = vrcp.f32 %v1825_v36  ;;  %v1826_v46 = vadd.f32 1.0, %v9370_v42  ;;  %v529_v7 = vpop.permute.xlu0 %528 }
 0x1b2   : >> { %v9374_v18 = vpop.eup %9373  ;;  %9393 = vrcp.f32 %v1824_v62  ;;  %v1827_v4 = vadd.f32 1.0, %v9372_v49  ;;  %v11840_v41 = vadd.f32 %v11612_v48, %v529_v7  ;;  %v11842_v36 = vpop.f32.mrb[52].mxu0  ;;  %v11847_v49 = vadd.f32 %v11614_v17, %v529_v7 }
 0x1b3   : >> { %v9376_v34 = vpop.eup %9375  ;;  %9395 = vrcp.f32 %v1826_v46  ;;  %v1829_v27 = vadd.f32 1.0, %v9374_v18  ;;  %14930 = vst [vmem:[#allocation9_spill] sm:$0xff] %v11842_v36  ;;  %v11844_v42 = vpop.f32.mrb[52].mxu1  ;;  %v11850_v56 = vadd.f32 %v11619_v51, %v529_v7  ;;  %v11857_v36 = vadd.f32 %v11621_v21, %v529_v7  ;;  %v14938_v7 = vld [vmem:[#allocation11_spill] sm:$0xff] }
 0x1b4   : >> { %14931 = vst [vmem:[#allocation34_spill] sm:$0xff] %v11844_v42  ;;  %v9378_v63 = vpop.eup %9377  ;;  %9397 = vrcp.f32 %v1827_v4  ;;  %v1828_v62 = vadd.f32 1.0, %v9376_v34  ;;  %v11852_v46 = vpop.f32.mrb[53].mxu0  ;;  %v11860_v42 = vadd.f32 %v11628_v52, %v534_v54  ;;  %v2198_v51 = vmul.f32 %v11780_v37, %v11603_v24 }
 0x1b5   : >> { %14932 = vst [vmem:[#allocation35_spill] sm:$0xff] %v11852_v46  ;;  %v11854_v18 = vpop.f32.mrb[53].mxu1  ;;  %v9380_v35 = vpop.eup %9379  ;;  %9399 = vrcp.f32 %v1829_v27  ;;  %v1830_v48 = vadd.f32 1.0, %v9378_v63  ;;  %v14935_v46 = vld [vmem:[#allocation10_spill] sm:$0xff]  ;;  %v8001_v52 = vmul.f32 -1.442695, %v11836_v12 }
 0x1b6   : >> { %14933 = vst [vmem:[#allocation36_spill] sm:$0xff] %v11854_v18  ;;  %v11862_v4 = vpop.f32.mrb[54].mxu0  ;;  %v9382_v17 = vpop.eup %9381  ;;  %v2202_v34 = vmul.f32 %v9380_v35, %v11684_v45  ;;  %9401 = vrcp.f32 %v1828_v62  ;;  %v11868_v18 = vadd.f32 %v14935_v46, %v534_v54  ;;  %v8002_v37 = vmul.f32 -1.442695, %v11840_v41 }
 0x1b7   : >> { %14934 = vst [vmem:[#allocation37_spill] sm:$0xff] %v11862_v4  ;;  %v11870_v27 = vpop.f32.mrb[54].mxu1  ;;  %v11872_v63 = vpop.f32.mrb[55].mxu0  ;;  %9403 = vrcp.f32 %v1830_v48  ;;  %v11876_v4 = vadd.f32 %v14938_v7, %v534_v54  ;;  %v8004_v46 = vmul.f32 -1.442695, %v11847_v49 }
 0x1b8   : >> { %14936 = vst [vmem:[#allocation10_spill] sm:$0xff] %v11870_v27  ;;  %14937 = vst [vmem:[#allocation38_spill] sm:$0xff] %v11872_v63  ;;  %v9384_v21 = vpop.eup %9383  ;;  %v11878_v39 = vpop.f32.mrb[55].mxu1  ;;  %v2310_v45 = vpack.c.bf16 %v2202_v34, %v2198_v51  ;;  %9405 = vpow2.f32 %v7998_v3  ;;  %v8003_v35 = vmul.f32 -1.442695, %v11850_v56  ;;  %v14940_v3 = vld [vmem:[#allocation12_spill] sm:$0xff] }
 0x1b9   : >> { %14939 = vst [vmem:[#allocation11_spill] sm:$0xff] %v11878_v39  ;;  %v9386_v24 = vpop.eup %9385  ;;  %9407 = vpow2.f32 %v8000_v40  ;;  %v8005_v48 = vmul.f32 -1.442695, %v11857_v36  ;;  %v11884_v27 = vpop.permute.xlu0 %538  ;;  %v8006_v7 = vmul.f32 -1.442695, %v11860_v42  ;;  %v11890_v34 = vadd.f32 %v14940_v3, %v534_v54 }
 0x1ba   : >> { %v9388_v62 = vpop.eup %9387  ;;  %2379 = vst [vmem:[%s11515_s10 + $0x98] sm:$0xff] %v2310_v45  ;;  %9409 = vpow2.f32 %v7999_v32  ;;  %v8008_v51 = vmul.f32 -1.442695, %v11868_v18  ;;  %v2203_v40 = vmul.f32 %v9382_v17, %v11695_v53  ;;  %v8007_v58 = vmul.f32 -1.442695, %v11876_v4  ;;  %v11895_v26 = vpop.f32.mrb[56].mxu0 }
 0x1bb   : >> { %v9390_v63 = vpop.eup %9389  ;;  %9411 = vpow2.f32 %v8001_v52  ;;  %v11897_v16 = vpop.f32.mrb[56].mxu1  ;;  %v2205_v45 = vmul.f32 %v9384_v21, %v11700_v6  ;;  %v11903_v54 = vadd.f32 %v11656_v61, %v11884_v27  ;;  %v2206_v61 = vmul.f32 %v9388_v62, %v11711_v11 }
 0x1bc   : >> { %v9392_v39 = vpop.eup %9391  ;;  %v2207_v43 = vmul.f32 %v9390_v63, %v11716_v15  ;;  %9413 = vpow2.f32 %v8002_v37  ;;  %v11905_v53 = vpop.f32.mrb[57].mxu0  ;;  %v2204_v63 = vmul.f32 %v9386_v24, %v11703_v14  ;;  %v8009_v24 = vmul.f32 -1.442695, %v11890_v34 }
 0x1bd   : >> { %v9394_v32 = vpop.eup %9393  ;;  %v2209_v44 = vmul.f32 %v9392_v39, %v11719_v60  ;;  %v11907_v15 = vpop.f32.mrb[57].mxu1  ;;  %9415 = vpow2.f32 %v8004_v46 }
 0x1be   : >> { %14941 = vst [vmem:[#allocation12_spill] sm:$0xff] %v11907_v15  ;;  %v9396_v17 = vpop.eup %9395  ;;  %v2311_v52 = vpack.c.bf16 %v2207_v43, %v2203_v40  ;;  %v2208_v3 = vmul.f32 %v9394_v32, %v11723_v25  ;;  %v11911_v6 = vpop.f32.mrb[58].mxu0  ;;  %9417 = vpow2.f32 %v8003_v35 }
 0x1bf   : >> { %v11913_v60 = vpop.f32.mrb[58].mxu1  ;;  %v11915_v39 = vpop.eup %9397  ;;  %v2313_v21 = vpack.c.bf16 %v2209_v44, %v2205_v45  ;;  %v2210_v37 = vmul.f32 %v9396_v17, %v11740_v28  ;;  %9419 = vpow2.f32 %v8005_v48  ;;  %v8010_v28 = vmul.f32 -1.442695, %v11903_v54 }
 0x1c0   : >> { %14942 = vst [vmem:[#allocation39_spill] sm:$0xff] %v11913_v60  ;;  %v11919_v15 = vpop.f32.mrb[59].mxu0  ;;  %v11921_v14 = vpop.f32.mrb[59].mxu1  ;;  %2380 = vst [vmem:[%s11515_s10 + $0xa0] sm:$0xff] %v2311_v52  ;;  %v2312_v43 = vpack.c.bf16 %v2208_v3, %v2204_v63  ;;  %9421 = vpow2.f32 %v8006_v7 }
 0x1c1   : >> { %14943 = vst [vmem:[#allocation40_spill] sm:$0xff] %v11919_v15  ;;  %14944 = vst [vmem:[#allocation41_spill] sm:$0xff] %v11921_v14  ;;  %v11923_v25 = vpop.eup %9399  ;;  %v2314_v11 = vpack.c.bf16 %v2210_v37, %v2206_v61  ;;  %9423 = vpow2.f32 %v8008_v51  ;;  %v11935_v48 = vpop.f32.mrb[60].mxu0 }
 0x1c2   : >> { %v11927_v46 = vpop.eup %9401  ;;  %2382 = vst [vmem:[%s11515_s10 + $0xb0] sm:$0xff] %v2313_v21  ;;  %2381 = vst [vmem:[%s11515_s10 + $0xa8] sm:$0xff] %v2312_v43  ;;  %9425 = vpow2.f32 %v8007_v58  ;;  %v11937_v17 = vpop.f32.mrb[60].mxu1 }
 0x1c3   : >> { %v11931_v44 = vpop.eup %9403  ;;  %2383 = vst [vmem:[%s11515_s10 + $0xb8] sm:$0xff] %v2314_v11  ;;  %9427 = vpow2.f32 %v8009_v24  ;;  %14945 = vst [vmem:[#allocation42_spill] sm:$0xff] %v11935_v48  ;;  %v11939_v7 = vpop.f32.mrb[61].mxu0  ;;  %v11951_v11 = vadd.f32 %v11658_v1, %v11884_v27 }
 0x1c4   : >> { %v9406_v62 = vpop.eup %9405  ;;  %9429 = vpow2.f32 %v8010_v28  ;;  %14946 = vst [vmem:[#allocation43_spill] sm:$0xff] %v11937_v17  ;;  %14947 = vst [vmem:[#allocation44_spill] sm:$0xff] %v11939_v7  ;;  %v11941_v3 = vpop.f32.mrb[61].mxu1  ;;  %v14954_v17 = vld [vmem:[#allocation14_spill] sm:$0xff] }
 0x1c5   : >> { %v9408_v35 = vpop.eup %9407  ;;  %v1831_v40 = vadd.f32 1.0, %v9406_v62  ;;  %14948 = vst [vmem:[#allocation45_spill] sm:$0xff] %v11941_v3  ;;  %v11943_v51 = vpop.f32.mrb[62].mxu0 }
 0x1c6   : >> { %v9410_v32 = vpop.eup %9409  ;;  %v1833_v45 = vadd.f32 1.0, %v9408_v35  ;;  %14949 = vst [vmem:[#allocation46_spill] sm:$0xff] %v11943_v51  ;;  %v11945_v21 = vpop.f32.mrb[62].mxu1 }
 0x1c7   : >> { %v9412_v63 = vpop.eup %9411  ;;  %9431 = vrcp.f32 %v1831_v40  ;;  %v1832_v52 = vadd.f32 1.0, %v9410_v32  ;;  %14950 = vst [vmem:[#allocation47_spill] sm:$0xff] %v11945_v21  ;;  %v11947_v37 = vpop.f32.mrb[63].mxu0  ;;  %v11957_v32 = vadd.f32 %v11664_v38, %v11884_v27  ;;  %v14953_v21 = vld [vmem:[#allocation13_spill] sm:$0xff] }
 0x1c8   : >> { %v9414_v58 = vpop.eup %9413  ;;  %9433 = vrcp.f32 %v1833_v45  ;;  %v1834_v61 = vadd.f32 1.0, %v9412_v63  ;;  %14951 = vst [vmem:[#allocation48_spill] sm:$0xff] %v11947_v37  ;;  %v11953_v28 = vpop.f32.mrb[63].mxu1  ;;  %v11961_v45 = vadd.f32 %v11666_v55, %v11884_v27  ;;  %v8012_v55 = vmul.f32 -1.442695, %v11951_v11 }
 0x1c9   : >> { %v9416_v43 = vpop.eup %9415  ;;  %9435 = vrcp.f32 %v1832_v52  ;;  %v1835_v24 = vadd.f32 1.0, %v9414_v58  ;;  %14952 = vst [vmem:[#allocation49_spill] sm:$0xff] %v11953_v28  ;;  %v544_v35 = vpop.permute.xlu1 %543 }
 0x1ca   : >> { %v9418_v62 = vpop.eup %9417  ;;  %9437 = vrcp.f32 %v1834_v61  ;;  %v1837_v40 = vadd.f32 1.0, %v9416_v43  ;;  %v11964_v1 = vadd.f32 %v11671_v59, %v544_v35  ;;  %v11967_v61 = vadd.f32 %v11673_v0, %v544_v35 }
 0x1cb   : >> { %v9420_v63 = vpop.eup %9419  ;;  %9439 = vrcp.f32 %v1835_v24  ;;  %v1836_v52 = vadd.f32 1.0, %v9418_v62  ;;  %v11970_v43 = vadd.f32 %v11676_v20, %v544_v35  ;;  %v8011_v59 = vmul.f32 -1.442695, %v11957_v32 }
 0x1cc   : >> { %v9422_v58 = vpop.eup %9421  ;;  %9441 = vrcp.f32 %v1837_v40  ;;  %v1838_v28 = vadd.f32 1.0, %v9420_v63  ;;  %v8013_v62 = vmul.f32 -1.442695, %v11961_v45  ;;  %v8014_v0 = vmul.f32 -1.442695, %v11964_v1 }
 0x1cd   : >> { %v9424_v38 = vpop.eup %9423  ;;  %9443 = vrcp.f32 %v1836_v52  ;;  %v1839_v37 = vadd.f32 1.0, %v9422_v58  ;;  %v11977_v20 = vadd.f32 %v14953_v21, %v544_v35  ;;  %v549_v52 = vpop.permute.xlu0 %548  ;;  %v8016_v3 = vmul.f32 -1.442695, %v11967_v61 }
 0x1ce   : >> { %v9426_v27 = vpop.eup %9425  ;;  %9445 = vrcp.f32 %v1838_v28  ;;  %v1841_v24 = vadd.f32 1.0, %v9424_v38  ;;  %v8015_v28 = vmul.f32 -1.442695, %v11970_v43  ;;  %v11982_v48 = vadd.f32 %v14954_v17, %v549_v52 }
 0x1cf   : >> { %v9428_v40 = vpop.eup %9427  ;;  %9447 = vrcp.f32 %v1839_v37  ;;  %v1840_v63 = vadd.f32 1.0, %v9426_v27  ;;  %v14955_v37 = vld [vmem:[#allocation15_spill] sm:$0xff]  ;;  %v2211_v21 = vmul.f32 %v11915_v39, %v11743_v9  ;;  %v2212_v9 = vmul.f32 %v11927_v46, %v11763_v31 }
 0x1d0   : >> { %v9430_v51 = vpop.eup %9429  ;;  %9449 = vrcp.f32 %v1841_v24  ;;  %v1842_v58 = vadd.f32 1.0, %v9428_v40  ;;  %v11985_v27 = vadd.f32 %v14955_v37, %v549_v52  ;;  %v14956_v24 = vld [vmem:[#allocation16_spill] sm:$0xff]  ;;  %v8017_v46 = vmul.f32 -1.442695, %v11977_v20 }
 0x1d1   : >> { %v9432_v38 = vpop.eup %9431  ;;  %9451 = vrcp.f32 %v1840_v63  ;;  %v1843_v7 = vadd.f32 1.0, %v9430_v51  ;;  %v11991_v40 = vadd.f32 %v14956_v24, %v549_v52  ;;  %v2213_v51 = vmul.f32 %v11923_v25, %v11753_v19  ;;  %v14957_v63 = vld [vmem:[#allocation17_spill] sm:$0xff] }
 0x1d2   : >> { %v9434_v14 = vpop.eup %9433  ;;  %v2215_v35 = vmul.f32 %v9432_v38, %v11817_v47  ;;  %9453 = vrcp.f32 %v1842_v58  ;;  %v11997_v37 = vadd.f32 %v14957_v63, %v549_v52  ;;  %v12002_v38 = vpop.permute.xlu1 %553  ;;  %v2214_v19 = vmul.f32 %v11931_v44, %v11772_v33 }
 0x1d3   : >> { %v9436_v15 = vpop.eup %9435  ;;  %v2217_v17 = vmul.f32 %v9434_v14, %v11822_v22  ;;  %9455 = vrcp.f32 %v1843_v7  ;;  %v8018_v33 = vmul.f32 -1.442695, %v11982_v48  ;;  %v8019_v52 = vmul.f32 -1.442695, %v11991_v40 }
 0x1d4   : >> { %v9438_v60 = vpop.eup %9437  ;;  %v2315_v47 = vpack.c.bf16 %v2215_v35, %v2211_v21  ;;  %v2216_v39 = vmul.f32 %v9436_v15, %v11827_v13  ;;  %9457 = vpow2.f32 %v8012_v55  ;;  %v14958_v13 = vld [vmem:[#allocation18_spill] sm:$0xff]  ;;  %v8021_v21 = vmul.f32 -1.442695, %v11997_v37 }
 0x1d5   : >> { %v9440_v58 = vpop.eup %9439  ;;  %v2317_v22 = vpack.c.bf16 %v2217_v17, %v2213_v51  ;;  %v2218_v14 = vmul.f32 %v9438_v60, %v11836_v12  ;;  %9459 = vpow2.f32 %v8011_v59  ;;  %v12011_v15 = vadd.f32 %v14958_v13, %v12002_v38  ;;  %v14959_v12 = vld [vmem:[#allocation19_spill] sm:$0xff] }
 0x1d6   : >> { %v9442_v25 = vpop.eup %9441  ;;  %2384 = vst [vmem:[%s11515_s10 + $0xc0] sm:$0xff] %v2315_v47  ;;  %v2316_v31 = vpack.c.bf16 %v2216_v39, %v2212_v9  ;;  %9461 = vpow2.f32 %v8013_v62  ;;  %v12017_v60 = vadd.f32 %v14959_v12, %v12002_v38  ;;  %v8020_v59 = vmul.f32 -1.442695, %v11985_v27 }
 0x1d7   : >> { %v9444_v7 = vpop.eup %9443  ;;  %2386 = vst [vmem:[%s11515_s10 + $0xd0] sm:$0xff] %v2317_v22  ;;  %v2318_v55 = vpack.c.bf16 %v2218_v14, %v2214_v19  ;;  %9463 = vpow2.f32 %v8014_v0  ;;  %v2219_v0 = vmul.f32 %v9440_v58, %v11840_v41  ;;  %v8022_v51 = vmul.f32 -1.442695, %v12011_v15 }
 0x1d8   : >> { %v9446_v44 = vpop.eup %9445  ;;  %2385 = vst [vmem:[%s11515_s10 + $0xc8] sm:$0xff] %v2316_v31  ;;  %9465 = vpow2.f32 %v8016_v3  ;;  %v2221_v3 = vmul.f32 %v9442_v25, %v11847_v49  ;;  %v2220_v47 = vmul.f32 %v9444_v7, %v11850_v56  ;;  %v14960_v7 = vld [vmem:[#allocation20_spill] sm:$0xff] }
 0x1d9   : >> { %v9448_v62 = vpop.eup %9447  ;;  %2387 = vst [vmem:[%s11515_s10 + $0xd8] sm:$0xff] %v2318_v55  ;;  %9467 = vpow2.f32 %v8015_v28  ;;  %v8024_v28 = vmul.f32 -1.442695, %v12017_v60  ;;  %v2222_v58 = vmul.f32 %v9446_v44, %v11857_v36  ;;  %v12042_v55 = vadd.f32 %v14960_v7, %v12002_v38 }
 0x1da   : >> { %v9450_v35 = vpop.eup %9449  ;;  %v2223_v24 = vmul.f32 %v9448_v62, %v11860_v42  ;;  %9469 = vpow2.f32 %v8017_v46 }
 0x1db   : >> { %v9452_v17 = vpop.eup %9451  ;;  %v2225_v63 = vmul.f32 %v9450_v35, %v11868_v18  ;;  %9471 = vpow2.f32 %v8018_v33  ;;  %v559_v35 = vpop.permute.xlu0 %558 }
 0x1dc   : >> { %v9454_v9 = vpop.eup %9453  ;;  %v2319_v39 = vpack.c.bf16 %v2223_v24, %v2219_v0  ;;  %v2224_v41 = vmul.f32 %v9452_v17, %v11876_v4  ;;  %9473 = vpow2.f32 %v8020_v59  ;;  %v8023_v24 = vmul.f32 -1.442695, %v12042_v55 }
 0x1dd   : >> { %v12032_v42 = vpop.eup %9455  ;;  %v2321_v19 = vpack.c.bf16 %v2225_v63, %v2221_v3  ;;  %v2226_v49 = vmul.f32 %v9454_v9, %v11890_v34  ;;  %9475 = vpow2.f32 %v8019_v52  ;;  %v14961_v3 = vld [vmem:[#allocation21_spill] sm:$0xff] }
 0x1de   : >> { %v9458_v18 = vpop.eup %9457  ;;  %2388 = vst [vmem:[%s11515_s10 + $0xe0] sm:$0xff] %v2319_v39  ;;  %v2320_v22 = vpack.c.bf16 %v2224_v41, %v2220_v47  ;;  %9477 = vpow2.f32 %v8021_v21  ;;  %v12047_v63 = vadd.f32 %v14961_v3, %v12002_v38  ;;  %v564_v39 = vpop.permute.xlu1 %563 }
 0x1df   : >> { %v9460_v14 = vpop.eup %9459  ;;  %2390 = vst [vmem:[%s11515_s10 + $0xf0] sm:$0xff] %v2321_v19  ;;  %v2322_v56 = vpack.c.bf16 %v2226_v49, %v2222_v58  ;;  %v1845_v25 = vadd.f32 1.0, %v9458_v18  ;;  %9479 = vpow2.f32 %v8022_v51  ;;  %v14963_v58 = vld [vmem:[#allocation23_spill] sm:$0xff]  ;;  %v14964_v49 = vld [vmem:[#allocation24_spill] sm:$0xff]  ;;  %v12062_v38 = vadd.f32 %v11745_v10, %v564_v39 }
 0x1e0   : >> { %v9462_v4 = vpop.eup %9461  ;;  %2389 = vst [vmem:[%s11515_s10 + $0xe8] sm:$0xff] %v2320_v22  ;;  %v1844_v31 = vadd.f32 1.0, %v9460_v14  ;;  %9481 = vpow2.f32 %v8024_v28  ;;  %v14962_v28 = vld [vmem:[#allocation22_spill] sm:$0xff]  ;;  %v12053_v19 = vadd.f32 %v14963_v58, %v559_v35  ;;  %v12056_v18 = vadd.f32 %v14964_v49, %v559_v35 }
 0x1e1   : >> { %v9464_v46 = vpop.eup %9463  ;;  %2391 = vst [vmem:[%s11515_s10 + $0xf8] sm:$0xff] %v2322_v56  ;;  %9483 = vrcp.f32 %v1845_v25  ;;  %v1846_v36 = vadd.f32 1.0, %v9462_v4  ;;  %v12050_v9 = vadd.f32 %v14962_v28, %v559_v35  ;;  %v14965_v56 = vld [vmem:[#allocation25_spill] sm:$0xff]  ;;  %v2227_v49 = vmul.f32 %v12032_v42, %v11903_v54 }
 0x1e2   : >> { %v9466_v34 = vpop.eup %9465  ;;  %9485 = vrcp.f32 %v1844_v31  ;;  %v1847_v13 = vadd.f32 1.0, %v9464_v46  ;;  %v12059_v25 = vadd.f32 %v14965_v56, %v559_v35  ;;  %v14966_v46 = vld [vmem:[#allocation26_spill] sm:$0xff]  ;;  %v8028_v10 = vmul.f32 -1.442695, %v12053_v19 }
 0x1e3   : >> { %v9468_v33 = vpop.eup %9467  ;;  %9487 = vrcp.f32 %v1846_v36  ;;  %v1849_v12 = vadd.f32 1.0, %v9466_v34  ;;  %v12065_v36 = vadd.f32 %v14966_v46, %v564_v39  ;;  %v14967_v34 = vld [vmem:[#allocation27_spill] sm:$0xff] }
 0x1e4   : >> { %v9470_v44 = vpop.eup %9469  ;;  %9489 = vrcp.f32 %v1847_v13  ;;  %v1848_v59 = vadd.f32 1.0, %v9468_v33  ;;  %v12068_v13 = vadd.f32 %v14967_v34, %v564_v39  ;;  %v8029_v35 = vmul.f32 -1.442695, %v12059_v25 }
 0x1e5   : >> { %v9472_v62 = vpop.eup %9471  ;;  %9491 = vrcp.f32 %v1849_v12  ;;  %v1850_v52 = vadd.f32 1.0, %v9470_v44  ;;  %v8025_v12 = vmul.f32 -1.442695, %v12047_v63  ;;  %v8032_v28 = vmul.f32 -1.442695, %v12065_v36 }
 0x1e6   : >> { %v9474_v21 = vpop.eup %9473  ;;  %9493 = vrcp.f32 %v1848_v59  ;;  %v1851_v0 = vadd.f32 1.0, %v9472_v62  ;;  %v8026_v59 = vmul.f32 -1.442695, %v12050_v9  ;;  %v8027_v62 = vmul.f32 -1.442695, %v12056_v18 }
 0x1e7   : >> { %v9476_v51 = vpop.eup %9475  ;;  %9495 = vrcp.f32 %v1850_v52  ;;  %v1853_v17 = vadd.f32 1.0, %v9474_v21  ;;  %v12074_v21 = vpop.permute.xlu0 %568 }
 0x1e8   : >> { %v9478_v47 = vpop.eup %9477  ;;  %9497 = vrcp.f32 %v1851_v0  ;;  %v1852_v41 = vadd.f32 1.0, %v9476_v51  ;;  %v8030_v0 = vmul.f32 -1.442695, %v12062_v38  ;;  %v14968_v51 = vld [vmem:[#allocation28_spill] sm:$0xff] }
 0x1e9   : >> { %v9480_v22 = vpop.eup %9479  ;;  %9499 = vrcp.f32 %v1853_v17  ;;  %v1854_v14 = vadd.f32 1.0, %v9478_v47  ;;  %v12079_v17 = vadd.f32 %v14968_v51, %v564_v39  ;;  %v8031_v47 = vmul.f32 -1.442695, %v12068_v13 }
 0x1ea   : >> { %v9482_v4 = vpop.eup %9481  ;;  %9501 = vrcp.f32 %v1852_v41  ;;  %v1855_v31 = vadd.f32 1.0, %v9480_v22  ;;  %v12085_v41 = vadd.f32 %v11776_v5, %v12074_v21  ;;  %v12092_v39 = vadd.f32 %v11778_v8, %v12074_v21 }
 0x1eb   : >> { %v9484_v7 = vpop.eup %9483  ;;  %9503 = vrcp.f32 %v1854_v14  ;;  %v1857_v33 = vadd.f32 1.0, %v9482_v4  ;;  %v12098_v5 = vadd.f32 %v11784_v23, %v12074_v21  ;;  %v8033_v34 = vmul.f32 -1.442695, %v12079_v17 }
 0x1ec   : >> { %v9486_v44 = vpop.eup %9485  ;;  %9505 = vrcp.f32 %v1855_v31  ;;  %v2229_v14 = vmul.f32 %v9484_v7, %v11951_v11  ;;  %v8034_v7 = vmul.f32 -1.442695, %v12085_v41 }
 0x1ed   : >> { %v9488_v52 = vpop.eup %9487  ;;  %9507 = vrcp.f32 %v1857_v33  ;;  %v2228_v54 = vmul.f32 %v9486_v44, %v11957_v32 }
 0x1ee   : >> { %v9490_v3 = vpop.eup %9489  ;;  %9509 = vpow2.f32 %v8023_v24  ;;  %v2230_v31 = vmul.f32 %v9488_v52, %v11961_v45  ;;  %v8036_v45 = vmul.f32 -1.442695, %v12092_v39 }
 0x1ef   : >> { %v9492_v58 = vpop.eup %9491  ;;  %v2231_v22 = vmul.f32 %v9490_v3, %v11964_v1  ;;  %9511 = vpow2.f32 %v8025_v12  ;;  %v8035_v12 = vmul.f32 -1.442695, %v12098_v5 }
 0x1f0   : >> { %v9494_v24 = vpop.eup %9493  ;;  %v2233_v56 = vmul.f32 %v9492_v58, %v11967_v61  ;;  %9513 = vpow2.f32 %v8026_v59 }
 0x1f1   : >> { %v9496_v4 = vpop.eup %9495  ;;  %v2323_v1 = vpack.c.bf16 %v2231_v22, %v2227_v49  ;;  %v2232_v42 = vmul.f32 %v9494_v24, %v11970_v43  ;;  %9515 = vpow2.f32 %v8028_v10  ;;  %v574_v24 = vpop.permute.xlu1 %573 }
 0x1f2   : >> { %v9498_v8 = vpop.eup %9497  ;;  %v2325_v11 = vpack.c.bf16 %v2233_v56, %v2229_v14  ;;  %v2234_v61 = vmul.f32 %v9496_v4, %v11977_v20  ;;  %9517 = vpow2.f32 %v8027_v62  ;;  %v12124_v4 = vadd.f32 %v11786_v29, %v12074_v21  ;;  %v579_v21 = vpop.permute.xlu0 %578 }
 0x1f3   : >> { %v9500_v46 = vpop.eup %9499  ;;  %2392 = vst [vmem:[%s11515_s10 + $0x100] sm:$0xff] %v2323_v1  ;;  %v2324_v23 = vpack.c.bf16 %v2232_v42, %v2228_v54  ;;  %9519 = vpow2.f32 %v8029_v35  ;;  %v2235_v59 = vmul.f32 %v9498_v8, %v11982_v48  ;;  %v12127_v54 = vadd.f32 %v11790_v50, %v574_v24 }
 0x1f4   : >> { %v12106_v32 = vpop.eup %9501  ;;  %2394 = vst [vmem:[%s11515_s10 + $0x110] sm:$0xff] %v2325_v11  ;;  %v2326_v43 = vpack.c.bf16 %v2234_v61, %v2230_v31  ;;  %9521 = vpow2.f32 %v8030_v0  ;;  %v2237_v52 = vmul.f32 %v9500_v46, %v11985_v27  ;;  %v12130_v11 = vadd.f32 %v11792_v30, %v574_v24 }
 0x1f5   : >> { %v12110_v33 = vpop.eup %9503  ;;  %2393 = vst [vmem:[%s11515_s10 + $0x108] sm:$0xff] %v2324_v23  ;;  %9523 = vpow2.f32 %v8032_v28  ;;  %v12133_v61 = vadd.f32 %v11797_v2, %v574_v24  ;;  %v12138_v30 = vadd.f32 %v11799_v57, %v574_v24  ;;  %v14973_v24 = vld [vmem:[#allocation6_spill] sm:$0xff] }
 0x1f6   : >> { %v9506_v20 = vpop.eup %9505  ;;  %2395 = vst [vmem:[%s11515_s10 + $0x118] sm:$0xff] %v2326_v43  ;;  %9525 = vpow2.f32 %v8031_v47  ;;  %v8038_v43 = vmul.f32 -1.442695, %v12127_v54 }
 0x1f7   : >> { %v9508_v44 = vpop.eup %9507  ;;  %v2239_v10 = vmul.f32 %v9506_v20, %v12011_v15  ;;  %9527 = vpow2.f32 %v8033_v34  ;;  %v8037_v34 = vmul.f32 -1.442695, %v12124_v4  ;;  %v14969_v20 = vld [vmem:[#allocation29_spill] sm:$0xff] }
 0x1f8   : >> { %v9510_v62 = vpop.eup %9509  ;;  %v2241_v35 = vmul.f32 %v9508_v44, %v12017_v60  ;;  %9529 = vpow2.f32 %v8034_v7  ;;  %v12141_v2 = vadd.f32 %v14969_v20, %v579_v21 }
 0x1f9   : >> { %v9512_v0 = vpop.eup %9511  ;;  %v2327_v51 = vpack.c.bf16 %v2239_v10, %v2235_v59  ;;  %v1856_v3 = vadd.f32 1.0, %v9510_v62  ;;  %9531 = vpow2.f32 %v8036_v45  ;;  %v8040_v59 = vmul.f32 -1.442695, %v12130_v11 }
 0x1fa   : >> { %v9514_v28 = vpop.eup %9513  ;;  %v2329_v47 = vpack.c.bf16 %v2241_v35, %v2237_v52  ;;  %v1858_v58 = vadd.f32 1.0, %v9512_v0  ;;  %9533 = vpow2.f32 %v8035_v12  ;;  %v8039_v10 = vmul.f32 -1.442695, %v12133_v61  ;;  %v14970_v35 = vld [vmem:[#allocation30_spill] sm:$0xff] }
 0x1fb   : >> { %v9516_v48 = vpop.eup %9515  ;;  %2396 = vst [vmem:[%s11515_s10 + $0x120] sm:$0xff] %v2327_v51  ;;  %9535 = vrcp.f32 %v1856_v3  ;;  %v1859_v15 = vadd.f32 1.0, %v9514_v28  ;;  %v12146_v0 = vadd.f32 %v14970_v35, %v579_v21  ;;  %v14971_v51 = vld [vmem:[#allocation31_spill] sm:$0xff]  ;;  %v584_v28 = vpop.permute.xlu1 %583 }
 0x1fc   : >> { %v9518_v49 = vpop.eup %9517  ;;  %2398 = vst [vmem:[%s11515_s10 + $0x130] sm:$0xff] %v2329_v47  ;;  %9537 = vrcp.f32 %v1858_v58  ;;  %v1861_v27 = vadd.f32 1.0, %v9516_v48  ;;  %v12149_v3 = vadd.f32 %v14971_v51, %v579_v21  ;;  %v2236_v47 = vmul.f32 %v12106_v32, %v11991_v40  ;;  %v14972_v48 = vld [vmem:[#allocation32_spill] sm:$0xff]  ;;  %v14974_v32 = vld [vmem:[#allocation7_spill] sm:$0xff] }
 0x1fd   : >> { %v9520_v22 = vpop.eup %9519  ;;  %9539 = vrcp.f32 %v1859_v15  ;;  %v1860_v60 = vadd.f32 1.0, %v9518_v49  ;;  %v12155_v15 = vadd.f32 %v14972_v48, %v579_v21 }
 0x1fe   : >> { %v9522_v14 = vpop.eup %9521  ;;  %9541 = vrcp.f32 %v1861_v27  ;;  %v1862_v56 = vadd.f32 1.0, %v9520_v22  ;;  %v2238_v27 = vmul.f32 %v12110_v33, %v11997_v37  ;;  %v8042_v37 = vmul.f32 -1.442695, %v12141_v2  ;;  %v14975_v33 = vld [vmem:[#allocation8_spill] sm:$0xff] }
 0x1ff   : >> { %v9524_v1 = vpop.eup %9523  ;;  %9543 = vrcp.f32 %v1860_v60  ;;  %v1863_v42 = vadd.f32 1.0, %v9522_v14  ;;  %v12161_v60 = vadd.f32 %v14973_v24, %v584_v28 }
 0x200   : >> { %v9526_v8 = vpop.eup %9525  ;;  %9545 = vrcp.f32 %v1862_v56  ;;  %v1865_v31 = vadd.f32 1.0, %v9524_v1  ;;  %v12165_v56 = vadd.f32 %v14974_v32, %v584_v28 }
 0x201   : >> { %v9528_v46 = vpop.eup %9527  ;;  %9547 = vrcp.f32 %v1863_v42  ;;  %v1864_v23 = vadd.f32 1.0, %v9526_v8  ;;  %v8046_v21 = vmul.f32 -1.442695, %v12161_v60 }
 0x202   : >> { %v9530_v29 = vpop.eup %9529  ;;  %9549 = vrcp.f32 %v1865_v31  ;;  %v1866_v50 = vadd.f32 1.0, %v9528_v46  ;;  %v8044_v31 = vmul.f32 -1.442695, %v12146_v0  ;;  %v8043_v46 = vmul.f32 -1.442695, %v12149_v3 }
 0x203   : >> { %v9532_v7 = vpop.eup %9531  ;;  %9551 = vrcp.f32 %v1864_v23  ;;  %v1867_v45 = vadd.f32 1.0, %v9530_v29  ;;  %v8045_v29 = vmul.f32 -1.442695, %v12155_v15  ;;  %v8048_v20 = vmul.f32 -1.442695, %v12165_v56 }
 0x204   : >> { %v9534_v12 = vpop.eup %9533  ;;  %9553 = vrcp.f32 %v1866_v50  ;;  %v1869_v44 = vadd.f32 1.0, %v9532_v7  ;;  %v14976_v50 = vld [vmem:[#allocation33_spill] sm:$0xff] }
 0x205   : >> { %v9536_v62 = vpop.eup %9535  ;;  %9555 = vrcp.f32 %v1867_v45  ;;  %v1868_v52 = vadd.f32 1.0, %v9534_v12 }
 0x206   : >> { %v9538_v57 = vpop.eup %9537  ;;  %v2240_v58 = vmul.f32 %v9536_v62, %v12042_v55  ;;  %9557 = vrcp.f32 %v1869_v44  ;;  %v8041_v55 = vmul.f32 -1.442695, %v12138_v30 }
 0x207   : >> { %v9540_v49 = vpop.eup %9539  ;;  %v2242_v22 = vmul.f32 %v9538_v57, %v12047_v63  ;;  %9559 = vrcp.f32 %v1868_v52  ;;  %v12169_v63 = vadd.f32 %v14975_v33, %v584_v28 }
 0x208   : >> { %v9542_v14 = vpop.eup %9541  ;;  %v2328_v40 = vpack.c.bf16 %v2240_v58, %v2236_v47  ;;  %9561 = vpow2.f32 %v8037_v34  ;;  %v12178_v34 = vadd.f32 %v14976_v50, %v584_v28  ;;  %v2243_v7 = vmul.f32 %v9540_v49, %v12050_v9 }
 0x209   : >> { %v9544_v1 = vpop.eup %9543  ;;  %v2330_v42 = vpack.c.bf16 %v2242_v22, %v2238_v27  ;;  %9563 = vpow2.f32 %v8038_v43  ;;  %v2245_v44 = vmul.f32 %v9542_v14, %v12053_v19 }
 0x20a   : >> { %v9546_v8 = vpop.eup %9545  ;;  %2397 = vst [vmem:[%s11515_s10 + $0x128] sm:$0xff] %v2328_v40  ;;  %9565 = vpow2.f32 %v8040_v59  ;;  %v2244_v52 = vmul.f32 %v9544_v1, %v12056_v18  ;;  %v8049_v18 = vmul.f32 -1.442695, %v12178_v34  ;;  %v589_v1 = vpop.permute.xlu0 %588 }
 0x20b   : >> { %v9548_v23 = vpop.eup %9547  ;;  %2399 = vst [vmem:[%s11515_s10 + $0x138] sm:$0xff] %v2330_v42  ;;  %9567 = vpow2.f32 %v8039_v10  ;;  %v8047_v10 = vmul.f32 -1.442695, %v12169_v63  ;;  %v2246_v51 = vmul.f32 %v9546_v8, %v12059_v25  ;;  %v14977_v8 = vld [vmem:[#allocation9_spill] sm:$0xff] }
 0x20c   : >> { %v9550_v43 = vpop.eup %9549  ;;  %v2247_v45 = vmul.f32 %v9548_v23, %v12062_v38  ;;  %9569 = vpow2.f32 %v8041_v55  ;;  %v594_v23 = vpop.permute.xlu1 %593 }
 0x20d   : >> { %v9552_v12 = vpop.eup %9551  ;;  %v2249_v59 = vmul.f32 %v9550_v43, %v12065_v36  ;;  %9571 = vpow2.f32 %v8042_v37  ;;  %v14979_v43 = vld [vmem:[#allocation35_spill] sm:$0xff] }
 0x20e   : >> { %v9554_v62 = vpop.eup %9553  ;;  %v2331_v35 = vpack.c.bf16 %v2247_v45, %v2243_v7  ;;  %v2248_v9 = vmul.f32 %v9552_v12, %v12068_v13  ;;  %9573 = vpow2.f32 %v8044_v31  ;;  %v12202_v31 = vadd.f32 %v14977_v8, %v589_v1  ;;  %v14980_v12 = vld [vmem:[#allocation36_spill] sm:$0xff] }
 0x20f   : >> { %v12188_v38 = vpop.eup %9555  ;;  %v2333_v57 = vpack.c.bf16 %v2249_v59, %v2245_v44  ;;  %v2250_v19 = vmul.f32 %v9554_v62, %v12079_v17  ;;  %9575 = vpow2.f32 %v8043_v46  ;;  %v12208_v7 = vadd.f32 %v14979_v43, %v589_v1  ;;  %v14981_v59 = vld [vmem:[#allocation37_spill] sm:$0xff] }
 0x210   : >> { %v12192_v36 = vpop.eup %9557  ;;  %2400 = vst [vmem:[%s11515_s10 + $0x140] sm:$0xff] %v2331_v35  ;;  %v2332_v28 = vpack.c.bf16 %v2248_v9, %v2244_v52  ;;  %9577 = vpow2.f32 %v8045_v29  ;;  %v12211_v44 = vadd.f32 %v14980_v12, %v589_v1  ;;  %v14982_v35 = vld [vmem:[#allocation10_spill] sm:$0xff] }
 0x211   : >> { %v12196_v47 = vpop.eup %9559  ;;  %2402 = vst [vmem:[%s11515_s10 + $0x150] sm:$0xff] %v2333_v57  ;;  %v2334_v13 = vpack.c.bf16 %v2250_v19, %v2246_v51  ;;  %9579 = vpow2.f32 %v8046_v21  ;;  %v14978_v21 = vld [vmem:[#allocation34_spill] sm:$0xff]  ;;  %v12217_v9 = vadd.f32 %v14982_v35, %v594_v23 }
 0x212   : >> { %v9562_v58 = vpop.eup %9561  ;;  %2401 = vst [vmem:[%s11515_s10 + $0x148] sm:$0xff] %v2332_v28  ;;  %9581 = vpow2.f32 %v8048_v20  ;;  %v12205_v50 = vadd.f32 %v14978_v21, %v589_v1  ;;  %v14983_v51 = vld [vmem:[#allocation38_spill] sm:$0xff] }
 0x213   : >> { %v9564_v25 = vpop.eup %9563  ;;  %2403 = vst [vmem:[%s11515_s10 + $0x158] sm:$0xff] %v2334_v13  ;;  %v1870_v48 = vadd.f32 1.0, %v9562_v58  ;;  %9583 = vpow2.f32 %v8047_v10  ;;  %v12214_v10 = vadd.f32 %v14981_v59, %v594_v23  ;;  %v12220_v57 = vadd.f32 %v14983_v51, %v594_v23 }
 0x214   : >> { %v9566_v17 = vpop.eup %9565  ;;  %v1871_v49 = vadd.f32 1.0, %v9564_v25  ;;  %9585 = vpow2.f32 %v8049_v18  ;;  %v8050_v18 = vmul.f32 -1.442695, %v12202_v31  ;;  %v8052_v25 = vmul.f32 -1.442695, %v12205_v50 }
 0x215   : >> { %v9568_v27 = vpop.eup %9567  ;;  %9587 = vrcp.f32 %v1870_v48  ;;  %v1873_v22 = vadd.f32 1.0, %v9566_v17  ;;  %v8051_v48 = vmul.f32 -1.442695, %v12208_v7 }
 0x216   : >> { %v9570_v24 = vpop.eup %9569  ;;  %9589 = vrcp.f32 %v1871_v49  ;;  %v1872_v14 = vadd.f32 1.0, %v9568_v27  ;;  %v8053_v27 = vmul.f32 -1.442695, %v12211_v44 }
 0x217   : >> { %v9572_v40 = vpop.eup %9571  ;;  %9591 = vrcp.f32 %v1873_v22  ;;  %v1874_v55 = vadd.f32 1.0, %v9570_v24  ;;  %v8054_v22 = vmul.f32 -1.442695, %v12214_v10 }
 0x218   : >> { %v9574_v32 = vpop.eup %9573  ;;  %9593 = vrcp.f32 %v1872_v14  ;;  %v1875_v42 = vadd.f32 1.0, %v9572_v40  ;;  %v12227_v14 = vpop.permute.xlu0 %598  ;;  %v8056_v40 = vmul.f32 -1.442695, %v12217_v9 }
 0x219   : >> { %v9576_v37 = vpop.eup %9575  ;;  %9595 = vrcp.f32 %v1874_v55  ;;  %v1877_v33 = vadd.f32 1.0, %v9574_v32  ;;  %v8055_v55 = vmul.f32 -1.442695, %v12220_v57  ;;  %v14984_v32 = vld [vmem:[#allocation11_spill] sm:$0xff]  ;;  %v12239_v8 = vadd.f32 %v11895_v26, %v12227_v14 }
 0x21a   : >> { %v9578_v46 = vpop.eup %9577  ;;  %9597 = vrcp.f32 %v1875_v42  ;;  %v1876_v29 = vadd.f32 1.0, %v9576_v37  ;;  %v12232_v1 = vadd.f32 %v14984_v32, %v594_v23  ;;  %v2251_v37 = vmul.f32 %v12188_v38, %v12085_v41 }
 0x21b   : >> { %v9580_v45 = vpop.eup %9579  ;;  %9599 = vrcp.f32 %v1877_v33  ;;  %v1878_v20 = vadd.f32 1.0, %v9578_v46  ;;  %v12246_v23 = vadd.f32 %v11897_v16, %v12227_v14  ;;  %v12253_v16 = vpop.permute.xlu1 %603 }
 0x21c   : >> { %v9582_v62 = vpop.eup %9581  ;;  %9601 = vrcp.f32 %v1876_v29  ;;  %v1879_v52 = vadd.f32 1.0, %v9580_v45  ;;  %v2253_v29 = vmul.f32 %v12192_v36, %v12092_v39  ;;  %v12265_v12 = vadd.f32 %v11911_v6, %v12253_v16 }
 0x21d   : >> { %v9584_v19 = vpop.eup %9583  ;;  %9603 = vrcp.f32 %v1878_v20  ;;  %v1881_v28 = vadd.f32 1.0, %v9582_v62  ;;  %v8060_v62 = vmul.f32 -1.442695, %v12246_v23 }
 0x21e   : >> { %v9586_v13 = vpop.eup %9585  ;;  %9605 = vrcp.f32 %v1879_v52  ;;  %v1880_v58 = vadd.f32 1.0, %v9584_v19 }
 0x21f   : >> { %v9588_v17 = vpop.eup %9587  ;;  %9607 = vrcp.f32 %v1881_v28  ;;  %v1882_v49 = vadd.f32 1.0, %v9586_v13  ;;  %v8062_v13 = vmul.f32 -1.442695, %v12265_v12 }
 0x220   : >> { %v9590_v24 = vpop.eup %9589  ;;  %9609 = vrcp.f32 %v1880_v58  ;;  %v2254_v39 = vmul.f32 %v9588_v17, %v12124_v4 }
 0x221   : >> { %v9592_v42 = vpop.eup %9591  ;;  %v2255_v33 = vmul.f32 %v9590_v24, %v12127_v54  ;;  %9611 = vrcp.f32 %v1882_v49  ;;  %v2252_v54 = vmul.f32 %v12196_v47, %v12098_v5  ;;  %v8057_v5 = vmul.f32 -1.442695, %v12232_v1 }
 0x222   : >> { %v9594_v46 = vpop.eup %9593  ;;  %v2257_v21 = vmul.f32 %v9592_v42, %v12130_v11  ;;  %9613 = vpow2.f32 %v8050_v18 }
 0x223   : >> { %v9596_v41 = vpop.eup %9595  ;;  %v2335_v38 = vpack.c.bf16 %v2255_v33, %v2251_v37  ;;  %v2256_v26 = vmul.f32 %v9594_v46, %v12133_v61  ;;  %9615 = vpow2.f32 %v8052_v25  ;;  %v12259_v61 = vadd.f32 %v11905_v53, %v12227_v14 }
 0x224   : >> { %v9598_v43 = vpop.eup %9597  ;;  %v2337_v36 = vpack.c.bf16 %v2257_v21, %v2253_v29  ;;  %v2258_v11 = vmul.f32 %v9596_v41, %v12138_v30  ;;  %9617 = vpow2.f32 %v8051_v48  ;;  %v8058_v30 = vmul.f32 -1.442695, %v12239_v8 }
 0x225   : >> { %v9600_v45 = vpop.eup %9599  ;;  %2404 = vst [vmem:[%s11515_s10 + $0x160] sm:$0xff] %v2335_v38  ;;  %v2336_v20 = vpack.c.bf16 %v2256_v26, %v2252_v54  ;;  %9619 = vpow2.f32 %v8053_v27  ;;  %v2259_v35 = vmul.f32 %v9598_v43, %v12141_v2  ;;  %v8059_v19 = vmul.f32 -1.442695, %v12259_v61  ;;  %v14986_v38 = vld [vmem:[#allocation39_spill] sm:$0xff] }
 0x226   : >> { %v9602_v47 = vpop.eup %9601  ;;  %2406 = vst [vmem:[%s11515_s10 + $0x170] sm:$0xff] %v2337_v36  ;;  %v2338_v4 = vpack.c.bf16 %v2258_v11, %v2254_v39  ;;  %9621 = vpow2.f32 %v8054_v22  ;;  %v2261_v6 = vmul.f32 %v9600_v45, %v12146_v0  ;;  %v12291_v26 = vadd.f32 %v14986_v38, %v12253_v16  ;;  %v14987_v39 = vld [vmem:[#allocation40_spill] sm:$0xff] }
 0x227   : >> { %v9604_v59 = vpop.eup %9603  ;;  %2405 = vst [vmem:[%s11515_s10 + $0x168] sm:$0xff] %v2336_v20  ;;  %9623 = vpow2.f32 %v8056_v40  ;;  %v2260_v25 = vmul.f32 %v9602_v47, %v12149_v3  ;;  %v12295_v36 = vadd.f32 %v14987_v39, %v12253_v16  ;;  %v609_v20 = vpop.permute.xlu0 %608  ;;  %v14988_v47 = vld [vmem:[#allocation41_spill] sm:$0xff] }
 0x228   : >> { %v9606_v52 = vpop.eup %9605  ;;  %2407 = vst [vmem:[%s11515_s10 + $0x178] sm:$0xff] %v2338_v4  ;;  %9625 = vpow2.f32 %v8055_v55  ;;  %v2262_v17 = vmul.f32 %v9604_v59, %v12155_v15  ;;  %v14985_v15 = vld [vmem:[#allocation12_spill] sm:$0xff]  ;;  %v12299_v4 = vadd.f32 %v14988_v47, %v12253_v16  ;;  %v8064_v59 = vmul.f32 -1.442695, %v12291_v26 }
 0x229   : >> { %v9608_v53 = vpop.eup %9607  ;;  %v2263_v51 = vmul.f32 %v9606_v52, %v12161_v60  ;;  %9627 = vpow2.f32 %v8057_v5  ;;  %v12285_v32 = vadd.f32 %v14985_v15, %v12227_v14 }
 0x22a   : >> { %v9610_v28 = vpop.eup %9609  ;;  %v2265_v18 = vmul.f32 %v9608_v53, %v12165_v56  ;;  %9629 = vpow2.f32 %v8058_v30 }
 0x22b   : >> { %v9612_v58 = vpop.eup %9611  ;;  %v2339_v48 = vpack.c.bf16 %v2263_v51, %v2259_v35  ;;  %v2264_v2 = vmul.f32 %v9610_v28, %v12169_v63  ;;  %9631 = vpow2.f32 %v8060_v62  ;;  %v8061_v54 = vmul.f32 -1.442695, %v12285_v32  ;;  %v14989_v62 = vld [vmem:[#allocation42_spill] sm:$0xff]  ;;  %v614_v35 = vpop.permute.xlu1 %613 }
 0x22c   : >> { %v9614_v60 = vpop.eup %9613  ;;  %v2341_v49 = vpack.c.bf16 %v2265_v18, %v2261_v6  ;;  %v2266_v0 = vmul.f32 %v9612_v58, %v12178_v34  ;;  %9633 = vpow2.f32 %v8059_v19  ;;  %v12303_v52 = vadd.f32 %v14989_v62, %v609_v20  ;;  %v14990_v19 = vld [vmem:[#allocation43_spill] sm:$0xff]  ;;  %v14991_v6 = vld [vmem:[#allocation44_spill] sm:$0xff] }
 0x22d   : >> { %v9616_v27 = vpop.eup %9615  ;;  %2408 = vst [vmem:[%s11515_s10 + $0x180] sm:$0xff] %v2339_v48  ;;  %v2340_v56 = vpack.c.bf16 %v2264_v2, %v2260_v25  ;;  %v1883_v22 = vadd.f32 1.0, %v9614_v60  ;;  %9635 = vpow2.f32 %v8062_v13  ;;  %v8063_v51 = vmul.f32 -1.442695, %v12295_v36  ;;  %v14992_v13 = vld [vmem:[#allocation45_spill] sm:$0xff]  ;;  %v14993_v48 = vld [vmem:[#allocation46_spill] sm:$0xff] }
 0x22e   : >> { %v9618_v24 = vpop.eup %9617  ;;  %2410 = vst [vmem:[%s11515_s10 + $0x190] sm:$0xff] %v2341_v49  ;;  %v2342_v3 = vpack.c.bf16 %v2266_v0, %v2262_v17  ;;  %v1885_v40 = vadd.f32 1.0, %v9616_v27  ;;  %v12307_v28 = vadd.f32 %v14990_v19, %v609_v20  ;;  %v12310_v18 = vadd.f32 %v14991_v6, %v609_v20  ;;  %v14994_v60 = vld [vmem:[#allocation47_spill] sm:$0xff] }
 0x22f   : >> { %v9620_v63 = vpop.eup %9619  ;;  %2409 = vst [vmem:[%s11515_s10 + $0x188] sm:$0xff] %v2340_v56  ;;  %9637 = vrcp.f32 %v1883_v22  ;;  %v1884_v55 = vadd.f32 1.0, %v9618_v24  ;;  %v12313_v16 = vadd.f32 %v14992_v13, %v609_v20  ;;  %v12316_v2 = vadd.f32 %v14993_v48, %v614_v35  ;;  %v14995_v22 = vld [vmem:[#allocation48_spill] sm:$0xff] }
 0x230   : >> { %v9622_v34 = vpop.eup %9621  ;;  %2411 = vst [vmem:[%s11515_s10 + $0x198] sm:$0xff] %v2342_v3  ;;  %9639 = vrcp.f32 %v1885_v40  ;;  %v1886_v42 = vadd.f32 1.0, %v9620_v63  ;;  %v12319_v17 = vadd.f32 %v14994_v60, %v614_v35  ;;  %v8065_v0 = vmul.f32 -1.442695, %v12299_v4 }
 0x231   : >> { %v9624_v37 = vpop.eup %9623  ;;  %9641 = vrcp.f32 %v1884_v55  ;;  %v1887_v33 = vadd.f32 1.0, %v9622_v34  ;;  %v8066_v56 = vmul.f32 -1.442695, %v12303_v52  ;;  %v12324_v24 = vadd.f32 %v14995_v22, %v614_v35 }
 0x232   : >> { %v9626_v46 = vpop.eup %9625  ;;  %9643 = vrcp.f32 %v1886_v42  ;;  %v1889_v29 = vadd.f32 1.0, %v9624_v37  ;;  %v8068_v40 = vmul.f32 -1.442695, %v12307_v28  ;;  %v8067_v63 = vmul.f32 -1.442695, %v12310_v18 }
 0x233   : >> { %v9628_v21 = vpop.eup %9627  ;;  %9645 = vrcp.f32 %v1887_v33  ;;  %v1888_v41 = vadd.f32 1.0, %v9626_v46  ;;  %v8069_v15 = vmul.f32 -1.442695, %v12313_v16  ;;  %v8070_v34 = vmul.f32 -1.442695, %v12316_v2 }
 0x234   : >> { %v9630_v14 = vpop.eup %9629  ;;  %9647 = vrcp.f32 %v1889_v29  ;;  %v1890_v43 = vadd.f32 1.0, %v9628_v21  ;;  %v8072_v42 = vmul.f32 -1.442695, %v12319_v17  ;;  %v14996_v29 = vld [vmem:[#allocation49_spill] sm:$0xff] }
 0x235   : >> { %v9632_v11 = vpop.eup %9631  ;;  %9649 = vrcp.f32 %v1888_v41  ;;  %v1891_v45 = vadd.f32 1.0, %v9630_v14  ;;  %v12334_v21 = vadd.f32 %v14996_v29, %v614_v35  ;;  %v8071_v14 = vmul.f32 -1.442695, %v12324_v24 }
 0x236   : >> { %9651 = vrcp.f32 %v1890_v43  ;;  %v1893_v5 = vadd.f32 1.0, %v9632_v11  ;;  %v9634_v30 = vpop.eup %9633 }
 0x237   : >> { %9653 = vpow2.f32 %v8061_v54  ;;  %v9636_v53 = vpop.eup %9635 }
 0x238   : >> { %9655 = vrcp.f32 %v1891_v45  ;;  %v1895_v25 = vadd.f32 1.0, %v9636_v53 }
 0x239   : >> { %v9638_v58 = vpop.eup %9637  ;;  %9657 = vrcp.f32 %v1893_v5  ;;  %v8073_v5 = vmul.f32 -1.442695, %v12334_v21 }
 0x23a   : >> { %v9640_v49 = vpop.eup %9639  ;;  %9659 = vrcp.f32 %v1895_v25  ;;  %v2267_v33 = vmul.f32 %v9638_v58, %v12202_v31 }
 0x23b   : >> { %v9642_v27 = vpop.eup %9641  ;;  %9661 = vpow2.f32 %v8064_v59  ;;  %v2269_v54 = vmul.f32 %v9640_v49, %v12205_v50  ;;  %v1892_v59 = vadd.f32 1.0, %v9634_v30 }
 0x23c   : >> { %v9644_v3 = vpop.eup %9643  ;;  %9663 = vpow2.f32 %v8063_v51  ;;  %v2268_v39 = vmul.f32 %v9642_v27, %v12208_v7 }
 0x23d   : >> { %v9646_v55 = vpop.eup %9645  ;;  %9665 = vpow2.f32 %v8065_v0  ;;  %v2270_v45 = vmul.f32 %v9644_v3, %v12211_v44 }
 0x23e   : >> { %v9648_v37 = vpop.eup %9647  ;;  %v2271_v46 = vmul.f32 %v9646_v55, %v12214_v10  ;;  %9667 = vpow2.f32 %v8066_v56 }
 0x23f   : >> { %v9650_v41 = vpop.eup %9649  ;;  %v2273_v38 = vmul.f32 %v9648_v37, %v12217_v9  ;;  %9669 = vpow2.f32 %v8068_v40 }
 0x240   : >> { %v9652_v43 = vpop.eup %9651  ;;  %v2343_v31 = vpack.c.bf16 %v2271_v46, %v2267_v33  ;;  %v2272_v10 = vmul.f32 %v9650_v41, %v12220_v57  ;;  %9671 = vpow2.f32 %v8067_v63 }
 0x241   : >> { %v9654_v11 = vpop.eup %9653  ;;  %v2345_v20 = vpack.c.bf16 %v2273_v38, %v2269_v54  ;;  %v2274_v50 = vmul.f32 %v9652_v43, %v12232_v1  ;;  %9673 = vpow2.f32 %v8069_v15 }
 0x242   : >> { %2412 = vst [vmem:[%s11515_s10 + $0x1a0] sm:$0xff] %v2343_v31  ;;  %v2344_v9 = vpack.c.bf16 %v2272_v10, %v2268_v39  ;;  %v9656_v47 = vpop.eup %9655  ;;  %9675 = vpow2.f32 %v8070_v34  ;;  %v1894_v62 = vadd.f32 1.0, %v9654_v11 }
 0x243   : >> { %2414 = vst [vmem:[%s11515_s10 + $0x1b0] sm:$0xff] %v2345_v20  ;;  %v2346_v7 = vpack.c.bf16 %v2274_v50, %v2270_v45  ;;  %v9658_v57 = vpop.eup %9657  ;;  %9677 = vpow2.f32 %v8072_v42  ;;  %v2275_v53 = vmul.f32 %v9656_v47, %v12239_v8 }
 0x244   : >> { %2413 = vst [vmem:[%s11515_s10 + $0x1a8] sm:$0xff] %v2344_v9  ;;  %v9660_v44 = vpop.eup %9659  ;;  %9679 = vpow2.f32 %v8071_v14  ;;  %v2277_v29 = vmul.f32 %v9658_v57, %v12246_v23 }
 0x245   : >> { %2415 = vst [vmem:[%s11515_s10 + $0x1b8] sm:$0xff] %v2346_v7  ;;  %v9662_v1 = vpop.eup %9661  ;;  %v2279_v35 = vmul.f32 %v9660_v44, %v12265_v12  ;;  %9681 = vpow2.f32 %v8073_v5 }
 0x246   : >> { %v9664_v51 = vpop.eup %9663  ;;  %9683 = vrcp.f32 %v1892_v59  ;;  %v1897_v19 = vadd.f32 1.0, %v9662_v1 }
 0x247   : >> { %v9666_v6 = vpop.eup %9665  ;;  %9685 = vrcp.f32 %v1894_v62  ;;  %v2347_v30 = vpack.c.bf16 %v2279_v35, %v2275_v53  ;;  %v1896_v13 = vadd.f32 1.0, %v9664_v51 }
 0x248   : >> { %v9668_v58 = vpop.eup %9667  ;;  %9687 = vrcp.f32 %v1897_v19  ;;  %v1898_v25 = vadd.f32 1.0, %v9666_v6 }
 0x249   : >> { %v9670_v48 = vpop.eup %9669  ;;  %2416 = vst [vmem:[%s11515_s10 + $0x1c0] sm:$0xff] %v2347_v30  ;;  %9689 = vrcp.f32 %v1896_v13  ;;  %v1899_v60 = vadd.f32 1.0, %v9668_v58 }
 0x24a   : >> { %v9672_v49 = vpop.eup %9671  ;;  %9691 = vrcp.f32 %v1898_v25  ;;  %v1901_v8 = vadd.f32 1.0, %v9670_v48 }
 0x24b   : >> { %v9674_v0 = vpop.eup %9673  ;;  %9693 = vrcp.f32 %v1899_v60  ;;  %v1900_v12 = vadd.f32 1.0, %v9672_v49 }
 0x24c   : >> { %v9676_v27 = vpop.eup %9675  ;;  %9695 = vrcp.f32 %v1901_v8  ;;  %v1902_v56 = vadd.f32 1.0, %v9674_v0 }
 0x24d   : >> { %v9678_v22 = vpop.eup %9677  ;;  %9697 = vrcp.f32 %v1900_v12  ;;  %v1903_v3 = vadd.f32 1.0, %v9676_v27 }
 0x24e   : >> { %v9680_v40 = vpop.eup %9679  ;;  %9699 = vrcp.f32 %v1902_v56  ;;  %v1905_v63 = vadd.f32 1.0, %v9678_v22 }
 0x24f   : >> { %v9682_v55 = vpop.eup %9681  ;;  %9701 = vrcp.f32 %v1903_v3  ;;  %v1904_v15 = vadd.f32 1.0, %v9680_v40 }
 0x250   : >> { %v9684_v34 = vpop.eup %9683  ;;  %9703 = vrcp.f32 %v1905_v63  ;;  %v1906_v42 = vadd.f32 1.0, %v9682_v55 }
 0x251   : >> { %v9686_v37 = vpop.eup %9685  ;;  %9705 = vrcp.f32 %v1904_v15  ;;  %v2276_v38 = vmul.f32 %v9684_v34, %v12259_v61 }
 0x252   : >> { %v9688_v33 = vpop.eup %9687  ;;  %9707 = vrcp.f32 %v1906_v42  ;;  %v2278_v39 = vmul.f32 %v9686_v37, %v12285_v32 }
 0x253   : >> { %v9690_v46 = vpop.eup %9689  ;;  %v2281_v41 = vmul.f32 %v9688_v33, %v12291_v26 }
 0x254   : >> { %v9692_v54 = vpop.eup %9691  ;;  %v2280_v14 = vmul.f32 %v9690_v46, %v12295_v36 }
 0x255   : >> { %v9694_v43 = vpop.eup %9693  ;;  %v2349_v31 = vpack.c.bf16 %v2281_v41, %v2277_v29  ;;  %v2282_v10 = vmul.f32 %v9692_v54, %v12299_v4 }
 0x256   : >> { %v9696_v11 = vpop.eup %9695  ;;  %v2348_v45 = vpack.c.bf16 %v2280_v14, %v2276_v38  ;;  %v2283_v36 = vmul.f32 %v9694_v43, %v12303_v52 }
 0x257   : >> { %v9698_v20 = vpop.eup %9697  ;;  %2418 = vst [vmem:[%s11515_s10 + $0x1d0] sm:$0xff] %v2349_v31  ;;  %v2350_v50 = vpack.c.bf16 %v2282_v10, %v2278_v39  ;;  %v2285_v4 = vmul.f32 %v9696_v11, %v12307_v28 }
 0x258   : >> { %v9700_v23 = vpop.eup %9699  ;;  %2417 = vst [vmem:[%s11515_s10 + $0x1c8] sm:$0xff] %v2348_v45  ;;  %v2284_v7 = vmul.f32 %v9698_v20, %v12310_v18 }
 0x259   : >> { %v9702_v26 = vpop.eup %9701  ;;  %2419 = vst [vmem:[%s11515_s10 + $0x1d8] sm:$0xff] %v2350_v50  ;;  %v2286_v62 = vmul.f32 %v9700_v23, %v12313_v16 }
 0x25a   : >> { %v9704_v61 = vpop.eup %9703  ;;  %v2287_v32 = vmul.f32 %v9702_v26, %v12316_v2 }
 0x25b   : >> { %v9706_v9 = vpop.eup %9705  ;;  %v2289_v5 = vmul.f32 %v9704_v61, %v12319_v17  ;;  %343 = sbr.rel (!%p341_p1) target bundleno = 71 (0x47), region = 147 }
 0x25c   : >> { %v9708_v47 = vpop.eup %9707  ;;  %v2351_v59 = vpack.c.bf16 %v2287_v32, %v2283_v36  ;;  %v2288_v57 = vmul.f32 %v9706_v9, %v12324_v24 }
 0x25d   : >> { %v2353_v44 = vpack.c.bf16 %v2289_v5, %v2285_v4  ;;  %v2290_v52 = vmul.f32 %v9708_v47, %v12334_v21 }
 0x25e   : >> { %2420 = vst [vmem:[%s11515_s10 + $0x1e0] sm:$0xff] %v2351_v59  ;;  %v2352_v1 = vpack.c.bf16 %v2288_v57, %v2284_v7 }
 0x25f   : >> { %2422 = vst [vmem:[%s11515_s10 + $0x1f0] sm:$0xff] %v2353_v44  ;;  %v2354_v2 = vpack.c.bf16 %v2290_v52, %v2286_v62 }
 0x260   : >> { %2421 = vst [vmem:[%s11515_s10 + $0x1e8] sm:$0xff] %v2352_v1 }
 0x261   : >> { %2423 = vst [vmem:[%s11515_s10 + $0x1f8] sm:$0xff] %v2354_v2 }
 0x262 LB: >> { %s12381_s14 = sshll.u32 %s11015_s18, 8  ;;  %s2429_s18 = sadd.s32 1, %s11015_s18   ;;  %s11015_s18 = sphi %s12375_s18, %s2429_s18  }
 0x263   : >> { %s2431_s16 = sshra.s32 %s12381_s14, 3  ;;  %s12416_s8 = scalar_lea.vmem %s14891_s4, %s12381_s14 }
 0x264   : >> { %s8478_s20 = sshll.u32 %s2431_s16, 4  ;;  %s4873_s9 = sshra.s32 %s12381_s14, 4 }
 0x265   : >> { %s12387_s30 = scalar_lea.vmem %s14890_s3, %s8478_s20  ;;  %s12574_s10 = sshll.u32 %s4873_s9, 5 }
 0x266   : >> { %v9713_v63 = vld [vmem:[%s12387_s30 + $0x4] ss:$16 sps:$4 sm:$0xff]   ;;  %s12621_s14 = scalar_lea.vmem [#allocation3], %s12574_s10  ;;  %p2426_p2 = scmp.ge.s32.totalorder %s2429_s18, 2  }
 0x267   : >> { %3173 = vmatprep.mubr.bf16.mxu0 %v9713_v63  ;;  %3559 = vmatprep.mubr.bf16.mxu1 %v9713_v63 }
 0x268   : >> { %v2501_v28 = vld [vmem:[#allocation2 + $0x8] sm:$0xff]  ;;  %v2503_v18 = vld [vmem:[#allocation2 + $0x18] sm:$0xff]  ;;  %v2500_v16 = vld [vmem:[#allocation2] sm:$0xff] }
 0x269   : >> { %3141 = vmatprep.subr.bf16.mxu0 %v2501_v28  ;;  %3527 = vmatprep.subr.bf16.mxu1 %v2503_v18  ;;  %v2502_v17 = vld [vmem:[#allocation2 + $0x10] sm:$0xff]  ;;  %v2505_v24 = vld [vmem:[#allocation2 + $0x28] sm:$0xff]  ;;  %v2507_v21 = vld [vmem:[#allocation2 + $0x38] sm:$0xff] }
 0x26a   : >> { %3142 = vmatpush1.bf16.msra.mxu0 %v2500_v16  ;;  %3528 = vmatpush1.bf16.msra.mxu1 %v2502_v17  ;;  %v2504_v53 = vld [vmem:[#allocation2 + $0x20] sm:$0xff]  ;;  %v2506_v35 = vld [vmem:[#allocation2 + $0x30] sm:$0xff]  ;;  %v2509_v51 = vld [vmem:[#allocation2 + $0x48] sm:$0xff] }
 0x26b   : >> { %3143 = vmatprep.subr.bf16.mxu0 %v2505_v24  ;;  %3529 = vmatprep.subr.bf16.mxu1 %v2507_v21  ;;  %v2511_v19 = vld [vmem:[#allocation2 + $0x58] sm:$0xff]  ;;  %v2508_v6 = vld [vmem:[#allocation2 + $0x40] sm:$0xff]  ;;  %v2510_v30 = vld [vmem:[#allocation2 + $0x50] sm:$0xff] }
 0x26c   : >> { %v2513_v13 = vld [vmem:[#allocation2 + $0x68] sm:$0xff]  ;;  %v2515_v58 = vld [vmem:[#allocation2 + $0x78] sm:$0xff]  ;;  %v2512_v25 = vld [vmem:[#allocation2 + $0x60] sm:$0xff] }
 0x26d   : >> { %v2514_v48 = vld [vmem:[#allocation2 + $0x70] sm:$0xff]  ;;  %v2517_v60 = vld [vmem:[#allocation2 + $0x88] sm:$0xff]  ;;  %v2519_v49 = vld [vmem:[#allocation2 + $0x98] sm:$0xff] }
 0x26e   : >> { %3144 = vmatpush1.bf16.msra.mxu0 %v2504_v53  ;;  %3530 = vmatpush1.bf16.msra.mxu1 %v2506_v35  ;;  %v2516_v8 = vld [vmem:[#allocation2 + $0x80] sm:$0xff]  ;;  %v2518_v0 = vld [vmem:[#allocation2 + $0x90] sm:$0xff]  ;;  %v2521_v12 = vld [vmem:[#allocation2 + $0xa8] sm:$0xff] }
 0x26f   : >> { %3145 = vmatprep.subr.bf16.mxu0 %v2509_v51  ;;  %3531 = vmatprep.subr.bf16.mxu1 %v2511_v19  ;;  %v2523_v27 = vld [vmem:[#allocation2 + $0xb8] sm:$0xff]  ;;  %v2520_v56 = vld [vmem:[#allocation2 + $0xa0] sm:$0xff]  ;;  %v2522_v22 = vld [vmem:[#allocation2 + $0xb0] sm:$0xff] }
 0x270   : >> { %v2525_v3 = vld [vmem:[#allocation2 + $0xc8] sm:$0xff]  ;;  %v2527_v40 = vld [vmem:[#allocation2 + $0xd8] sm:$0xff]  ;;  %v2524_v55 = vld [vmem:[#allocation2 + $0xc0] sm:$0xff] }
 0x271   : >> { %v2526_v15 = vld [vmem:[#allocation2 + $0xd0] sm:$0xff]  ;;  %v2529_v34 = vld [vmem:[#allocation2 + $0xe8] sm:$0xff]  ;;  %v2531_v42 = vld [vmem:[#allocation2 + $0xf8] sm:$0xff] }
 0x272   : >> { %3146 = vmatpush1.bf16.msra.mxu0 %v2508_v6  ;;  %3532 = vmatpush1.bf16.msra.mxu1 %v2510_v30  ;;  %v2528_v37 = vld [vmem:[#allocation2 + $0xe0] sm:$0xff]  ;;  %v2530_v33 = vld [vmem:[#allocation2 + $0xf0] sm:$0xff]  ;;  %v2533_v46 = vld [vmem:[#allocation2 + $0x108] sm:$0xff] }
 0x273   : >> { %3147 = vmatprep.subr.bf16.mxu0 %v2513_v13  ;;  %3533 = vmatprep.subr.bf16.mxu1 %v2515_v58  ;;  %v2535_v29 = vld [vmem:[#allocation2 + $0x118] sm:$0xff]  ;;  %v2532_v41 = vld [vmem:[#allocation2 + $0x100] sm:$0xff]  ;;  %v2534_v54 = vld [vmem:[#allocation2 + $0x110] sm:$0xff] }
 0x274   : >> { %v2537_v38 = vld [vmem:[#allocation2 + $0x128] sm:$0xff]  ;;  %v2539_v14 = vld [vmem:[#allocation2 + $0x138] sm:$0xff]  ;;  %v2536_v43 = vld [vmem:[#allocation2 + $0x120] sm:$0xff] }
 0x275   : >> { %v2538_v39 = vld [vmem:[#allocation2 + $0x130] sm:$0xff]  ;;  %v2541_v31 = vld [vmem:[#allocation2 + $0x148] sm:$0xff]  ;;  %v2543_v10 = vld [vmem:[#allocation2 + $0x158] sm:$0xff] }
 0x276   : >> { %3148 = vmatpush1.bf16.msra.mxu0 %v2512_v25  ;;  %3534 = vmatpush1.bf16.msra.mxu1 %v2514_v48  ;;  %v2540_v11 = vld [vmem:[#allocation2 + $0x140] sm:$0xff]  ;;  %v2542_v45 = vld [vmem:[#allocation2 + $0x150] sm:$0xff]  ;;  %v2545_v20 = vld [vmem:[#allocation2 + $0x168] sm:$0xff] }
 0x277   : >> { %3149 = vmatprep.subr.bf16.mxu0 %v2517_v60  ;;  %3535 = vmatprep.subr.bf16.mxu1 %v2519_v49  ;;  %v2547_v50 = vld [vmem:[#allocation2 + $0x178] sm:$0xff]  ;;  %v2544_v23 = vld [vmem:[#allocation2 + $0x160] sm:$0xff]  ;;  %v2546_v26 = vld [vmem:[#allocation2 + $0x170] sm:$0xff] }
 0x278   : >> { %v2549_v61 = vld [vmem:[#allocation2 + $0x188] sm:$0xff]  ;;  %v2551_v36 = vld [vmem:[#allocation2 + $0x198] sm:$0xff]  ;;  %v2548_v32 = vld [vmem:[#allocation2 + $0x180] sm:$0xff] }
 0x279   : >> { %v2550_v9 = vld [vmem:[#allocation2 + $0x190] sm:$0xff]  ;;  %v2553_v4 = vld [vmem:[#allocation2 + $0x1a8] sm:$0xff]  ;;  %v2555_v5 = vld [vmem:[#allocation2 + $0x1b8] sm:$0xff] }
 0x27a   : >> { %3150 = vmatpush1.bf16.msra.mxu0 %v2516_v8  ;;  %3536 = vmatpush1.bf16.msra.mxu1 %v2518_v0  ;;  %v2552_v47 = vld [vmem:[#allocation2 + $0x1a0] sm:$0xff]  ;;  %v2554_v7 = vld [vmem:[#allocation2 + $0x1b0] sm:$0xff]  ;;  %v2557_v59 = vld [vmem:[#allocation2 + $0x1c8] sm:$0xff] }
 0x27b   : >> { %3151 = vmatprep.subr.bf16.mxu0 %v2521_v12  ;;  %3537 = vmatprep.subr.bf16.mxu1 %v2523_v27  ;;  %v2559_v57 = vld [vmem:[#allocation2 + $0x1d8] sm:$0xff]  ;;  %v2556_v62 = vld [vmem:[#allocation2 + $0x1c0] sm:$0xff]  ;;  %v2558_v44 = vld [vmem:[#allocation2 + $0x1d0] sm:$0xff] }
 0x27c   : >> { %v2561_v52 = vld [vmem:[#allocation2 + $0x1e8] sm:$0xff]  ;;  %v2563_v1 = vld [vmem:[#allocation2 + $0x1f8] sm:$0xff]  ;;  %v2560_v2 = vld [vmem:[#allocation2 + $0x1e0] sm:$0xff] }
 0x27d   : >> { %v2562_v28 = vld [vmem:[#allocation2 + $0x1f0] sm:$0xff]  ;;  %v2565_v18 = vld [vmem:[#allocation2 + $0x208] sm:$0xff]  ;;  %v2567_v16 = vld [vmem:[#allocation2 + $0x218] sm:$0xff] }
 0x27e   : >> { %3152 = vmatpush1.bf16.msra.mxu0 %v2520_v56  ;;  %3538 = vmatpush1.bf16.msra.mxu1 %v2522_v22  ;;  %v9711_v17 = vld [vmem:[%s12387_s30] ss:$16 sps:$4 sm:$0xff]   ;;  %v9714_v53 = vld [vmem:[%s12387_s30 + $0x24] ss:$16 sps:$4 sm:$0xff]   ;;  %v2569_v35 = vld [vmem:[#allocation2 + $0x228] sm:$0xff] }
 0x27f   : >> { %3153 = vmatprep.subr.bf16.mxu0 %v2525_v3  ;;  %3539 = vmatprep.subr.bf16.mxu1 %v2527_v40  ;;  %v2564_v24 = vld [vmem:[#allocation2 + $0x200] sm:$0xff]  ;;  %v2566_v21 = vld [vmem:[#allocation2 + $0x210] sm:$0xff]  ;;  %v2571_v51 = vld [vmem:[#allocation2 + $0x238] sm:$0xff] }
 0x280   : >> { %v2568_v19 = vld [vmem:[#allocation2 + $0x220] sm:$0xff]  ;;  %v2570_v6 = vld [vmem:[#allocation2 + $0x230] sm:$0xff]  ;;  %v2573_v30 = vld [vmem:[#allocation2 + $0x248] sm:$0xff] }
 0x281   : >> { %v2575_v13 = vld [vmem:[#allocation2 + $0x258] sm:$0xff]  ;;  %v9716_v58 = vld [vmem:[%s12387_s30 + $0x20] ss:$16 sps:$4 sm:$0xff]   ;;  %v9717_v25 = vld [vmem:[%s12387_s30 + $0x44] ss:$16 sps:$4 sm:$0xff]  }
 0x282   : >> { %3154 = vmatpush1.bf16.msra.mxu0 %v2524_v55  ;;  %3540 = vmatpush1.bf16.msra.mxu1 %v2526_v15  ;;  %v2572_v48 = vld [vmem:[#allocation2 + $0x240] sm:$0xff]  ;;  %v2574_v60 = vld [vmem:[#allocation2 + $0x250] sm:$0xff]  ;;  %v2577_v49 = vld [vmem:[#allocation2 + $0x268] sm:$0xff] }
 0x283   : >> { %3155 = vmatprep.subr.bf16.mxu0 %v2529_v34  ;;  %3541 = vmatprep.subr.bf16.mxu1 %v2531_v42  ;;  %v2579_v8 = vld [vmem:[#allocation2 + $0x278] sm:$0xff]  ;;  %v2576_v0 = vld [vmem:[#allocation2 + $0x260] sm:$0xff]  ;;  %v2578_v12 = vld [vmem:[#allocation2 + $0x270] sm:$0xff] }
 0x284   : >> { %v9719_v27 = vld [vmem:[%s12387_s30 + $0x40] ss:$16 sps:$4 sm:$0xff]   ;;  %v2581_v56 = vld [vmem:[#allocation2 + $0x288] sm:$0xff]  ;;  %v2583_v22 = vld [vmem:[#allocation2 + $0x298] sm:$0xff] }
 0x285   : >> { %v9720_v3 = vld [vmem:[%s12387_s30 + $0x64] ss:$16 sps:$4 sm:$0xff]   ;;  %v2585_v55 = vld [vmem:[#allocation2 + $0x2a8] sm:$0xff]  ;;  %v2587_v15 = vld [vmem:[#allocation2 + $0x2b8] sm:$0xff] }
 0x286   : >> { %3156 = vmatpush1.bf16.msra.mxu0 %v2528_v37  ;;  %3542 = vmatpush1.bf16.msra.mxu1 %v2530_v33  ;;  %v2580_v40 = vld [vmem:[#allocation2 + $0x280] sm:$0xff]  ;;  %v2582_v63 = vld [vmem:[#allocation2 + $0x290] sm:$0xff]  ;;  %v2589_v33 = vld [vmem:[#allocation2 + $0x2c8] sm:$0xff] }
 0x287   : >> { %3157 = vmatprep.subr.bf16.mxu0 %v2533_v46  ;;  %3543 = vmatprep.subr.bf16.mxu1 %v2535_v29  ;;  %v2584_v34 = vld [vmem:[#allocation2 + $0x2a0] sm:$0xff]  ;;  %v2586_v42 = vld [vmem:[#allocation2 + $0x2b0] sm:$0xff]  ;;  %v2591_v46 = vld [vmem:[#allocation2 + $0x2d8] sm:$0xff] }
 0x288   : >> { %v9722_v37 = vld [vmem:[%s12387_s30 + $0x60] ss:$16 sps:$4 sm:$0xff]   ;;  %v9723_v29 = vld [vmem:[%s12387_s30 + $0x84] ss:$16 sps:$4 sm:$0xff]  }
 0x28a   : >> { %3158 = vmatpush1.bf16.msra.mxu0 %v2532_v41  ;;  %3544 = vmatpush1.bf16.msra.mxu1 %v2534_v54  ;;  %v2588_v41 = vld [vmem:[#allocation2 + $0x2c0] sm:$0xff]  ;;  %v2590_v54 = vld [vmem:[#allocation2 + $0x2d0] sm:$0xff] }
 0x28b   : >> { %3159 = vmatprep.subr.bf16.mxu0 %v2537_v38  ;;  %3545 = vmatprep.subr.bf16.mxu1 %v2539_v14  ;;  %v2593_v38 = vld [vmem:[#allocation2 + $0x2e8] sm:$0xff]  ;;  %v2595_v14 = vld [vmem:[#allocation2 + $0x2f8] sm:$0xff] }
 0x28e   : >> { %3160 = vmatpush1.bf16.msra.mxu0 %v2536_v43  ;;  %3546 = vmatpush1.bf16.msra.mxu1 %v2538_v39  ;;  %v2592_v43 = vld [vmem:[#allocation2 + $0x2e0] sm:$0xff]  ;;  %v2594_v39 = vld [vmem:[#allocation2 + $0x2f0] sm:$0xff] }
 0x28f   : >> { %3161 = vmatprep.subr.bf16.mxu0 %v2541_v31  ;;  %3547 = vmatprep.subr.bf16.mxu1 %v2543_v10  ;;  %v9725_v31 = vld [vmem:[%s12387_s30 + $0x80] ss:$16 sps:$4 sm:$0xff]   ;;  %v2597_v10 = vld [vmem:[#allocation2 + $0x308] sm:$0xff] }
 0x292   : >> { %3162 = vmatpush1.bf16.msra.mxu0 %v2540_v11  ;;  %3548 = vmatpush1.bf16.msra.mxu1 %v2542_v45  ;;  %v2599_v11 = vld [vmem:[#allocation2 + $0x318] sm:$0xff]  ;;  %v9726_v45 = vld [vmem:[%s12387_s30 + $0xa4] ss:$16 sps:$4 sm:$0xff]  }
 0x293   : >> { %3163 = vmatprep.subr.bf16.mxu0 %v2545_v20  ;;  %3549 = vmatprep.subr.bf16.mxu1 %v2547_v50  ;;  %v2596_v20 = vld [vmem:[#allocation2 + $0x300] sm:$0xff]  ;;  %v2598_v50 = vld [vmem:[#allocation2 + $0x310] sm:$0xff] }
 0x296   : >> { %3164 = vmatpush1.bf16.msra.mxu0 %v2544_v23  ;;  %3550 = vmatpush1.bf16.msra.mxu1 %v2546_v26  ;;  %v2601_v23 = vld [vmem:[#allocation2 + $0x328] sm:$0xff]  ;;  %v2603_v26 = vld [vmem:[#allocation2 + $0x338] sm:$0xff] }
 0x297   : >> { %3165 = vmatprep.subr.bf16.mxu0 %v2549_v61  ;;  %3551 = vmatprep.subr.bf16.mxu1 %v2551_v36  ;;  %v2600_v61 = vld [vmem:[#allocation2 + $0x320] sm:$0xff]  ;;  %v2602_v36 = vld [vmem:[#allocation2 + $0x330] sm:$0xff] }
 0x29a   : >> { %3166 = vmatpush1.bf16.msra.mxu0 %v2548_v32  ;;  %3552 = vmatpush1.bf16.msra.mxu1 %v2550_v9  ;;  %v9728_v32 = vld [vmem:[%s12387_s30 + $0xa0] ss:$16 sps:$4 sm:$0xff]   ;;  %v2605_v9 = vld [vmem:[#allocation2 + $0x348] sm:$0xff] }
 0x29b   : >> { %3167 = vmatprep.subr.bf16.mxu0 %v2553_v4  ;;  %3553 = vmatprep.subr.bf16.mxu1 %v2555_v5  ;;  %v2607_v4 = vld [vmem:[#allocation2 + $0x358] sm:$0xff]  ;;  %v9729_v5 = vld [vmem:[%s12387_s30 + $0xc4] ss:$16 sps:$4 sm:$0xff]  }
 0x29e   : >> { %3168 = vmatpush1.bf16.msra.mxu0 %v2552_v47  ;;  %3554 = vmatpush1.bf16.msra.mxu1 %v2554_v7  ;;  %v2604_v47 = vld [vmem:[#allocation2 + $0x340] sm:$0xff]  ;;  %v2606_v7 = vld [vmem:[#allocation2 + $0x350] sm:$0xff] }
 0x29f   : >> { %3169 = vmatprep.subr.bf16.mxu0 %v2557_v59  ;;  %3555 = vmatprep.subr.bf16.mxu1 %v2559_v57  ;;  %v2609_v59 = vld [vmem:[#allocation2 + $0x368] sm:$0xff]  ;;  %v2611_v57 = vld [vmem:[#allocation2 + $0x378] sm:$0xff] }
 0x2a2   : >> { %3170 = vmatpush1.bf16.msra.mxu0 %v2556_v62  ;;  %3556 = vmatpush1.bf16.msra.mxu1 %v2558_v44  ;;  %v2608_v62 = vld [vmem:[#allocation2 + $0x360] sm:$0xff]  ;;  %v2610_v44 = vld [vmem:[#allocation2 + $0x370] sm:$0xff] }
 0x2a3   : >> { %3171 = vmatprep.subr.bf16.mxu0 %v2561_v52  ;;  %3557 = vmatprep.subr.bf16.mxu1 %v2563_v1  ;;  %v9731_v52 = vld [vmem:[%s12387_s30 + $0xc0] ss:$16 sps:$4 sm:$0xff]   ;;  %v2613_v1 = vld [vmem:[#allocation2 + $0x388] sm:$0xff] }
 0x2a6   : >> { %3172 = vmatpush1.bf16.msra.mxu0 %v2560_v2  ;;  %3558 = vmatpush1.bf16.msra.mxu1 %v2562_v28  ;;  %v2615_v2 = vld [vmem:[#allocation2 + $0x398] sm:$0xff]  ;;  %v9732_v28 = vld [vmem:[%s12387_s30 + $0xe4] ss:$16 sps:$4 sm:$0xff]  }
 0x2a7   : >> { %3334 = vmatprep.subr.bf16.mxu0 %v2565_v18  ;;  %3720 = vmatprep.subr.bf16.mxu1 %v2567_v16  ;;  %v2612_v18 = vld [vmem:[#allocation2 + $0x380] sm:$0xff]  ;;  %v2614_v16 = vld [vmem:[#allocation2 + $0x390] sm:$0xff] }
 0x2a9   : >> { %3174 = vmatmul.mubr.bf16.vlgmr.msra.gmra.mrb[0].mxu0 %v9711_v17  ;;  %3560 = vmatmul.mubr.bf16.vlgmr.msra.gmra.mrb[0].mxu1 %v9711_v17  ;;  %v2617_v17 = vld [vmem:[#allocation2 + $0x3a8] sm:$0xff] }
 0x2aa   : >> { %3335 = vmatpush1.bf16.msra.mxu0 %v2564_v24  ;;  %3721 = vmatpush1.bf16.msra.mxu1 %v2566_v21  ;;  %v2619_v24 = vld [vmem:[#allocation2 + $0x3b8] sm:$0xff]  ;;  %v2616_v21 = vld [vmem:[#allocation2 + $0x3a0] sm:$0xff] }
 0x2ab   : >> { %3183 = vmatprep.mubr.bf16.mxu0 %v9714_v53  ;;  %3569 = vmatprep.mubr.bf16.mxu1 %v9714_v53  ;;  %v2618_v53 = vld [vmem:[#allocation2 + $0x3b0] sm:$0xff] }
 0x2ac   : >> { %3336 = vmatprep.subr.bf16.mxu0 %v2569_v35  ;;  %3722 = vmatprep.subr.bf16.mxu1 %v2571_v51  ;;  %v9734_v35 = vld [vmem:[%s12387_s30 + $0xe0] ss:$16 sps:$4 sm:$0xff]   ;;  %v2621_v51 = vld [vmem:[#allocation2 + $0x3c8] sm:$0xff] }
 0x2ae   : >> { %3337 = vmatpush1.bf16.msra.mxu0 %v2568_v19  ;;  %3723 = vmatpush1.bf16.msra.mxu1 %v2570_v6  ;;  %v2623_v19 = vld [vmem:[#allocation2 + $0x3d8] sm:$0xff]  ;;  %v9735_v6 = vld [vmem:[%s12387_s30 + $0x104] ss:$16 sps:$4 sm:$0xff]  }
 0x2af   : >> { %3338 = vmatprep.subr.bf16.mxu0 %v2573_v30  ;;  %3724 = vmatprep.subr.bf16.mxu1 %v2575_v13  ;;  %v2620_v30 = vld [vmem:[#allocation2 + $0x3c0] sm:$0xff]  ;;  %v2622_v13 = vld [vmem:[#allocation2 + $0x3d0] sm:$0xff] }
 0x2b1   : >> { %3184 = vmatmul.mubr.bf16.gmra.mrb[4].mxu0 %v9716_v58  ;;  %3570 = vmatmul.mubr.bf16.gmra.mrb[4].mxu1 %v9716_v58  ;;  %v2625_v58 = vld [vmem:[#allocation2 + $0x3e8] sm:$0xff] }
 0x2b2   : >> { %3193 = vmatprep.mubr.bf16.mxu0 %v9717_v25  ;;  %3579 = vmatprep.mubr.bf16.mxu1 %v9717_v25  ;;  %v2627_v25 = vld [vmem:[#allocation2 + $0x3f8] sm:$0xff] }
 0x2b3   : >> { %3339 = vmatpush1.bf16.msra.mxu0 %v2572_v48  ;;  %3725 = vmatpush1.bf16.msra.mxu1 %v2574_v60  ;;  %v2624_v48 = vld [vmem:[#allocation2 + $0x3e0] sm:$0xff]  ;;  %v2626_v60 = vld [vmem:[#allocation2 + $0x3f0] sm:$0xff] }
 0x2b4   : >> { %3340 = vmatprep.subr.bf16.mxu0 %v2577_v49  ;;  %3726 = vmatprep.subr.bf16.mxu1 %v2579_v8  ;;  %v9737_v49 = vld [vmem:[%s12387_s30 + $0x100] ss:$16 sps:$4 sm:$0xff]   ;;  %v9738_v8 = vld [vmem:[%s12387_s30 + $0x124] ss:$16 sps:$4 sm:$0xff]  }
 0x2b7   : >> { %3341 = vmatpush1.bf16.msra.mxu0 %v2576_v0  ;;  %3727 = vmatpush1.bf16.msra.mxu1 %v2578_v12  ;;  %v9740_v0 = vld [vmem:[%s12387_s30 + $0x120] ss:$16 sps:$4 sm:$0xff]   ;;  %v9741_v12 = vld [vmem:[%s12387_s30 + $0x144] ss:$16 sps:$4 sm:$0xff]  }
 0x2b8   : >> { %3342 = vmatprep.subr.bf16.mxu0 %v2581_v56  ;;  %3728 = vmatprep.subr.bf16.mxu1 %v2583_v22  ;;  %v9744_v56 = vld [vmem:[%s12387_s30 + $0x164] ss:$16 sps:$4 sm:$0xff]  }
 0x2b9   : >> { %3194 = vmatmul.mubr.bf16.gmra.mrb[8].mxu0 %v9719_v27  ;;  %3580 = vmatmul.mubr.bf16.gmra.mrb[8].mxu1 %v9719_v27  ;;  %v9743_v27 = vld [vmem:[%s12387_s30 + $0x140] ss:$16 sps:$4 sm:$0xff]  }
 0x2ba   : >> { %3203 = vmatprep.mubr.bf16.mxu0 %v9720_v3  ;;  %3589 = vmatprep.mubr.bf16.mxu1 %v9720_v3  ;;  %v2629_v22 = vld [vmem:[%s12416_s8] sm:$0xff]  ;;  %v2631_v3 = vld [vmem:[%s12416_s8 + $0x10] sm:$0xff] }
 0x2bb   : >> { %3343 = vmatpush1.bf16.msra.mxu0 %v2580_v40  ;;  %3729 = vmatpush1.bf16.msra.mxu1 %v2582_v63  ;;  %v11018_v40 = vmov 0   ;;  %v9746_v63 = vld [vmem:[%s12387_s30 + $0x160] ss:$16 sps:$4 sm:$0xff]  }
 0x2bc   : >> { %3344 = vmatprep.subr.bf16.mxu0 %v2585_v55  ;;  %3730 = vmatprep.subr.bf16.mxu1 %v2587_v15  ;;  %v2630_v55 = vld [vmem:[%s12416_s8 + $0x8] sm:$0xff]  ;;  %v9747_v15 = vld [vmem:[%s12387_s30 + $0x184] ss:$16 sps:$4 sm:$0xff]  }
 0x2bd   : >> { %9709 = vset.pattern.permute.xlu0 %v11018_v40  ;;  %9710 = vset.pattern.permute.xlu1 %v11018_v40  ;;  %v9795_v40 = vld [vmem:[%s12387_s30 + $0x18c] ss:$16 sps:$4 sm:$0xff]  }
 0x2be   : >> { %2663 = vperm.xlu0 %9709, %v2629_v22   ;;  %2673 = vperm.xlu1 %9710, %v2631_v3   ;;  %v9792_v22 = vld [vmem:[%s12387_s30 + $0x16c] ss:$16 sps:$4 sm:$0xff]   ;;  %v9794_v3 = vld [vmem:[%s12387_s30 + $0x168] ss:$16 sps:$4 sm:$0xff]  }
 0x2bf   : >> { %3345 = vmatpush1.bf16.msra.mxu0 %v2584_v34  ;;  %3731 = vmatpush1.bf16.msra.mxu1 %v2586_v42  ;;  %v2632_v34 = vld [vmem:[%s12416_s8 + $0x18] sm:$0xff]  ;;  %v2633_v42 = vld [vmem:[%s12416_s8 + $0x20] sm:$0xff] }
 0x2c0   : >> { %3346 = vmatprep.subr.bf16.mxu0 %v2589_v33  ;;  %3732 = vmatprep.subr.bf16.mxu1 %v2591_v46  ;;  %v9749_v33 = vld [vmem:[%s12387_s30 + $0x180] ss:$16 sps:$4 sm:$0xff]   ;;  %v9750_v46 = vld [vmem:[%s12387_s30 + $0x1a4] ss:$16 sps:$4 sm:$0xff]  }
 0x2c1   : >> { %3204 = vmatmul.mubr.bf16.gmra.mrb[12].mxu0 %v9722_v37  ;;  %3590 = vmatmul.mubr.bf16.gmra.mrb[12].mxu1 %v9722_v37  ;;  %v2634_v37 = vld [vmem:[%s12416_s8 + $0x28] sm:$0xff] }
 0x2c2   : >> { %3213 = vmatprep.mubr.bf16.mxu0 %v9723_v29  ;;  %3599 = vmatprep.mubr.bf16.mxu1 %v9723_v29  ;;  %v2636_v29 = vld [vmem:[%s12416_s8 + $0x38] sm:$0xff] }
 0x2c3   : >> { %3347 = vmatpush1.bf16.msra.mxu0 %v2588_v41  ;;  %3733 = vmatpush1.bf16.msra.mxu1 %v2590_v54  ;;  %v2635_v41 = vld [vmem:[%s12416_s8 + $0x30] sm:$0xff]  ;;  %v2638_v54 = vld [vmem:[%s12416_s8 + $0x48] sm:$0xff] }
 0x2c4   : >> { %3348 = vmatprep.subr.bf16.mxu0 %v2593_v38  ;;  %3734 = vmatprep.subr.bf16.mxu1 %v2595_v14  ;;  %v2637_v38 = vld [vmem:[%s12416_s8 + $0x40] sm:$0xff] }
 0x2c5   : >> { %2668 = vperm.xlu0 %9709, %v2630_v55   ;;  %2678 = vperm.xlu1 %9710, %v2632_v34   ;;  %v9752_v14 = vld [vmem:[%s12387_s30 + $0x1a0] ss:$16 sps:$4 sm:$0xff]   ;;  %v9798_v55 = vld [vmem:[%s12387_s30 + $0x1ac] ss:$16 sps:$4 sm:$0xff]  }
 0x2c6   : >> { %v9801_v34 = vld [vmem:[%s12387_s30 + $0x1cc] ss:$16 sps:$4 sm:$0xff]  }
 0x2c7   : >> { %3349 = vmatpush1.bf16.msra.mxu0 %v2592_v43  ;;  %3735 = vmatpush1.bf16.msra.mxu1 %v2594_v39  ;;  %v9753_v43 = vld [vmem:[%s12387_s30 + $0x1c4] ss:$16 sps:$4 sm:$0xff]   ;;  %v2640_v39 = vld [vmem:[%s12416_s8 + $0x58] sm:$0xff] }
 0x2c8   : >> { %3350 = vmatprep.subr.bf16.mxu0 %v2597_v10  ;;  %3736 = vmatprep.subr.bf16.mxu1 %v2599_v11  ;;  %v2642_v10 = vld [vmem:[%s12416_s8 + $0x68] sm:$0xff]  ;;  %v2641_v11 = vld [vmem:[%s12416_s8 + $0x60] sm:$0xff] }
 0x2c9   : >> { %3214 = vmatmul.mubr.bf16.gmra.mrb[16].mxu0 %v9725_v31  ;;  %3600 = vmatmul.mubr.bf16.gmra.mrb[16].mxu1 %v9725_v31  ;;  %v2639_v31 = vld [vmem:[%s12416_s8 + $0x50] sm:$0xff] }
 0x2ca   : >> { %3223 = vmatprep.mubr.bf16.mxu0 %v9726_v45  ;;  %3609 = vmatprep.mubr.bf16.mxu1 %v9726_v45  ;;  %v9755_v45 = vld [vmem:[%s12387_s30 + $0x1c0] ss:$16 sps:$4 sm:$0xff]  }
 0x2cb   : >> { %3351 = vmatpush1.bf16.msra.mxu0 %v2596_v20  ;;  %3737 = vmatpush1.bf16.msra.mxu1 %v2598_v50  ;;  %v9756_v20 = vld [vmem:[%s12387_s30 + $0x1e4] ss:$16 sps:$4 sm:$0xff]   ;;  %v2644_v50 = vld [vmem:[%s12416_s8 + $0x78] sm:$0xff] }
 0x2cc   : >> { %3352 = vmatprep.subr.bf16.mxu0 %v2601_v23  ;;  %3738 = vmatprep.subr.bf16.mxu1 %v2603_v26  ;;  %v2643_v23 = vld [vmem:[%s12416_s8 + $0x70] sm:$0xff]  ;;  %v2646_v26 = vld [vmem:[%s12416_s8 + $0x88] sm:$0xff] }
 0x2cd   : >> { %2683 = vperm.xlu0 %9709, %v2633_v42   ;;  %2688 = vperm.xlu1 %9710, %v2634_v37   ;;  %v9803_v42 = vld [vmem:[%s12387_s30 + $0x1c8] ss:$16 sps:$4 sm:$0xff]   ;;  %v9804_v37 = vld [vmem:[%s12387_s30 + $0x1ec] ss:$16 sps:$4 sm:$0xff]  }
 0x2cf   : >> { %3353 = vmatpush1.bf16.msra.mxu0 %v2600_v61  ;;  %3739 = vmatpush1.bf16.msra.mxu1 %v2602_v36  ;;  %v2645_v61 = vld [vmem:[%s12416_s8 + $0x80] sm:$0xff] }
 0x2d0   : >> { %3354 = vmatprep.subr.bf16.mxu0 %v2605_v9  ;;  %3740 = vmatprep.subr.bf16.mxu1 %v2607_v4  ;;  %v9758_v36 = vld [vmem:[%s12387_s30 + $0x1e0] ss:$16 sps:$4 sm:$0xff]   ;;  %v2648_v9 = vld [vmem:[%s12416_s8 + $0x98] sm:$0xff] }
 0x2d1   : >> { %3224 = vmatmul.mubr.bf16.gmra.mrb[20].mxu0 %v9728_v32  ;;  %3610 = vmatmul.mubr.bf16.gmra.mrb[20].mxu1 %v9728_v32  ;;  %v9761_v32 = vld [vmem:[%s12387_s30 + $0xc] ss:$16 sps:$4 sm:$0xff]   ;;  %v2647_v4 = vld [vmem:[%s12416_s8 + $0x90] sm:$0xff] }
 0x2d2   : >> { %3233 = vmatprep.mubr.bf16.mxu0 %v9729_v5  ;;  %3619 = vmatprep.mubr.bf16.mxu1 %v9729_v5  ;;  %v2650_v5 = vld [vmem:[%s12416_s8 + $0xa8] sm:$0xff] }
 0x2d3   : >> { %3355 = vmatpush1.bf16.msra.mxu0 %v2604_v47  ;;  %3741 = vmatpush1.bf16.msra.mxu1 %v2606_v7  ;;  %v2649_v47 = vld [vmem:[%s12416_s8 + $0xa0] sm:$0xff]  ;;  %v9759_v7 = vld [vmem:[%s12387_s30 + $0x8] ss:$16 sps:$4 sm:$0xff]  }
 0x2d4   : >> { %3356 = vmatprep.subr.bf16.mxu0 %v2609_v59  ;;  %3742 = vmatprep.subr.bf16.mxu1 %v2611_v57  ;;  %v9762_v59 = vld [vmem:[%s12387_s30 + $0x2c] ss:$16 sps:$4 sm:$0xff]  }
 0x2d5   : >> { %2698 = vperm.xlu1 %9710, %v2636_v29   ;;  %2693 = vperm.xlu0 %9709, %v2635_v41   ;;  %v2652_v57 = vld [vmem:[%s12416_s8 + $0xb8] sm:$0xff] }
 0x2d7   : >> { %3357 = vmatpush1.bf16.msra.mxu0 %v2608_v62  ;;  %3743 = vmatpush1.bf16.msra.mxu1 %v2610_v44  ;;  %v2651_v62 = vld [vmem:[%s12416_s8 + $0xb0] sm:$0xff]  ;;  %v2654_v44 = vld [vmem:[%s12416_s8 + $0xc8] sm:$0xff] }
 0x2d8   : >> { %3358 = vmatprep.subr.bf16.mxu0 %v2613_v1  ;;  %3744 = vmatprep.subr.bf16.mxu1 %v2615_v2  ;;  %v9764_v1 = vld [vmem:[%s12387_s30 + $0x28] ss:$16 sps:$4 sm:$0xff]   ;;  %v9765_v2 = vld [vmem:[%s12387_s30 + $0x4c] ss:$16 sps:$4 sm:$0xff]  }
 0x2d9   : >> { %3234 = vmatmul.mubr.bf16.gmra.mrb[24].mxu0 %v9731_v52  ;;  %3620 = vmatmul.mubr.bf16.gmra.mrb[24].mxu1 %v9731_v52  ;;  %v2653_v52 = vld [vmem:[%s12416_s8 + $0xc0] sm:$0xff] }
 0x2da   : >> { %3243 = vmatprep.mubr.bf16.mxu0 %v9732_v28  ;;  %3629 = vmatprep.mubr.bf16.mxu1 %v9732_v28  ;;  %v2656_v28 = vld [vmem:[%s12416_s8 + $0xd8] sm:$0xff] }
 0x2db   : >> { %3359 = vmatpush1.bf16.msra.mxu0 %v2612_v18  ;;  %3745 = vmatpush1.bf16.msra.mxu1 %v2614_v16  ;;  %v2655_v18 = vld [vmem:[%s12416_s8 + $0xd0] sm:$0xff]  ;;  %v2658_v16 = vld [vmem:[%s12416_s8 + $0xe8] sm:$0xff] }
 0x2dc   : >> { %3360 = vmatprep.subr.bf16.mxu0 %v2617_v17  ;;  %3746 = vmatprep.subr.bf16.mxu1 %v2619_v24  ;;  %v2657_v17 = vld [vmem:[%s12416_s8 + $0xe0] sm:$0xff]  ;;  %v9767_v24 = vld [vmem:[%s12387_s30 + $0x48] ss:$16 sps:$4 sm:$0xff]  }
 0x2dd   : >> { %2708 = vperm.xlu1 %9710, %v2638_v54   ;;  %2703 = vperm.xlu0 %9709, %v2637_v38  }
 0x2df   : >> { %3361 = vmatpush1.bf16.msra.mxu0 %v2616_v21  ;;  %3747 = vmatpush1.bf16.msra.mxu1 %v2618_v53  ;;  %v9768_v21 = vld [vmem:[%s12387_s30 + $0x6c] ss:$16 sps:$4 sm:$0xff]  }
 0x2e0   : >> { %3362 = vmatprep.subr.bf16.mxu0 %v2621_v51  ;;  %3748 = vmatprep.subr.bf16.mxu1 %v2623_v19  ;;  %v2660_v53 = vld [vmem:[%s12416_s8 + $0xf8] sm:$0xff] }
 0x2e1   : >> { %3244 = vmatmul.mubr.bf16.gmra.mrb[28].mxu0 %v9734_v35  ;;  %3630 = vmatmul.mubr.bf16.gmra.mrb[28].mxu1 %v9734_v35  ;;  %v2659_v35 = vld [vmem:[%s12416_s8 + $0xf0] sm:$0xff]  ;;  %v9770_v51 = vld [vmem:[%s12387_s30 + $0x68] ss:$16 sps:$4 sm:$0xff]   ;;  %v9771_v19 = vld [vmem:[%s12387_s30 + $0x8c] ss:$16 sps:$4 sm:$0xff]  }
 0x2e2   : >> { %3253 = vmatprep.mubr.bf16.mxu0 %v9735_v6  ;;  %3639 = vmatprep.mubr.bf16.mxu1 %v9735_v6  ;;  %v9773_v6 = vld [vmem:[%s12387_s30 + $0x88] ss:$16 sps:$4 sm:$0xff]  }
 0x2e3   : >> { %3363 = vmatpush1.bf16.msra.mxu0 %v2620_v30  ;;  %3749 = vmatpush1.bf16.msra.mxu1 %v2622_v13  ;;  %v9774_v30 = vld [vmem:[%s12387_s30 + $0xac] ss:$16 sps:$4 sm:$0xff]   ;;  %v9776_v13 = vld [vmem:[%s12387_s30 + $0xa8] ss:$16 sps:$4 sm:$0xff]  }
 0x2e4   : >> { %3364 = vmatprep.subr.bf16.mxu0 %v2625_v58  ;;  %3750 = vmatprep.subr.bf16.mxu1 %v2627_v25  ;;  %v9777_v58 = vld [vmem:[%s12387_s30 + $0xcc] ss:$16 sps:$4 sm:$0xff]   ;;  %v9779_v25 = vld [vmem:[%s12387_s30 + $0xc8] ss:$16 sps:$4 sm:$0xff]  }
 0x2e5   : >> { %2718 = vperm.xlu1 %9710, %v2640_v39   ;;  %2713 = vperm.xlu0 %9709, %v2639_v31  }
 0x2e7   : >> { %3365 = vmatpush1.bf16.msra.mxu0 %v2624_v48  ;;  %3751 = vmatpush1.bf16.msra.mxu1 %v2626_v60  ;;  %v9780_v48 = vld [vmem:[%s12387_s30 + $0xec] ss:$16 sps:$4 sm:$0xff]   ;;  %v9782_v60 = vld [vmem:[%s12387_s30 + $0xe8] ss:$16 sps:$4 sm:$0xff]  }
 0x2e9   : >> { %3254 = vmatmul.mubr.bf16.gmra.mrb[32].mxu0 %v9737_v49  ;;  %3640 = vmatmul.mubr.bf16.gmra.mrb[32].mxu1 %v9737_v49  ;;  %v9783_v49 = vld [vmem:[%s12387_s30 + $0x10c] ss:$16 sps:$4 sm:$0xff]  }
 0x2ea   : >> { %3263 = vmatprep.mubr.bf16.mxu0 %v9738_v8  ;;  %3649 = vmatprep.mubr.bf16.mxu1 %v9738_v8  ;;  %v9785_v8 = vld [vmem:[%s12387_s30 + $0x108] ss:$16 sps:$4 sm:$0xff]  }
 0x2eb   : >> { %2728 = vperm.xlu1 %9710, %v2642_v10   ;;  %2723 = vperm.xlu0 %9709, %v2641_v11  }
 0x2ef   : >> { %2738 = vperm.xlu1 %9710, %v2644_v50   ;;  %2733 = vperm.xlu0 %9709, %v2643_v23  }
 0x2f1   : >> { %3264 = vmatmul.mubr.bf16.gmra.mrb[36].mxu0 %v9740_v0  ;;  %3650 = vmatmul.mubr.bf16.gmra.mrb[36].mxu1 %v9740_v0  ;;  %v9786_v0 = vld [vmem:[%s12387_s30 + $0x12c] ss:$16 sps:$4 sm:$0xff]  }
 0x2f2   : >> { %3273 = vmatprep.mubr.bf16.mxu0 %v9741_v12  ;;  %3659 = vmatprep.mubr.bf16.mxu1 %v9741_v12  ;;  %v9788_v12 = vld [vmem:[%s12387_s30 + $0x128] ss:$16 sps:$4 sm:$0xff]  }
 0x2f3   : >> { %2748 = vperm.xlu1 %9710, %v2646_v26   ;;  %2743 = vperm.xlu0 %9709, %v2645_v61  }
 0x2f7   : >> { %2758 = vperm.xlu1 %9710, %v2648_v9   ;;  %2753 = vperm.xlu0 %9709, %v2647_v4  }
 0x2f9   : >> { %3274 = vmatmul.mubr.bf16.gmra.mrb[40].mxu0 %v9743_v27  ;;  %3660 = vmatmul.mubr.bf16.gmra.mrb[40].mxu1 %v9743_v27  ;;  %v9789_v27 = vld [vmem:[%s12387_s30 + $0x14c] ss:$16 sps:$4 sm:$0xff]  }
 0x2fa   : >> { %3283 = vmatprep.mubr.bf16.mxu0 %v9744_v56  ;;  %3669 = vmatprep.mubr.bf16.mxu1 %v9744_v56  ;;  %v9791_v56 = vld [vmem:[%s12387_s30 + $0x148] ss:$16 sps:$4 sm:$0xff]  }
 0x2fb   : >> { %2768 = vperm.xlu1 %9710, %v2650_v5   ;;  %2763 = vperm.xlu0 %9709, %v2649_v47  }
 0x2ff   : >> { %2778 = vperm.xlu1 %9710, %v2652_v57   ;;  %2773 = vperm.xlu0 %9709, %v2651_v62  }
 0x301   : >> { %3284 = vmatmul.mubr.bf16.gmra.mrb[44].mxu0 %v9746_v63  ;;  %3670 = vmatmul.mubr.bf16.gmra.mrb[44].mxu1 %v9746_v63  ;;  %v9797_v63 = vld [vmem:[%s12387_s30 + $0x188] ss:$16 sps:$4 sm:$0xff]  }
 0x302   : >> { %3293 = vmatprep.mubr.bf16.mxu0 %v9747_v15  ;;  %3679 = vmatprep.mubr.bf16.mxu1 %v9747_v15  ;;  %v9800_v15 = vld [vmem:[%s12387_s30 + $0x1a8] ss:$16 sps:$4 sm:$0xff]  }
 0x303   : >> { %2788 = vperm.xlu1 %9710, %v2654_v44   ;;  %2783 = vperm.xlu0 %9709, %v2653_v52  }
 0x307   : >> { %2798 = vperm.xlu1 %9710, %v2656_v28   ;;  %2793 = vperm.xlu0 %9709, %v2655_v18  }
 0x309   : >> { %3294 = vmatmul.mubr.bf16.gmra.mrb[48].mxu0 %v9749_v33  ;;  %3680 = vmatmul.mubr.bf16.gmra.mrb[48].mxu1 %v9749_v33  ;;  %v9806_v33 = vld [vmem:[%s12387_s30 + $0x1e8] ss:$16 sps:$4 sm:$0xff]  }
 0x30a   : >> { %3303 = vmatprep.mubr.bf16.mxu0 %v9750_v46  ;;  %3689 = vmatprep.mubr.bf16.mxu1 %v9750_v46 }
 0x30b   : >> { %2808 = vperm.xlu1 %9710, %v2658_v16   ;;  %2803 = vperm.xlu0 %9709, %v2657_v17  }
 0x30f   : >> { %2818 = vperm.xlu1 %9710, %v2660_v53   ;;  %2813 = vperm.xlu0 %9709, %v2659_v35  }
 0x311   : >> { %3304 = vmatmul.mubr.bf16.gmra.mrb[52].mxu0 %v9752_v14  ;;  %3690 = vmatmul.mubr.bf16.gmra.mrb[52].mxu1 %v9752_v14 }
 0x312   : >> { %3313 = vmatprep.mubr.bf16.mxu0 %v9753_v43  ;;  %3699 = vmatprep.mubr.bf16.mxu1 %v9753_v43 }
 0x319   : >> { %3314 = vmatmul.mubr.bf16.gmra.mrb[56].mxu0 %v9755_v45  ;;  %3700 = vmatmul.mubr.bf16.gmra.mrb[56].mxu1 %v9755_v45 }
 0x31a   : >> { %3323 = vmatprep.mubr.bf16.mxu0 %v9756_v20  ;;  %3709 = vmatprep.mubr.bf16.mxu1 %v9756_v20 }
 0x321   : >> { %3324 = vmatmul.mubr.bf16.gmra.mrb[60].mxu0 %v9758_v36  ;;  %3710 = vmatmul.mubr.bf16.gmra.mrb[60].mxu1 %v9758_v36 }
 0x322   : >> { %3366 = vmatprep.mubr.bf16.mxu0 %v9761_v32  ;;  %3752 = vmatprep.mubr.bf16.mxu1 %v9761_v32 }
 0x329   : >> { %3367 = vmatmul.mubr.bf16.vlgmr.msra.gmra.mrb[0].mxu0 %v9759_v7  ;;  %3753 = vmatmul.mubr.bf16.vlgmr.msra.gmra.mrb[0].mxu1 %v9759_v7 }
 0x32a   : >> { %3376 = vmatprep.mubr.bf16.mxu0 %v9762_v59  ;;  %3762 = vmatprep.mubr.bf16.mxu1 %v9762_v59 }
 0x331   : >> { %3377 = vmatmul.mubr.bf16.gmra.mrb[4].mxu0 %v9764_v1  ;;  %3763 = vmatmul.mubr.bf16.gmra.mrb[4].mxu1 %v9764_v1 }
 0x332   : >> { %3386 = vmatprep.mubr.bf16.mxu0 %v9765_v2  ;;  %3772 = vmatprep.mubr.bf16.mxu1 %v9765_v2 }
 0x339   : >> { %3387 = vmatmul.mubr.bf16.gmra.mrb[8].mxu0 %v9767_v24  ;;  %3773 = vmatmul.mubr.bf16.gmra.mrb[8].mxu1 %v9767_v24 }
 0x33a   : >> { %3396 = vmatprep.mubr.bf16.mxu0 %v9768_v21  ;;  %3782 = vmatprep.mubr.bf16.mxu1 %v9768_v21 }
 0x33d   : >> { %v2664_v46 = vpop.permute.xlu0 %2663  ;;  %v2674_v41 = vpop.permute.xlu1 %2673 }
 0x341   : >> { %3397 = vmatmul.mubr.bf16.gmra.mrb[12].mxu0 %v9770_v51  ;;  %3783 = vmatmul.mubr.bf16.gmra.mrb[12].mxu1 %v9770_v51 }
 0x342   : >> { %3406 = vmatprep.mubr.bf16.mxu0 %v9771_v19  ;;  %3792 = vmatprep.mubr.bf16.mxu1 %v9771_v19 }
 0x344   : >> { %v2669_v29 = vpop.permute.xlu0 %2668  ;;  %v12514_v62 = vpop.permute.xlu1 %2678 }
 0x349   : >> { %3407 = vmatmul.mubr.bf16.gmra.mrb[16].mxu0 %v9773_v6  ;;  %3793 = vmatmul.mubr.bf16.gmra.mrb[16].mxu1 %v9773_v6 }
 0x34a   : >> { %3416 = vmatprep.mubr.bf16.mxu0 %v9774_v30  ;;  %3802 = vmatprep.mubr.bf16.mxu1 %v9774_v30 }
 0x351   : >> { %3417 = vmatmul.mubr.bf16.gmra.mrb[20].mxu0 %v9776_v13  ;;  %3803 = vmatmul.mubr.bf16.gmra.mrb[20].mxu1 %v9776_v13 }
 0x352   : >> { %3426 = vmatprep.mubr.bf16.mxu0 %v9777_v58  ;;  %3812 = vmatprep.mubr.bf16.mxu1 %v9777_v58 }
 0x359   : >> { %3427 = vmatmul.mubr.bf16.gmra.mrb[24].mxu0 %v9779_v25  ;;  %3813 = vmatmul.mubr.bf16.gmra.mrb[24].mxu1 %v9779_v25 }
 0x35a   : >> { %3436 = vmatprep.mubr.bf16.mxu0 %v9780_v48  ;;  %3822 = vmatprep.mubr.bf16.mxu1 %v9780_v48 }
 0x361   : >> { %3437 = vmatmul.mubr.bf16.gmra.mrb[28].mxu0 %v9782_v60  ;;  %3823 = vmatmul.mubr.bf16.gmra.mrb[28].mxu1 %v9782_v60 }
 0x362   : >> { %3446 = vmatprep.mubr.bf16.mxu0 %v9783_v49  ;;  %3832 = vmatprep.mubr.bf16.mxu1 %v9783_v49 }
 0x369   : >> { %3447 = vmatmul.mubr.bf16.gmra.mrb[32].mxu0 %v9785_v8  ;;  %3833 = vmatmul.mubr.bf16.gmra.mrb[32].mxu1 %v9785_v8 }
 0x36a   : >> { %3456 = vmatprep.mubr.bf16.mxu0 %v9786_v0  ;;  %3842 = vmatprep.mubr.bf16.mxu1 %v9786_v0 }
 0x371   : >> { %3457 = vmatmul.mubr.bf16.gmra.mrb[36].mxu0 %v9788_v12  ;;  %3843 = vmatmul.mubr.bf16.gmra.mrb[36].mxu1 %v9788_v12 }
 0x372   : >> { %3466 = vmatprep.mubr.bf16.mxu0 %v9789_v27  ;;  %3852 = vmatprep.mubr.bf16.mxu1 %v9789_v27 }
 0x379   : >> { %3467 = vmatmul.mubr.bf16.gmra.mrb[40].mxu0 %v9791_v56  ;;  %3853 = vmatmul.mubr.bf16.gmra.mrb[40].mxu1 %v9791_v56 }
 0x37a   : >> { %3476 = vmatprep.mubr.bf16.mxu0 %v9792_v22  ;;  %3862 = vmatprep.mubr.bf16.mxu1 %v9792_v22 }
 0x381   : >> { %3477 = vmatmul.mubr.bf16.gmra.mrb[44].mxu0 %v9794_v3  ;;  %3863 = vmatmul.mubr.bf16.gmra.mrb[44].mxu1 %v9794_v3 }
 0x382   : >> { %3486 = vmatprep.mubr.bf16.mxu0 %v9795_v40  ;;  %3872 = vmatprep.mubr.bf16.mxu1 %v9795_v40 }
 0x389   : >> { %3487 = vmatmul.mubr.bf16.gmra.mrb[48].mxu0 %v9797_v63  ;;  %3873 = vmatmul.mubr.bf16.gmra.mrb[48].mxu1 %v9797_v63 }
 0x38a   : >> { %3496 = vmatprep.mubr.bf16.mxu0 %v9798_v55  ;;  %3882 = vmatprep.mubr.bf16.mxu1 %v9798_v55 }
 0x391   : >> { %3497 = vmatmul.mubr.bf16.gmra.mrb[52].mxu0 %v9800_v15  ;;  %3883 = vmatmul.mubr.bf16.gmra.mrb[52].mxu1 %v9800_v15 }
 0x392   : >> { %3506 = vmatprep.mubr.bf16.mxu0 %v9801_v34  ;;  %3892 = vmatprep.mubr.bf16.mxu1 %v9801_v34 }
 0x399   : >> { %3507 = vmatmul.mubr.bf16.gmra.mrb[56].mxu0 %v9803_v42  ;;  %3893 = vmatmul.mubr.bf16.gmra.mrb[56].mxu1 %v9803_v42 }
 0x39a   : >> { %3516 = vmatprep.mubr.bf16.mxu0 %v9804_v37  ;;  %3902 = vmatprep.mubr.bf16.mxu1 %v9804_v37 }
 0x3a1   : >> { %3517 = vmatmul.mubr.bf16.gmra.mrb[60].mxu0 %v9806_v33  ;;  %3903 = vmatmul.mubr.bf16.gmra.mrb[60].mxu1 %v9806_v33 }
 0x3fc   : >> { %v3368_v54 = vpop.f32.mrb[0].mxu0  ;;  %v3754_v38 = vpop.f32.mrb[0].mxu1 }
 0x3fd   : >> { %v12491_v14 = vadd.f32 %v3368_v54, %v2664_v46  ;;  %v12493_v43 = vadd.f32 %v3754_v38, %v2664_v46  ;;  %v3370_v39 = vpop.f32.mrb[1].mxu0  ;;  %v3756_v31 = vpop.f32.mrb[1].mxu1 }
 0x3fe   : >> { %v12495_v10 = vadd.f32 %v3370_v39, %v2664_v46  ;;  %v12497_v11 = vadd.f32 %v3756_v31, %v2664_v46  ;;  %v3372_v45 = vpop.f32.mrb[2].mxu0  ;;  %v3758_v20 = vpop.f32.mrb[2].mxu1 }
 0x3ff   : >> { %v8143_v50 = vmul.f32 -1.442695, %v12491_v14  ;;  %v8145_v23 = vmul.f32 -1.442695, %v12493_v43  ;;  %v12501_v26 = vadd.f32 %v3372_v45, %v2669_v29  ;;  %v12503_v61 = vadd.f32 %v3758_v20, %v2669_v29  ;;  %v3374_v36 = vpop.f32.mrb[3].mxu0  ;;  %v3760_v32 = vpop.f32.mrb[3].mxu1 }
 0x400   : >> { %v8144_v9 = vmul.f32 -1.442695, %v12495_v10  ;;  %v8146_v4 = vmul.f32 -1.442695, %v12497_v11  ;;  %v12507_v5 = vadd.f32 %v3374_v36, %v2669_v29  ;;  %v12509_v47 = vadd.f32 %v3760_v32, %v2669_v29 }
 0x401   : >> { %9807 = vpow2.f32 %v8143_v50  ;;  %v8147_v7 = vmul.f32 -1.442695, %v12501_v26  ;;  %v8149_v59 = vmul.f32 -1.442695, %v12503_v61  ;;  %v2689_v50 = vpop.permute.xlu1 %2688 }
 0x402   : >> { %9809 = vpow2.f32 %v8145_v23  ;;  %v8148_v57 = vmul.f32 -1.442695, %v12507_v5  ;;  %v8150_v44 = vmul.f32 -1.442695, %v12509_v47 }
 0x403   : >> { %9811 = vpow2.f32 %v8144_v9 }
 0x404   : >> { %9813 = vpow2.f32 %v8146_v4  ;;  %v3378_v52 = vpop.f32.mrb[4].mxu0  ;;  %v3764_v1 = vpop.f32.mrb[4].mxu1 }
 0x405   : >> { %9815 = vpow2.f32 %v8147_v7  ;;  %v12517_v2 = vadd.f32 %v3378_v52, %v2674_v41  ;;  %v12519_v28 = vadd.f32 %v3764_v1, %v2674_v41  ;;  %v3380_v18 = vpop.f32.mrb[5].mxu0  ;;  %v3766_v16 = vpop.f32.mrb[5].mxu1 }
 0x406   : >> { %9817 = vpow2.f32 %v8149_v59  ;;  %v12521_v17 = vadd.f32 %v3380_v18, %v2674_v41  ;;  %v12523_v24 = vadd.f32 %v3766_v16, %v2674_v41  ;;  %v3382_v21 = vpop.f32.mrb[6].mxu0  ;;  %v3768_v53 = vpop.f32.mrb[6].mxu1 }
 0x407   : >> { %9819 = vpow2.f32 %v8148_v57  ;;  %v8151_v35 = vmul.f32 -1.442695, %v12517_v2  ;;  %v8153_v51 = vmul.f32 -1.442695, %v12519_v28  ;;  %v12528_v19 = vadd.f32 %v3382_v21, %v12514_v62  ;;  %v3384_v6 = vpop.f32.mrb[7].mxu0  ;;  %v3770_v30 = vpop.f32.mrb[7].mxu1 }
 0x408   : >> { %9821 = vpow2.f32 %v8150_v44  ;;  %v8152_v13 = vmul.f32 -1.442695, %v12521_v17  ;;  %v8154_v58 = vmul.f32 -1.442695, %v12523_v24  ;;  %v12534_v46 = vadd.f32 %v3768_v53, %v12514_v62  ;;  %v2684_v4 = vpop.permute.xlu0 %2683 }
 0x409   : >> { %9823 = vpow2.f32 %v8151_v35  ;;  %v8155_v25 = vmul.f32 -1.442695, %v12528_v19  ;;  %v12539_v38 = vadd.f32 %v3384_v6, %v12514_v62  ;;  %v12543_v9 = vadd.f32 %v3770_v30, %v12514_v62 }
 0x40a   : >> { %9825 = vpow2.f32 %v8153_v51  ;;  %v8157_v32 = vmul.f32 -1.442695, %v12534_v46 }
 0x40b   : >> { %v9808_v48 = vpop.eup %9807  ;;  %9827 = vpow2.f32 %v8152_v13  ;;  %v8156_v44 = vmul.f32 -1.442695, %v12539_v38 }
 0x40c   : >> { %v9810_v60 = vpop.eup %9809  ;;  %v4297_v49 = vadd.f32 1.0, %v9808_v48  ;;  %9829 = vpow2.f32 %v8154_v58  ;;  %v3388_v8 = vpop.f32.mrb[8].mxu0 }
 0x40d   : >> { %v3774_v0 = vpop.f32.mrb[8].mxu1  ;;  %v9812_v12 = vpop.eup %9811  ;;  %v4299_v27 = vadd.f32 1.0, %v9810_v60  ;;  %9831 = vpow2.f32 %v8155_v25  ;;  %v12546_v52 = vadd.f32 %v3388_v8, %v2684_v4 }
 0x40e   : >> { %v3390_v56 = vpop.f32.mrb[9].mxu0  ;;  %v3776_v22 = vpop.f32.mrb[9].mxu1  ;;  %9833 = vrcp.f32 %v4297_v49  ;;  %v4298_v40 = vadd.f32 1.0, %v9812_v12  ;;  %v12550_v53 = vadd.f32 %v3774_v0, %v2684_v4 }
 0x40f   : >> { %v9814_v3 = vpop.eup %9813  ;;  %v3392_v63 = vpop.f32.mrb[10].mxu0  ;;  %9835 = vrcp.f32 %v4299_v27  ;;  %v12552_v62 = vadd.f32 %v3390_v56, %v2684_v4  ;;  %v12559_v13 = vadd.f32 %v3776_v22, %v2684_v4  ;;  %v8158_v56 = vmul.f32 -1.442695, %v12543_v9 }
 0x410   : >> { %v3778_v55 = vpop.f32.mrb[10].mxu1  ;;  %v9816_v15 = vpop.eup %9815  ;;  %v4300_v34 = vadd.f32 1.0, %v9814_v3  ;;  %9837 = vrcp.f32 %v4298_v40  ;;  %v12561_v58 = vadd.f32 %v3392_v63, %v2689_v50  ;;  %v8159_v3 = vmul.f32 -1.442695, %v12546_v52 }
 0x411   : >> { %v3394_v42 = vpop.f32.mrb[11].mxu0  ;;  %v9818_v37 = vpop.eup %9817  ;;  %v4301_v33 = vadd.f32 1.0, %v9816_v15  ;;  %v12567_v8 = vadd.f32 %v3778_v55, %v2689_v50  ;;  %v8161_v40 = vmul.f32 -1.442695, %v12550_v53  ;;  %v8160_v15 = vmul.f32 -1.442695, %v12552_v62 }
 0x412   : >> { %v12536_v29 = vpop.f32.mrb[11].mxu1  ;;  %v9820_v41 = vpop.eup %9819  ;;  %9839 = vrcp.f32 %v4300_v34  ;;  %v4303_v54 = vadd.f32 1.0, %v9818_v37  ;;  %v12569_v0 = vadd.f32 %v3394_v42, %v2689_v50  ;;  %v8162_v34 = vmul.f32 -1.442695, %v12559_v13 }
 0x413   : >> { %v9822_v39 = vpop.eup %9821  ;;  %9841 = vrcp.f32 %v4301_v33  ;;  %v4302_v31 = vadd.f32 1.0, %v9820_v41  ;;  %v12578_v55 = vpop.permute.xlu0 %2693  ;;  %v8163_v42 = vmul.f32 -1.442695, %v12561_v58  ;;  %v8165_v33 = vmul.f32 -1.442695, %v12567_v8 }
 0x414   : >> { %v9824_v45 = vpop.eup %9823  ;;  %9843 = vrcp.f32 %v4303_v54  ;;  %v4304_v20 = vadd.f32 1.0, %v9822_v39  ;;  %v3398_v7 = vpop.f32.mrb[12].mxu0  ;;  %v8164_v41 = vmul.f32 -1.442695, %v12569_v0  ;;  %v12586_v54 = vadd.f32 %v12536_v29, %v2689_v50 }
 0x415   : >> { %v9826_v23 = vpop.eup %9825  ;;  %9845 = vrcp.f32 %v4302_v31  ;;  %v4305_v36 = vadd.f32 1.0, %v9824_v45  ;;  %v3784_v1 = vpop.f32.mrb[12].mxu1 }
 0x416   : >> { %v9828_v59 = vpop.eup %9827  ;;  %9847 = vrcp.f32 %v4304_v20  ;;  %v4307_v57 = vadd.f32 1.0, %v9826_v23  ;;  %v12548_v18 = vpop.f32.mrb[13].mxu0 }
 0x417   : >> { %v9830_v16 = vpop.eup %9829  ;;  %9849 = vrcp.f32 %v4305_v36  ;;  %v4306_v21 = vadd.f32 1.0, %v9828_v59  ;;  %v12554_v35 = vpop.f32.mrb[13].mxu1  ;;  %v12595_v36 = vadd.f32 %v3398_v7, %v12578_v55 }
 0x418   : >> { %v12556_v51 = vpop.f32.mrb[14].mxu0  ;;  %v9832_v6 = vpop.eup %9831  ;;  %9851 = vrcp.f32 %v4307_v57  ;;  %v4308_v30 = vadd.f32 1.0, %v9830_v16  ;;  %v12604_v57 = vadd.f32 %v3784_v1, %v12578_v55 }
 0x419   : >> { %v12563_v25 = vpop.f32.mrb[14].mxu1  ;;  %v12565_v48 = vpop.f32.mrb[15].mxu0  ;;  %9853 = vrcp.f32 %v4306_v21  ;;  %v4309_v49 = vadd.f32 1.0, %v9832_v6 }
 0x41a   : >> { %v9834_v60 = vpop.eup %9833  ;;  %v12571_v12 = vpop.f32.mrb[15].mxu1  ;;  %9855 = vrcp.f32 %v4308_v30 }
 0x41b   : >> { %v9836_v27 = vpop.eup %9835  ;;  %9857 = vrcp.f32 %v4309_v49  ;;  %v4681_v20 = vmul.f32 %v9834_v60, %v12491_v14 }
 0x41c   : >> { %v9838_v22 = vpop.eup %9837  ;;  %9859 = vpow2.f32 %v8157_v32  ;;  %v12588_v39 = vpop.f32.mrb[16].mxu0  ;;  %v4683_v29 = vmul.f32 %v9836_v27, %v12493_v43 }
 0x41d   : >> { %v9840_v63 = vpop.eup %9839  ;;  %9861 = vpow2.f32 %v8156_v44  ;;  %v12590_v31 = vpop.f32.mrb[16].mxu1  ;;  %v4682_v44 = vmul.f32 %v9838_v22, %v12495_v10  ;;  %v8169_v22 = vmul.f32 -1.442695, %v12604_v57 }
 0x41e   : >> { %v9842_v37 = vpop.eup %9841  ;;  %9863 = vpow2.f32 %v8158_v56  ;;  %v12597_v32 = vpop.f32.mrb[17].mxu0  ;;  %v4684_v1 = vmul.f32 %v9840_v63, %v12497_v11 }
 0x41f   : >> { %v9844_v45 = vpop.eup %9843  ;;  %v4685_v23 = vmul.f32 %v9842_v37, %v12501_v26  ;;  %v12599_v4 = vpop.f32.mrb[17].mxu1  ;;  %9865 = vpow2.f32 %v8159_v3 }
 0x420   : >> { %v9846_v59 = vpop.eup %9845  ;;  %v4687_v50 = vmul.f32 %v9844_v45, %v12503_v61  ;;  %v12606_v14 = vpop.f32.mrb[18].mxu0  ;;  %9867 = vpow2.f32 %v8161_v40 }
 0x421   : >> { %v12608_v26 = vpop.f32.mrb[18].mxu1  ;;  %v9848_v7 = vpop.eup %9847  ;;  %v4809_v16 = vpack.c.bf16 %v4685_v23, %v4681_v20  ;;  %v4686_v21 = vmul.f32 %v9846_v59, %v12507_v5  ;;  %9869 = vpow2.f32 %v8160_v15  ;;  %v8166_v5 = vmul.f32 -1.442695, %v12586_v54 }
 0x422   : >> { %v12612_v6 = vpop.f32.mrb[19].mxu0  ;;  %v12614_v43 = vpop.f32.mrb[19].mxu1  ;;  %v4811_v30 = vpack.c.bf16 %v4687_v50, %v4683_v29  ;;  %v4688_v60 = vmul.f32 %v9848_v7, %v12509_v47  ;;  %9871 = vpow2.f32 %v8162_v34  ;;  %v8167_v47 = vmul.f32 -1.442695, %v12595_v36 }
 0x423   : >> { %v9850_v61 = vpop.eup %9849  ;;  %4878 = vst [vmem:[%s12621_s14] sm:$0xff] %v4809_v16  ;;  %v4810_v10 = vpack.c.bf16 %v4686_v21, %v4682_v44  ;;  %9873 = vpow2.f32 %v8163_v42 }
 0x424   : >> { %v12618_v49 = vpop.eup %9851  ;;  %4880 = vst [vmem:[%s12621_s14 + $0x10] sm:$0xff] %v4811_v30  ;;  %v4812_v11 = vpack.c.bf16 %v4688_v60, %v4684_v1  ;;  %9875 = vpow2.f32 %v8165_v33  ;;  %v12634_v40 = vpop.f32.mrb[20].mxu0  ;;  %v4689_v34 = vmul.f32 %v9850_v61, %v12517_v2  ;;  %v12655_v61 = vadd.f32 %v12548_v18, %v12578_v55 }
 0x425   : >> { %v12625_v27 = vpop.eup %9853  ;;  %4879 = vst [vmem:[%s12621_s14 + $0x8] sm:$0xff] %v4810_v10  ;;  %9877 = vpow2.f32 %v8164_v41  ;;  %v12636_v63 = vpop.f32.mrb[20].mxu1  ;;  %v12659_v10 = vadd.f32 %v12554_v35, %v12578_v55 }
 0x426   : >> { %v12629_v56 = vpop.eup %9855  ;;  %4881 = vst [vmem:[%s12621_s14 + $0x18] sm:$0xff] %v4812_v11  ;;  %9879 = vpow2.f32 %v8166_v5  ;;  %v12640_v37 = vpop.f32.mrb[21].mxu0  ;;  %v8168_v55 = vmul.f32 -1.442695, %v12655_v61 }
 0x427   : >> { %v9858_v3 = vpop.eup %9857  ;;  %v12642_v45 = vpop.f32.mrb[21].mxu1  ;;  %9881 = vpow2.f32 %v8167_v47 }
 0x428   : >> { %v9860_v15 = vpop.eup %9859  ;;  %v4693_v42 = vmul.f32 %v9858_v3, %v12528_v19  ;;  %v12644_v23 = vpop.f32.mrb[22].mxu0  ;;  %9883 = vpow2.f32 %v8169_v22 }
 0x429   : >> { %v9862_v33 = vpop.eup %9861  ;;  %v4311_v20 = vadd.f32 1.0, %v9860_v15  ;;  %v12646_v41 = vpop.f32.mrb[22].mxu1 }
 0x42a   : >> { %v9864_v59 = vpop.eup %9863  ;;  %v4813_v29 = vpack.c.bf16 %v4693_v42, %v4689_v34  ;;  %v4310_v50 = vadd.f32 1.0, %v9862_v33  ;;  %v12648_v2 = vpop.f32.mrb[23].mxu0 }
 0x42b   : >> { %v12650_v19 = vpop.f32.mrb[23].mxu1  ;;  %v9866_v7 = vpop.eup %9865  ;;  %9885 = vrcp.f32 %v4311_v20  ;;  %v4312_v44 = vadd.f32 1.0, %v9864_v59 }
 0x42c   : >> { %v9868_v16 = vpop.eup %9867  ;;  %4882 = vst [vmem:[%s12621_s14 + $0x20] sm:$0xff] %v4813_v29  ;;  %9887 = vrcp.f32 %v4310_v50  ;;  %v4313_v21 = vadd.f32 1.0, %v9866_v7  ;;  %v2699_v30 = vpop.permute.xlu1 %2698  ;;  %v8170_v29 = vmul.f32 -1.442695, %v12659_v10 }
 0x42d   : >> { %v9870_v1 = vpop.eup %9869  ;;  %9889 = vrcp.f32 %v4312_v44  ;;  %v4315_v60 = vadd.f32 1.0, %v9868_v16  ;;  %v12662_v47 = vadd.f32 %v12556_v51, %v2699_v30  ;;  %v12665_v18 = vadd.f32 %v12563_v25, %v2699_v30  ;;  %v12667_v15 = vpop.f32.mrb[24].mxu0 }
 0x42e   : >> { %v9872_v5 = vpop.eup %9871  ;;  %9891 = vrcp.f32 %v4313_v21  ;;  %v4314_v11 = vadd.f32 1.0, %v9870_v1  ;;  %v12669_v34 = vpop.f32.mrb[24].mxu1  ;;  %v12673_v33 = vadd.f32 %v12565_v48, %v2699_v30 }
 0x42f   : >> { %v9874_v22 = vpop.eup %9873  ;;  %9893 = vrcp.f32 %v4315_v60  ;;  %v4316_v3 = vadd.f32 1.0, %v9872_v5  ;;  %v12675_v51 = vpop.f32.mrb[25].mxu0  ;;  %v8171_v21 = vmul.f32 -1.442695, %v12662_v47 }
 0x430   : >> { %v9876_v42 = vpop.eup %9875  ;;  %9895 = vrcp.f32 %v4314_v11  ;;  %v4317_v35 = vadd.f32 1.0, %v9874_v22  ;;  %v12677_v20 = vpop.f32.mrb[25].mxu1  ;;  %v8173_v22 = vmul.f32 -1.442695, %v12665_v18 }
 0x431   : >> { %v9878_v59 = vpop.eup %9877  ;;  %9897 = vrcp.f32 %v4316_v3  ;;  %v4319_v25 = vadd.f32 1.0, %v9876_v42  ;;  %v12680_v50 = vpop.f32.mrb[26].mxu0  ;;  %v12691_v3 = vadd.f32 %v12571_v12, %v2699_v30  ;;  %v4691_v12 = vmul.f32 %v12618_v49, %v12519_v28 }
 0x432   : >> { %14997 = vst [vmem:[#allocation50_spill] sm:$0xff] %v12680_v50  ;;  %v12682_v7 = vpop.f32.mrb[26].mxu1  ;;  %v9880_v44 = vpop.eup %9879  ;;  %9899 = vrcp.f32 %v4317_v35  ;;  %v4318_v16 = vadd.f32 1.0, %v9878_v59  ;;  %v8172_v35 = vmul.f32 -1.442695, %v12673_v33 }
 0x433   : >> { %14998 = vst [vmem:[#allocation51_spill] sm:$0xff] %v12682_v7  ;;  %v12685_v48 = vpop.f32.mrb[27].mxu0  ;;  %v12687_v1 = vpop.f32.mrb[27].mxu1  ;;  %9901 = vrcp.f32 %v4319_v25  ;;  %v4320_v5 = vadd.f32 1.0, %v9880_v44 }
 0x434   : >> { %14999 = vst [vmem:[#allocation52_spill] sm:$0xff] %v12685_v48  ;;  %15000 = vst [vmem:[#allocation53_spill] sm:$0xff] %v12687_v1  ;;  %v9882_v60 = vpop.eup %9881  ;;  %v2704_v11 = vpop.permute.xlu0 %2703  ;;  %9903 = vrcp.f32 %v4318_v16 }
 0x435   : >> { %v9884_v42 = vpop.eup %9883  ;;  %v4321_v7 = vadd.f32 1.0, %v9882_v60  ;;  %v12695_v59 = vadd.f32 %v12588_v39, %v2704_v11  ;;  %9905 = vrcp.f32 %v4320_v5  ;;  %v12698_v25 = vadd.f32 %v12590_v31, %v2704_v11  ;;  %v12706_v16 = vpop.permute.xlu1 %2708 }
 0x436   : >> { %v9886_v48 = vpop.eup %9885  ;;  %v4323_v1 = vadd.f32 1.0, %v9884_v42  ;;  %v12701_v44 = vadd.f32 %v12597_v32, %v2704_v11  ;;  %v12709_v39 = vadd.f32 %v12599_v4, %v2704_v11  ;;  %v4690_v31 = vmul.f32 %v12625_v27, %v12521_v17  ;;  %v12718_v28 = vpop.f32.mrb[28].mxu0 }
 0x437   : >> { %v9888_v50 = vpop.eup %9887  ;;  %v4695_v30 = vmul.f32 %v9886_v48, %v12534_v46  ;;  %9907 = vrcp.f32 %v4321_v7  ;;  %v12716_v32 = vadd.f32 %v12606_v14, %v12706_v16  ;;  %v12720_v46 = vpop.f32.mrb[28].mxu1  ;;  %v4692_v4 = vmul.f32 %v12629_v56, %v12523_v24 }
 0x438   : >> { %v9890_v60 = vpop.eup %9889  ;;  %v4694_v5 = vmul.f32 %v9888_v50, %v12539_v38  ;;  %9909 = vrcp.f32 %v4323_v1  ;;  %v12725_v17 = vpop.f32.mrb[29].mxu0  ;;  %v8174_v50 = vmul.f32 -1.442695, %v12691_v3  ;;  %v12732_v1 = vadd.f32 %v12608_v26, %v12706_v16 }
 0x439   : >> { %v9892_v49 = vpop.eup %9891  ;;  %v4815_v7 = vpack.c.bf16 %v4695_v30, %v4691_v12  ;;  %v4696_v48 = vmul.f32 %v9890_v60, %v12543_v9  ;;  %9911 = vpow2.f32 %v8168_v55  ;;  %v12727_v38 = vpop.f32.mrb[29].mxu1  ;;  %v8175_v11 = vmul.f32 -1.442695, %v12695_v59 }
 0x43a   : >> { %v9894_v27 = vpop.eup %9893  ;;  %v4814_v14 = vpack.c.bf16 %v4694_v5, %v4690_v31  ;;  %9913 = vpow2.f32 %v8170_v29  ;;  %v12734_v24 = vpop.f32.mrb[30].mxu0  ;;  %v12742_v29 = vadd.f32 %v12612_v6, %v12706_v16  ;;  %v8177_v30 = vmul.f32 -1.442695, %v12698_v25 }
 0x43b   : >> { %v12736_v56 = vpop.f32.mrb[30].mxu1  ;;  %v9896_v9 = vpop.eup %9895  ;;  %4884 = vst [vmem:[%s12621_s14 + $0x30] sm:$0xff] %v4815_v7  ;;  %v4816_v55 = vpack.c.bf16 %v4696_v48, %v4692_v4  ;;  %9915 = vpow2.f32 %v8171_v21  ;;  %v8176_v21 = vmul.f32 -1.442695, %v12701_v44  ;;  %v8178_v31 = vmul.f32 -1.442695, %v12709_v39 }
 0x43c   : >> { %15001 = vst [vmem:[#allocation54_spill] sm:$0xff] %v12736_v56  ;;  %v12744_v42 = vpop.f32.mrb[31].mxu0  ;;  %v12746_v12 = vpop.f32.mrb[31].mxu1  ;;  %4883 = vst [vmem:[%s12621_s14 + $0x28] sm:$0xff] %v4814_v14  ;;  %9917 = vpow2.f32 %v8173_v22  ;;  %v8179_v5 = vmul.f32 -1.442695, %v12716_v32  ;;  %v4697_v4 = vmul.f32 %v9892_v49, %v12546_v52  ;;  %v4699_v14 = vmul.f32 %v9894_v27, %v12550_v53 }
 0x43d   : >> { %15002 = vst [vmem:[#allocation55_spill] sm:$0xff] %v12744_v42  ;;  %15003 = vst [vmem:[#allocation56_spill] sm:$0xff] %v12746_v12  ;;  %v9898_v26 = vpop.eup %9897  ;;  %9919 = vpow2.f32 %v8172_v35  ;;  %v8181_v48 = vmul.f32 -1.442695, %v12732_v1  ;;  %v8180_v35 = vmul.f32 -1.442695, %v12742_v29  ;;  %v4698_v42 = vmul.f32 %v9896_v9, %v12552_v62 }
 0x43e   : >> { %v9900_v60 = vpop.eup %9899  ;;  %4885 = vst [vmem:[%s12621_s14 + $0x38] sm:$0xff] %v4816_v55  ;;  %9921 = vpow2.f32 %v8174_v50  ;;  %v12764_v49 = vpop.f32.mrb[32].mxu1  ;;  %v4700_v53 = vmul.f32 %v9898_v26, %v12559_v13 }
 0x43f   : >> { %v9902_v6 = vpop.eup %9901  ;;  %v4701_v7 = vmul.f32 %v9900_v60, %v12561_v58  ;;  %9923 = vpow2.f32 %v8175_v11  ;;  %v12762_v58 = vpop.f32.mrb[32].mxu0 }
 0x440   : >> { %v9904_v22 = vpop.eup %9903  ;;  %v4703_v55 = vmul.f32 %v9902_v6, %v12567_v8  ;;  %9925 = vpow2.f32 %v8177_v30  ;;  %v12770_v11 = vpop.f32.mrb[33].mxu0 }
 0x441   : >> { %v9906_v12 = vpop.eup %9905  ;;  %v4817_v56 = vpack.c.bf16 %v4701_v7, %v4697_v4  ;;  %v4702_v52 = vmul.f32 %v9904_v22, %v12569_v0  ;;  %9927 = vpow2.f32 %v8176_v21  ;;  %v12772_v62 = vpop.f32.mrb[33].mxu1 }
 0x442   : >> { %v12766_v50 = vpop.eup %9907  ;;  %v4819_v8 = vpack.c.bf16 %v4703_v55, %v4699_v14  ;;  %v4704_v27 = vmul.f32 %v9906_v12, %v12586_v54  ;;  %9929 = vpow2.f32 %v8178_v31  ;;  %v12777_v30 = vpop.f32.mrb[34].mxu0 }
 0x443   : >> { %v12774_v0 = vpop.eup %9909  ;;  %4886 = vst [vmem:[%s12621_s14 + $0x40] sm:$0xff] %v4817_v56  ;;  %v4818_v9 = vpack.c.bf16 %v4702_v52, %v4698_v42  ;;  %v12779_v60 = vpop.f32.mrb[34].mxu1  ;;  %9931 = vpow2.f32 %v8179_v5  ;;  %v12790_v52 = vadd.f32 %v12614_v43, %v12706_v16 }
 0x444   : >> { %v9912_v13 = vpop.eup %9911  ;;  %4888 = vst [vmem:[%s12621_s14 + $0x50] sm:$0xff] %v4819_v8  ;;  %v4820_v26 = vpack.c.bf16 %v4704_v27, %v4700_v53  ;;  %v12782_v54 = vpop.f32.mrb[35].mxu0  ;;  %9933 = vpow2.f32 %v8181_v48 }
 0x445   : >> { %v12784_v12 = vpop.f32.mrb[35].mxu1  ;;  %v9914_v21 = vpop.eup %9913  ;;  %4887 = vst [vmem:[%s12621_s14 + $0x48] sm:$0xff] %v4818_v9  ;;  %v4322_v6 = vadd.f32 1.0, %v9912_v13  ;;  %9935 = vpow2.f32 %v8180_v35 }
 0x446   : >> { %15004 = vst [vmem:[#allocation57_spill] sm:$0xff] %v12784_v12  ;;  %v9916_v56 = vpop.eup %9915  ;;  %4889 = vst [vmem:[%s12621_s14 + $0x58] sm:$0xff] %v4820_v26  ;;  %v4324_v42 = vadd.f32 1.0, %v9914_v21  ;;  %v2714_v22 = vpop.permute.xlu0 %2713 }
 0x447   : >> { %v9918_v31 = vpop.eup %9917  ;;  %9937 = vrcp.f32 %v4322_v6  ;;  %v4325_v4 = vadd.f32 1.0, %v9916_v56  ;;  %v12792_v53 = vpop.f32.mrb[36].mxu0  ;;  %v12801_v21 = vadd.f32 %v12634_v40, %v2714_v22  ;;  %v12806_v56 = vadd.f32 %v12636_v63, %v2714_v22 }
 0x448   : >> { %v9920_v7 = vpop.eup %9919  ;;  %9939 = vrcp.f32 %v4324_v42  ;;  %v4327_v14 = vadd.f32 1.0, %v9918_v31  ;;  %15005 = vst [vmem:[#allocation58_spill] sm:$0xff] %v12792_v53  ;;  %v12794_v48 = vpop.f32.mrb[36].mxu1  ;;  %v12809_v42 = vadd.f32 %v12640_v37, %v2714_v22 }
 0x449   : >> { %v9922_v5 = vpop.eup %9921  ;;  %9941 = vrcp.f32 %v4325_v4  ;;  %v4326_v55 = vadd.f32 1.0, %v9920_v7  ;;  %15006 = vst [vmem:[#allocation59_spill] sm:$0xff] %v12794_v48  ;;  %v12796_v27 = vpop.f32.mrb[37].mxu0 }
 0x44a   : >> { %v9924_v8 = vpop.eup %9923  ;;  %9943 = vrcp.f32 %v4327_v14  ;;  %v4328_v35 = vadd.f32 1.0, %v9922_v5  ;;  %15007 = vst [vmem:[#allocation60_spill] sm:$0xff] %v12796_v27  ;;  %v12798_v9 = vpop.f32.mrb[37].mxu1  ;;  %v8182_v5 = vmul.f32 -1.442695, %v12790_v52 }
 0x44b   : >> { %15008 = vst [vmem:[#allocation61_spill] sm:$0xff] %v12798_v9  ;;  %v9926_v13 = vpop.eup %9925  ;;  %9945 = vrcp.f32 %v4326_v55  ;;  %v4329_v26 = vadd.f32 1.0, %v9924_v8  ;;  %v12803_v6 = vpop.f32.mrb[38].mxu0  ;;  %v12817_v55 = vadd.f32 %v12642_v45, %v2714_v22 }
 0x44c   : >> { %15009 = vst [vmem:[#allocation62_spill] sm:$0xff] %v12803_v6  ;;  %v9928_v43 = vpop.eup %9927  ;;  %9947 = vrcp.f32 %v4328_v35  ;;  %v4331_v16 = vadd.f32 1.0, %v9926_v13  ;;  %v12811_v31 = vpop.f32.mrb[38].mxu1 }
 0x44d   : >> { %15010 = vst [vmem:[#allocation63_spill] sm:$0xff] %v12811_v31  ;;  %v12813_v4 = vpop.f32.mrb[39].mxu0  ;;  %v9930_v7 = vpop.eup %9929  ;;  %9949 = vrcp.f32 %v4329_v26  ;;  %v4330_v40 = vadd.f32 1.0, %v9928_v43  ;;  %v8183_v43 = vmul.f32 -1.442695, %v12801_v21 }
 0x44e   : >> { %15011 = vst [vmem:[#allocation64_spill] sm:$0xff] %v12813_v4  ;;  %v2719_v14 = vpop.permute.xlu1 %2718  ;;  %v12819_v8 = vpop.f32.mrb[39].mxu1  ;;  %9951 = vrcp.f32 %v4331_v16  ;;  %v4332_v35 = vadd.f32 1.0, %v9930_v7  ;;  %v8185_v16 = vmul.f32 -1.442695, %v12806_v56 }
 0x44f   : >> { %15012 = vst [vmem:[#allocation65_spill] sm:$0xff] %v12819_v8  ;;  %v9932_v63 = vpop.eup %9931  ;;  %v12822_v37 = vadd.f32 %v12644_v23, %v2719_v14  ;;  %v12825_v13 = vadd.f32 %v12646_v41, %v2719_v14  ;;  %9953 = vrcp.f32 %v4330_v40  ;;  %v12829_v31 = vadd.f32 %v12648_v2, %v2719_v14  ;;  %v2724_v22 = vpop.permute.xlu0 %2723 }
 0x450   : >> { %v9934_v4 = vpop.eup %9933  ;;  %v4333_v26 = vadd.f32 1.0, %v9932_v63  ;;  %9955 = vrcp.f32 %v4332_v35  ;;  %v8184_v23 = vmul.f32 -1.442695, %v12809_v42  ;;  %v8186_v6 = vmul.f32 -1.442695, %v12817_v55  ;;  %v12834_v40 = vpop.f32.mrb[40].mxu0 }
 0x451   : >> { %v9936_v45 = vpop.eup %9935  ;;  %v4335_v8 = vadd.f32 1.0, %v9934_v4  ;;  %15013 = vst [vmem:[#allocation66_spill] sm:$0xff] %v12834_v40  ;;  %v12836_v63 = vpop.f32.mrb[40].mxu1  ;;  %v8187_v2 = vmul.f32 -1.442695, %v12822_v37  ;;  %v12849_v40 = vadd.f32 %v12667_v15, %v2724_v22 }
 0x452   : >> { %v9938_v7 = vpop.eup %9937  ;;  %9957 = vrcp.f32 %v4333_v26  ;;  %v4334_v41 = vadd.f32 1.0, %v9936_v45  ;;  %15014 = vst [vmem:[#allocation67_spill] sm:$0xff] %v12836_v63  ;;  %v8189_v35 = vmul.f32 -1.442695, %v12825_v13  ;;  %v12840_v4 = vpop.f32.mrb[41].mxu0  ;;  %v12846_v45 = vadd.f32 %v12650_v19, %v2719_v14 }
 0x453   : >> { %v9940_v9 = vpop.eup %9939  ;;  %9959 = vrcp.f32 %v4335_v8  ;;  %15015 = vst [vmem:[#allocation68_spill] sm:$0xff] %v12840_v4  ;;  %v12842_v27 = vpop.f32.mrb[41].mxu1  ;;  %v8188_v26 = vmul.f32 -1.442695, %v12829_v31  ;;  %v4705_v4 = vmul.f32 %v12766_v50, %v12595_v36  ;;  %v4707_v14 = vmul.f32 %v12774_v0, %v12604_v57 }
 0x454   : >> { %15016 = vst [vmem:[#allocation69_spill] sm:$0xff] %v12842_v27  ;;  %v9942_v48 = vpop.eup %9941  ;;  %9961 = vrcp.f32 %v4334_v41  ;;  %v12851_v63 = vpop.f32.mrb[42].mxu0  ;;  %v12859_v41 = vadd.f32 %v12669_v34, %v2724_v22  ;;  %v12869_v36 = vadd.f32 %v12675_v51, %v2724_v22  ;;  %v4706_v50 = vmul.f32 %v9938_v7, %v12655_v61 }
 0x455   : >> { %v12853_v8 = vpop.f32.mrb[42].mxu1  ;;  %v9944_v53 = vpop.eup %9943  ;;  %v4709_v27 = vmul.f32 %v9942_v48, %v12662_v47  ;;  %9963 = vpow2.f32 %v8182_v5  ;;  %v8190_v0 = vmul.f32 -1.442695, %v12846_v45  ;;  %v12878_v61 = vadd.f32 %v12677_v20, %v2724_v22 }
 0x456   : >> { %15017 = vst [vmem:[#allocation70_spill] sm:$0xff] %v12853_v8  ;;  %v12861_v12 = vpop.f32.mrb[43].mxu0  ;;  %v12863_v19 = vpop.f32.mrb[43].mxu1  ;;  %v4711_v8 = vmul.f32 %v9944_v53, %v12665_v18  ;;  %9965 = vpow2.f32 %v8183_v43 }
 0x457   : >> { %15018 = vst [vmem:[#allocation71_spill] sm:$0xff] %v12861_v12  ;;  %15019 = vst [vmem:[#allocation72_spill] sm:$0xff] %v12863_v19  ;;  %v9946_v15 = vpop.eup %9945  ;;  %v4821_v34 = vpack.c.bf16 %v4709_v27, %v4705_v4  ;;  %9967 = vpow2.f32 %v8185_v16  ;;  %v4708_v19 = vmul.f32 %v9940_v9, %v12659_v10  ;;  %v8191_v10 = vmul.f32 -1.442695, %v12849_v40  ;;  %v12882_v27 = vpop.f32.mrb[44].mxu0 }
 0x458   : >> { %v9948_v47 = vpop.eup %9947  ;;  %v4710_v48 = vmul.f32 %v9946_v15, %v12673_v33  ;;  %v4823_v12 = vpack.c.bf16 %v4711_v8, %v4707_v14  ;;  %9969 = vpow2.f32 %v8184_v23  ;;  %v12890_v43 = vpop.f32.mrb[45].mxu0  ;;  %v8194_v4 = vmul.f32 -1.442695, %v12878_v61 }
 0x459   : >> { %v9950_v5 = vpop.eup %9949  ;;  %v4712_v57 = vmul.f32 %v9948_v47, %v12691_v3  ;;  %4890 = vst [vmem:[%s12621_s14 + $0x60] sm:$0xff] %v4821_v34  ;;  %9971 = vpow2.f32 %v8186_v6  ;;  %v12884_v3 = vpop.f32.mrb[44].mxu1  ;;  %v8193_v6 = vmul.f32 -1.442695, %v12859_v41 }
 0x45a   : >> { %v9952_v18 = vpop.eup %9951  ;;  %v4822_v51 = vpack.c.bf16 %v4710_v48, %v4706_v50  ;;  %4892 = vst [vmem:[%s12621_s14 + $0x70] sm:$0xff] %v4823_v12  ;;  %9973 = vpow2.f32 %v8187_v2  ;;  %v12892_v20 = vpop.f32.mrb[45].mxu1  ;;  %v8192_v12 = vmul.f32 -1.442695, %v12869_v36  ;;  %v4713_v2 = vmul.f32 %v9950_v5, %v12695_v59 }
 0x45b   : >> { %v9954_v33 = vpop.eup %9953  ;;  %v4824_v53 = vpack.c.bf16 %v4712_v57, %v4708_v19  ;;  %9975 = vpow2.f32 %v8189_v35  ;;  %v12896_v16 = vpop.f32.mrb[46].mxu0  ;;  %v4715_v15 = vmul.f32 %v9952_v18, %v12698_v25 }
 0x45c   : >> { %v12886_v9 = vpop.eup %9955  ;;  %4891 = vst [vmem:[%s12621_s14 + $0x68] sm:$0xff] %v4822_v51  ;;  %9977 = vpow2.f32 %v8188_v26  ;;  %v12898_v23 = vpop.f32.mrb[46].mxu1  ;;  %v4714_v59 = vmul.f32 %v9954_v33, %v12701_v44 }
 0x45d   : >> { %v9958_v22 = vpop.eup %9957  ;;  %4893 = vst [vmem:[%s12621_s14 + $0x78] sm:$0xff] %v4824_v53  ;;  %9979 = vpow2.f32 %v8190_v0  ;;  %v12903_v8 = vpop.f32.mrb[47].mxu0 }
 0x45e   : >> { %v9960_v7 = vpop.eup %9959  ;;  %v4717_v35 = vmul.f32 %v9958_v22, %v12716_v32  ;;  %v12905_v19 = vpop.f32.mrb[47].mxu1  ;;  %9981 = vpow2.f32 %v8191_v10 }
 0x45f   : >> { %v9962_v26 = vpop.eup %9961  ;;  %v4719_v14 = vmul.f32 %v9960_v7, %v12732_v1  ;;  %9983 = vpow2.f32 %v8193_v6  ;;  %v2729_v51 = vpop.permute.xlu1 %2728  ;;  %v15024_v7 = vld [vmem:[#allocation50_spill] sm:$0xff] }
 0x460   : >> { %v9964_v47 = vpop.eup %9963  ;;  %v4825_v50 = vpack.c.bf16 %v4717_v35, %v4713_v2  ;;  %v4718_v32 = vmul.f32 %v9962_v26, %v12742_v29  ;;  %9985 = vpow2.f32 %v8192_v12  ;;  %v12913_v44 = vpop.f32.mrb[48].mxu0  ;;  %v12923_v2 = vadd.f32 %v15024_v7, %v2729_v51 }
 0x461   : >> { %v9966_v34 = vpop.eup %9965  ;;  %v4827_v48 = vpack.c.bf16 %v4719_v14, %v4715_v15  ;;  %v4336_v5 = vadd.f32 1.0, %v9964_v47  ;;  %9987 = vpow2.f32 %v8194_v4  ;;  %15020 = vst [vmem:[#allocation73_spill] sm:$0xff] %v12913_v44  ;;  %v12915_v33 = vpop.f32.mrb[48].mxu1  ;;  %v15026_v15 = vld [vmem:[#allocation51_spill] sm:$0xff] }
 0x462   : >> { %v9968_v57 = vpop.eup %9967  ;;  %4894 = vst [vmem:[%s12621_s14 + $0x80] sm:$0xff] %v4825_v50  ;;  %v4826_v25 = vpack.c.bf16 %v4718_v32, %v4714_v59  ;;  %v4337_v18 = vadd.f32 1.0, %v9966_v34  ;;  %15021 = vst [vmem:[#allocation74_spill] sm:$0xff] %v12915_v33  ;;  %v12918_v10 = vpop.f32.mrb[49].mxu0  ;;  %v12928_v14 = vadd.f32 %v15026_v15, %v2729_v51  ;;  %v15028_v32 = vld [vmem:[#allocation52_spill] sm:$0xff] }
 0x463   : >> { %v9970_v1 = vpop.eup %9969  ;;  %4896 = vst [vmem:[%s12621_s14 + $0x90] sm:$0xff] %v4827_v48  ;;  %9989 = vrcp.f32 %v4336_v5  ;;  %v4339_v0 = vadd.f32 1.0, %v9968_v57  ;;  %15022 = vst [vmem:[#allocation75_spill] sm:$0xff] %v12918_v10  ;;  %v12920_v6 = vpop.f32.mrb[49].mxu1  ;;  %v12933_v34 = vadd.f32 %v15028_v32, %v2729_v51 }
 0x464   : >> { %v9972_v29 = vpop.eup %9971  ;;  %4895 = vst [vmem:[%s12621_s14 + $0x88] sm:$0xff] %v4826_v25  ;;  %9991 = vrcp.f32 %v4337_v18  ;;  %v4338_v53 = vadd.f32 1.0, %v9970_v1  ;;  %15023 = vst [vmem:[#allocation76_spill] sm:$0xff] %v12920_v6  ;;  %v12925_v35 = vpop.f32.mrb[50].mxu0  ;;  %v8197_v7 = vmul.f32 -1.442695, %v12928_v14 }
 0x465   : >> { %v9974_v22 = vpop.eup %9973  ;;  %9993 = vrcp.f32 %v4339_v0  ;;  %v4340_v12 = vadd.f32 1.0, %v9972_v29  ;;  %15025 = vst [vmem:[#allocation50_spill] sm:$0xff] %v12925_v35  ;;  %v12930_v47 = vpop.f32.mrb[50].mxu1  ;;  %v8195_v0 = vmul.f32 -1.442695, %v12923_v2 }
 0x466   : >> { %v9976_v4 = vpop.eup %9975  ;;  %9995 = vrcp.f32 %v4338_v53  ;;  %v4341_v26 = vadd.f32 1.0, %v9974_v22  ;;  %15027 = vst [vmem:[#allocation51_spill] sm:$0xff] %v12930_v47  ;;  %v12935_v48 = vpop.f32.mrb[51].mxu0 }
 0x467   : >> { %v9978_v59 = vpop.eup %9977  ;;  %9997 = vrcp.f32 %v4340_v12  ;;  %v4343_v50 = vadd.f32 1.0, %v9976_v4  ;;  %15029 = vst [vmem:[#allocation52_spill] sm:$0xff] %v12935_v48  ;;  %v12937_v5 = vpop.f32.mrb[51].mxu1  ;;  %v15031_v4 = vld [vmem:[#allocation53_spill] sm:$0xff] }
 0x468   : >> { %15030 = vst [vmem:[#allocation77_spill] sm:$0xff] %v12937_v5  ;;  %v9980_v57 = vpop.eup %9979  ;;  %9999 = vrcp.f32 %v4341_v26  ;;  %v4342_v25 = vadd.f32 1.0, %v9978_v59  ;;  %v2739_v53 = vpop.permute.xlu1 %2738  ;;  %v12942_v15 = vadd.f32 %v15031_v4, %v2729_v51  ;;  %v8196_v26 = vmul.f32 -1.442695, %v12933_v34 }
 0x469   : >> { %v9982_v18 = vpop.eup %9981  ;;  %10001 = vrcp.f32 %v4343_v50  ;;  %v4344_v1 = vadd.f32 1.0, %v9980_v57  ;;  %v2734_v22 = vpop.permute.xlu0 %2733 }
 0x46a   : >> { %v9984_v29 = vpop.eup %9983  ;;  %10003 = vrcp.f32 %v4342_v25  ;;  %v4345_v12 = vadd.f32 1.0, %v9982_v18  ;;  %v12946_v59 = vadd.f32 %v12718_v28, %v2734_v22  ;;  %v12948_v50 = vpop.f32.mrb[52].mxu0  ;;  %v12953_v18 = vadd.f32 %v12720_v46, %v2734_v22 }
 0x46b   : >> { %v9986_v32 = vpop.eup %9985  ;;  %10005 = vrcp.f32 %v4344_v1  ;;  %v4347_v5 = vadd.f32 1.0, %v9984_v29  ;;  %15032 = vst [vmem:[#allocation53_spill] sm:$0xff] %v12948_v50  ;;  %v12950_v57 = vpop.f32.mrb[52].mxu1  ;;  %v12956_v51 = vadd.f32 %v12725_v17, %v2734_v22  ;;  %v12963_v50 = vadd.f32 %v12727_v38, %v2734_v22  ;;  %v15040_v22 = vld [vmem:[#allocation55_spill] sm:$0xff] }
 0x46c   : >> { %15033 = vst [vmem:[#allocation78_spill] sm:$0xff] %v12950_v57  ;;  %v9988_v48 = vpop.eup %9987  ;;  %10007 = vrcp.f32 %v4345_v12  ;;  %v4346_v25 = vadd.f32 1.0, %v9986_v32  ;;  %v12958_v1 = vpop.f32.mrb[53].mxu0  ;;  %v12966_v57 = vadd.f32 %v12734_v24, %v2739_v53  ;;  %v4716_v17 = vmul.f32 %v12886_v9, %v12709_v39 }
 0x46d   : >> { %15034 = vst [vmem:[#allocation79_spill] sm:$0xff] %v12958_v1  ;;  %v12960_v29 = vpop.f32.mrb[53].mxu1  ;;  %v9990_v4 = vpop.eup %9989  ;;  %10009 = vrcp.f32 %v4347_v5  ;;  %v4348_v28 = vadd.f32 1.0, %v9988_v48  ;;  %v15037_v1 = vld [vmem:[#allocation54_spill] sm:$0xff]  ;;  %v8198_v24 = vmul.f32 -1.442695, %v12942_v15 }
 0x46e   : >> { %15035 = vst [vmem:[#allocation80_spill] sm:$0xff] %v12960_v29  ;;  %v12968_v12 = vpop.f32.mrb[54].mxu0  ;;  %v9992_v46 = vpop.eup %9991  ;;  %v4720_v32 = vmul.f32 %v9990_v4, %v12790_v52  ;;  %10011 = vrcp.f32 %v4346_v25  ;;  %v12974_v29 = vadd.f32 %v15037_v1, %v2739_v53  ;;  %v8199_v9 = vmul.f32 -1.442695, %v12946_v59 }
 0x46f   : >> { %15036 = vst [vmem:[#allocation81_spill] sm:$0xff] %v12968_v12  ;;  %v12976_v5 = vpop.f32.mrb[54].mxu1  ;;  %v12978_v48 = vpop.f32.mrb[55].mxu0  ;;  %10013 = vrcp.f32 %v4348_v28  ;;  %v12982_v12 = vadd.f32 %v15040_v22, %v2739_v53  ;;  %v8201_v1 = vmul.f32 -1.442695, %v12953_v18 }
 0x470   : >> { %15038 = vst [vmem:[#allocation54_spill] sm:$0xff] %v12976_v5  ;;  %15039 = vst [vmem:[#allocation82_spill] sm:$0xff] %v12978_v48  ;;  %v9994_v38 = vpop.eup %9993  ;;  %v12984_v47 = vpop.f32.mrb[55].mxu1  ;;  %v4828_v52 = vpack.c.bf16 %v4720_v32, %v4716_v17  ;;  %10015 = vpow2.f32 %v8195_v0  ;;  %v8200_v4 = vmul.f32 -1.442695, %v12956_v51  ;;  %v15042_v0 = vld [vmem:[#allocation56_spill] sm:$0xff] }
 0x471   : >> { %15041 = vst [vmem:[#allocation55_spill] sm:$0xff] %v12984_v47  ;;  %v9996_v39 = vpop.eup %9995  ;;  %10017 = vpow2.f32 %v8197_v7  ;;  %v8202_v28 = vmul.f32 -1.442695, %v12963_v50  ;;  %v12991_v5 = vpop.permute.xlu0 %2743  ;;  %v8203_v22 = vmul.f32 -1.442695, %v12966_v57  ;;  %v12996_v32 = vadd.f32 %v15042_v0, %v2739_v53 }
 0x472   : >> { %v9998_v25 = vpop.eup %9997  ;;  %4897 = vst [vmem:[%s12621_s14 + $0x98] sm:$0xff] %v4828_v52  ;;  %10019 = vpow2.f32 %v8196_v26  ;;  %v8205_v17 = vmul.f32 -1.442695, %v12974_v29  ;;  %v4721_v7 = vmul.f32 %v9992_v46, %v12801_v21  ;;  %v8204_v6 = vmul.f32 -1.442695, %v12982_v12  ;;  %v13001_v10 = vpop.f32.mrb[56].mxu0 }
 0x473   : >> { %v10000_v48 = vpop.eup %9999  ;;  %10021 = vpow2.f32 %v8198_v24  ;;  %v13003_v52 = vpop.f32.mrb[56].mxu1  ;;  %v4723_v33 = vmul.f32 %v9994_v38, %v12806_v56  ;;  %v13009_v53 = vadd.f32 %v12762_v58, %v12991_v5  ;;  %v4724_v58 = vmul.f32 %v9998_v25, %v12817_v55 }
 0x474   : >> { %v10002_v47 = vpop.eup %10001  ;;  %v4725_v35 = vmul.f32 %v10000_v48, %v12822_v37  ;;  %10023 = vpow2.f32 %v8199_v9  ;;  %v13011_v21 = vpop.f32.mrb[57].mxu0  ;;  %v4722_v48 = vmul.f32 %v9996_v39, %v12809_v42  ;;  %v8206_v39 = vmul.f32 -1.442695, %v12996_v32 }
 0x475   : >> { %v10004_v26 = vpop.eup %10003  ;;  %v4727_v44 = vmul.f32 %v10002_v47, %v12825_v13  ;;  %v13013_v37 = vpop.f32.mrb[57].mxu1  ;;  %10025 = vpow2.f32 %v8201_v1 }
 0x476   : >> { %15043 = vst [vmem:[#allocation56_spill] sm:$0xff] %v13013_v37  ;;  %v10006_v46 = vpop.eup %10005  ;;  %v4829_v24 = vpack.c.bf16 %v4725_v35, %v4721_v7  ;;  %v4726_v0 = vmul.f32 %v10004_v26, %v12829_v31  ;;  %v13017_v56 = vpop.f32.mrb[58].mxu0  ;;  %10027 = vpow2.f32 %v8200_v4 }
 0x477   : >> { %v13019_v13 = vpop.f32.mrb[58].mxu1  ;;  %v13021_v47 = vpop.eup %10007  ;;  %v4831_v38 = vpack.c.bf16 %v4727_v44, %v4723_v33  ;;  %v4728_v9 = vmul.f32 %v10006_v46, %v12846_v45  ;;  %10029 = vpow2.f32 %v8202_v28  ;;  %v8207_v45 = vmul.f32 -1.442695, %v13009_v53 }
 0x478   : >> { %15044 = vst [vmem:[#allocation83_spill] sm:$0xff] %v13019_v13  ;;  %v13025_v37 = vpop.f32.mrb[59].mxu0  ;;  %v13027_v42 = vpop.f32.mrb[59].mxu1  ;;  %4898 = vst [vmem:[%s12621_s14 + $0xa0] sm:$0xff] %v4829_v24  ;;  %v4830_v35 = vpack.c.bf16 %v4726_v0, %v4722_v48  ;;  %10031 = vpow2.f32 %v8203_v22 }
 0x479   : >> { %15045 = vst [vmem:[#allocation84_spill] sm:$0xff] %v13025_v37  ;;  %15046 = vst [vmem:[#allocation85_spill] sm:$0xff] %v13027_v42  ;;  %v13029_v31 = vpop.eup %10009  ;;  %v4832_v55 = vpack.c.bf16 %v4728_v9, %v4724_v58  ;;  %10033 = vpow2.f32 %v8205_v17  ;;  %v13041_v28 = vpop.f32.mrb[60].mxu0 }
 0x47a   : >> { %v13033_v1 = vpop.eup %10011  ;;  %4900 = vst [vmem:[%s12621_s14 + $0xb0] sm:$0xff] %v4831_v38  ;;  %4899 = vst [vmem:[%s12621_s14 + $0xa8] sm:$0xff] %v4830_v35  ;;  %10035 = vpow2.f32 %v8204_v6  ;;  %v13043_v46 = vpop.f32.mrb[60].mxu1 }
 0x47b   : >> { %v13037_v44 = vpop.eup %10013  ;;  %4901 = vst [vmem:[%s12621_s14 + $0xb8] sm:$0xff] %v4832_v55  ;;  %10037 = vpow2.f32 %v8206_v39  ;;  %15047 = vst [vmem:[#allocation86_spill] sm:$0xff] %v13041_v28  ;;  %v13045_v22 = vpop.f32.mrb[61].mxu0  ;;  %v13057_v55 = vadd.f32 %v12764_v49, %v12991_v5 }
 0x47c   : >> { %v10016_v33 = vpop.eup %10015  ;;  %10039 = vpow2.f32 %v8207_v45  ;;  %15048 = vst [vmem:[#allocation87_spill] sm:$0xff] %v13043_v46  ;;  %15049 = vst [vmem:[#allocation88_spill] sm:$0xff] %v13045_v22  ;;  %v13047_v0 = vpop.f32.mrb[61].mxu1  ;;  %v15056_v46 = vld [vmem:[#allocation58_spill] sm:$0xff] }
 0x47d   : >> { %v10018_v25 = vpop.eup %10017  ;;  %v4349_v4 = vadd.f32 1.0, %v10016_v33  ;;  %15050 = vst [vmem:[#allocation89_spill] sm:$0xff] %v13047_v0  ;;  %v13049_v17 = vpop.f32.mrb[62].mxu0 }
 0x47e   : >> { %v10020_v7 = vpop.eup %10019  ;;  %v4351_v26 = vadd.f32 1.0, %v10018_v25  ;;  %15051 = vst [vmem:[#allocation90_spill] sm:$0xff] %v13049_v17  ;;  %v13051_v38 = vpop.f32.mrb[62].mxu1 }
 0x47f   : >> { %v10022_v48 = vpop.eup %10021  ;;  %10041 = vrcp.f32 %v4349_v4  ;;  %v4350_v24 = vadd.f32 1.0, %v10020_v7  ;;  %15052 = vst [vmem:[#allocation91_spill] sm:$0xff] %v13051_v38  ;;  %v13053_v9 = vpop.f32.mrb[63].mxu0  ;;  %v13063_v7 = vadd.f32 %v12770_v11, %v12991_v5  ;;  %v15055_v38 = vld [vmem:[#allocation57_spill] sm:$0xff] }
 0x480   : >> { %v10024_v6 = vpop.eup %10023  ;;  %10043 = vrcp.f32 %v4351_v26  ;;  %v4352_v58 = vadd.f32 1.0, %v10022_v48  ;;  %15053 = vst [vmem:[#allocation92_spill] sm:$0xff] %v13053_v9  ;;  %v13059_v45 = vpop.f32.mrb[63].mxu1  ;;  %v13067_v26 = vadd.f32 %v12772_v62, %v12991_v5  ;;  %v8209_v62 = vmul.f32 -1.442695, %v13057_v55 }
 0x481   : >> { %v10026_v35 = vpop.eup %10025  ;;  %10045 = vrcp.f32 %v4350_v24  ;;  %v4353_v39 = vadd.f32 1.0, %v10024_v6  ;;  %15054 = vst [vmem:[#allocation93_spill] sm:$0xff] %v13059_v45  ;;  %v2749_v25 = vpop.permute.xlu1 %2748 }
 0x482   : >> { %v10028_v33 = vpop.eup %10027  ;;  %10047 = vrcp.f32 %v4352_v58  ;;  %v4355_v4 = vadd.f32 1.0, %v10026_v35  ;;  %v13070_v49 = vadd.f32 %v12777_v30, %v2749_v25  ;;  %v13073_v58 = vadd.f32 %v12779_v60, %v2749_v25 }
 0x483   : >> { %v10030_v48 = vpop.eup %10029  ;;  %10049 = vrcp.f32 %v4353_v39  ;;  %v4354_v24 = vadd.f32 1.0, %v10028_v33  ;;  %v13076_v35 = vadd.f32 %v12782_v54, %v2749_v25  ;;  %v8208_v30 = vmul.f32 -1.442695, %v13063_v7 }
 0x484   : >> { %v10032_v6 = vpop.eup %10031  ;;  %10051 = vrcp.f32 %v4355_v4  ;;  %v4356_v45 = vadd.f32 1.0, %v10030_v48  ;;  %v8210_v33 = vmul.f32 -1.442695, %v13067_v26  ;;  %v8211_v60 = vmul.f32 -1.442695, %v13070_v49 }
 0x485   : >> { %v10034_v11 = vpop.eup %10033  ;;  %10053 = vrcp.f32 %v4354_v24  ;;  %v4357_v9 = vadd.f32 1.0, %v10032_v6  ;;  %v13083_v54 = vadd.f32 %v15055_v38, %v2749_v25  ;;  %v2754_v24 = vpop.permute.xlu0 %2753  ;;  %v8213_v0 = vmul.f32 -1.442695, %v13073_v58 }
 0x486   : >> { %v10036_v5 = vpop.eup %10035  ;;  %10055 = vrcp.f32 %v4356_v45  ;;  %v4359_v39 = vadd.f32 1.0, %v10034_v11  ;;  %v8212_v45 = vmul.f32 -1.442695, %v13076_v35  ;;  %v13088_v28 = vadd.f32 %v15056_v46, %v2754_v24 }
 0x487   : >> { %v10038_v4 = vpop.eup %10037  ;;  %10057 = vrcp.f32 %v4357_v9  ;;  %v4358_v48 = vadd.f32 1.0, %v10036_v5  ;;  %v15057_v9 = vld [vmem:[#allocation59_spill] sm:$0xff]  ;;  %v4729_v38 = vmul.f32 %v13021_v47, %v12849_v40  ;;  %v4730_v40 = vmul.f32 %v13033_v1, %v12869_v36 }
 0x488   : >> { %v10040_v17 = vpop.eup %10039  ;;  %10059 = vrcp.f32 %v4359_v39  ;;  %v4360_v6 = vadd.f32 1.0, %v10038_v4  ;;  %v13091_v5 = vadd.f32 %v15057_v9, %v2754_v24  ;;  %v15058_v39 = vld [vmem:[#allocation60_spill] sm:$0xff]  ;;  %v8214_v1 = vmul.f32 -1.442695, %v13083_v54 }
 0x489   : >> { %v10042_v11 = vpop.eup %10041  ;;  %10061 = vrcp.f32 %v4358_v48  ;;  %v4361_v22 = vadd.f32 1.0, %v10040_v17  ;;  %v13097_v4 = vadd.f32 %v15058_v39, %v2754_v24  ;;  %v4731_v17 = vmul.f32 %v13029_v31, %v12859_v41  ;;  %v15059_v48 = vld [vmem:[#allocation61_spill] sm:$0xff] }
 0x48a   : >> { %v10044_v42 = vpop.eup %10043  ;;  %v4733_v25 = vmul.f32 %v10042_v11, %v12923_v2  ;;  %10063 = vrcp.f32 %v4360_v6  ;;  %v13103_v9 = vadd.f32 %v15059_v48, %v2754_v24  ;;  %v13108_v11 = vpop.permute.xlu1 %2758  ;;  %v4732_v41 = vmul.f32 %v13037_v44, %v12878_v61 }
 0x48b   : >> { %v10046_v37 = vpop.eup %10045  ;;  %v4735_v46 = vmul.f32 %v10044_v42, %v12928_v14  ;;  %10065 = vrcp.f32 %v4361_v22  ;;  %v8215_v61 = vmul.f32 -1.442695, %v13088_v28  ;;  %v8216_v24 = vmul.f32 -1.442695, %v13097_v4 }
 0x48c   : >> { %v10048_v13 = vpop.eup %10047  ;;  %v4833_v2 = vpack.c.bf16 %v4733_v25, %v4729_v38  ;;  %v4734_v47 = vmul.f32 %v10046_v37, %v12933_v34  ;;  %10067 = vpow2.f32 %v8209_v62  ;;  %v15060_v34 = vld [vmem:[#allocation62_spill] sm:$0xff]  ;;  %v8218_v38 = vmul.f32 -1.442695, %v13103_v9 }
 0x48d   : >> { %v10050_v6 = vpop.eup %10049  ;;  %v4835_v14 = vpack.c.bf16 %v4735_v46, %v4731_v17  ;;  %v4736_v42 = vmul.f32 %v10048_v13, %v12942_v15  ;;  %10069 = vpow2.f32 %v8208_v30  ;;  %v13117_v37 = vadd.f32 %v15060_v34, %v13108_v11  ;;  %v15061_v15 = vld [vmem:[#allocation63_spill] sm:$0xff] }
 0x48e   : >> { %v10052_v31 = vpop.eup %10051  ;;  %4902 = vst [vmem:[%s12621_s14 + $0xc0] sm:$0xff] %v4833_v2  ;;  %v4834_v36 = vpack.c.bf16 %v4734_v47, %v4730_v40  ;;  %10071 = vpow2.f32 %v8210_v33  ;;  %v13123_v13 = vadd.f32 %v15061_v15, %v13108_v11  ;;  %v8217_v30 = vmul.f32 -1.442695, %v13091_v5 }
 0x48f   : >> { %v10054_v22 = vpop.eup %10053  ;;  %4904 = vst [vmem:[%s12621_s14 + $0xd0] sm:$0xff] %v4835_v14  ;;  %v4836_v62 = vpack.c.bf16 %v4736_v42, %v4732_v41  ;;  %10073 = vpow2.f32 %v8211_v60  ;;  %v4737_v60 = vmul.f32 %v10050_v6, %v12946_v59  ;;  %v8219_v17 = vmul.f32 -1.442695, %v13117_v37 }
 0x490   : >> { %v10056_v44 = vpop.eup %10055  ;;  %4903 = vst [vmem:[%s12621_s14 + $0xc8] sm:$0xff] %v4834_v36  ;;  %10075 = vpow2.f32 %v8213_v0  ;;  %v4739_v0 = vmul.f32 %v10052_v31, %v12953_v18  ;;  %v4738_v2 = vmul.f32 %v10054_v22, %v12956_v51  ;;  %v15062_v22 = vld [vmem:[#allocation64_spill] sm:$0xff] }
 0x491   : >> { %v10058_v33 = vpop.eup %10057  ;;  %4905 = vst [vmem:[%s12621_s14 + $0xd8] sm:$0xff] %v4836_v62  ;;  %10077 = vpow2.f32 %v8212_v45  ;;  %v8221_v45 = vmul.f32 -1.442695, %v13123_v13  ;;  %v4740_v6 = vmul.f32 %v10056_v44, %v12963_v50  ;;  %v13148_v62 = vadd.f32 %v15062_v22, %v13108_v11 }
 0x492   : >> { %v10060_v25 = vpop.eup %10059  ;;  %v4741_v39 = vmul.f32 %v10058_v33, %v12966_v57  ;;  %10079 = vpow2.f32 %v8214_v1 }
 0x493   : >> { %v10062_v46 = vpop.eup %10061  ;;  %v4743_v48 = vmul.f32 %v10060_v25, %v12974_v29  ;;  %10081 = vpow2.f32 %v8215_v61  ;;  %v2764_v25 = vpop.permute.xlu0 %2763 }
 0x494   : >> { %v10064_v40 = vpop.eup %10063  ;;  %v4837_v47 = vpack.c.bf16 %v4741_v39, %v4737_v60  ;;  %v4742_v59 = vmul.f32 %v10062_v46, %v12982_v12  ;;  %10083 = vpow2.f32 %v8217_v30  ;;  %v8220_v39 = vmul.f32 -1.442695, %v13148_v62 }
 0x495   : >> { %v13138_v57 = vpop.eup %10065  ;;  %v4839_v41 = vpack.c.bf16 %v4743_v48, %v4739_v0  ;;  %v4744_v18 = vmul.f32 %v10064_v40, %v12996_v32  ;;  %10085 = vpow2.f32 %v8216_v24  ;;  %v15063_v0 = vld [vmem:[#allocation65_spill] sm:$0xff] }
 0x496   : >> { %v10068_v29 = vpop.eup %10067  ;;  %4906 = vst [vmem:[%s12621_s14 + $0xe0] sm:$0xff] %v4837_v47  ;;  %v4838_v14 = vpack.c.bf16 %v4742_v59, %v4738_v2  ;;  %10087 = vpow2.f32 %v8218_v38  ;;  %v13153_v48 = vadd.f32 %v15063_v0, %v13108_v11  ;;  %v2769_v47 = vpop.permute.xlu1 %2768 }
 0x497   : >> { %v10070_v42 = vpop.eup %10069  ;;  %4908 = vst [vmem:[%s12621_s14 + $0xf0] sm:$0xff] %v4839_v41  ;;  %v4840_v51 = vpack.c.bf16 %v4744_v18, %v4740_v6  ;;  %v4363_v31 = vadd.f32 1.0, %v10068_v29  ;;  %10089 = vpow2.f32 %v8219_v17  ;;  %v15065_v6 = vld [vmem:[#allocation67_spill] sm:$0xff]  ;;  %v15066_v18 = vld [vmem:[#allocation68_spill] sm:$0xff]  ;;  %v13168_v11 = vadd.f32 %v12851_v63, %v2769_v47 }
 0x498   : >> { %v10072_v12 = vpop.eup %10071  ;;  %4907 = vst [vmem:[%s12621_s14 + $0xe8] sm:$0xff] %v4838_v14  ;;  %v4362_v36 = vadd.f32 1.0, %v10070_v42  ;;  %10091 = vpow2.f32 %v8221_v45  ;;  %v15064_v45 = vld [vmem:[#allocation66_spill] sm:$0xff]  ;;  %v13159_v41 = vadd.f32 %v15065_v6, %v2764_v25  ;;  %v13162_v29 = vadd.f32 %v15066_v18, %v2764_v25 }
 0x499   : >> { %v10074_v1 = vpop.eup %10073  ;;  %4909 = vst [vmem:[%s12621_s14 + $0xf8] sm:$0xff] %v4840_v51  ;;  %10093 = vrcp.f32 %v4363_v31  ;;  %v4364_v50 = vadd.f32 1.0, %v10072_v12  ;;  %v13156_v40 = vadd.f32 %v15064_v45, %v2764_v25  ;;  %v15067_v51 = vld [vmem:[#allocation69_spill] sm:$0xff]  ;;  %v4745_v18 = vmul.f32 %v13138_v57, %v13009_v53 }
 0x49a   : >> { %v10076_v32 = vpop.eup %10075  ;;  %10095 = vrcp.f32 %v4362_v36  ;;  %v4365_v34 = vadd.f32 1.0, %v10074_v1  ;;  %v13165_v31 = vadd.f32 %v15067_v51, %v2764_v25  ;;  %v15068_v1 = vld [vmem:[#allocation70_spill] sm:$0xff]  ;;  %v8225_v63 = vmul.f32 -1.442695, %v13159_v41 }
 0x49b   : >> { %v10078_v61 = vpop.eup %10077  ;;  %10097 = vrcp.f32 %v4364_v50  ;;  %v4367_v15 = vadd.f32 1.0, %v10076_v32  ;;  %v13171_v50 = vadd.f32 %v15068_v1, %v2769_v47  ;;  %v15069_v32 = vld [vmem:[#allocation71_spill] sm:$0xff] }
 0x49c   : >> { %v10080_v44 = vpop.eup %10079  ;;  %10099 = vrcp.f32 %v4365_v34  ;;  %v4366_v30 = vadd.f32 1.0, %v10078_v61  ;;  %v13174_v34 = vadd.f32 %v15069_v32, %v2769_v47  ;;  %v8226_v25 = vmul.f32 -1.442695, %v13165_v31 }
 0x49d   : >> { %v10082_v33 = vpop.eup %10081  ;;  %10101 = vrcp.f32 %v4367_v15  ;;  %v4368_v24 = vadd.f32 1.0, %v10080_v44  ;;  %v8222_v15 = vmul.f32 -1.442695, %v13153_v48  ;;  %v8229_v45 = vmul.f32 -1.442695, %v13171_v50 }
 0x49e   : >> { %v10084_v38 = vpop.eup %10083  ;;  %10103 = vrcp.f32 %v4366_v30  ;;  %v4369_v60 = vadd.f32 1.0, %v10082_v33  ;;  %v8223_v30 = vmul.f32 -1.442695, %v13156_v40  ;;  %v8224_v33 = vmul.f32 -1.442695, %v13162_v29 }
 0x49f   : >> { %v10086_v17 = vpop.eup %10085  ;;  %10105 = vrcp.f32 %v4368_v24  ;;  %v4371_v46 = vadd.f32 1.0, %v10084_v38  ;;  %v13180_v38 = vpop.permute.xlu0 %2773 }
 0x4a0   : >> { %v10088_v2 = vpop.eup %10087  ;;  %10107 = vrcp.f32 %v4369_v60  ;;  %v4370_v59 = vadd.f32 1.0, %v10086_v17  ;;  %v8227_v60 = vmul.f32 -1.442695, %v13168_v11  ;;  %v15070_v17 = vld [vmem:[#allocation72_spill] sm:$0xff] }
 0x4a1   : >> { %v10090_v14 = vpop.eup %10089  ;;  %10109 = vrcp.f32 %v4371_v46  ;;  %v4372_v42 = vadd.f32 1.0, %v10088_v2  ;;  %v13185_v46 = vadd.f32 %v15070_v17, %v2769_v47  ;;  %v8228_v2 = vmul.f32 -1.442695, %v13174_v34 }
 0x4a2   : >> { %v10092_v12 = vpop.eup %10091  ;;  %10111 = vrcp.f32 %v4370_v59  ;;  %v4373_v36 = vadd.f32 1.0, %v10090_v14  ;;  %v13191_v59 = vadd.f32 %v12882_v27, %v13180_v38  ;;  %v13198_v47 = vadd.f32 %v12884_v3, %v13180_v38 }
 0x4a3   : >> { %v10094_v22 = vpop.eup %10093  ;;  %10113 = vrcp.f32 %v4372_v42  ;;  %v4375_v61 = vadd.f32 1.0, %v10092_v12  ;;  %v13204_v27 = vadd.f32 %v12890_v43, %v13180_v38  ;;  %v8230_v32 = vmul.f32 -1.442695, %v13185_v46 }
 0x4a4   : >> { %v10096_v44 = vpop.eup %10095  ;;  %10115 = vrcp.f32 %v4373_v36  ;;  %v4747_v42 = vmul.f32 %v10094_v22, %v13057_v55  ;;  %v8231_v22 = vmul.f32 -1.442695, %v13191_v59 }
 0x4a5   : >> { %v10098_v24 = vpop.eup %10097  ;;  %10117 = vrcp.f32 %v4375_v61  ;;  %v4746_v53 = vmul.f32 %v10096_v44, %v13063_v7 }
 0x4a6   : >> { %v10100_v0 = vpop.eup %10099  ;;  %10119 = vpow2.f32 %v8220_v39  ;;  %v4748_v36 = vmul.f32 %v10098_v24, %v13067_v26  ;;  %v8233_v26 = vmul.f32 -1.442695, %v13198_v47 }
 0x4a7   : >> { %v10102_v6 = vpop.eup %10101  ;;  %v4749_v14 = vmul.f32 %v10100_v0, %v13070_v49  ;;  %10121 = vpow2.f32 %v8222_v15  ;;  %v8232_v15 = vmul.f32 -1.442695, %v13204_v27 }
 0x4a8   : >> { %v10104_v39 = vpop.eup %10103  ;;  %v4751_v51 = vmul.f32 %v10102_v6, %v13073_v58  ;;  %10123 = vpow2.f32 %v8223_v30 }
 0x4a9   : >> { %v10106_v12 = vpop.eup %10105  ;;  %v4841_v49 = vpack.c.bf16 %v4749_v14, %v4745_v18  ;;  %v4750_v57 = vmul.f32 %v10104_v39, %v13076_v35  ;;  %10125 = vpow2.f32 %v8225_v63  ;;  %v2779_v39 = vpop.permute.xlu1 %2778 }
 0x4aa   : >> { %v10108_v3 = vpop.eup %10107  ;;  %v4843_v55 = vpack.c.bf16 %v4751_v51, %v4747_v42  ;;  %v4752_v58 = vmul.f32 %v10106_v12, %v13083_v54  ;;  %10127 = vpow2.f32 %v8224_v33  ;;  %v13230_v12 = vadd.f32 %v12892_v20, %v13180_v38  ;;  %v2784_v38 = vpop.permute.xlu0 %2783 }
 0x4ab   : >> { %v10110_v1 = vpop.eup %10109  ;;  %4910 = vst [vmem:[%s12621_s14 + $0x100] sm:$0xff] %v4841_v49  ;;  %v4842_v43 = vpack.c.bf16 %v4750_v57, %v4746_v53  ;;  %10129 = vpow2.f32 %v8226_v25  ;;  %v4753_v30 = vmul.f32 %v10108_v3, %v13088_v28  ;;  %v13233_v53 = vadd.f32 %v12896_v16, %v2779_v39 }
 0x4ac   : >> { %v13212_v7 = vpop.eup %10111  ;;  %4912 = vst [vmem:[%s12621_s14 + $0x110] sm:$0xff] %v4843_v55  ;;  %v4844_v35 = vpack.c.bf16 %v4752_v58, %v4748_v36  ;;  %10131 = vpow2.f32 %v8227_v60  ;;  %v4755_v24 = vmul.f32 %v10110_v1, %v13091_v5  ;;  %v13236_v55 = vadd.f32 %v12898_v23, %v2779_v39 }
 0x4ad   : >> { %v13216_v61 = vpop.eup %10113  ;;  %4911 = vst [vmem:[%s12621_s14 + $0x108] sm:$0xff] %v4842_v43  ;;  %10133 = vpow2.f32 %v8229_v45  ;;  %v13239_v58 = vadd.f32 %v12903_v8, %v2779_v39  ;;  %v13244_v23 = vadd.f32 %v12905_v19, %v2779_v39  ;;  %v15075_v39 = vld [vmem:[#allocation50_spill] sm:$0xff] }
 0x4ae   : >> { %v10116_v54 = vpop.eup %10115  ;;  %4913 = vst [vmem:[%s12621_s14 + $0x118] sm:$0xff] %v4844_v35  ;;  %10135 = vpow2.f32 %v8228_v2  ;;  %v8235_v35 = vmul.f32 -1.442695, %v13233_v53 }
 0x4af   : >> { %v10118_v44 = vpop.eup %10117  ;;  %v4757_v63 = vmul.f32 %v10116_v54, %v13117_v37  ;;  %10137 = vpow2.f32 %v8230_v32  ;;  %v8234_v32 = vmul.f32 -1.442695, %v13230_v12  ;;  %v15071_v54 = vld [vmem:[#allocation73_spill] sm:$0xff] }
 0x4b0   : >> { %v10120_v33 = vpop.eup %10119  ;;  %v4759_v25 = vmul.f32 %v10118_v44, %v13123_v13  ;;  %10139 = vpow2.f32 %v8231_v22  ;;  %v13247_v8 = vadd.f32 %v15071_v54, %v2784_v38 }
 0x4b1   : >> { %v10122_v60 = vpop.eup %10121  ;;  %v4845_v17 = vpack.c.bf16 %v4757_v63, %v4753_v30  ;;  %v4374_v0 = vadd.f32 1.0, %v10120_v33  ;;  %10141 = vpow2.f32 %v8233_v26  ;;  %v8237_v30 = vmul.f32 -1.442695, %v13236_v55 }
 0x4b2   : >> { %v10124_v45 = vpop.eup %10123  ;;  %v4847_v2 = vpack.c.bf16 %v4759_v25, %v4755_v24  ;;  %v4376_v6 = vadd.f32 1.0, %v10122_v60  ;;  %10143 = vpow2.f32 %v8232_v15  ;;  %v8236_v63 = vmul.f32 -1.442695, %v13239_v58  ;;  %v15072_v25 = vld [vmem:[#allocation74_spill] sm:$0xff] }
 0x4b3   : >> { %v10126_v28 = vpop.eup %10125  ;;  %4914 = vst [vmem:[%s12621_s14 + $0x120] sm:$0xff] %v4845_v17  ;;  %10145 = vrcp.f32 %v4374_v0  ;;  %v4377_v37 = vadd.f32 1.0, %v10124_v45  ;;  %v13252_v60 = vadd.f32 %v15072_v25, %v2784_v38  ;;  %v15073_v17 = vld [vmem:[#allocation75_spill] sm:$0xff]  ;;  %v2789_v45 = vpop.permute.xlu1 %2788 }
 0x4b4   : >> { %v10128_v18 = vpop.eup %10127  ;;  %4916 = vst [vmem:[%s12621_s14 + $0x130] sm:$0xff] %v4847_v2  ;;  %10147 = vrcp.f32 %v4376_v6  ;;  %v4379_v5 = vadd.f32 1.0, %v10126_v28  ;;  %v13255_v0 = vadd.f32 %v15073_v17, %v2784_v38  ;;  %v4754_v2 = vmul.f32 %v13212_v7, %v13097_v4  ;;  %v15074_v28 = vld [vmem:[#allocation76_spill] sm:$0xff]  ;;  %v15076_v7 = vld [vmem:[#allocation51_spill] sm:$0xff] }
 0x4b5   : >> { %v10130_v14 = vpop.eup %10129  ;;  %10149 = vrcp.f32 %v4377_v37  ;;  %v4378_v13 = vadd.f32 1.0, %v10128_v18  ;;  %v13261_v37 = vadd.f32 %v15074_v28, %v2784_v38 }
 0x4b6   : >> { %v10132_v42 = vpop.eup %10131  ;;  %10151 = vrcp.f32 %v4379_v5  ;;  %v4380_v51 = vadd.f32 1.0, %v10130_v14  ;;  %v4756_v5 = vmul.f32 %v13216_v61, %v13103_v9  ;;  %v8239_v9 = vmul.f32 -1.442695, %v13247_v8  ;;  %v15077_v61 = vld [vmem:[#allocation52_spill] sm:$0xff] }
 0x4b7   : >> { %v10134_v49 = vpop.eup %10133  ;;  %10153 = vrcp.f32 %v4378_v13  ;;  %v4381_v57 = vadd.f32 1.0, %v10132_v42  ;;  %v13267_v13 = vadd.f32 %v15075_v39, %v2789_v45 }
 0x4b8   : >> { %v10136_v3 = vpop.eup %10135  ;;  %10155 = vrcp.f32 %v4380_v51  ;;  %v4383_v36 = vadd.f32 1.0, %v10134_v49  ;;  %v13271_v51 = vadd.f32 %v15076_v7, %v2789_v45 }
 0x4b9   : >> { %v10138_v1 = vpop.eup %10137  ;;  %10157 = vrcp.f32 %v4381_v57  ;;  %v4382_v43 = vadd.f32 1.0, %v10136_v3  ;;  %v8243_v38 = vmul.f32 -1.442695, %v13267_v13 }
 0x4ba   : >> { %v10140_v20 = vpop.eup %10139  ;;  %10159 = vrcp.f32 %v4383_v36  ;;  %v4384_v16 = vadd.f32 1.0, %v10138_v1  ;;  %v8241_v36 = vmul.f32 -1.442695, %v13252_v60  ;;  %v8240_v1 = vmul.f32 -1.442695, %v13255_v0 }
 0x4bb   : >> { %v10142_v22 = vpop.eup %10141  ;;  %10161 = vrcp.f32 %v4382_v43  ;;  %v4385_v26 = vadd.f32 1.0, %v10140_v20  ;;  %v8242_v20 = vmul.f32 -1.442695, %v13261_v37  ;;  %v8245_v54 = vmul.f32 -1.442695, %v13271_v51 }
 0x4bc   : >> { %v10144_v15 = vpop.eup %10143  ;;  %10163 = vrcp.f32 %v4384_v16  ;;  %v4387_v44 = vadd.f32 1.0, %v10142_v22  ;;  %v15078_v16 = vld [vmem:[#allocation77_spill] sm:$0xff] }
 0x4bd   : >> { %v10146_v33 = vpop.eup %10145  ;;  %10165 = vrcp.f32 %v4385_v26  ;;  %v4386_v24 = vadd.f32 1.0, %v10144_v15 }
 0x4be   : >> { %v10148_v19 = vpop.eup %10147  ;;  %v4758_v6 = vmul.f32 %v10146_v33, %v13148_v62  ;;  %10167 = vrcp.f32 %v4387_v44  ;;  %v8238_v62 = vmul.f32 -1.442695, %v13244_v23 }
 0x4bf   : >> { %v10150_v18 = vpop.eup %10149  ;;  %v4760_v14 = vmul.f32 %v10148_v19, %v13153_v48  ;;  %10169 = vrcp.f32 %v4386_v24  ;;  %v13275_v48 = vadd.f32 %v15077_v61, %v2789_v45 }
 0x4c0   : >> { %v10152_v42 = vpop.eup %10151  ;;  %v4846_v4 = vpack.c.bf16 %v4758_v6, %v4754_v2  ;;  %10171 = vpow2.f32 %v8234_v32  ;;  %v13284_v32 = vadd.f32 %v15078_v16, %v2789_v45  ;;  %v4761_v22 = vmul.f32 %v10150_v18, %v13156_v40 }
 0x4c1   : >> { %v10154_v49 = vpop.eup %10153  ;;  %v4848_v57 = vpack.c.bf16 %v4760_v14, %v4756_v5  ;;  %10173 = vpow2.f32 %v8235_v35  ;;  %v4763_v44 = vmul.f32 %v10152_v42, %v13159_v41 }
 0x4c2   : >> { %v10156_v3 = vpop.eup %10155  ;;  %4915 = vst [vmem:[%s12621_s14 + $0x128] sm:$0xff] %v4846_v4  ;;  %10175 = vpow2.f32 %v8237_v30  ;;  %v4762_v24 = vmul.f32 %v10154_v49, %v13162_v29  ;;  %v8246_v29 = vmul.f32 -1.442695, %v13284_v32  ;;  %v2794_v49 = vpop.permute.xlu0 %2793 }
 0x4c3   : >> { %v10158_v43 = vpop.eup %10157  ;;  %4917 = vst [vmem:[%s12621_s14 + $0x138] sm:$0xff] %v4848_v57  ;;  %10177 = vpow2.f32 %v8236_v63  ;;  %v8244_v63 = vmul.f32 -1.442695, %v13275_v48  ;;  %v4764_v17 = vmul.f32 %v10156_v3, %v13165_v31  ;;  %v15079_v3 = vld [vmem:[#allocation53_spill] sm:$0xff] }
 0x4c4   : >> { %v10160_v35 = vpop.eup %10159  ;;  %v4765_v26 = vmul.f32 %v10158_v43, %v13168_v11  ;;  %10179 = vpow2.f32 %v8238_v62  ;;  %v2799_v43 = vpop.permute.xlu1 %2798 }
 0x4c5   : >> { %v10162_v15 = vpop.eup %10161  ;;  %v4767_v30 = vmul.f32 %v10160_v35, %v13171_v50  ;;  %10181 = vpow2.f32 %v8239_v9  ;;  %v15081_v35 = vld [vmem:[#allocation79_spill] sm:$0xff] }
 0x4c6   : >> { %v10164_v33 = vpop.eup %10163  ;;  %v4849_v25 = vpack.c.bf16 %v4765_v26, %v4761_v22  ;;  %v4766_v40 = vmul.f32 %v10162_v15, %v13174_v34  ;;  %10183 = vpow2.f32 %v8241_v36  ;;  %v13308_v36 = vadd.f32 %v15079_v3, %v2794_v49  ;;  %v15082_v15 = vld [vmem:[#allocation80_spill] sm:$0xff] }
 0x4c7   : >> { %v13294_v11 = vpop.eup %10165  ;;  %v4851_v19 = vpack.c.bf16 %v4767_v30, %v4763_v44  ;;  %v4768_v41 = vmul.f32 %v10164_v33, %v13185_v46  ;;  %10185 = vpow2.f32 %v8240_v1  ;;  %v13314_v22 = vadd.f32 %v15081_v35, %v2794_v49  ;;  %v15083_v30 = vld [vmem:[#allocation81_spill] sm:$0xff] }
 0x4c8   : >> { %v13298_v50 = vpop.eup %10167  ;;  %4918 = vst [vmem:[%s12621_s14 + $0x140] sm:$0xff] %v4849_v25  ;;  %v4850_v45 = vpack.c.bf16 %v4766_v40, %v4762_v24  ;;  %10187 = vpow2.f32 %v8242_v20  ;;  %v13317_v44 = vadd.f32 %v15082_v15, %v2794_v49  ;;  %v15084_v25 = vld [vmem:[#allocation54_spill] sm:$0xff] }
 0x4c9   : >> { %v13302_v2 = vpop.eup %10169  ;;  %4920 = vst [vmem:[%s12621_s14 + $0x150] sm:$0xff] %v4851_v19  ;;  %v4852_v34 = vpack.c.bf16 %v4768_v41, %v4764_v17  ;;  %10189 = vpow2.f32 %v8243_v38  ;;  %v15080_v38 = vld [vmem:[#allocation78_spill] sm:$0xff]  ;;  %v13323_v40 = vadd.f32 %v15084_v25, %v2799_v43 }
 0x4ca   : >> { %v10172_v6 = vpop.eup %10171  ;;  %4919 = vst [vmem:[%s12621_s14 + $0x148] sm:$0xff] %v4850_v45  ;;  %10191 = vpow2.f32 %v8245_v54  ;;  %v13311_v16 = vadd.f32 %v15080_v38, %v2794_v49  ;;  %v15085_v17 = vld [vmem:[#allocation82_spill] sm:$0xff] }
 0x4cb   : >> { %v10174_v31 = vpop.eup %10173  ;;  %4921 = vst [vmem:[%s12621_s14 + $0x158] sm:$0xff] %v4852_v34  ;;  %v4388_v28 = vadd.f32 1.0, %v10172_v6  ;;  %10193 = vpow2.f32 %v8244_v63  ;;  %v13320_v63 = vadd.f32 %v15083_v30, %v2799_v43  ;;  %v13326_v19 = vadd.f32 %v15085_v17, %v2799_v43 }
 0x4cc   : >> { %v10176_v46 = vpop.eup %10175  ;;  %v4389_v18 = vadd.f32 1.0, %v10174_v31  ;;  %10195 = vpow2.f32 %v8246_v29  ;;  %v8247_v29 = vmul.f32 -1.442695, %v13308_v36  ;;  %v8249_v31 = vmul.f32 -1.442695, %v13311_v16 }
 0x4cd   : >> { %v10178_v5 = vpop.eup %10177  ;;  %10197 = vrcp.f32 %v4388_v28  ;;  %v4391_v14 = vadd.f32 1.0, %v10176_v46  ;;  %v8248_v28 = vmul.f32 -1.442695, %v13314_v22 }
 0x4ce   : >> { %v10180_v39 = vpop.eup %10179  ;;  %10199 = vrcp.f32 %v4389_v18  ;;  %v4390_v42 = vadd.f32 1.0, %v10178_v5  ;;  %v8250_v5 = vmul.f32 -1.442695, %v13317_v44 }
 0x4cf   : >> { %v10182_v4 = vpop.eup %10181  ;;  %10201 = vrcp.f32 %v4391_v14  ;;  %v4392_v62 = vadd.f32 1.0, %v10180_v39  ;;  %v8251_v14 = vmul.f32 -1.442695, %v13320_v63 }
 0x4d0   : >> { %v10184_v7 = vpop.eup %10183  ;;  %10203 = vrcp.f32 %v4390_v42  ;;  %v4393_v57 = vadd.f32 1.0, %v10182_v4  ;;  %v13333_v42 = vpop.permute.xlu0 %2803  ;;  %v8253_v4 = vmul.f32 -1.442695, %v13323_v40 }
 0x4d1   : >> { %v10186_v9 = vpop.eup %10185  ;;  %10205 = vrcp.f32 %v4392_v62  ;;  %v4395_v61 = vadd.f32 1.0, %v10184_v7  ;;  %v8252_v62 = vmul.f32 -1.442695, %v13326_v19  ;;  %v15086_v7 = vld [vmem:[#allocation55_spill] sm:$0xff]  ;;  %v13345_v3 = vadd.f32 %v13001_v10, %v13333_v42 }
 0x4d2   : >> { %v10188_v1 = vpop.eup %10187  ;;  %10207 = vrcp.f32 %v4393_v57  ;;  %v4394_v20 = vadd.f32 1.0, %v10186_v9  ;;  %v13338_v49 = vadd.f32 %v15086_v7, %v2799_v43  ;;  %v4769_v9 = vmul.f32 %v13294_v11, %v13191_v59 }
 0x4d3   : >> { %v10190_v26 = vpop.eup %10189  ;;  %10209 = vrcp.f32 %v4395_v61  ;;  %v4396_v54 = vadd.f32 1.0, %v10188_v1  ;;  %v13352_v43 = vadd.f32 %v13003_v52, %v13333_v42  ;;  %v13359_v52 = vpop.permute.xlu1 %2808 }
 0x4d4   : >> { %v10192_v33 = vpop.eup %10191  ;;  %10211 = vrcp.f32 %v4394_v20  ;;  %v4397_v24 = vadd.f32 1.0, %v10190_v26  ;;  %v4771_v20 = vmul.f32 %v13298_v50, %v13198_v47  ;;  %v13371_v15 = vadd.f32 %v13017_v56, %v13359_v52 }
 0x4d5   : >> { %v10194_v41 = vpop.eup %10193  ;;  %10213 = vrcp.f32 %v4396_v54  ;;  %v4399_v45 = vadd.f32 1.0, %v10192_v33  ;;  %v8257_v33 = vmul.f32 -1.442695, %v13352_v43 }
 0x4d6   : >> { %v10196_v34 = vpop.eup %10195  ;;  %10215 = vrcp.f32 %v4397_v24  ;;  %v4398_v6 = vadd.f32 1.0, %v10194_v41 }
 0x4d7   : >> { %v10198_v46 = vpop.eup %10197  ;;  %10217 = vrcp.f32 %v4399_v45  ;;  %v4400_v18 = vadd.f32 1.0, %v10196_v34  ;;  %v8259_v34 = vmul.f32 -1.442695, %v13371_v15 }
 0x4d8   : >> { %v10200_v39 = vpop.eup %10199  ;;  %10219 = vrcp.f32 %v4398_v6  ;;  %v4772_v47 = vmul.f32 %v10198_v46, %v13230_v12 }
 0x4d9   : >> { %v10202_v57 = vpop.eup %10201  ;;  %v4773_v61 = vmul.f32 %v10200_v39, %v13233_v53  ;;  %10221 = vrcp.f32 %v4400_v18  ;;  %v4770_v53 = vmul.f32 %v13302_v2, %v13204_v27  ;;  %v8254_v27 = vmul.f32 -1.442695, %v13338_v49 }
 0x4da   : >> { %v10204_v1 = vpop.eup %10203  ;;  %v4775_v38 = vmul.f32 %v10202_v57, %v13236_v55  ;;  %10223 = vpow2.f32 %v8247_v29 }
 0x4db   : >> { %v10206_v59 = vpop.eup %10205  ;;  %v4853_v11 = vpack.c.bf16 %v4773_v61, %v4769_v9  ;;  %v4774_v10 = vmul.f32 %v10204_v1, %v13239_v58  ;;  %10225 = vpow2.f32 %v8249_v31  ;;  %v13365_v58 = vadd.f32 %v13011_v21, %v13333_v42 }
 0x4dc   : >> { %v10208_v35 = vpop.eup %10207  ;;  %v4855_v50 = vpack.c.bf16 %v4775_v38, %v4771_v20  ;;  %v4776_v55 = vmul.f32 %v10206_v59, %v13244_v23  ;;  %10227 = vpow2.f32 %v8248_v28  ;;  %v8255_v23 = vmul.f32 -1.442695, %v13345_v3 }
 0x4dd   : >> { %v10210_v26 = vpop.eup %10209  ;;  %4922 = vst [vmem:[%s12621_s14 + $0x160] sm:$0xff] %v4853_v11  ;;  %v4854_v54 = vpack.c.bf16 %v4774_v10, %v4770_v53  ;;  %10229 = vpow2.f32 %v8250_v5  ;;  %v4777_v25 = vmul.f32 %v10208_v35, %v13247_v8  ;;  %v8256_v41 = vmul.f32 -1.442695, %v13365_v58  ;;  %v15088_v11 = vld [vmem:[#allocation83_spill] sm:$0xff] }
 0x4de   : >> { %v10212_v2 = vpop.eup %10211  ;;  %4924 = vst [vmem:[%s12621_s14 + $0x170] sm:$0xff] %v4855_v50  ;;  %v4856_v12 = vpack.c.bf16 %v4776_v55, %v4772_v47  ;;  %10231 = vpow2.f32 %v8251_v14  ;;  %v4779_v56 = vmul.f32 %v10210_v26, %v13252_v60  ;;  %v13397_v10 = vadd.f32 %v15088_v11, %v13359_v52  ;;  %v15089_v47 = vld [vmem:[#allocation84_spill] sm:$0xff] }
 0x4df   : >> { %v10214_v30 = vpop.eup %10213  ;;  %4923 = vst [vmem:[%s12621_s14 + $0x168] sm:$0xff] %v4854_v54  ;;  %10233 = vpow2.f32 %v8253_v4  ;;  %v4778_v31 = vmul.f32 %v10212_v2, %v13255_v0  ;;  %v13401_v50 = vadd.f32 %v15089_v47, %v13359_v52  ;;  %v2814_v54 = vpop.permute.xlu0 %2813  ;;  %v15090_v2 = vld [vmem:[#allocation85_spill] sm:$0xff] }
 0x4e0   : >> { %v10216_v24 = vpop.eup %10215  ;;  %4925 = vst [vmem:[%s12621_s14 + $0x178] sm:$0xff] %v4856_v12  ;;  %10235 = vpow2.f32 %v8252_v62  ;;  %v4780_v46 = vmul.f32 %v10214_v30, %v13261_v37  ;;  %v15087_v37 = vld [vmem:[#allocation56_spill] sm:$0xff]  ;;  %v13405_v12 = vadd.f32 %v15090_v2, %v13359_v52  ;;  %v8261_v30 = vmul.f32 -1.442695, %v13397_v10 }
 0x4e1   : >> { %v10218_v21 = vpop.eup %10217  ;;  %v4781_v17 = vmul.f32 %v10216_v24, %v13267_v13  ;;  %10237 = vpow2.f32 %v8254_v27  ;;  %v13391_v7 = vadd.f32 %v15087_v37, %v13333_v42 }
 0x4e2   : >> { %v10220_v45 = vpop.eup %10219  ;;  %v4783_v29 = vmul.f32 %v10218_v21, %v13271_v51  ;;  %10239 = vpow2.f32 %v8255_v23 }
 0x4e3   : >> { %v10222_v6 = vpop.eup %10221  ;;  %v4857_v28 = vpack.c.bf16 %v4781_v17, %v4777_v25  ;;  %v4782_v8 = vmul.f32 %v10220_v45, %v13275_v48  ;;  %10241 = vpow2.f32 %v8257_v33  ;;  %v8258_v53 = vmul.f32 -1.442695, %v13391_v7  ;;  %v15091_v33 = vld [vmem:[#allocation86_spill] sm:$0xff]  ;;  %v2819_v25 = vpop.permute.xlu1 %2818 }
 0x4e4   : >> { %v10224_v13 = vpop.eup %10223  ;;  %v4859_v18 = vpack.c.bf16 %v4783_v29, %v4779_v56  ;;  %v4784_v60 = vmul.f32 %v10222_v6, %v13284_v32  ;;  %10243 = vpow2.f32 %v8256_v41  ;;  %v13409_v24 = vadd.f32 %v15091_v33, %v2814_v54  ;;  %v15092_v41 = vld [vmem:[#allocation87_spill] sm:$0xff]  ;;  %v15093_v56 = vld [vmem:[#allocation88_spill] sm:$0xff] }
 0x4e5   : >> { %v10226_v5 = vpop.eup %10225  ;;  %4926 = vst [vmem:[%s12621_s14 + $0x180] sm:$0xff] %v4857_v28  ;;  %v4858_v51 = vpack.c.bf16 %v4782_v8, %v4778_v31  ;;  %v4401_v14 = vadd.f32 1.0, %v10224_v13  ;;  %10245 = vpow2.f32 %v8259_v34  ;;  %v8260_v17 = vmul.f32 -1.442695, %v13401_v50  ;;  %v15094_v34 = vld [vmem:[#allocation89_spill] sm:$0xff]  ;;  %v15095_v28 = vld [vmem:[#allocation90_spill] sm:$0xff] }
 0x4e6   : >> { %v10228_v39 = vpop.eup %10227  ;;  %4928 = vst [vmem:[%s12621_s14 + $0x190] sm:$0xff] %v4859_v18  ;;  %v4860_v0 = vpack.c.bf16 %v4784_v60, %v4780_v46  ;;  %v4403_v4 = vadd.f32 1.0, %v10226_v5  ;;  %v13413_v45 = vadd.f32 %v15092_v41, %v2814_v54  ;;  %v13416_v29 = vadd.f32 %v15093_v56, %v2814_v54  ;;  %v15096_v13 = vld [vmem:[#allocation91_spill] sm:$0xff] }
 0x4e7   : >> { %v10230_v48 = vpop.eup %10229  ;;  %4927 = vst [vmem:[%s12621_s14 + $0x188] sm:$0xff] %v4858_v51  ;;  %10247 = vrcp.f32 %v4401_v14  ;;  %v4402_v62 = vadd.f32 1.0, %v10228_v39  ;;  %v13419_v52 = vadd.f32 %v15094_v34, %v2814_v54  ;;  %v13422_v8 = vadd.f32 %v15095_v28, %v2819_v25  ;;  %v15097_v14 = vld [vmem:[#allocation92_spill] sm:$0xff] }
 0x4e8   : >> { %v10232_v32 = vpop.eup %10231  ;;  %4929 = vst [vmem:[%s12621_s14 + $0x198] sm:$0xff] %v4860_v0  ;;  %10249 = vrcp.f32 %v4403_v4  ;;  %v4404_v57 = vadd.f32 1.0, %v10230_v48  ;;  %v13425_v46 = vadd.f32 %v15096_v13, %v2819_v25  ;;  %v8262_v60 = vmul.f32 -1.442695, %v13405_v12 }
 0x4e9   : >> { %v10234_v9 = vpop.eup %10233  ;;  %10251 = vrcp.f32 %v4402_v62  ;;  %v4405_v61 = vadd.f32 1.0, %v10232_v32  ;;  %v8263_v51 = vmul.f32 -1.442695, %v13409_v24  ;;  %v13430_v39 = vadd.f32 %v15097_v14, %v2819_v25 }
 0x4ea   : >> { %v10236_v1 = vpop.eup %10235  ;;  %10253 = vrcp.f32 %v4404_v57  ;;  %v4407_v20 = vadd.f32 1.0, %v10234_v9  ;;  %v8265_v4 = vmul.f32 -1.442695, %v13413_v45  ;;  %v8264_v48 = vmul.f32 -1.442695, %v13416_v29 }
 0x4eb   : >> { %v10238_v38 = vpop.eup %10237  ;;  %10255 = vrcp.f32 %v4405_v61  ;;  %v4406_v59 = vadd.f32 1.0, %v10236_v1  ;;  %v8266_v37 = vmul.f32 -1.442695, %v13419_v52  ;;  %v8267_v32 = vmul.f32 -1.442695, %v13422_v8 }
 0x4ec   : >> { %v10240_v42 = vpop.eup %10239  ;;  %10257 = vrcp.f32 %v4407_v20  ;;  %v4408_v35 = vadd.f32 1.0, %v10238_v38  ;;  %v8269_v57 = vmul.f32 -1.442695, %v13425_v46  ;;  %v15098_v20 = vld [vmem:[#allocation93_spill] sm:$0xff] }
 0x4ed   : >> { %v10242_v55 = vpop.eup %10241  ;;  %10259 = vrcp.f32 %v4406_v59  ;;  %v4409_v26 = vadd.f32 1.0, %v10240_v42  ;;  %v13440_v38 = vadd.f32 %v15098_v20, %v2819_v25  ;;  %v8268_v42 = vmul.f32 -1.442695, %v13430_v39 }
 0x4ee   : >> { %10261 = vrcp.f32 %v4408_v35  ;;  %v4411_v27 = vadd.f32 1.0, %v10242_v55  ;;  %v10244_v23 = vpop.eup %10243 }
 0x4ef   : >> { %10263 = vpow2.f32 %v8258_v53  ;;  %v10246_v21 = vpop.eup %10245 }
 0x4f0   : >> { %10265 = vrcp.f32 %v4409_v26  ;;  %v4413_v31 = vadd.f32 1.0, %v10246_v21 }
 0x4f1   : >> { %v10248_v6 = vpop.eup %10247  ;;  %10267 = vrcp.f32 %v4411_v27  ;;  %v8270_v27 = vmul.f32 -1.442695, %v13440_v38 }
 0x4f2   : >> { %v10250_v18 = vpop.eup %10249  ;;  %10269 = vrcp.f32 %v4413_v31  ;;  %v4785_v61 = vmul.f32 %v10248_v6, %v13308_v36 }
 0x4f3   : >> { %v10252_v5 = vpop.eup %10251  ;;  %10271 = vpow2.f32 %v8261_v30  ;;  %v4787_v53 = vmul.f32 %v10250_v18, %v13311_v16  ;;  %v4410_v30 = vadd.f32 1.0, %v10244_v23 }
 0x4f4   : >> { %v10254_v0 = vpop.eup %10253  ;;  %10273 = vpow2.f32 %v8260_v17  ;;  %v4786_v47 = vmul.f32 %v10252_v5, %v13314_v22 }
 0x4f5   : >> { %v10256_v62 = vpop.eup %10255  ;;  %10275 = vpow2.f32 %v8262_v60  ;;  %v4788_v26 = vmul.f32 %v10254_v0, %v13317_v44 }
 0x4f6   : >> { %v10258_v9 = vpop.eup %10257  ;;  %v4789_v1 = vmul.f32 %v10256_v62, %v13320_v63  ;;  %10277 = vpow2.f32 %v8263_v51 }
 0x4f7   : >> { %v10260_v59 = vpop.eup %10259  ;;  %v4791_v11 = vmul.f32 %v10258_v9, %v13323_v40  ;;  %10279 = vpow2.f32 %v8265_v4 }
 0x4f8   : >> { %v10262_v35 = vpop.eup %10261  ;;  %v4861_v36 = vpack.c.bf16 %v4789_v1, %v4785_v61  ;;  %v4790_v63 = vmul.f32 %v10260_v59, %v13326_v19  ;;  %10281 = vpow2.f32 %v8264_v48 }
 0x4f9   : >> { %v10264_v55 = vpop.eup %10263  ;;  %v4863_v54 = vpack.c.bf16 %v4791_v11, %v4787_v53  ;;  %v4792_v16 = vmul.f32 %v10262_v35, %v13338_v49  ;;  %10283 = vpow2.f32 %v8266_v37 }
 0x4fa   : >> { %4930 = vst [vmem:[%s12621_s14 + $0x1a0] sm:$0xff] %v4861_v36  ;;  %v4862_v40 = vpack.c.bf16 %v4790_v63, %v4786_v47  ;;  %v10266_v2 = vpop.eup %10265  ;;  %10285 = vpow2.f32 %v8267_v32  ;;  %v4412_v33 = vadd.f32 1.0, %v10264_v55 }
 0x4fb   : >> { %4932 = vst [vmem:[%s12621_s14 + $0x1b0] sm:$0xff] %v4863_v54  ;;  %v4864_v22 = vpack.c.bf16 %v4792_v16, %v4788_v26  ;;  %v10268_v19 = vpop.eup %10267  ;;  %10287 = vpow2.f32 %v8269_v57  ;;  %v4793_v21 = vmul.f32 %v10266_v2, %v13345_v3 }
 0x4fc   : >> { %4931 = vst [vmem:[%s12621_s14 + $0x1a8] sm:$0xff] %v4862_v40  ;;  %v10270_v44 = vpop.eup %10269  ;;  %10289 = vpow2.f32 %v8268_v42  ;;  %v4795_v20 = vmul.f32 %v10268_v19, %v13352_v43 }
 0x4fd   : >> { %4933 = vst [vmem:[%s12621_s14 + $0x1b8] sm:$0xff] %v4864_v22  ;;  %v10272_v49 = vpop.eup %10271  ;;  %v4797_v25 = vmul.f32 %v10270_v44, %v13371_v15  ;;  %10291 = vpow2.f32 %v8270_v27 }
 0x4fe   : >> { %v10274_v17 = vpop.eup %10273  ;;  %10293 = vrcp.f32 %v4410_v30  ;;  %v4415_v41 = vadd.f32 1.0, %v10272_v49 }
 0x4ff   : >> { %v10276_v56 = vpop.eup %10275  ;;  %10295 = vrcp.f32 %v4412_v33  ;;  %v4865_v23 = vpack.c.bf16 %v4797_v25, %v4793_v21  ;;  %v4414_v34 = vadd.f32 1.0, %v10274_v17 }
 0x500   : >> { %v10278_v6 = vpop.eup %10277  ;;  %10297 = vrcp.f32 %v4415_v41  ;;  %v4416_v31 = vadd.f32 1.0, %v10276_v56 }
 0x501   : >> { %v10280_v28 = vpop.eup %10279  ;;  %4934 = vst [vmem:[%s12621_s14 + $0x1c0] sm:$0xff] %v4865_v23  ;;  %10299 = vrcp.f32 %v4414_v34  ;;  %v4417_v13 = vadd.f32 1.0, %v10278_v6 }
 0x502   : >> { %v10282_v18 = vpop.eup %10281  ;;  %10301 = vrcp.f32 %v4416_v31  ;;  %v4419_v3 = vadd.f32 1.0, %v10280_v28 }
 0x503   : >> { %v10284_v60 = vpop.eup %10283  ;;  %10303 = vrcp.f32 %v4417_v13  ;;  %v4418_v15 = vadd.f32 1.0, %v10282_v18 }
 0x504   : >> { %v10286_v5 = vpop.eup %10285  ;;  %10305 = vrcp.f32 %v4419_v3  ;;  %v4420_v51 = vadd.f32 1.0, %v10284_v60 }
 0x505   : >> { %v10288_v14 = vpop.eup %10287  ;;  %10307 = vrcp.f32 %v4418_v15  ;;  %v4421_v0 = vadd.f32 1.0, %v10286_v5 }
 0x506   : >> { %v10290_v4 = vpop.eup %10289  ;;  %10309 = vrcp.f32 %v4420_v51  ;;  %v4423_v48 = vadd.f32 1.0, %v10288_v14 }
 0x507   : >> { %v10292_v62 = vpop.eup %10291  ;;  %10311 = vrcp.f32 %v4421_v0  ;;  %v4422_v37 = vadd.f32 1.0, %v10290_v4 }
 0x508   : >> { %v10294_v32 = vpop.eup %10293  ;;  %10313 = vrcp.f32 %v4423_v48  ;;  %v4424_v57 = vadd.f32 1.0, %v10292_v62 }
 0x509   : >> { %v10296_v9 = vpop.eup %10295  ;;  %10315 = vrcp.f32 %v4422_v37  ;;  %v4794_v11 = vmul.f32 %v10294_v32, %v13365_v58 }
 0x50a   : >> { %v10298_v61 = vpop.eup %10297  ;;  %10317 = vrcp.f32 %v4424_v57  ;;  %v4796_v47 = vmul.f32 %v10296_v9, %v13391_v7 }
 0x50b   : >> { %v10300_v1 = vpop.eup %10299  ;;  %v4799_v59 = vmul.f32 %v10298_v61, %v13397_v10 }
 0x50c   : >> { %v10302_v53 = vpop.eup %10301  ;;  %v4798_v42 = vmul.f32 %v10300_v1, %v13401_v50 }
 0x50d   : >> { %v10304_v35 = vpop.eup %10303  ;;  %v4867_v36 = vpack.c.bf16 %v4799_v59, %v4795_v20  ;;  %v4800_v63 = vmul.f32 %v10302_v53, %v13405_v12 }
 0x50e   : >> { %v10306_v55 = vpop.eup %10305  ;;  %v4866_v26 = vpack.c.bf16 %v4798_v42, %v4794_v11  ;;  %v4801_v50 = vmul.f32 %v10304_v35, %v13409_v24 }
 0x50f   : >> { %v10308_v54 = vpop.eup %10307  ;;  %4936 = vst [vmem:[%s12621_s14 + $0x1d0] sm:$0xff] %v4867_v36  ;;  %v4868_v16 = vpack.c.bf16 %v4800_v63, %v4796_v47  ;;  %v4803_v12 = vmul.f32 %v10306_v55, %v13413_v45 }
 0x510   : >> { %v10310_v43 = vpop.eup %10309  ;;  %4935 = vst [vmem:[%s12621_s14 + $0x1c8] sm:$0xff] %v4866_v26  ;;  %v4802_v22 = vmul.f32 %v10308_v54, %v13416_v29 }
 0x511   : >> { %v10312_v10 = vpop.eup %10311  ;;  %4937 = vst [vmem:[%s12621_s14 + $0x1d8] sm:$0xff] %v4868_v16  ;;  %v4804_v33 = vmul.f32 %v10310_v43, %v13419_v52 }
 0x512   : >> { %v10314_v58 = vpop.eup %10313  ;;  %v4805_v7 = vmul.f32 %v10312_v10, %v13422_v8 }
 0x513   : >> { %v10316_v40 = vpop.eup %10315  ;;  %v4807_v27 = vmul.f32 %v10314_v58, %v13425_v46  ;;  %2428 = sbr.rel (!%p2426_p2) target bundleno = 610 (0x262), region = 158 }
 0x514   : >> { %v10318_v2 = vpop.eup %10317  ;;  %v4869_v30 = vpack.c.bf16 %v4805_v7, %v4801_v50  ;;  %v4806_v19 = vmul.f32 %v10316_v40, %v13430_v39 }
 0x515   : >> { %v4871_v44 = vpack.c.bf16 %v4807_v27, %v4803_v12  ;;  %v4808_v24 = vmul.f32 %v10318_v2, %v13440_v38 }
 0x516   : >> { %4938 = vst [vmem:[%s12621_s14 + $0x1e0] sm:$0xff] %v4869_v30  ;;  %v4870_v49 = vpack.c.bf16 %v4806_v19, %v4802_v22 }
 0x517   : >> { %4940 = vst [vmem:[%s12621_s14 + $0x1f0] sm:$0xff] %v4871_v44  ;;  %v4872_v8 = vpack.c.bf16 %v4808_v24, %v4804_v33 }
 0x518   : >> { %4939 = vst [vmem:[%s12621_s14 + $0x1e8] sm:$0xff] %v4870_v49 }
 0x519   : >> { %4941 = vst [vmem:[%s12621_s14 + $0x1f8] sm:$0xff] %v4872_v8 }
 0x51a PF: > { %s13482_s18 = sshll.u32 %s10991_s22, 8  ;;  %s8470_s8 = sshll.u32 (%p11118_p9), %s10995_s23, 2 }
 0x51b   : > { %s4943_s16 = sshra.s32 %s13482_s18, 3  ;;  %s13517_s7 = scalar_lea.vmem %s14891_s4, %s13482_s18 }
 0x51c   : > { %s8480_s20 = sshll.u32 %s4943_s16, 4  ;;  %s7459_s11 = sadd.s32 (%p11118_p9), %s8470_s8, %s13482_s18 }
 0x51d   : > { %s13488_s29 = scalar_lea.vmem %s14890_s3, %s8480_s20  ;;  %s8472_s9 = sshll.u32 (%p11118_p9), %s7459_s11, 3 }
 0x51e   : > { %v10323_v48 = vld [vmem:[%s13488_s29 + $0x4] ss:$16 sps:$4 sm:$0xff]   ;;  %s14611_s16 = scalar_lea.vmem (%p11118_p9), %s14892_s5, %s8472_s9 }
 0x51f   : > { %5685 = vmatprep.mubr.bf16.mxu0 %v10323_v48  ;;  %6071 = vmatprep.mubr.bf16.mxu1 %v10323_v48 }
 0x520   : > { %v5013_v45 = vld [vmem:[#allocation3 + $0x8] sm:$0xff]  ;;  %v5015_v29 = vld [vmem:[#allocation3 + $0x18] sm:$0xff]  ;;  %v5012_v46 = vld [vmem:[#allocation3] sm:$0xff] }
 0x521   : > { %5653 = vmatprep.subr.bf16.mxu0 %v5013_v45  ;;  %6039 = vmatprep.subr.bf16.mxu1 %v5015_v29  ;;  %v5014_v52 = vld [vmem:[#allocation3 + $0x10] sm:$0xff]  ;;  %v5017_v39 = vld [vmem:[#allocation3 + $0x28] sm:$0xff]  ;;  %v5019_v38 = vld [vmem:[#allocation3 + $0x38] sm:$0xff] }
 0x522   : > { %5654 = vmatpush1.bf16.msra.mxu0 %v5012_v46  ;;  %6040 = vmatpush1.bf16.msra.mxu1 %v5014_v52  ;;  %v5016_v21 = vld [vmem:[#allocation3 + $0x20] sm:$0xff]  ;;  %v5018_v25 = vld [vmem:[#allocation3 + $0x30] sm:$0xff]  ;;  %v5021_v17 = vld [vmem:[#allocation3 + $0x48] sm:$0xff] }
 0x523   : > { %5655 = vmatprep.subr.bf16.mxu0 %v5017_v39  ;;  %6041 = vmatprep.subr.bf16.mxu1 %v5019_v38  ;;  %v5023_v41 = vld [vmem:[#allocation3 + $0x58] sm:$0xff]  ;;  %v5020_v56 = vld [vmem:[#allocation3 + $0x40] sm:$0xff]  ;;  %v5022_v23 = vld [vmem:[#allocation3 + $0x50] sm:$0xff] }
 0x524   : > { %v5025_v34 = vld [vmem:[#allocation3 + $0x68] sm:$0xff]  ;;  %v5027_v6 = vld [vmem:[#allocation3 + $0x78] sm:$0xff]  ;;  %v5024_v31 = vld [vmem:[#allocation3 + $0x60] sm:$0xff] }
 0x525   : > { %v5026_v28 = vld [vmem:[#allocation3 + $0x70] sm:$0xff]  ;;  %v5029_v13 = vld [vmem:[#allocation3 + $0x88] sm:$0xff]  ;;  %v5031_v18 = vld [vmem:[#allocation3 + $0x98] sm:$0xff] }
 0x526   : > { %5656 = vmatpush1.bf16.msra.mxu0 %v5016_v21  ;;  %6042 = vmatpush1.bf16.msra.mxu1 %v5018_v25  ;;  %v5028_v3 = vld [vmem:[#allocation3 + $0x80] sm:$0xff]  ;;  %v5030_v60 = vld [vmem:[#allocation3 + $0x90] sm:$0xff]  ;;  %v5033_v15 = vld [vmem:[#allocation3 + $0xa8] sm:$0xff] }
 0x527   : > { %5657 = vmatprep.subr.bf16.mxu0 %v5021_v17  ;;  %6043 = vmatprep.subr.bf16.mxu1 %v5023_v41  ;;  %v5035_v5 = vld [vmem:[#allocation3 + $0xb8] sm:$0xff]  ;;  %v5032_v51 = vld [vmem:[#allocation3 + $0xa0] sm:$0xff]  ;;  %v5034_v14 = vld [vmem:[#allocation3 + $0xb0] sm:$0xff] }
 0x528   : > { %v5037_v0 = vld [vmem:[#allocation3 + $0xc8] sm:$0xff]  ;;  %v5039_v4 = vld [vmem:[#allocation3 + $0xd8] sm:$0xff]  ;;  %v5036_v62 = vld [vmem:[#allocation3 + $0xc0] sm:$0xff] }
 0x529   : > { %v5038_v37 = vld [vmem:[#allocation3 + $0xd0] sm:$0xff]  ;;  %v5041_v32 = vld [vmem:[#allocation3 + $0xe8] sm:$0xff]  ;;  %v5043_v57 = vld [vmem:[#allocation3 + $0xf8] sm:$0xff] }
 0x52a   : > { %5658 = vmatpush1.bf16.msra.mxu0 %v5020_v56  ;;  %6044 = vmatpush1.bf16.msra.mxu1 %v5022_v23  ;;  %v5040_v9 = vld [vmem:[#allocation3 + $0xe0] sm:$0xff]  ;;  %v5042_v61 = vld [vmem:[#allocation3 + $0xf0] sm:$0xff]  ;;  %v5045_v1 = vld [vmem:[#allocation3 + $0x108] sm:$0xff] }
 0x52b   : > { %5659 = vmatprep.subr.bf16.mxu0 %v5025_v34  ;;  %6045 = vmatprep.subr.bf16.mxu1 %v5027_v6  ;;  %v5047_v20 = vld [vmem:[#allocation3 + $0x118] sm:$0xff]  ;;  %v5044_v59 = vld [vmem:[#allocation3 + $0x100] sm:$0xff]  ;;  %v5046_v53 = vld [vmem:[#allocation3 + $0x110] sm:$0xff] }
 0x52c   : > { %v5049_v11 = vld [vmem:[#allocation3 + $0x128] sm:$0xff]  ;;  %v5051_v42 = vld [vmem:[#allocation3 + $0x138] sm:$0xff]  ;;  %v5048_v35 = vld [vmem:[#allocation3 + $0x120] sm:$0xff] }
 0x52d   : > { %v5050_v47 = vld [vmem:[#allocation3 + $0x130] sm:$0xff]  ;;  %v5053_v36 = vld [vmem:[#allocation3 + $0x148] sm:$0xff]  ;;  %v5055_v63 = vld [vmem:[#allocation3 + $0x158] sm:$0xff] }
 0x52e   : > { %5660 = vmatpush1.bf16.msra.mxu0 %v5024_v31  ;;  %6046 = vmatpush1.bf16.msra.mxu1 %v5026_v28  ;;  %v5052_v55 = vld [vmem:[#allocation3 + $0x140] sm:$0xff]  ;;  %v5054_v26 = vld [vmem:[#allocation3 + $0x150] sm:$0xff]  ;;  %v5057_v54 = vld [vmem:[#allocation3 + $0x168] sm:$0xff] }
 0x52f   : > { %5661 = vmatprep.subr.bf16.mxu0 %v5029_v13  ;;  %6047 = vmatprep.subr.bf16.mxu1 %v5031_v18  ;;  %v5059_v16 = vld [vmem:[#allocation3 + $0x178] sm:$0xff]  ;;  %v5056_v43 = vld [vmem:[#allocation3 + $0x160] sm:$0xff]  ;;  %v5058_v10 = vld [vmem:[#allocation3 + $0x170] sm:$0xff] }
 0x530   : > { %v5061_v58 = vld [vmem:[#allocation3 + $0x188] sm:$0xff]  ;;  %v5063_v50 = vld [vmem:[#allocation3 + $0x198] sm:$0xff]  ;;  %v5060_v7 = vld [vmem:[#allocation3 + $0x180] sm:$0xff] }
 0x531   : > { %v5062_v40 = vld [vmem:[#allocation3 + $0x190] sm:$0xff]  ;;  %v5065_v12 = vld [vmem:[#allocation3 + $0x1a8] sm:$0xff]  ;;  %v5067_v27 = vld [vmem:[#allocation3 + $0x1b8] sm:$0xff] }
 0x532   : > { %5662 = vmatpush1.bf16.msra.mxu0 %v5028_v3  ;;  %6048 = vmatpush1.bf16.msra.mxu1 %v5030_v60  ;;  %v5064_v2 = vld [vmem:[#allocation3 + $0x1a0] sm:$0xff]  ;;  %v5066_v22 = vld [vmem:[#allocation3 + $0x1b0] sm:$0xff]  ;;  %v5069_v30 = vld [vmem:[#allocation3 + $0x1c8] sm:$0xff] }
 0x533   : > { %5663 = vmatprep.subr.bf16.mxu0 %v5033_v15  ;;  %6049 = vmatprep.subr.bf16.mxu1 %v5035_v5  ;;  %v5071_v19 = vld [vmem:[#allocation3 + $0x1d8] sm:$0xff]  ;;  %v5068_v33 = vld [vmem:[#allocation3 + $0x1c0] sm:$0xff]  ;;  %v5070_v44 = vld [vmem:[#allocation3 + $0x1d0] sm:$0xff] }
 0x534   : > { %v5073_v24 = vld [vmem:[#allocation3 + $0x1e8] sm:$0xff]  ;;  %v5075_v49 = vld [vmem:[#allocation3 + $0x1f8] sm:$0xff]  ;;  %v5072_v8 = vld [vmem:[#allocation3 + $0x1e0] sm:$0xff] }
 0x535   : > { %v5074_v45 = vld [vmem:[#allocation3 + $0x1f0] sm:$0xff]  ;;  %v5077_v29 = vld [vmem:[#allocation3 + $0x208] sm:$0xff]  ;;  %v5079_v46 = vld [vmem:[#allocation3 + $0x218] sm:$0xff] }
 0x536   : > { %5664 = vmatpush1.bf16.msra.mxu0 %v5032_v51  ;;  %6050 = vmatpush1.bf16.msra.mxu1 %v5034_v14  ;;  %v10321_v52 = vld [vmem:[%s13488_s29] ss:$16 sps:$4 sm:$0xff]   ;;  %v10324_v21 = vld [vmem:[%s13488_s29 + $0x24] ss:$16 sps:$4 sm:$0xff]   ;;  %v5081_v25 = vld [vmem:[#allocation3 + $0x228] sm:$0xff] }
 0x537   : > { %5665 = vmatprep.subr.bf16.mxu0 %v5037_v0  ;;  %6051 = vmatprep.subr.bf16.mxu1 %v5039_v4  ;;  %v5076_v39 = vld [vmem:[#allocation3 + $0x200] sm:$0xff]  ;;  %v5078_v38 = vld [vmem:[#allocation3 + $0x210] sm:$0xff]  ;;  %v5083_v17 = vld [vmem:[#allocation3 + $0x238] sm:$0xff] }
 0x538   : > { %v5080_v41 = vld [vmem:[#allocation3 + $0x220] sm:$0xff]  ;;  %v5082_v56 = vld [vmem:[#allocation3 + $0x230] sm:$0xff]  ;;  %v5085_v23 = vld [vmem:[#allocation3 + $0x248] sm:$0xff] }
 0x539   : > { %v5087_v34 = vld [vmem:[#allocation3 + $0x258] sm:$0xff]  ;;  %v10326_v6 = vld [vmem:[%s13488_s29 + $0x20] ss:$16 sps:$4 sm:$0xff]   ;;  %v10327_v31 = vld [vmem:[%s13488_s29 + $0x44] ss:$16 sps:$4 sm:$0xff]  }
 0x53a   : > { %5666 = vmatpush1.bf16.msra.mxu0 %v5036_v62  ;;  %6052 = vmatpush1.bf16.msra.mxu1 %v5038_v37  ;;  %v5084_v28 = vld [vmem:[#allocation3 + $0x240] sm:$0xff]  ;;  %v5086_v13 = vld [vmem:[#allocation3 + $0x250] sm:$0xff]  ;;  %v5089_v18 = vld [vmem:[#allocation3 + $0x268] sm:$0xff] }
 0x53b   : > { %5667 = vmatprep.subr.bf16.mxu0 %v5041_v32  ;;  %6053 = vmatprep.subr.bf16.mxu1 %v5043_v57  ;;  %v5091_v3 = vld [vmem:[#allocation3 + $0x278] sm:$0xff]  ;;  %v5088_v60 = vld [vmem:[#allocation3 + $0x260] sm:$0xff]  ;;  %v5090_v15 = vld [vmem:[#allocation3 + $0x270] sm:$0xff] }
 0x53c   : > { %v10329_v5 = vld [vmem:[%s13488_s29 + $0x40] ss:$16 sps:$4 sm:$0xff]   ;;  %v5093_v51 = vld [vmem:[#allocation3 + $0x288] sm:$0xff]  ;;  %v5095_v14 = vld [vmem:[#allocation3 + $0x298] sm:$0xff] }
 0x53d   : > { %v10330_v0 = vld [vmem:[%s13488_s29 + $0x64] ss:$16 sps:$4 sm:$0xff]   ;;  %v5097_v62 = vld [vmem:[#allocation3 + $0x2a8] sm:$0xff]  ;;  %v5099_v37 = vld [vmem:[#allocation3 + $0x2b8] sm:$0xff] }
 0x53e   : > { %5668 = vmatpush1.bf16.msra.mxu0 %v5040_v9  ;;  %6054 = vmatpush1.bf16.msra.mxu1 %v5042_v61  ;;  %v5092_v4 = vld [vmem:[#allocation3 + $0x280] sm:$0xff]  ;;  %v5094_v48 = vld [vmem:[#allocation3 + $0x290] sm:$0xff]  ;;  %v5101_v61 = vld [vmem:[#allocation3 + $0x2c8] sm:$0xff] }
 0x53f   : > { %5669 = vmatprep.subr.bf16.mxu0 %v5045_v1  ;;  %6055 = vmatprep.subr.bf16.mxu1 %v5047_v20  ;;  %v5096_v32 = vld [vmem:[#allocation3 + $0x2a0] sm:$0xff]  ;;  %v5098_v57 = vld [vmem:[#allocation3 + $0x2b0] sm:$0xff]  ;;  %v5103_v1 = vld [vmem:[#allocation3 + $0x2d8] sm:$0xff] }
 0x540   : > { %v10332_v9 = vld [vmem:[%s13488_s29 + $0x60] ss:$16 sps:$4 sm:$0xff]   ;;  %v10333_v20 = vld [vmem:[%s13488_s29 + $0x84] ss:$16 sps:$4 sm:$0xff]  }
 0x542   : > { %5670 = vmatpush1.bf16.msra.mxu0 %v5044_v59  ;;  %6056 = vmatpush1.bf16.msra.mxu1 %v5046_v53  ;;  %v5100_v59 = vld [vmem:[#allocation3 + $0x2c0] sm:$0xff]  ;;  %v5102_v53 = vld [vmem:[#allocation3 + $0x2d0] sm:$0xff] }
 0x543   : > { %5671 = vmatprep.subr.bf16.mxu0 %v5049_v11  ;;  %6057 = vmatprep.subr.bf16.mxu1 %v5051_v42  ;;  %v5105_v11 = vld [vmem:[#allocation3 + $0x2e8] sm:$0xff]  ;;  %v5107_v42 = vld [vmem:[#allocation3 + $0x2f8] sm:$0xff] }
 0x546   : > { %5672 = vmatpush1.bf16.msra.mxu0 %v5048_v35  ;;  %6058 = vmatpush1.bf16.msra.mxu1 %v5050_v47  ;;  %v5104_v35 = vld [vmem:[#allocation3 + $0x2e0] sm:$0xff]  ;;  %v5106_v47 = vld [vmem:[#allocation3 + $0x2f0] sm:$0xff] }
 0x547   : > { %5673 = vmatprep.subr.bf16.mxu0 %v5053_v36  ;;  %6059 = vmatprep.subr.bf16.mxu1 %v5055_v63  ;;  %v10335_v36 = vld [vmem:[%s13488_s29 + $0x80] ss:$16 sps:$4 sm:$0xff]   ;;  %v5109_v63 = vld [vmem:[#allocation3 + $0x308] sm:$0xff] }
 0x54a   : > { %5674 = vmatpush1.bf16.msra.mxu0 %v5052_v55  ;;  %6060 = vmatpush1.bf16.msra.mxu1 %v5054_v26  ;;  %v5111_v55 = vld [vmem:[#allocation3 + $0x318] sm:$0xff]  ;;  %v10336_v26 = vld [vmem:[%s13488_s29 + $0xa4] ss:$16 sps:$4 sm:$0xff]  }
 0x54b   : > { %5675 = vmatprep.subr.bf16.mxu0 %v5057_v54  ;;  %6061 = vmatprep.subr.bf16.mxu1 %v5059_v16  ;;  %v5108_v54 = vld [vmem:[#allocation3 + $0x300] sm:$0xff]  ;;  %v5110_v16 = vld [vmem:[#allocation3 + $0x310] sm:$0xff] }
 0x54e   : > { %5676 = vmatpush1.bf16.msra.mxu0 %v5056_v43  ;;  %6062 = vmatpush1.bf16.msra.mxu1 %v5058_v10  ;;  %v5113_v43 = vld [vmem:[#allocation3 + $0x328] sm:$0xff]  ;;  %v5115_v10 = vld [vmem:[#allocation3 + $0x338] sm:$0xff] }
 0x54f   : > { %5677 = vmatprep.subr.bf16.mxu0 %v5061_v58  ;;  %6063 = vmatprep.subr.bf16.mxu1 %v5063_v50  ;;  %v5112_v58 = vld [vmem:[#allocation3 + $0x320] sm:$0xff]  ;;  %v5114_v50 = vld [vmem:[#allocation3 + $0x330] sm:$0xff] }
 0x552   : > { %5678 = vmatpush1.bf16.msra.mxu0 %v5060_v7  ;;  %6064 = vmatpush1.bf16.msra.mxu1 %v5062_v40  ;;  %v10338_v7 = vld [vmem:[%s13488_s29 + $0xa0] ss:$16 sps:$4 sm:$0xff]   ;;  %v5117_v40 = vld [vmem:[#allocation3 + $0x348] sm:$0xff] }
 0x553   : > { %5679 = vmatprep.subr.bf16.mxu0 %v5065_v12  ;;  %6065 = vmatprep.subr.bf16.mxu1 %v5067_v27  ;;  %v5119_v12 = vld [vmem:[#allocation3 + $0x358] sm:$0xff]  ;;  %v10339_v27 = vld [vmem:[%s13488_s29 + $0xc4] ss:$16 sps:$4 sm:$0xff]  }
 0x556   : > { %5680 = vmatpush1.bf16.msra.mxu0 %v5064_v2  ;;  %6066 = vmatpush1.bf16.msra.mxu1 %v5066_v22  ;;  %v5116_v2 = vld [vmem:[#allocation3 + $0x340] sm:$0xff]  ;;  %v5118_v22 = vld [vmem:[#allocation3 + $0x350] sm:$0xff] }
 0x557   : > { %5681 = vmatprep.subr.bf16.mxu0 %v5069_v30  ;;  %6067 = vmatprep.subr.bf16.mxu1 %v5071_v19  ;;  %v5121_v30 = vld [vmem:[#allocation3 + $0x368] sm:$0xff]  ;;  %v5123_v19 = vld [vmem:[#allocation3 + $0x378] sm:$0xff] }
 0x55a   : > { %5682 = vmatpush1.bf16.msra.mxu0 %v5068_v33  ;;  %6068 = vmatpush1.bf16.msra.mxu1 %v5070_v44  ;;  %v5120_v33 = vld [vmem:[#allocation3 + $0x360] sm:$0xff]  ;;  %v5122_v44 = vld [vmem:[#allocation3 + $0x370] sm:$0xff] }
 0x55b   : > { %5683 = vmatprep.subr.bf16.mxu0 %v5073_v24  ;;  %6069 = vmatprep.subr.bf16.mxu1 %v5075_v49  ;;  %v10341_v24 = vld [vmem:[%s13488_s29 + $0xc0] ss:$16 sps:$4 sm:$0xff]   ;;  %v5125_v49 = vld [vmem:[#allocation3 + $0x388] sm:$0xff] }
 0x55e   : > { %5684 = vmatpush1.bf16.msra.mxu0 %v5072_v8  ;;  %6070 = vmatpush1.bf16.msra.mxu1 %v5074_v45  ;;  %v5127_v8 = vld [vmem:[#allocation3 + $0x398] sm:$0xff]  ;;  %v10342_v45 = vld [vmem:[%s13488_s29 + $0xe4] ss:$16 sps:$4 sm:$0xff]  }
 0x55f   : > { %5846 = vmatprep.subr.bf16.mxu0 %v5077_v29  ;;  %6232 = vmatprep.subr.bf16.mxu1 %v5079_v46  ;;  %v5124_v29 = vld [vmem:[#allocation3 + $0x380] sm:$0xff]  ;;  %v5126_v46 = vld [vmem:[#allocation3 + $0x390] sm:$0xff] }
 0x561   : > { %5686 = vmatmul.mubr.bf16.vlgmr.msra.gmra.mrb[0].mxu0 %v10321_v52  ;;  %6072 = vmatmul.mubr.bf16.vlgmr.msra.gmra.mrb[0].mxu1 %v10321_v52  ;;  %v5129_v52 = vld [vmem:[#allocation3 + $0x3a8] sm:$0xff] }
 0x562   : > { %5847 = vmatpush1.bf16.msra.mxu0 %v5076_v39  ;;  %6233 = vmatpush1.bf16.msra.mxu1 %v5078_v38  ;;  %v5131_v39 = vld [vmem:[#allocation3 + $0x3b8] sm:$0xff]  ;;  %v5128_v38 = vld [vmem:[#allocation3 + $0x3a0] sm:$0xff] }
 0x563   : > { %5695 = vmatprep.mubr.bf16.mxu0 %v10324_v21  ;;  %6081 = vmatprep.mubr.bf16.mxu1 %v10324_v21  ;;  %v5130_v21 = vld [vmem:[#allocation3 + $0x3b0] sm:$0xff] }
 0x564   : > { %5848 = vmatprep.subr.bf16.mxu0 %v5081_v25  ;;  %6234 = vmatprep.subr.bf16.mxu1 %v5083_v17  ;;  %v10344_v25 = vld [vmem:[%s13488_s29 + $0xe0] ss:$16 sps:$4 sm:$0xff]   ;;  %v5133_v17 = vld [vmem:[#allocation3 + $0x3c8] sm:$0xff] }
 0x566   : > { %5849 = vmatpush1.bf16.msra.mxu0 %v5080_v41  ;;  %6235 = vmatpush1.bf16.msra.mxu1 %v5082_v56  ;;  %v5135_v41 = vld [vmem:[#allocation3 + $0x3d8] sm:$0xff]  ;;  %v10345_v56 = vld [vmem:[%s13488_s29 + $0x104] ss:$16 sps:$4 sm:$0xff]  }
 0x567   : > { %5850 = vmatprep.subr.bf16.mxu0 %v5085_v23  ;;  %6236 = vmatprep.subr.bf16.mxu1 %v5087_v34  ;;  %v5132_v23 = vld [vmem:[#allocation3 + $0x3c0] sm:$0xff]  ;;  %v5134_v34 = vld [vmem:[#allocation3 + $0x3d0] sm:$0xff] }
 0x569   : > { %5696 = vmatmul.mubr.bf16.gmra.mrb[4].mxu0 %v10326_v6  ;;  %6082 = vmatmul.mubr.bf16.gmra.mrb[4].mxu1 %v10326_v6  ;;  %v5137_v6 = vld [vmem:[#allocation3 + $0x3e8] sm:$0xff] }
 0x56a   : > { %5705 = vmatprep.mubr.bf16.mxu0 %v10327_v31  ;;  %6091 = vmatprep.mubr.bf16.mxu1 %v10327_v31  ;;  %v5139_v31 = vld [vmem:[#allocation3 + $0x3f8] sm:$0xff] }
 0x56b   : > { %5851 = vmatpush1.bf16.msra.mxu0 %v5084_v28  ;;  %6237 = vmatpush1.bf16.msra.mxu1 %v5086_v13  ;;  %v5136_v28 = vld [vmem:[#allocation3 + $0x3e0] sm:$0xff]  ;;  %v5138_v13 = vld [vmem:[#allocation3 + $0x3f0] sm:$0xff] }
 0x56c   : > { %5852 = vmatprep.subr.bf16.mxu0 %v5089_v18  ;;  %6238 = vmatprep.subr.bf16.mxu1 %v5091_v3  ;;  %v10347_v18 = vld [vmem:[%s13488_s29 + $0x100] ss:$16 sps:$4 sm:$0xff]   ;;  %v10348_v3 = vld [vmem:[%s13488_s29 + $0x124] ss:$16 sps:$4 sm:$0xff]  }
 0x56f   : > { %5853 = vmatpush1.bf16.msra.mxu0 %v5088_v60  ;;  %6239 = vmatpush1.bf16.msra.mxu1 %v5090_v15  ;;  %v10350_v60 = vld [vmem:[%s13488_s29 + $0x120] ss:$16 sps:$4 sm:$0xff]   ;;  %v10351_v15 = vld [vmem:[%s13488_s29 + $0x144] ss:$16 sps:$4 sm:$0xff]  }
 0x570   : > { %5854 = vmatprep.subr.bf16.mxu0 %v5093_v51  ;;  %6240 = vmatprep.subr.bf16.mxu1 %v5095_v14  ;;  %v10354_v51 = vld [vmem:[%s13488_s29 + $0x164] ss:$16 sps:$4 sm:$0xff]  }
 0x571   : > { %5706 = vmatmul.mubr.bf16.gmra.mrb[8].mxu0 %v10329_v5  ;;  %6092 = vmatmul.mubr.bf16.gmra.mrb[8].mxu1 %v10329_v5  ;;  %v10353_v5 = vld [vmem:[%s13488_s29 + $0x140] ss:$16 sps:$4 sm:$0xff]  }
 0x572   : > { %5715 = vmatprep.mubr.bf16.mxu0 %v10330_v0  ;;  %6101 = vmatprep.mubr.bf16.mxu1 %v10330_v0  ;;  %v5141_v14 = vld [vmem:[%s13517_s7] sm:$0xff]  ;;  %v5143_v0 = vld [vmem:[%s13517_s7 + $0x10] sm:$0xff] }
 0x573   : > { %5855 = vmatpush1.bf16.msra.mxu0 %v5092_v4  ;;  %6241 = vmatpush1.bf16.msra.mxu1 %v5094_v48  ;;  %v11019_v4 = vmov 0   ;;  %v10356_v48 = vld [vmem:[%s13488_s29 + $0x160] ss:$16 sps:$4 sm:$0xff]  }
 0x574   : > { %5856 = vmatprep.subr.bf16.mxu0 %v5097_v62  ;;  %6242 = vmatprep.subr.bf16.mxu1 %v5099_v37  ;;  %v5142_v62 = vld [vmem:[%s13517_s7 + $0x8] sm:$0xff]  ;;  %v10357_v37 = vld [vmem:[%s13488_s29 + $0x184] ss:$16 sps:$4 sm:$0xff]  }
 0x575   : > { %10319 = vset.pattern.permute.xlu0 %v11019_v4  ;;  %10320 = vset.pattern.permute.xlu1 %v11019_v4  ;;  %v10405_v4 = vld [vmem:[%s13488_s29 + $0x18c] ss:$16 sps:$4 sm:$0xff]  }
 0x576   : > { %5175 = vperm.xlu0 %10319, %v5141_v14   ;;  %5185 = vperm.xlu1 %10320, %v5143_v0   ;;  %v10402_v14 = vld [vmem:[%s13488_s29 + $0x16c] ss:$16 sps:$4 sm:$0xff]   ;;  %v10404_v0 = vld [vmem:[%s13488_s29 + $0x168] ss:$16 sps:$4 sm:$0xff]  }
 0x577   : > { %5857 = vmatpush1.bf16.msra.mxu0 %v5096_v32  ;;  %6243 = vmatpush1.bf16.msra.mxu1 %v5098_v57  ;;  %v5144_v32 = vld [vmem:[%s13517_s7 + $0x18] sm:$0xff]  ;;  %v5145_v57 = vld [vmem:[%s13517_s7 + $0x20] sm:$0xff] }
 0x578   : > { %5858 = vmatprep.subr.bf16.mxu0 %v5101_v61  ;;  %6244 = vmatprep.subr.bf16.mxu1 %v5103_v1  ;;  %v10359_v61 = vld [vmem:[%s13488_s29 + $0x180] ss:$16 sps:$4 sm:$0xff]   ;;  %v10360_v1 = vld [vmem:[%s13488_s29 + $0x1a4] ss:$16 sps:$4 sm:$0xff]  }
 0x579   : > { %5716 = vmatmul.mubr.bf16.gmra.mrb[12].mxu0 %v10332_v9  ;;  %6102 = vmatmul.mubr.bf16.gmra.mrb[12].mxu1 %v10332_v9  ;;  %v5146_v9 = vld [vmem:[%s13517_s7 + $0x28] sm:$0xff] }
 0x57a   : > { %5725 = vmatprep.mubr.bf16.mxu0 %v10333_v20  ;;  %6111 = vmatprep.mubr.bf16.mxu1 %v10333_v20  ;;  %v5148_v20 = vld [vmem:[%s13517_s7 + $0x38] sm:$0xff] }
 0x57b   : > { %5859 = vmatpush1.bf16.msra.mxu0 %v5100_v59  ;;  %6245 = vmatpush1.bf16.msra.mxu1 %v5102_v53  ;;  %v5147_v59 = vld [vmem:[%s13517_s7 + $0x30] sm:$0xff]  ;;  %v5150_v53 = vld [vmem:[%s13517_s7 + $0x48] sm:$0xff] }
 0x57c   : > { %5860 = vmatprep.subr.bf16.mxu0 %v5105_v11  ;;  %6246 = vmatprep.subr.bf16.mxu1 %v5107_v42  ;;  %v5149_v11 = vld [vmem:[%s13517_s7 + $0x40] sm:$0xff] }
 0x57d   : > { %5180 = vperm.xlu0 %10319, %v5142_v62   ;;  %5190 = vperm.xlu1 %10320, %v5144_v32   ;;  %v10362_v42 = vld [vmem:[%s13488_s29 + $0x1a0] ss:$16 sps:$4 sm:$0xff]   ;;  %v10408_v62 = vld [vmem:[%s13488_s29 + $0x1ac] ss:$16 sps:$4 sm:$0xff]  }
 0x57e   : > { %v10411_v32 = vld [vmem:[%s13488_s29 + $0x1cc] ss:$16 sps:$4 sm:$0xff]  }
 0x57f   : > { %5861 = vmatpush1.bf16.msra.mxu0 %v5104_v35  ;;  %6247 = vmatpush1.bf16.msra.mxu1 %v5106_v47  ;;  %v10363_v35 = vld [vmem:[%s13488_s29 + $0x1c4] ss:$16 sps:$4 sm:$0xff]   ;;  %v5152_v47 = vld [vmem:[%s13517_s7 + $0x58] sm:$0xff] }
 0x580   : > { %5862 = vmatprep.subr.bf16.mxu0 %v5109_v63  ;;  %6248 = vmatprep.subr.bf16.mxu1 %v5111_v55  ;;  %v5154_v63 = vld [vmem:[%s13517_s7 + $0x68] sm:$0xff]  ;;  %v5153_v55 = vld [vmem:[%s13517_s7 + $0x60] sm:$0xff] }
 0x581   : > { %5726 = vmatmul.mubr.bf16.gmra.mrb[16].mxu0 %v10335_v36  ;;  %6112 = vmatmul.mubr.bf16.gmra.mrb[16].mxu1 %v10335_v36  ;;  %v5151_v36 = vld [vmem:[%s13517_s7 + $0x50] sm:$0xff] }
 0x582   : > { %5735 = vmatprep.mubr.bf16.mxu0 %v10336_v26  ;;  %6121 = vmatprep.mubr.bf16.mxu1 %v10336_v26  ;;  %v10365_v26 = vld [vmem:[%s13488_s29 + $0x1c0] ss:$16 sps:$4 sm:$0xff]  }
 0x583   : > { %5863 = vmatpush1.bf16.msra.mxu0 %v5108_v54  ;;  %6249 = vmatpush1.bf16.msra.mxu1 %v5110_v16  ;;  %v10366_v54 = vld [vmem:[%s13488_s29 + $0x1e4] ss:$16 sps:$4 sm:$0xff]   ;;  %v5156_v16 = vld [vmem:[%s13517_s7 + $0x78] sm:$0xff] }
 0x584   : > { %5864 = vmatprep.subr.bf16.mxu0 %v5113_v43  ;;  %6250 = vmatprep.subr.bf16.mxu1 %v5115_v10  ;;  %v5155_v43 = vld [vmem:[%s13517_s7 + $0x70] sm:$0xff]  ;;  %v5158_v10 = vld [vmem:[%s13517_s7 + $0x88] sm:$0xff] }
 0x585   : > { %5195 = vperm.xlu0 %10319, %v5145_v57   ;;  %5200 = vperm.xlu1 %10320, %v5146_v9   ;;  %v10413_v57 = vld [vmem:[%s13488_s29 + $0x1c8] ss:$16 sps:$4 sm:$0xff]   ;;  %v10414_v9 = vld [vmem:[%s13488_s29 + $0x1ec] ss:$16 sps:$4 sm:$0xff]  }
 0x587   : > { %5865 = vmatpush1.bf16.msra.mxu0 %v5112_v58  ;;  %6251 = vmatpush1.bf16.msra.mxu1 %v5114_v50  ;;  %v5157_v58 = vld [vmem:[%s13517_s7 + $0x80] sm:$0xff] }
 0x588   : > { %5866 = vmatprep.subr.bf16.mxu0 %v5117_v40  ;;  %6252 = vmatprep.subr.bf16.mxu1 %v5119_v12  ;;  %v10368_v50 = vld [vmem:[%s13488_s29 + $0x1e0] ss:$16 sps:$4 sm:$0xff]   ;;  %v5160_v40 = vld [vmem:[%s13517_s7 + $0x98] sm:$0xff] }
 0x589   : > { %5736 = vmatmul.mubr.bf16.gmra.mrb[20].mxu0 %v10338_v7  ;;  %6122 = vmatmul.mubr.bf16.gmra.mrb[20].mxu1 %v10338_v7  ;;  %v10371_v7 = vld [vmem:[%s13488_s29 + $0xc] ss:$16 sps:$4 sm:$0xff]   ;;  %v5159_v12 = vld [vmem:[%s13517_s7 + $0x90] sm:$0xff] }
 0x58a   : > { %5745 = vmatprep.mubr.bf16.mxu0 %v10339_v27  ;;  %6131 = vmatprep.mubr.bf16.mxu1 %v10339_v27  ;;  %v5162_v27 = vld [vmem:[%s13517_s7 + $0xa8] sm:$0xff] }
 0x58b   : > { %5867 = vmatpush1.bf16.msra.mxu0 %v5116_v2  ;;  %6253 = vmatpush1.bf16.msra.mxu1 %v5118_v22  ;;  %v5161_v2 = vld [vmem:[%s13517_s7 + $0xa0] sm:$0xff]  ;;  %v10369_v22 = vld [vmem:[%s13488_s29 + $0x8] ss:$16 sps:$4 sm:$0xff]  }
 0x58c   : > { %5868 = vmatprep.subr.bf16.mxu0 %v5121_v30  ;;  %6254 = vmatprep.subr.bf16.mxu1 %v5123_v19  ;;  %v10372_v30 = vld [vmem:[%s13488_s29 + $0x2c] ss:$16 sps:$4 sm:$0xff]  }
 0x58d   : > { %5210 = vperm.xlu1 %10320, %v5148_v20   ;;  %5205 = vperm.xlu0 %10319, %v5147_v59   ;;  %v5164_v19 = vld [vmem:[%s13517_s7 + $0xb8] sm:$0xff] }
 0x58f   : > { %5869 = vmatpush1.bf16.msra.mxu0 %v5120_v33  ;;  %6255 = vmatpush1.bf16.msra.mxu1 %v5122_v44  ;;  %v5163_v33 = vld [vmem:[%s13517_s7 + $0xb0] sm:$0xff]  ;;  %v5166_v44 = vld [vmem:[%s13517_s7 + $0xc8] sm:$0xff] }
 0x590   : > { %5870 = vmatprep.subr.bf16.mxu0 %v5125_v49  ;;  %6256 = vmatprep.subr.bf16.mxu1 %v5127_v8  ;;  %v10374_v49 = vld [vmem:[%s13488_s29 + $0x28] ss:$16 sps:$4 sm:$0xff]   ;;  %v10375_v8 = vld [vmem:[%s13488_s29 + $0x4c] ss:$16 sps:$4 sm:$0xff]  }
 0x591   : > { %5746 = vmatmul.mubr.bf16.gmra.mrb[24].mxu0 %v10341_v24  ;;  %6132 = vmatmul.mubr.bf16.gmra.mrb[24].mxu1 %v10341_v24  ;;  %v5165_v24 = vld [vmem:[%s13517_s7 + $0xc0] sm:$0xff] }
 0x592   : > { %5755 = vmatprep.mubr.bf16.mxu0 %v10342_v45  ;;  %6141 = vmatprep.mubr.bf16.mxu1 %v10342_v45  ;;  %v5168_v45 = vld [vmem:[%s13517_s7 + $0xd8] sm:$0xff] }
 0x593   : > { %5871 = vmatpush1.bf16.msra.mxu0 %v5124_v29  ;;  %6257 = vmatpush1.bf16.msra.mxu1 %v5126_v46  ;;  %v5167_v29 = vld [vmem:[%s13517_s7 + $0xd0] sm:$0xff]  ;;  %v5170_v46 = vld [vmem:[%s13517_s7 + $0xe8] sm:$0xff] }
 0x594   : > { %5872 = vmatprep.subr.bf16.mxu0 %v5129_v52  ;;  %6258 = vmatprep.subr.bf16.mxu1 %v5131_v39  ;;  %v5169_v52 = vld [vmem:[%s13517_s7 + $0xe0] sm:$0xff]  ;;  %v10377_v39 = vld [vmem:[%s13488_s29 + $0x48] ss:$16 sps:$4 sm:$0xff]  }
 0x595   : > { %5220 = vperm.xlu1 %10320, %v5150_v53   ;;  %5215 = vperm.xlu0 %10319, %v5149_v11  }
 0x597   : > { %5873 = vmatpush1.bf16.msra.mxu0 %v5128_v38  ;;  %6259 = vmatpush1.bf16.msra.mxu1 %v5130_v21  ;;  %v10378_v38 = vld [vmem:[%s13488_s29 + $0x6c] ss:$16 sps:$4 sm:$0xff]  }
 0x598   : > { %5874 = vmatprep.subr.bf16.mxu0 %v5133_v17  ;;  %6260 = vmatprep.subr.bf16.mxu1 %v5135_v41  ;;  %v5172_v21 = vld [vmem:[%s13517_s7 + $0xf8] sm:$0xff] }
 0x599   : > { %5756 = vmatmul.mubr.bf16.gmra.mrb[28].mxu0 %v10344_v25  ;;  %6142 = vmatmul.mubr.bf16.gmra.mrb[28].mxu1 %v10344_v25  ;;  %v5171_v25 = vld [vmem:[%s13517_s7 + $0xf0] sm:$0xff]  ;;  %v10380_v17 = vld [vmem:[%s13488_s29 + $0x68] ss:$16 sps:$4 sm:$0xff]   ;;  %v10381_v41 = vld [vmem:[%s13488_s29 + $0x8c] ss:$16 sps:$4 sm:$0xff]  }
 0x59a   : > { %5765 = vmatprep.mubr.bf16.mxu0 %v10345_v56  ;;  %6151 = vmatprep.mubr.bf16.mxu1 %v10345_v56  ;;  %v10383_v56 = vld [vmem:[%s13488_s29 + $0x88] ss:$16 sps:$4 sm:$0xff]  }
 0x59b   : > { %5875 = vmatpush1.bf16.msra.mxu0 %v5132_v23  ;;  %6261 = vmatpush1.bf16.msra.mxu1 %v5134_v34  ;;  %v10384_v23 = vld [vmem:[%s13488_s29 + $0xac] ss:$16 sps:$4 sm:$0xff]   ;;  %v10386_v34 = vld [vmem:[%s13488_s29 + $0xa8] ss:$16 sps:$4 sm:$0xff]  }
 0x59c   : > { %5876 = vmatprep.subr.bf16.mxu0 %v5137_v6  ;;  %6262 = vmatprep.subr.bf16.mxu1 %v5139_v31  ;;  %v10387_v6 = vld [vmem:[%s13488_s29 + $0xcc] ss:$16 sps:$4 sm:$0xff]   ;;  %v10389_v31 = vld [vmem:[%s13488_s29 + $0xc8] ss:$16 sps:$4 sm:$0xff]  }
 0x59d   : > { %5230 = vperm.xlu1 %10320, %v5152_v47   ;;  %5225 = vperm.xlu0 %10319, %v5151_v36  }
 0x59f   : > { %5877 = vmatpush1.bf16.msra.mxu0 %v5136_v28  ;;  %6263 = vmatpush1.bf16.msra.mxu1 %v5138_v13  ;;  %v10390_v28 = vld [vmem:[%s13488_s29 + $0xec] ss:$16 sps:$4 sm:$0xff]   ;;  %v10392_v13 = vld [vmem:[%s13488_s29 + $0xe8] ss:$16 sps:$4 sm:$0xff]  }
 0x5a1   : > { %5766 = vmatmul.mubr.bf16.gmra.mrb[32].mxu0 %v10347_v18  ;;  %6152 = vmatmul.mubr.bf16.gmra.mrb[32].mxu1 %v10347_v18  ;;  %v10393_v18 = vld [vmem:[%s13488_s29 + $0x10c] ss:$16 sps:$4 sm:$0xff]  }
 0x5a2   : > { %5775 = vmatprep.mubr.bf16.mxu0 %v10348_v3  ;;  %6161 = vmatprep.mubr.bf16.mxu1 %v10348_v3  ;;  %v10395_v3 = vld [vmem:[%s13488_s29 + $0x108] ss:$16 sps:$4 sm:$0xff]  }
 0x5a3   : > { %5240 = vperm.xlu1 %10320, %v5154_v63   ;;  %5235 = vperm.xlu0 %10319, %v5153_v55  }
 0x5a7   : > { %5250 = vperm.xlu1 %10320, %v5156_v16   ;;  %5245 = vperm.xlu0 %10319, %v5155_v43  }
 0x5a9   : > { %5776 = vmatmul.mubr.bf16.gmra.mrb[36].mxu0 %v10350_v60  ;;  %6162 = vmatmul.mubr.bf16.gmra.mrb[36].mxu1 %v10350_v60  ;;  %v10396_v60 = vld [vmem:[%s13488_s29 + $0x12c] ss:$16 sps:$4 sm:$0xff]  }
 0x5aa   : > { %5785 = vmatprep.mubr.bf16.mxu0 %v10351_v15  ;;  %6171 = vmatprep.mubr.bf16.mxu1 %v10351_v15  ;;  %v10398_v15 = vld [vmem:[%s13488_s29 + $0x128] ss:$16 sps:$4 sm:$0xff]  }
 0x5ab   : > { %5260 = vperm.xlu1 %10320, %v5158_v10   ;;  %5255 = vperm.xlu0 %10319, %v5157_v58  }
 0x5af   : > { %5270 = vperm.xlu1 %10320, %v5160_v40   ;;  %5265 = vperm.xlu0 %10319, %v5159_v12  }
 0x5b1   : > { %5786 = vmatmul.mubr.bf16.gmra.mrb[40].mxu0 %v10353_v5  ;;  %6172 = vmatmul.mubr.bf16.gmra.mrb[40].mxu1 %v10353_v5  ;;  %v10399_v5 = vld [vmem:[%s13488_s29 + $0x14c] ss:$16 sps:$4 sm:$0xff]  }
 0x5b2   : > { %5795 = vmatprep.mubr.bf16.mxu0 %v10354_v51  ;;  %6181 = vmatprep.mubr.bf16.mxu1 %v10354_v51  ;;  %v10401_v51 = vld [vmem:[%s13488_s29 + $0x148] ss:$16 sps:$4 sm:$0xff]  }
 0x5b3   : > { %5280 = vperm.xlu1 %10320, %v5162_v27   ;;  %5275 = vperm.xlu0 %10319, %v5161_v2  }
 0x5b7   : > { %5290 = vperm.xlu1 %10320, %v5164_v19   ;;  %5285 = vperm.xlu0 %10319, %v5163_v33  }
 0x5b9   : > { %5796 = vmatmul.mubr.bf16.gmra.mrb[44].mxu0 %v10356_v48  ;;  %6182 = vmatmul.mubr.bf16.gmra.mrb[44].mxu1 %v10356_v48  ;;  %v10407_v48 = vld [vmem:[%s13488_s29 + $0x188] ss:$16 sps:$4 sm:$0xff]  }
 0x5ba   : > { %5805 = vmatprep.mubr.bf16.mxu0 %v10357_v37  ;;  %6191 = vmatprep.mubr.bf16.mxu1 %v10357_v37  ;;  %v10410_v37 = vld [vmem:[%s13488_s29 + $0x1a8] ss:$16 sps:$4 sm:$0xff]  }
 0x5bb   : > { %5300 = vperm.xlu1 %10320, %v5166_v44   ;;  %5295 = vperm.xlu0 %10319, %v5165_v24  }
 0x5bf   : > { %5310 = vperm.xlu1 %10320, %v5168_v45   ;;  %5305 = vperm.xlu0 %10319, %v5167_v29  }
 0x5c1   : > { %5806 = vmatmul.mubr.bf16.gmra.mrb[48].mxu0 %v10359_v61  ;;  %6192 = vmatmul.mubr.bf16.gmra.mrb[48].mxu1 %v10359_v61  ;;  %v10416_v61 = vld [vmem:[%s13488_s29 + $0x1e8] ss:$16 sps:$4 sm:$0xff]  }
 0x5c2   : > { %5815 = vmatprep.mubr.bf16.mxu0 %v10360_v1  ;;  %6201 = vmatprep.mubr.bf16.mxu1 %v10360_v1 }
 0x5c3   : > { %5320 = vperm.xlu1 %10320, %v5170_v46   ;;  %5315 = vperm.xlu0 %10319, %v5169_v52  }
 0x5c7   : > { %5330 = vperm.xlu1 %10320, %v5172_v21   ;;  %5325 = vperm.xlu0 %10319, %v5171_v25  }
 0x5c9   : > { %5816 = vmatmul.mubr.bf16.gmra.mrb[52].mxu0 %v10362_v42  ;;  %6202 = vmatmul.mubr.bf16.gmra.mrb[52].mxu1 %v10362_v42 }
 0x5ca   : > { %5825 = vmatprep.mubr.bf16.mxu0 %v10363_v35  ;;  %6211 = vmatprep.mubr.bf16.mxu1 %v10363_v35 }
 0x5d1   : > { %5826 = vmatmul.mubr.bf16.gmra.mrb[56].mxu0 %v10365_v26  ;;  %6212 = vmatmul.mubr.bf16.gmra.mrb[56].mxu1 %v10365_v26 }
 0x5d2   : > { %5835 = vmatprep.mubr.bf16.mxu0 %v10366_v54  ;;  %6221 = vmatprep.mubr.bf16.mxu1 %v10366_v54 }
 0x5d9   : > { %5836 = vmatmul.mubr.bf16.gmra.mrb[60].mxu0 %v10368_v50  ;;  %6222 = vmatmul.mubr.bf16.gmra.mrb[60].mxu1 %v10368_v50 }
 0x5da   : > { %5878 = vmatprep.mubr.bf16.mxu0 %v10371_v7  ;;  %6264 = vmatprep.mubr.bf16.mxu1 %v10371_v7 }
 0x5e1   : > { %5879 = vmatmul.mubr.bf16.vlgmr.msra.gmra.mrb[0].mxu0 %v10369_v22  ;;  %6265 = vmatmul.mubr.bf16.vlgmr.msra.gmra.mrb[0].mxu1 %v10369_v22 }
 0x5e2   : > { %5888 = vmatprep.mubr.bf16.mxu0 %v10372_v30  ;;  %6274 = vmatprep.mubr.bf16.mxu1 %v10372_v30 }
 0x5e9   : > { %5889 = vmatmul.mubr.bf16.gmra.mrb[4].mxu0 %v10374_v49  ;;  %6275 = vmatmul.mubr.bf16.gmra.mrb[4].mxu1 %v10374_v49 }
 0x5ea   : > { %5898 = vmatprep.mubr.bf16.mxu0 %v10375_v8  ;;  %6284 = vmatprep.mubr.bf16.mxu1 %v10375_v8 }
 0x5f1   : > { %5899 = vmatmul.mubr.bf16.gmra.mrb[8].mxu0 %v10377_v39  ;;  %6285 = vmatmul.mubr.bf16.gmra.mrb[8].mxu1 %v10377_v39 }
 0x5f2   : > { %5908 = vmatprep.mubr.bf16.mxu0 %v10378_v38  ;;  %6294 = vmatprep.mubr.bf16.mxu1 %v10378_v38 }
 0x5f5   : > { %v5176_v1 = vpop.permute.xlu0 %5175  ;;  %v5186_v59 = vpop.permute.xlu1 %5185 }
 0x5f9   : > { %5909 = vmatmul.mubr.bf16.gmra.mrb[12].mxu0 %v10380_v17  ;;  %6295 = vmatmul.mubr.bf16.gmra.mrb[12].mxu1 %v10380_v17 }
 0x5fa   : > { %5918 = vmatprep.mubr.bf16.mxu0 %v10381_v41  ;;  %6304 = vmatprep.mubr.bf16.mxu1 %v10381_v41 }
 0x5fc   : > { %v5181_v20 = vpop.permute.xlu0 %5180  ;;  %v13615_v33 = vpop.permute.xlu1 %5190 }
 0x601   : > { %5919 = vmatmul.mubr.bf16.gmra.mrb[16].mxu0 %v10383_v56  ;;  %6305 = vmatmul.mubr.bf16.gmra.mrb[16].mxu1 %v10383_v56 }
 0x602   : > { %5928 = vmatprep.mubr.bf16.mxu0 %v10384_v23  ;;  %6314 = vmatprep.mubr.bf16.mxu1 %v10384_v23 }
 0x609   : > { %5929 = vmatmul.mubr.bf16.gmra.mrb[20].mxu0 %v10386_v34  ;;  %6315 = vmatmul.mubr.bf16.gmra.mrb[20].mxu1 %v10386_v34 }
 0x60a   : > { %5938 = vmatprep.mubr.bf16.mxu0 %v10387_v6  ;;  %6324 = vmatprep.mubr.bf16.mxu1 %v10387_v6 }
 0x611   : > { %5939 = vmatmul.mubr.bf16.gmra.mrb[24].mxu0 %v10389_v31  ;;  %6325 = vmatmul.mubr.bf16.gmra.mrb[24].mxu1 %v10389_v31 }
 0x612   : > { %5948 = vmatprep.mubr.bf16.mxu0 %v10390_v28  ;;  %6334 = vmatprep.mubr.bf16.mxu1 %v10390_v28 }
 0x619   : > { %5949 = vmatmul.mubr.bf16.gmra.mrb[28].mxu0 %v10392_v13  ;;  %6335 = vmatmul.mubr.bf16.gmra.mrb[28].mxu1 %v10392_v13 }
 0x61a   : > { %5958 = vmatprep.mubr.bf16.mxu0 %v10393_v18  ;;  %6344 = vmatprep.mubr.bf16.mxu1 %v10393_v18 }
 0x621   : > { %5959 = vmatmul.mubr.bf16.gmra.mrb[32].mxu0 %v10395_v3  ;;  %6345 = vmatmul.mubr.bf16.gmra.mrb[32].mxu1 %v10395_v3 }
 0x622   : > { %5968 = vmatprep.mubr.bf16.mxu0 %v10396_v60  ;;  %6354 = vmatprep.mubr.bf16.mxu1 %v10396_v60 }
 0x629   : > { %5969 = vmatmul.mubr.bf16.gmra.mrb[36].mxu0 %v10398_v15  ;;  %6355 = vmatmul.mubr.bf16.gmra.mrb[36].mxu1 %v10398_v15 }
 0x62a   : > { %5978 = vmatprep.mubr.bf16.mxu0 %v10399_v5  ;;  %6364 = vmatprep.mubr.bf16.mxu1 %v10399_v5 }
 0x631   : > { %5979 = vmatmul.mubr.bf16.gmra.mrb[40].mxu0 %v10401_v51  ;;  %6365 = vmatmul.mubr.bf16.gmra.mrb[40].mxu1 %v10401_v51 }
 0x632   : > { %5988 = vmatprep.mubr.bf16.mxu0 %v10402_v14  ;;  %6374 = vmatprep.mubr.bf16.mxu1 %v10402_v14 }
 0x639   : > { %5989 = vmatmul.mubr.bf16.gmra.mrb[44].mxu0 %v10404_v0  ;;  %6375 = vmatmul.mubr.bf16.gmra.mrb[44].mxu1 %v10404_v0 }
 0x63a   : > { %5998 = vmatprep.mubr.bf16.mxu0 %v10405_v4  ;;  %6384 = vmatprep.mubr.bf16.mxu1 %v10405_v4 }
 0x641   : > { %5999 = vmatmul.mubr.bf16.gmra.mrb[48].mxu0 %v10407_v48  ;;  %6385 = vmatmul.mubr.bf16.gmra.mrb[48].mxu1 %v10407_v48 }
 0x642   : > { %6008 = vmatprep.mubr.bf16.mxu0 %v10408_v62  ;;  %6394 = vmatprep.mubr.bf16.mxu1 %v10408_v62 }
 0x649   : > { %6009 = vmatmul.mubr.bf16.gmra.mrb[52].mxu0 %v10410_v37  ;;  %6395 = vmatmul.mubr.bf16.gmra.mrb[52].mxu1 %v10410_v37 }
 0x64a   : > { %6018 = vmatprep.mubr.bf16.mxu0 %v10411_v32  ;;  %6404 = vmatprep.mubr.bf16.mxu1 %v10411_v32 }
 0x651   : > { %6019 = vmatmul.mubr.bf16.gmra.mrb[56].mxu0 %v10413_v57  ;;  %6405 = vmatmul.mubr.bf16.gmra.mrb[56].mxu1 %v10413_v57 }
 0x652   : > { %6028 = vmatprep.mubr.bf16.mxu0 %v10414_v9  ;;  %6414 = vmatprep.mubr.bf16.mxu1 %v10414_v9 }
 0x659   : > { %6029 = vmatmul.mubr.bf16.gmra.mrb[60].mxu0 %v10416_v61  ;;  %6415 = vmatmul.mubr.bf16.gmra.mrb[60].mxu1 %v10416_v61 }
 0x6b4   : > { %v5880_v53 = vpop.f32.mrb[0].mxu0  ;;  %v6266_v11 = vpop.f32.mrb[0].mxu1 }
 0x6b5   : > { %v13592_v42 = vadd.f32 %v5880_v53, %v5176_v1  ;;  %v13594_v35 = vadd.f32 %v6266_v11, %v5176_v1  ;;  %v5882_v47 = vpop.f32.mrb[1].mxu0  ;;  %v6268_v36 = vpop.f32.mrb[1].mxu1 }
 0x6b6   : > { %v13596_v63 = vadd.f32 %v5882_v47, %v5176_v1  ;;  %v13598_v55 = vadd.f32 %v6268_v36, %v5176_v1  ;;  %v5884_v26 = vpop.f32.mrb[2].mxu0  ;;  %v6270_v54 = vpop.f32.mrb[2].mxu1 }
 0x6b7   : > { %v8340_v16 = vmul.f32 -1.442695, %v13592_v42  ;;  %v8342_v43 = vmul.f32 -1.442695, %v13594_v35  ;;  %v13602_v10 = vadd.f32 %v5884_v26, %v5181_v20  ;;  %v13604_v58 = vadd.f32 %v6270_v54, %v5181_v20  ;;  %v5886_v50 = vpop.f32.mrb[3].mxu0  ;;  %v6272_v7 = vpop.f32.mrb[3].mxu1 }
 0x6b8   : > { %v8341_v40 = vmul.f32 -1.442695, %v13596_v63  ;;  %v8343_v12 = vmul.f32 -1.442695, %v13598_v55  ;;  %v13608_v27 = vadd.f32 %v5886_v50, %v5181_v20  ;;  %v13610_v2 = vadd.f32 %v6272_v7, %v5181_v20  ;;  %v5196_v50 = vpop.permute.xlu0 %5195 }
 0x6b9   : > { %10417 = vpow2.f32 %v8340_v16  ;;  %v8344_v22 = vmul.f32 -1.442695, %v13602_v10  ;;  %v8346_v30 = vmul.f32 -1.442695, %v13604_v58 }
 0x6ba   : > { %10419 = vpow2.f32 %v8342_v43  ;;  %v8345_v19 = vmul.f32 -1.442695, %v13608_v27  ;;  %v8347_v44 = vmul.f32 -1.442695, %v13610_v2 }
 0x6bb   : > { %10421 = vpow2.f32 %v8341_v40 }
 0x6bc   : > { %10423 = vpow2.f32 %v8343_v12  ;;  %v5890_v24 = vpop.f32.mrb[4].mxu0  ;;  %v6276_v49 = vpop.f32.mrb[4].mxu1 }
 0x6bd   : > { %10425 = vpow2.f32 %v8344_v22  ;;  %v13618_v8 = vadd.f32 %v5890_v24, %v5186_v59  ;;  %v13620_v45 = vadd.f32 %v6276_v49, %v5186_v59  ;;  %v5892_v29 = vpop.f32.mrb[5].mxu0  ;;  %v6278_v46 = vpop.f32.mrb[5].mxu1 }
 0x6be   : > { %10427 = vpow2.f32 %v8346_v30  ;;  %v13622_v52 = vadd.f32 %v5892_v29, %v5186_v59  ;;  %v13624_v39 = vadd.f32 %v6278_v46, %v5186_v59  ;;  %v5894_v38 = vpop.f32.mrb[6].mxu0  ;;  %v6280_v21 = vpop.f32.mrb[6].mxu1 }
 0x6bf   : > { %10429 = vpow2.f32 %v8345_v19  ;;  %v8348_v25 = vmul.f32 -1.442695, %v13618_v8  ;;  %v8350_v17 = vmul.f32 -1.442695, %v13620_v45  ;;  %v13629_v41 = vadd.f32 %v5894_v38, %v13615_v33  ;;  %v5896_v56 = vpop.f32.mrb[7].mxu0  ;;  %v6282_v23 = vpop.f32.mrb[7].mxu1 }
 0x6c0   : > { %10431 = vpow2.f32 %v8347_v44  ;;  %v8349_v34 = vmul.f32 -1.442695, %v13622_v52  ;;  %v8351_v6 = vmul.f32 -1.442695, %v13624_v39  ;;  %v13641_v26 = vadd.f32 %v6280_v21, %v13615_v33 }
 0x6c1   : > { %10433 = vpow2.f32 %v8348_v25  ;;  %v8352_v31 = vmul.f32 -1.442695, %v13629_v41  ;;  %v13644_v43 = vadd.f32 %v5896_v56, %v13615_v33  ;;  %v13649_v22 = vadd.f32 %v6282_v23, %v13615_v33 }
 0x6c2   : > { %10435 = vpow2.f32 %v8350_v17  ;;  %v8354_v25 = vmul.f32 -1.442695, %v13641_v26 }
 0x6c3   : > { %v10418_v28 = vpop.eup %10417  ;;  %10437 = vpow2.f32 %v8349_v34 }
 0x6c4   : > { %v10420_v13 = vpop.eup %10419  ;;  %v6809_v18 = vadd.f32 1.0, %v10418_v28  ;;  %10439 = vpow2.f32 %v8351_v6  ;;  %v5900_v3 = vpop.f32.mrb[8].mxu0  ;;  %v8353_v6 = vmul.f32 -1.442695, %v13644_v43 }
 0x6c5   : > { %v6286_v60 = vpop.f32.mrb[8].mxu1  ;;  %v10422_v15 = vpop.eup %10421  ;;  %v6811_v5 = vadd.f32 1.0, %v10420_v13  ;;  %10441 = vpow2.f32 %v8352_v31  ;;  %v13655_v49 = vadd.f32 %v5900_v3, %v5196_v50  ;;  %v8355_v3 = vmul.f32 -1.442695, %v13649_v22 }
 0x6c6   : > { %v5902_v51 = vpop.f32.mrb[9].mxu0  ;;  %v6288_v14 = vpop.f32.mrb[9].mxu1  ;;  %10443 = vrcp.f32 %v6809_v18  ;;  %v6810_v4 = vadd.f32 1.0, %v10422_v15  ;;  %v13662_v33 = vadd.f32 %v6286_v60, %v5196_v50 }
 0x6c7   : > { %v10424_v0 = vpop.eup %10423  ;;  %v5904_v48 = vpop.f32.mrb[10].mxu0  ;;  %10445 = vrcp.f32 %v6811_v5  ;;  %v13669_v31 = vadd.f32 %v5902_v51, %v5196_v50  ;;  %v13675_v15 = vadd.f32 %v6288_v14, %v5196_v50 }
 0x6c8   : > { %v13634_v62 = vpop.f32.mrb[10].mxu1  ;;  %v10426_v37 = vpop.eup %10425  ;;  %v6812_v32 = vadd.f32 1.0, %v10424_v0  ;;  %10447 = vrcp.f32 %v6810_v4  ;;  %v8356_v4 = vmul.f32 -1.442695, %v13655_v49 }
 0x6c9   : > { %v13636_v57 = vpop.f32.mrb[11].mxu0  ;;  %v10428_v9 = vpop.eup %10427  ;;  %v6813_v61 = vadd.f32 1.0, %v10426_v37 }
 0x6ca   : > { %v13638_v1 = vpop.f32.mrb[11].mxu1  ;;  %v10430_v20 = vpop.eup %10429  ;;  %10449 = vrcp.f32 %v6812_v32  ;;  %v6815_v59 = vadd.f32 1.0, %v10428_v9  ;;  %v8358_v9 = vmul.f32 -1.442695, %v13662_v33 }
 0x6cb   : > { %v10432_v53 = vpop.eup %10431  ;;  %10451 = vrcp.f32 %v6813_v61  ;;  %v6814_v11 = vadd.f32 1.0, %v10430_v20  ;;  %v5201_v60 = vpop.permute.xlu1 %5200 }
 0x6cc   : > { %v10434_v47 = vpop.eup %10433  ;;  %10453 = vrcp.f32 %v6815_v59  ;;  %v6816_v36 = vadd.f32 1.0, %v10432_v53  ;;  %v13646_v7 = vpop.f32.mrb[12].mxu0  ;;  %v13679_v51 = vadd.f32 %v5904_v48, %v5201_v60  ;;  %v13687_v14 = vadd.f32 %v13634_v62, %v5201_v60 }
 0x6cd   : > { %v10436_v54 = vpop.eup %10435  ;;  %10455 = vrcp.f32 %v6814_v11  ;;  %v6817_v16 = vadd.f32 1.0, %v10434_v47  ;;  %v13651_v30 = vpop.f32.mrb[12].mxu1  ;;  %v8357_v48 = vmul.f32 -1.442695, %v13669_v31  ;;  %v13693_v20 = vadd.f32 %v13636_v57, %v5201_v60 }
 0x6ce   : > { %v10438_v40 = vpop.eup %10437  ;;  %10457 = vrcp.f32 %v6816_v36  ;;  %v6819_v12 = vadd.f32 1.0, %v10436_v54  ;;  %v13653_v19 = vpop.f32.mrb[13].mxu0  ;;  %v8359_v11 = vmul.f32 -1.442695, %v13675_v15 }
 0x6cf   : > { %v10440_v44 = vpop.eup %10439  ;;  %10459 = vrcp.f32 %v6817_v16  ;;  %v6818_v24 = vadd.f32 1.0, %v10438_v40  ;;  %v13657_v29 = vpop.f32.mrb[13].mxu1  ;;  %v8360_v16 = vmul.f32 -1.442695, %v13679_v51 }
 0x6d0   : > { %v13659_v46 = vpop.f32.mrb[14].mxu0  ;;  %v10442_v38 = vpop.eup %10441  ;;  %10461 = vrcp.f32 %v6819_v12  ;;  %v6820_v21 = vadd.f32 1.0, %v10440_v44 }
 0x6d1   : > { %v13664_v17 = vpop.f32.mrb[14].mxu1  ;;  %v13666_v56 = vpop.f32.mrb[15].mxu0  ;;  %10463 = vrcp.f32 %v6818_v24  ;;  %v6821_v34 = vadd.f32 1.0, %v10442_v38 }
 0x6d2   : > { %v10444_v23 = vpop.eup %10443  ;;  %v13671_v28 = vpop.f32.mrb[15].mxu1  ;;  %10465 = vrcp.f32 %v6820_v21 }
 0x6d3   : > { %v10446_v13 = vpop.eup %10445  ;;  %v7193_v18 = vmul.f32 %v10444_v23, %v13592_v42  ;;  %10467 = vrcp.f32 %v6821_v34  ;;  %v13683_v32 = vpop.permute.xlu0 %5205 }
 0x6d4   : > { %v10448_v5 = vpop.eup %10447  ;;  %v7195_v0 = vmul.f32 %v10446_v13, %v13594_v35  ;;  %10469 = vpow2.f32 %v8354_v25  ;;  %v13697_v59 = vpop.f32.mrb[16].mxu1  ;;  %v13725_v44 = vadd.f32 %v13651_v30, %v13683_v32 }
 0x6d5   : > { %v10450_v37 = vpop.eup %10449  ;;  %7321 = vst [vmem:[%s11226_s15] sm:$0xff] %v7193_v18  ;;  %v7194_v42 = vmul.f32 %v10448_v5, %v13596_v63  ;;  %10471 = vpow2.f32 %v8353_v6  ;;  %v13695_v63 = vpop.f32.mrb[16].mxu0 }
 0x6d6   : > { %v10452_v61 = vpop.eup %10451  ;;  %7323 = vst [vmem:[%s11226_s15 + $0x10] sm:$0xff] %v7195_v0  ;;  %v7196_v35 = vmul.f32 %v10450_v37, %v13598_v55  ;;  %10473 = vpow2.f32 %v8355_v3  ;;  %v13703_v55 = vadd.f32 %v13638_v1, %v5201_v60  ;;  %v13705_v47 = vpop.f32.mrb[17].mxu0  ;;  %v8366_v3 = vmul.f32 -1.442695, %v13725_v44 }
 0x6d7   : > { %v10454_v53 = vpop.eup %10453  ;;  %7322 = vst [vmem:[%s11226_s15 + $0x8] sm:$0xff] %v7194_v42  ;;  %v7197_v62 = vmul.f32 %v10452_v61, %v13602_v10  ;;  %v13707_v36 = vpop.f32.mrb[17].mxu1  ;;  %10475 = vpow2.f32 %v8356_v4  ;;  %v13714_v10 = vadd.f32 %v13646_v7, %v13683_v32 }
 0x6d8   : > { %v10456_v57 = vpop.eup %10455  ;;  %7324 = vst [vmem:[%s11226_s15 + $0x18] sm:$0xff] %v7196_v35  ;;  %v7199_v54 = vmul.f32 %v10454_v53, %v13604_v58  ;;  %v13716_v50 = vpop.f32.mrb[18].mxu0  ;;  %10477 = vpow2.f32 %v8358_v9  ;;  %v8362_v58 = vmul.f32 -1.442695, %v13687_v14  ;;  %v8363_v30 = vmul.f32 -1.442695, %v13703_v55 }
 0x6d9   : > { %v13718_v1 = vpop.f32.mrb[18].mxu1  ;;  %v10458_v40 = vpop.eup %10457  ;;  %7325 = vst [vmem:[%s11226_s15 + $0x20] sm:$0xff] %v7197_v62  ;;  %v7198_v12 = vmul.f32 %v10456_v57, %v13608_v27  ;;  %10479 = vpow2.f32 %v8357_v48  ;;  %v8361_v27 = vmul.f32 -1.442695, %v13693_v20  ;;  %v8364_v13 = vmul.f32 -1.442695, %v13714_v10 }
 0x6da   : > { %v13727_v24 = vpop.f32.mrb[19].mxu0  ;;  %v13729_v7 = vpop.f32.mrb[19].mxu1  ;;  %7327 = vst [vmem:[%s11226_s15 + $0x30] sm:$0xff] %v7199_v54  ;;  %v7200_v21 = vmul.f32 %v10458_v40, %v13610_v2  ;;  %10481 = vpow2.f32 %v8359_v11 }
 0x6db   : > { %v10460_v38 = vpop.eup %10459  ;;  %7326 = vst [vmem:[%s11226_s15 + $0x28] sm:$0xff] %v7198_v12  ;;  %10483 = vpow2.f32 %v8360_v16 }
 0x6dc   : > { %v10462_v25 = vpop.eup %10461  ;;  %v7201_v23 = vmul.f32 %v10460_v38, %v13618_v8  ;;  %7328 = vst [vmem:[%s11226_s15 + $0x38] sm:$0xff] %v7200_v21  ;;  %10485 = vpow2.f32 %v8362_v58  ;;  %v13745_v5 = vpop.f32.mrb[20].mxu0 }
 0x6dd   : > { %v10464_v34 = vpop.eup %10463  ;;  %v7203_v6 = vmul.f32 %v10462_v25, %v13620_v45  ;;  %10487 = vpow2.f32 %v8361_v27  ;;  %v13747_v45 = vpop.f32.mrb[20].mxu1 }
 0x6de   : > { %v10466_v2 = vpop.eup %10465  ;;  %7329 = vst [vmem:[%s11226_s15 + $0x40] sm:$0xff] %v7201_v23  ;;  %v7202_v18 = vmul.f32 %v10464_v34, %v13622_v52  ;;  %10489 = vpow2.f32 %v8363_v30  ;;  %v13751_v52 = vpop.f32.mrb[21].mxu0  ;;  %v13769_v34 = vadd.f32 %v13653_v19, %v13683_v32 }
 0x6df   : > { %v10468_v8 = vpop.eup %10467  ;;  %7331 = vst [vmem:[%s11226_s15 + $0x50] sm:$0xff] %v7203_v6  ;;  %v7204_v60 = vmul.f32 %v10466_v2, %v13624_v39  ;;  %v13753_v37 = vpop.f32.mrb[21].mxu1  ;;  %10491 = vpow2.f32 %v8364_v13 }
 0x6e0   : > { %v10470_v0 = vpop.eup %10469  ;;  %7330 = vst [vmem:[%s11226_s15 + $0x48] sm:$0xff] %v7202_v18  ;;  %v7205_v4 = vmul.f32 %v10468_v8, %v13629_v41  ;;  %v13756_v39 = vpop.f32.mrb[22].mxu0  ;;  %10493 = vpow2.f32 %v8366_v3  ;;  %v13777_v3 = vadd.f32 %v13657_v29, %v13683_v32 }
 0x6e1   : > { %v10472_v42 = vpop.eup %10471  ;;  %7332 = vst [vmem:[%s11226_s15 + $0x58] sm:$0xff] %v7204_v60  ;;  %v6823_v9 = vadd.f32 1.0, %v10470_v0  ;;  %v13758_v61 = vpop.f32.mrb[22].mxu1 }
 0x6e2   : > { %v10474_v35 = vpop.eup %10473  ;;  %7333 = vst [vmem:[%s11226_s15 + $0x60] sm:$0xff] %v7205_v4  ;;  %v6822_v48 = vadd.f32 1.0, %v10472_v42  ;;  %v13761_v53 = vpop.f32.mrb[23].mxu0 }
 0x6e3   : > { %v13763_v41 = vpop.f32.mrb[23].mxu1  ;;  %v10476_v62 = vpop.eup %10475  ;;  %10495 = vrcp.f32 %v6823_v9  ;;  %v6824_v11 = vadd.f32 1.0, %v10474_v35 }
 0x6e4   : > { %v10478_v57 = vpop.eup %10477  ;;  %10497 = vrcp.f32 %v6822_v48  ;;  %v6825_v54 = vadd.f32 1.0, %v10476_v62  ;;  %v5211_v21 = vpop.permute.xlu1 %5210 }
 0x6e5   : > { %v10480_v16 = vpop.eup %10479  ;;  %10499 = vrcp.f32 %v6824_v11  ;;  %v6827_v40 = vadd.f32 1.0, %v10478_v57  ;;  %v13765_v25 = vpop.f32.mrb[24].mxu0  ;;  %v13784_v19 = vadd.f32 %v13659_v46, %v5211_v21  ;;  %v13791_v29 = vadd.f32 %v13664_v17, %v5211_v21 }
 0x6e6   : > { %v10482_v12 = vpop.eup %10481  ;;  %10501 = vrcp.f32 %v6825_v54  ;;  %v6826_v58 = vadd.f32 1.0, %v10480_v16  ;;  %v13771_v6 = vpop.f32.mrb[24].mxu1  ;;  %v8365_v57 = vmul.f32 -1.442695, %v13769_v34  ;;  %v13797_v46 = vadd.f32 %v13666_v56, %v5211_v21 }
 0x6e7   : > { %v10484_v38 = vpop.eup %10483  ;;  %10503 = vrcp.f32 %v6827_v40  ;;  %v6828_v27 = vadd.f32 1.0, %v10482_v12  ;;  %v13773_v13 = vpop.f32.mrb[25].mxu0  ;;  %v8367_v12 = vmul.f32 -1.442695, %v13777_v3  ;;  %v13801_v17 = vadd.f32 %v13671_v28, %v5211_v21 }
 0x6e8   : > { %v10486_v23 = vpop.eup %10485  ;;  %10505 = vrcp.f32 %v6826_v58  ;;  %v6829_v30 = vadd.f32 1.0, %v10484_v38  ;;  %v13779_v8 = vpop.f32.mrb[25].mxu1 }
 0x6e9   : > { %v10488_v2 = vpop.eup %10487  ;;  %10507 = vrcp.f32 %v6828_v27  ;;  %v6831_v18 = vadd.f32 1.0, %v10486_v23  ;;  %v13781_v60 = vpop.f32.mrb[26].mxu0  ;;  %v8368_v23 = vmul.f32 -1.442695, %v13784_v19 }
 0x6ea   : > { %v10490_v0 = vpop.eup %10489  ;;  %10509 = vrcp.f32 %v6829_v30  ;;  %v6830_v4 = vadd.f32 1.0, %v10488_v2  ;;  %v13786_v42 = vpop.f32.mrb[26].mxu1 }
 0x6eb   : > { %v13788_v9 = vpop.f32.mrb[27].mxu0  ;;  %v10492_v35 = vpop.eup %10491  ;;  %10511 = vrcp.f32 %v6831_v18  ;;  %v6832_v48 = vadd.f32 1.0, %v10490_v0  ;;  %v8370_v18 = vmul.f32 -1.442695, %v13791_v29 }
 0x6ec   : > { %v13793_v32 = vpop.f32.mrb[27].mxu1  ;;  %v10494_v62 = vpop.eup %10493  ;;  %10513 = vrcp.f32 %v6830_v4  ;;  %v6833_v11 = vadd.f32 1.0, %v10492_v35  ;;  %v8369_v4 = vmul.f32 -1.442695, %v13797_v46 }
 0x6ed   : > { %v10496_v54 = vpop.eup %10495  ;;  %10515 = vrcp.f32 %v6832_v48  ;;  %v5216_v16 = vpop.permute.xlu0 %5215  ;;  %v6835_v40 = vadd.f32 1.0, %v10494_v62 }
 0x6ee   : > { %v10498_v58 = vpop.eup %10497  ;;  %v7207_v38 = vmul.f32 %v10496_v54, %v13641_v26  ;;  %v13804_v27 = vpop.permute.xlu1 %5220  ;;  %10517 = vrcp.f32 %v6833_v11  ;;  %v13808_v56 = vadd.f32 %v13695_v63, %v5216_v16  ;;  %v13813_v28 = vadd.f32 %v13697_v59, %v5216_v16 }
 0x6ef   : > { %v10500_v30 = vpop.eup %10499  ;;  %v7206_v2 = vmul.f32 %v10498_v58, %v13644_v43  ;;  %10519 = vrcp.f32 %v6835_v40  ;;  %v13815_v21 = vpop.f32.mrb[28].mxu0  ;;  %v13823_v43 = vadd.f32 %v13705_v47, %v5216_v16  ;;  %v8371_v11 = vmul.f32 -1.442695, %v13801_v17 }
 0x6f0   : > { %v13817_v26 = vpop.f32.mrb[28].mxu1  ;;  %v10502_v0 = vpop.eup %10501  ;;  %7335 = vst [vmem:[%s11226_s15 + $0x70] sm:$0xff] %v7207_v38  ;;  %v7208_v63 = vmul.f32 %v10500_v30, %v13649_v22  ;;  %10521 = vpow2.f32 %v8365_v57  ;;  %v13833_v22 = vadd.f32 %v13707_v36, %v5216_v16  ;;  %v8372_v58 = vmul.f32 -1.442695, %v13808_v56 }
 0x6f1   : > { %v13825_v35 = vpop.f32.mrb[29].mxu0  ;;  %v13827_v48 = vpop.f32.mrb[29].mxu1  ;;  %7334 = vst [vmem:[%s11226_s15 + $0x68] sm:$0xff] %v7206_v2  ;;  %v7209_v62 = vmul.f32 %v10502_v0, %v13655_v49  ;;  %10523 = vpow2.f32 %v8367_v12  ;;  %v13844_v49 = vadd.f32 %v13716_v50, %v13804_v27  ;;  %v8373_v2 = vmul.f32 -1.442695, %v13823_v43 }
 0x6f2   : > { %v10504_v59 = vpop.eup %10503  ;;  %v13835_v57 = vpop.f32.mrb[30].mxu0  ;;  %7336 = vst [vmem:[%s11226_s15 + $0x78] sm:$0xff] %v7208_v63  ;;  %10525 = vpow2.f32 %v8368_v23  ;;  %v13855_v23 = vadd.f32 %v13718_v1, %v13804_v27  ;;  %v13862_v0 = vadd.f32 %v13727_v24, %v13804_v27  ;;  %v8375_v1 = vmul.f32 -1.442695, %v13833_v22 }
 0x6f3   : > { %v13837_v54 = vpop.f32.mrb[30].mxu1  ;;  %v10506_v47 = vpop.eup %10505  ;;  %v7211_v40 = vmul.f32 %v10504_v59, %v13662_v33  ;;  %7337 = vst [vmem:[%s11226_s15 + $0x80] sm:$0xff] %v7209_v62  ;;  %10527 = vpow2.f32 %v8370_v18  ;;  %v8374_v33 = vmul.f32 -1.442695, %v13813_v28 }
 0x6f4   : > { %v13846_v12 = vpop.f32.mrb[31].mxu0  ;;  %v13848_v36 = vpop.f32.mrb[31].mxu1  ;;  %v7210_v38 = vmul.f32 %v10506_v47, %v13669_v31  ;;  %10529 = vpow2.f32 %v8369_v4  ;;  %v8378_v62 = vmul.f32 -1.442695, %v13855_v23 }
 0x6f5   : > { %v10508_v16 = vpop.eup %10507  ;;  %7339 = vst [vmem:[%s11226_s15 + $0x90] sm:$0xff] %v7211_v40  ;;  %10531 = vpow2.f32 %v8371_v11  ;;  %v13875_v11 = vpop.f32.mrb[32].mxu1  ;;  %v8377_v40 = vmul.f32 -1.442695, %v13862_v0 }
 0x6f6   : > { %v10510_v30 = vpop.eup %10509  ;;  %v7212_v50 = vmul.f32 %v10508_v16, %v13675_v15  ;;  %7338 = vst [vmem:[%s11226_s15 + $0x88] sm:$0xff] %v7210_v38  ;;  %10533 = vpow2.f32 %v8372_v58  ;;  %v8376_v15 = vmul.f32 -1.442695, %v13844_v49  ;;  %v13882_v16 = vpop.f32.mrb[33].mxu1 }
 0x6f7   : > { %v10512_v31 = vpop.eup %10511  ;;  %v7213_v18 = vmul.f32 %v10510_v30, %v13679_v51  ;;  %10535 = vpow2.f32 %v8374_v33  ;;  %v13873_v51 = vpop.f32.mrb[32].mxu0 }
 0x6f8   : > { %v10514_v63 = vpop.eup %10513  ;;  %7340 = vst [vmem:[%s11226_s15 + $0x98] sm:$0xff] %v7212_v50  ;;  %v7215_v59 = vmul.f32 %v10512_v31, %v13687_v14  ;;  %10537 = vpow2.f32 %v8373_v2  ;;  %v13880_v58 = vpop.f32.mrb[33].mxu0 }
 0x6f9   : > { %v10516_v4 = vpop.eup %10515  ;;  %7341 = vst [vmem:[%s11226_s15 + $0xa0] sm:$0xff] %v7213_v18  ;;  %v7214_v24 = vmul.f32 %v10514_v63, %v13693_v20  ;;  %10539 = vpow2.f32 %v8375_v1  ;;  %v13886_v33 = vpop.f32.mrb[34].mxu0 }
 0x6fa   : > { %v10518_v47 = vpop.eup %10517  ;;  %7343 = vst [vmem:[%s11226_s15 + $0xb0] sm:$0xff] %v7215_v59  ;;  %v7216_v14 = vmul.f32 %v10516_v4, %v13703_v55  ;;  %v13888_v30 = vpop.f32.mrb[34].mxu1  ;;  %10541 = vpow2.f32 %v8376_v15 }
 0x6fb   : > { %v10520_v20 = vpop.eup %10519  ;;  %7342 = vst [vmem:[%s11226_s15 + $0xa8] sm:$0xff] %v7214_v24  ;;  %v7217_v38 = vmul.f32 %v10518_v47, %v13714_v10  ;;  %v13892_v2 = vpop.f32.mrb[35].mxu0  ;;  %10543 = vpow2.f32 %v8378_v62 }
 0x6fc   : > { %v10522_v50 = vpop.eup %10521  ;;  %7344 = vst [vmem:[%s11226_s15 + $0xb8] sm:$0xff] %v7216_v14  ;;  %v7219_v55 = vmul.f32 %v10520_v20, %v13725_v44  ;;  %v13894_v31 = vpop.f32.mrb[35].mxu1  ;;  %10545 = vpow2.f32 %v8377_v40 }
 0x6fd   : > { %15099 = vst [vmem:[#allocation94_spill] sm:$0xff] %v13894_v31  ;;  %v10524_v18 = vpop.eup %10523  ;;  %7345 = vst [vmem:[%s11226_s15 + $0xc0] sm:$0xff] %v7217_v38  ;;  %v6834_v63 = vadd.f32 1.0, %v10522_v50  ;;  %v5226_v15 = vpop.permute.xlu0 %5225 }
 0x6fe   : > { %v10526_v59 = vpop.eup %10525  ;;  %7347 = vst [vmem:[%s11226_s15 + $0xd0] sm:$0xff] %v7219_v55  ;;  %v6836_v10 = vadd.f32 1.0, %v10524_v18  ;;  %v13898_v20 = vpop.f32.mrb[36].mxu0 }
 0x6ff   : > { %v10528_v1 = vpop.eup %10527  ;;  %10547 = vrcp.f32 %v6834_v63  ;;  %v6837_v4 = vadd.f32 1.0, %v10526_v59  ;;  %v13900_v62 = vpop.f32.mrb[36].mxu1 }
 0x700   : > { %v10530_v24 = vpop.eup %10529  ;;  %10549 = vrcp.f32 %v6836_v10  ;;  %v6839_v47 = vadd.f32 1.0, %v10528_v1  ;;  %v13902_v50 = vpop.f32.mrb[37].mxu0  ;;  %v13910_v1 = vadd.f32 %v13729_v7, %v13804_v27 }
 0x701   : > { %v10532_v44 = vpop.eup %10531  ;;  %10551 = vrcp.f32 %v6837_v4  ;;  %v6838_v14 = vadd.f32 1.0, %v10530_v24  ;;  %15100 = vst [vmem:[#allocation95_spill] sm:$0xff] %v13902_v50  ;;  %v13904_v18 = vpop.f32.mrb[37].mxu1 }
 0x702   : > { %v10534_v31 = vpop.eup %10533  ;;  %10553 = vrcp.f32 %v6839_v47  ;;  %v6840_v38 = vadd.f32 1.0, %v10532_v44  ;;  %15101 = vst [vmem:[#allocation96_spill] sm:$0xff] %v13904_v18  ;;  %v13906_v63 = vpop.f32.mrb[38].mxu0 }
 0x703   : > { %v10536_v40 = vpop.eup %10535  ;;  %10555 = vrcp.f32 %v6838_v14  ;;  %v6841_v55 = vadd.f32 1.0, %v10534_v31  ;;  %15102 = vst [vmem:[#allocation97_spill] sm:$0xff] %v13906_v63  ;;  %v13912_v4 = vpop.f32.mrb[38].mxu1  ;;  %v13917_v31 = vadd.f32 %v13745_v5, %v5226_v15  ;;  %v8379_v5 = vmul.f32 -1.442695, %v13910_v1 }
 0x704   : > { %v10538_v59 = vpop.eup %10537  ;;  %10557 = vrcp.f32 %v6840_v38  ;;  %v6843_v10 = vadd.f32 1.0, %v10536_v40  ;;  %15103 = vst [vmem:[#allocation98_spill] sm:$0xff] %v13912_v4  ;;  %v13914_v24 = vpop.f32.mrb[39].mxu0  ;;  %v13922_v40 = vadd.f32 %v13747_v45, %v5226_v15  ;;  %v13925_v4 = vadd.f32 %v13751_v52, %v5226_v15 }
 0x705   : > { %15104 = vst [vmem:[#allocation99_spill] sm:$0xff] %v13914_v24  ;;  %v10540_v47 = vpop.eup %10539  ;;  %10559 = vrcp.f32 %v6841_v55  ;;  %v6842_v44 = vadd.f32 1.0, %v10538_v59  ;;  %v13919_v14 = vpop.f32.mrb[39].mxu1  ;;  %v8380_v18 = vmul.f32 -1.442695, %v13917_v31 }
 0x706   : > { %15105 = vst [vmem:[#allocation100_spill] sm:$0xff] %v13919_v14  ;;  %v10542_v63 = vpop.eup %10541  ;;  %10561 = vrcp.f32 %v6843_v10  ;;  %v6844_v38 = vadd.f32 1.0, %v10540_v47  ;;  %v5231_v55 = vpop.permute.xlu1 %5230  ;;  %v13929_v14 = vadd.f32 %v13753_v37, %v5226_v15 }
 0x707   : > { %v10544_v7 = vpop.eup %10543  ;;  %10563 = vrcp.f32 %v6842_v44  ;;  %v6845_v27 = vadd.f32 1.0, %v10542_v63  ;;  %v5236_v47 = vpop.permute.xlu0 %5235  ;;  %v13933_v63 = vadd.f32 %v13756_v39, %v5231_v55  ;;  %v13940_v37 = vadd.f32 %v13758_v61, %v5231_v55 }
 0x708   : > { %v10546_v24 = vpop.eup %10545  ;;  %10565 = vrcp.f32 %v6844_v38  ;;  %v6847_v59 = vadd.f32 1.0, %v10544_v7  ;;  %v13935_v52 = vpop.f32.mrb[40].mxu0  ;;  %v8382_v7 = vmul.f32 -1.442695, %v13922_v40  ;;  %v13949_v50 = vadd.f32 %v13761_v53, %v5231_v55 }
 0x709   : > { %v10548_v10 = vpop.eup %10547  ;;  %10567 = vrcp.f32 %v6845_v27  ;;  %v6846_v45 = vadd.f32 1.0, %v10546_v24  ;;  %15106 = vst [vmem:[#allocation101_spill] sm:$0xff] %v13935_v52  ;;  %v13942_v15 = vpop.f32.mrb[40].mxu1  ;;  %v8381_v52 = vmul.f32 -1.442695, %v13925_v4 }
 0x70a   : > { %v10550_v44 = vpop.eup %10549  ;;  %v7218_v38 = vmul.f32 %v10548_v10, %v13769_v34  ;;  %10569 = vrcp.f32 %v6847_v59  ;;  %v13944_v24 = vpop.f32.mrb[41].mxu0 }
 0x70b   : > { %15107 = vst [vmem:[#allocation102_spill] sm:$0xff] %v13944_v24  ;;  %v10552_v27 = vpop.eup %10551  ;;  %v7220_v39 = vmul.f32 %v10550_v44, %v13777_v3  ;;  %10571 = vrcp.f32 %v6846_v45  ;;  %v13951_v34 = vpop.f32.mrb[41].mxu1  ;;  %v8383_v24 = vmul.f32 -1.442695, %v13929_v14  ;;  %v13959_v3 = vadd.f32 %v13763_v41, %v5231_v55 }
 0x70c   : > { %v13953_v59 = vpop.f32.mrb[42].mxu0  ;;  %v10554_v61 = vpop.eup %10553  ;;  %7346 = vst [vmem:[%s11226_s15 + $0xc8] sm:$0xff] %v7218_v38  ;;  %v7221_v10 = vmul.f32 %v10552_v27, %v13784_v19  ;;  %10573 = vpow2.f32 %v8379_v5  ;;  %v8384_v38 = vmul.f32 -1.442695, %v13933_v63  ;;  %v13969_v19 = vadd.f32 %v13765_v25, %v5236_v47 }
 0x70d   : > { %15108 = vst [vmem:[#allocation103_spill] sm:$0xff] %v13953_v59  ;;  %v13961_v45 = vpop.f32.mrb[42].mxu1  ;;  %v13963_v53 = vpop.f32.mrb[43].mxu0  ;;  %7348 = vst [vmem:[%s11226_s15 + $0xd8] sm:$0xff] %v7220_v39  ;;  %v7223_v59 = vmul.f32 %v10554_v61, %v13791_v29  ;;  %10575 = vpow2.f32 %v8380_v18  ;;  %v8386_v27 = vmul.f32 -1.442695, %v13940_v37  ;;  %v13977_v39 = vadd.f32 %v13771_v6, %v5236_v47 }
 0x70e   : > { %v10556_v44 = vpop.eup %10555  ;;  %v13971_v5 = vpop.f32.mrb[43].mxu1  ;;  %7349 = vst [vmem:[%s11226_s15 + $0xe0] sm:$0xff] %v7221_v10  ;;  %10577 = vpow2.f32 %v8382_v7  ;;  %v8385_v25 = vmul.f32 -1.442695, %v13949_v50  ;;  %v13983_v61 = vadd.f32 %v13773_v13, %v5236_v47  ;;  %v8387_v7 = vmul.f32 -1.442695, %v13959_v3 }
 0x70f   : > { %v10558_v41 = vpop.eup %10557  ;;  %v7222_v55 = vmul.f32 %v10556_v44, %v13797_v46  ;;  %7351 = vst [vmem:[%s11226_s15 + $0xf0] sm:$0xff] %v7223_v59  ;;  %10579 = vpow2.f32 %v8381_v52  ;;  %v13989_v6 = vadd.f32 %v13779_v8, %v5236_v47  ;;  %v8388_v52 = vmul.f32 -1.442695, %v13969_v19  ;;  %v13994_v13 = vpop.f32.mrb[44].mxu0 }
 0x710   : > { %v10560_v29 = vpop.eup %10559  ;;  %v7224_v18 = vmul.f32 %v10558_v41, %v13801_v17  ;;  %10581 = vpow2.f32 %v8383_v24  ;;  %v13996_v44 = vpop.f32.mrb[44].mxu1  ;;  %v8390_v8 = vmul.f32 -1.442695, %v13977_v39 }
 0x711   : > { %v10562_v10 = vpop.eup %10561  ;;  %7350 = vst [vmem:[%s11226_s15 + $0xe8] sm:$0xff] %v7222_v55  ;;  %v7225_v46 = vmul.f32 %v10560_v29, %v13808_v56  ;;  %10583 = vpow2.f32 %v8384_v38  ;;  %v14001_v47 = vpop.f32.mrb[45].mxu0  ;;  %v8389_v55 = vmul.f32 -1.442695, %v13983_v61 }
 0x712   : > { %v10564_v59 = vpop.eup %10563  ;;  %7352 = vst [vmem:[%s11226_s15 + $0xf8] sm:$0xff] %v7224_v18  ;;  %v7227_v17 = vmul.f32 %v10562_v10, %v13813_v28  ;;  %10585 = vpow2.f32 %v8386_v27  ;;  %v14003_v41 = vpop.f32.mrb[45].mxu1  ;;  %v8391_v10 = vmul.f32 -1.442695, %v13989_v6 }
 0x713   : > { %v10566_v56 = vpop.eup %10565  ;;  %7353 = vst [vmem:[%s11226_s15 + $0x100] sm:$0xff] %v7225_v46  ;;  %v7226_v24 = vmul.f32 %v10564_v59, %v13823_v43  ;;  %10587 = vpow2.f32 %v8385_v25  ;;  %v14008_v29 = vpop.f32.mrb[46].mxu0 }
 0x714   : > { %v10568_v28 = vpop.eup %10567  ;;  %7355 = vst [vmem:[%s11226_s15 + $0x110] sm:$0xff] %v7227_v17  ;;  %v7228_v38 = vmul.f32 %v10566_v56, %v13833_v22  ;;  %v14010_v18 = vpop.f32.mrb[46].mxu1  ;;  %10589 = vpow2.f32 %v8387_v7 }
 0x715   : > { %v10570_v43 = vpop.eup %10569  ;;  %7354 = vst [vmem:[%s11226_s15 + $0x108] sm:$0xff] %v7226_v24  ;;  %v7229_v27 = vmul.f32 %v10568_v28, %v13844_v49  ;;  %v14015_v46 = vpop.f32.mrb[47].mxu0  ;;  %10591 = vpow2.f32 %v8388_v52 }
 0x716   : > { %15109 = vst [vmem:[#allocation104_spill] sm:$0xff] %v14015_v46  ;;  %v14017_v22 = vpop.f32.mrb[47].mxu1  ;;  %v10572_v25 = vpop.eup %10571  ;;  %7356 = vst [vmem:[%s11226_s15 + $0x118] sm:$0xff] %v7228_v38  ;;  %v7231_v59 = vmul.f32 %v10570_v43, %v13855_v23  ;;  %10593 = vpow2.f32 %v8390_v8 }
 0x717   : > { %15110 = vst [vmem:[#allocation105_spill] sm:$0xff] %v14017_v22  ;;  %v10574_v17 = vpop.eup %10573  ;;  %7357 = vst [vmem:[%s11226_s15 + $0x120] sm:$0xff] %v7229_v27  ;;  %v7230_v56 = vmul.f32 %v10572_v25, %v13862_v0  ;;  %10595 = vpow2.f32 %v8389_v55  ;;  %v14025_v38 = vpop.f32.mrb[48].mxu0 }
 0x718   : > { %v10576_v24 = vpop.eup %10575  ;;  %7359 = vst [vmem:[%s11226_s15 + $0x130] sm:$0xff] %v7231_v59  ;;  %v6848_v49 = vadd.f32 1.0, %v10574_v17  ;;  %10597 = vpow2.f32 %v8391_v10  ;;  %v14027_v43 = vpop.f32.mrb[48].mxu1 }
 0x719   : > { %v10578_v7 = vpop.eup %10577  ;;  %7358 = vst [vmem:[%s11226_s15 + $0x128] sm:$0xff] %v7230_v56  ;;  %v6849_v28 = vadd.f32 1.0, %v10576_v24  ;;  %v14029_v0 = vpop.f32.mrb[49].mxu0 }
 0x71a   : > { %v10580_v46 = vpop.eup %10579  ;;  %10599 = vrcp.f32 %v6848_v49  ;;  %v6851_v22 = vadd.f32 1.0, %v10578_v7  ;;  %v14031_v55 = vpop.f32.mrb[49].mxu1 }
 0x71b   : > { %v10582_v23 = vpop.eup %10581  ;;  %10601 = vrcp.f32 %v6849_v28  ;;  %v6850_v52 = vadd.f32 1.0, %v10580_v46  ;;  %15111 = vst [vmem:[#allocation106_spill] sm:$0xff] %v14031_v55  ;;  %v14033_v25 = vpop.f32.mrb[50].mxu0 }
 0x71c   : > { %v10584_v8 = vpop.eup %10583  ;;  %10603 = vrcp.f32 %v6851_v22  ;;  %v6852_v27 = vadd.f32 1.0, %v10582_v23  ;;  %15112 = vst [vmem:[#allocation107_spill] sm:$0xff] %v14033_v25  ;;  %v14035_v17 = vpop.f32.mrb[50].mxu1 }
 0x71d   : > { %v10586_v10 = vpop.eup %10585  ;;  %10605 = vrcp.f32 %v6850_v52  ;;  %v6853_v59 = vadd.f32 1.0, %v10584_v8  ;;  %15113 = vst [vmem:[#allocation108_spill] sm:$0xff] %v14035_v17  ;;  %v14037_v56 = vpop.f32.mrb[51].mxu0 }
 0x71e   : > { %15114 = vst [vmem:[#allocation109_spill] sm:$0xff] %v14037_v56  ;;  %v10588_v24 = vpop.eup %10587  ;;  %v5241_v46 = vpop.permute.xlu1 %5240  ;;  %10607 = vrcp.f32 %v6852_v27  ;;  %v6855_v49 = vadd.f32 1.0, %v10586_v10 }
 0x71f   : > { %v14039_v7 = vpop.f32.mrb[51].mxu1  ;;  %v10590_v28 = vpop.eup %10589  ;;  %10609 = vrcp.f32 %v6853_v59  ;;  %v6854_v22 = vadd.f32 1.0, %v10588_v24  ;;  %v14042_v23 = vadd.f32 %v13781_v60, %v5241_v46  ;;  %v14045_v8 = vadd.f32 %v13786_v42, %v5241_v46 }
 0x720   : > { %15115 = vst [vmem:[#allocation110_spill] sm:$0xff] %v14039_v7  ;;  %v10592_v25 = vpop.eup %10591  ;;  %10611 = vrcp.f32 %v6855_v49  ;;  %v6856_v52 = vadd.f32 1.0, %v10590_v28  ;;  %v14048_v27 = vadd.f32 %v13788_v9, %v5241_v46  ;;  %v5246_v7 = vpop.permute.xlu0 %5245  ;;  %v14051_v24 = vadd.f32 %v13793_v32, %v5241_v46 }
 0x721   : > { %v10594_v17 = vpop.eup %10593  ;;  %10613 = vrcp.f32 %v6854_v22  ;;  %v6857_v56 = vadd.f32 1.0, %v10592_v25  ;;  %v14053_v60 = vpop.f32.mrb[52].mxu0  ;;  %v8392_v42 = vmul.f32 -1.442695, %v14042_v23  ;;  %v14057_v22 = vadd.f32 %v13815_v21, %v5246_v7 }
 0x722   : > { %v10596_v10 = vpop.eup %10595  ;;  %10615 = vrcp.f32 %v6856_v52  ;;  %v6859_v59 = vadd.f32 1.0, %v10594_v17  ;;  %15116 = vst [vmem:[#allocation111_spill] sm:$0xff] %v14053_v60  ;;  %v14059_v25 = vpop.f32.mrb[52].mxu1  ;;  %v8394_v32 = vmul.f32 -1.442695, %v14045_v8  ;;  %v14065_v46 = vadd.f32 %v13817_v26, %v5246_v7 }
 0x723   : > { %v10598_v49 = vpop.eup %10597  ;;  %10617 = vrcp.f32 %v6857_v56  ;;  %v6858_v28 = vadd.f32 1.0, %v10596_v10  ;;  %15117 = vst [vmem:[#allocation112_spill] sm:$0xff] %v14059_v25  ;;  %v14061_v9 = vpop.f32.mrb[53].mxu0  ;;  %v8393_v25 = vmul.f32 -1.442695, %v14048_v27 }
 0x724   : > { %15118 = vst [vmem:[#allocation113_spill] sm:$0xff] %v14061_v9  ;;  %v10600_v55 = vpop.eup %10599  ;;  %10619 = vrcp.f32 %v6859_v59  ;;  %v6860_v17 = vadd.f32 1.0, %v10598_v49  ;;  %v14067_v52 = vpop.f32.mrb[53].mxu1  ;;  %v14074_v9 = vadd.f32 %v13825_v35, %v5246_v7 }
 0x725   : > { %15119 = vst [vmem:[#allocation114_spill] sm:$0xff] %v14067_v52  ;;  %v14069_v56 = vpop.f32.mrb[54].mxu0  ;;  %v10602_v10 = vpop.eup %10601  ;;  %v7232_v21 = vmul.f32 %v10600_v55, %v13910_v1  ;;  %10621 = vrcp.f32 %v6858_v28  ;;  %v14083_v1 = vadd.f32 %v13827_v48, %v5246_v7  ;;  %v8398_v48 = vmul.f32 -1.442695, %v14065_v46 }
 0x726   : > { %15120 = vst [vmem:[#allocation115_spill] sm:$0xff] %v14069_v56  ;;  %v14076_v59 = vpop.f32.mrb[54].mxu1  ;;  %v14078_v49 = vpop.f32.mrb[55].mxu0  ;;  %v7233_v52 = vmul.f32 %v10602_v10, %v13917_v31  ;;  %10623 = vrcp.f32 %v6860_v17  ;;  %v8395_v56 = vmul.f32 -1.442695, %v14051_v24 }
 0x727   : > { %15121 = vst [vmem:[#allocation116_spill] sm:$0xff] %v14076_v59  ;;  %15122 = vst [vmem:[#allocation117_spill] sm:$0xff] %v14078_v49  ;;  %v10604_v26 = vpop.eup %10603  ;;  %v5251_v60 = vpop.permute.xlu1 %5250  ;;  %10625 = vpow2.f32 %v8392_v42  ;;  %v8396_v49 = vmul.f32 -1.442695, %v14057_v22 }
 0x728   : > { %v14085_v55 = vpop.f32.mrb[55].mxu1  ;;  %v10606_v35 = vpop.eup %10605  ;;  %7360 = vst [vmem:[%s11226_s15 + $0x138] sm:$0xff] %v7232_v21  ;;  %v7235_v28 = vmul.f32 %v10604_v26, %v13922_v40  ;;  %v14091_v59 = vadd.f32 %v13835_v57, %v5251_v60  ;;  %7361 = vst [vmem:[%s11226_s15 + $0x140] sm:$0xff] %v7233_v52  ;;  %10627 = vpow2.f32 %v8394_v32  ;;  %v14097_v7 = vadd.f32 %v13837_v54, %v5251_v60 }
 0x729   : > { %v10608_v31 = vpop.eup %10607  ;;  %v7234_v17 = vmul.f32 %v10606_v35, %v13925_v4  ;;  %v14099_v40 = vpop.permute.xlu0 %5255  ;;  %10629 = vpow2.f32 %v8393_v25  ;;  %v8397_v57 = vmul.f32 -1.442695, %v14074_v9  ;;  %v14105_v52 = vadd.f32 %v13846_v12, %v5251_v60 }
 0x72a   : > { %v10610_v10 = vpop.eup %10609  ;;  %7363 = vst [vmem:[%s11226_s15 + $0x150] sm:$0xff] %v7235_v28  ;;  %v7236_v42 = vmul.f32 %v10608_v31, %v13929_v14  ;;  %10631 = vpow2.f32 %v8395_v56  ;;  %v8399_v54 = vmul.f32 -1.442695, %v14083_v1  ;;  %v14111_v21 = vadd.f32 %v13848_v36, %v5251_v60  ;;  %v14113_v26 = vpop.f32.mrb[56].mxu0 }
 0x72b   : > { %v10612_v4 = vpop.eup %10611  ;;  %7362 = vst [vmem:[%s11226_s15 + $0x148] sm:$0xff] %v7234_v17  ;;  %v7237_v32 = vmul.f32 %v10610_v10, %v13933_v63  ;;  %v14115_v14 = vpop.f32.mrb[56].mxu1  ;;  %10633 = vpow2.f32 %v8396_v49  ;;  %v8400_v35 = vmul.f32 -1.442695, %v14091_v59  ;;  %v14122_v63 = vadd.f32 %v13873_v51, %v14099_v40 }
 0x72c   : > { %v10614_v25 = vpop.eup %10613  ;;  %7364 = vst [vmem:[%s11226_s15 + $0x158] sm:$0xff] %v7236_v42  ;;  %v7239_v12 = vmul.f32 %v10612_v4, %v13940_v37  ;;  %v14124_v56 = vpop.f32.mrb[57].mxu0  ;;  %10635 = vpow2.f32 %v8398_v48  ;;  %v8402_v31 = vmul.f32 -1.442695, %v14097_v7  ;;  %v8401_v10 = vmul.f32 -1.442695, %v14105_v52 }
 0x72d   : > { %v14126_v36 = vpop.f32.mrb[57].mxu1  ;;  %v10616_v60 = vpop.eup %10615  ;;  %7365 = vst [vmem:[%s11226_s15 + $0x160] sm:$0xff] %v7237_v32  ;;  %v7238_v28 = vmul.f32 %v10614_v25, %v13949_v50  ;;  %10637 = vpow2.f32 %v8397_v57  ;;  %v8403_v32 = vmul.f32 -1.442695, %v14111_v21  ;;  %v8404_v57 = vmul.f32 -1.442695, %v14122_v63 }
 0x72e   : > { %v14131_v37 = vpop.f32.mrb[58].mxu0  ;;  %v14133_v49 = vpop.f32.mrb[58].mxu1  ;;  %7367 = vst [vmem:[%s11226_s15 + $0x170] sm:$0xff] %v7239_v12  ;;  %v7240_v51 = vmul.f32 %v10616_v60, %v13959_v3  ;;  %10639 = vpow2.f32 %v8399_v54 }
 0x72f   : > { %v10618_v17 = vpop.eup %10617  ;;  %v14138_v42 = vpop.f32.mrb[59].mxu0  ;;  %7366 = vst [vmem:[%s11226_s15 + $0x168] sm:$0xff] %v7238_v28  ;;  %10641 = vpow2.f32 %v8400_v35 }
 0x730   : > { %v14140_v4 = vpop.f32.mrb[59].mxu1  ;;  %v10620_v50 = vpop.eup %10619  ;;  %v7241_v48 = vmul.f32 %v10618_v17, %v13969_v19  ;;  %7368 = vst [vmem:[%s11226_s15 + $0x178] sm:$0xff] %v7240_v51  ;;  %10643 = vpow2.f32 %v8402_v31 }
 0x731   : > { %v10622_v25 = vpop.eup %10621  ;;  %v7243_v3 = vmul.f32 %v10620_v50, %v13977_v39  ;;  %10645 = vpow2.f32 %v8401_v10  ;;  %v14153_v51 = vpop.f32.mrb[60].mxu0 }
 0x732   : > { %v10624_v12 = vpop.eup %10623  ;;  %7369 = vst [vmem:[%s11226_s15 + $0x180] sm:$0xff] %v7241_v48  ;;  %v7242_v60 = vmul.f32 %v10622_v25, %v13983_v61  ;;  %10647 = vpow2.f32 %v8403_v32  ;;  %v14156_v50 = vpop.f32.mrb[60].mxu1 }
 0x733   : > { %v10626_v28 = vpop.eup %10625  ;;  %7371 = vst [vmem:[%s11226_s15 + $0x190] sm:$0xff] %v7243_v3  ;;  %v7244_v19 = vmul.f32 %v10624_v12, %v13989_v6  ;;  %10649 = vpow2.f32 %v8404_v57  ;;  %v14158_v48 = vpop.f32.mrb[61].mxu0 }
 0x734   : > { %v10628_v54 = vpop.eup %10627  ;;  %7370 = vst [vmem:[%s11226_s15 + $0x188] sm:$0xff] %v7242_v60  ;;  %v6861_v17 = vadd.f32 1.0, %v10626_v28  ;;  %v14160_v25 = vpop.f32.mrb[61].mxu1 }
 0x735   : > { %v10630_v39 = vpop.eup %10629  ;;  %7372 = vst [vmem:[%s11226_s15 + $0x198] sm:$0xff] %v7244_v19  ;;  %v6863_v35 = vadd.f32 1.0, %v10628_v54  ;;  %15123 = vst [vmem:[#allocation118_spill] sm:$0xff] %v14160_v25  ;;  %v14162_v6 = vpop.f32.mrb[62].mxu0 }
 0x736   : > { %v10632_v61 = vpop.eup %10631  ;;  %10651 = vrcp.f32 %v6861_v17  ;;  %v6862_v31 = vadd.f32 1.0, %v10630_v39  ;;  %15124 = vst [vmem:[#allocation119_spill] sm:$0xff] %v14162_v6  ;;  %v14164_v3 = vpop.f32.mrb[62].mxu1 }
 0x737   : > { %v10634_v10 = vpop.eup %10633  ;;  %10653 = vrcp.f32 %v6863_v35  ;;  %v6864_v32 = vadd.f32 1.0, %v10632_v61  ;;  %15125 = vst [vmem:[#allocation120_spill] sm:$0xff] %v14164_v3  ;;  %v14166_v12 = vpop.f32.mrb[63].mxu0  ;;  %v14172_v35 = vadd.f32 %v13875_v11, %v14099_v40 }
 0x738   : > { %15126 = vst [vmem:[#allocation121_spill] sm:$0xff] %v14166_v12  ;;  %v10636_v60 = vpop.eup %10635  ;;  %10655 = vrcp.f32 %v6862_v31  ;;  %v6865_v57 = vadd.f32 1.0, %v10634_v10  ;;  %v14168_v28 = vpop.f32.mrb[63].mxu1  ;;  %v14176_v31 = vadd.f32 %v13880_v58, %v14099_v40 }
 0x739   : > { %15127 = vst [vmem:[#allocation122_spill] sm:$0xff] %v14168_v28  ;;  %v10638_v19 = vpop.eup %10637  ;;  %10657 = vrcp.f32 %v6864_v32  ;;  %v6867_v54 = vadd.f32 1.0, %v10636_v60  ;;  %v5261_v32 = vpop.permute.xlu1 %5260  ;;  %v8406_v58 = vmul.f32 -1.442695, %v14172_v35 }
 0x73a   : > { %v10640_v17 = vpop.eup %10639  ;;  %10659 = vrcp.f32 %v6865_v57  ;;  %v6866_v39 = vadd.f32 1.0, %v10638_v19  ;;  %v14180_v57 = vadd.f32 %v13882_v16, %v14099_v40  ;;  %v14183_v11 = vadd.f32 %v13886_v33, %v5261_v32  ;;  %v5266_v33 = vpop.permute.xlu0 %5265 }
 0x73b   : > { %v10642_v25 = vpop.eup %10641  ;;  %10661 = vrcp.f32 %v6867_v54  ;;  %v6868_v6 = vadd.f32 1.0, %v10640_v17  ;;  %v8405_v16 = vmul.f32 -1.442695, %v14176_v31  ;;  %v14191_v40 = vadd.f32 %v13892_v2, %v5261_v32 }
 0x73c   : > { %v10644_v61 = vpop.eup %10643  ;;  %10663 = vrcp.f32 %v6866_v39  ;;  %v6869_v12 = vadd.f32 1.0, %v10642_v25  ;;  %v14187_v39 = vadd.f32 %v13888_v30, %v5261_v32  ;;  %v14201_v2 = vadd.f32 %v13898_v20, %v5266_v33  ;;  %v15129_v20 = vld [vmem:[#allocation95_spill] sm:$0xff] }
 0x73d   : > { %v10646_v10 = vpop.eup %10645  ;;  %10665 = vrcp.f32 %v6868_v6  ;;  %v6871_v60 = vadd.f32 1.0, %v10644_v61 }
 0x73e   : > { %v10648_v19 = vpop.eup %10647  ;;  %10667 = vrcp.f32 %v6869_v12  ;;  %v6870_v54 = vadd.f32 1.0, %v10646_v10 }
 0x73f   : > { %v10650_v17 = vpop.eup %10649  ;;  %10669 = vrcp.f32 %v6871_v60  ;;  %v6872_v25 = vadd.f32 1.0, %v10648_v19  ;;  %v8407_v60 = vmul.f32 -1.442695, %v14180_v57  ;;  %v15128_v19 = vld [vmem:[#allocation94_spill] sm:$0xff] }
 0x740   : > { %v10652_v6 = vpop.eup %10651  ;;  %10671 = vrcp.f32 %v6870_v54  ;;  %v6873_v61 = vadd.f32 1.0, %v10650_v17  ;;  %v14196_v30 = vadd.f32 %v15128_v19, %v5261_v32  ;;  %v8408_v17 = vmul.f32 -1.442695, %v14183_v11 }
 0x741   : > { %v10654_v12 = vpop.eup %10653  ;;  %v7245_v10 = vmul.f32 %v10652_v6, %v14042_v23  ;;  %10673 = vrcp.f32 %v6872_v25  ;;  %v8410_v25 = vmul.f32 -1.442695, %v14187_v39  ;;  %v14207_v32 = vadd.f32 %v13900_v62, %v5266_v33 }
 0x742   : > { %v10656_v28 = vpop.eup %10655  ;;  %v7247_v54 = vmul.f32 %v10654_v12, %v14045_v8  ;;  %10675 = vrcp.f32 %v6873_v61  ;;  %v8409_v61 = vmul.f32 -1.442695, %v14191_v40  ;;  %v14213_v12 = vadd.f32 %v15129_v20, %v5266_v33 }
 0x743   : > { %v10658_v3 = vpop.eup %10657  ;;  %7373 = vst [vmem:[%s11226_s15 + $0x1a0] sm:$0xff] %v7245_v10  ;;  %v7246_v23 = vmul.f32 %v10656_v28, %v14048_v27  ;;  %10677 = vpow2.f32 %v8406_v58  ;;  %v14215_v27 = vpop.permute.xlu1 %5270  ;;  %v8411_v62 = vmul.f32 -1.442695, %v14196_v30  ;;  %v15130_v58 = vld [vmem:[#allocation96_spill] sm:$0xff] }
 0x744   : > { %v10660_v6 = vpop.eup %10659  ;;  %7375 = vst [vmem:[%s11226_s15 + $0x1b0] sm:$0xff] %v7247_v54  ;;  %v7248_v8 = vmul.f32 %v10658_v3, %v14051_v24  ;;  %10679 = vpow2.f32 %v8405_v16  ;;  %v14221_v19 = vadd.f32 %v15130_v58, %v5266_v33  ;;  %v8412_v16 = vmul.f32 -1.442695, %v14201_v2  ;;  %v15131_v54 = vld [vmem:[#allocation97_spill] sm:$0xff] }
 0x745   : > { %v10662_v10 = vpop.eup %10661  ;;  %7374 = vst [vmem:[%s11226_s15 + $0x1a8] sm:$0xff] %v7246_v23  ;;  %v7249_v28 = vmul.f32 %v10660_v6, %v14057_v22  ;;  %10681 = vpow2.f32 %v8407_v60  ;;  %v14228_v23 = vadd.f32 %v15131_v54, %v14215_v27  ;;  %v8414_v33 = vmul.f32 -1.442695, %v14207_v32  ;;  %v15132_v6 = vld [vmem:[#allocation98_spill] sm:$0xff] }
 0x746   : > { %v10664_v24 = vpop.eup %10663  ;;  %7376 = vst [vmem:[%s11226_s15 + $0x1b8] sm:$0xff] %v7248_v8  ;;  %v7251_v3 = vmul.f32 %v10662_v10, %v14065_v46  ;;  %10683 = vpow2.f32 %v8408_v17  ;;  %v14235_v8 = vadd.f32 %v15132_v6, %v14215_v27  ;;  %v8413_v20 = vmul.f32 -1.442695, %v14213_v12 }
 0x747   : > { %v10666_v22 = vpop.eup %10665  ;;  %7377 = vst [vmem:[%s11226_s15 + $0x1c0] sm:$0xff] %v7249_v28  ;;  %v7250_v60 = vmul.f32 %v10664_v24, %v14074_v9  ;;  %10685 = vpow2.f32 %v8410_v25  ;;  %v8415_v25 = vmul.f32 -1.442695, %v14221_v19 }
 0x748   : > { %v10668_v46 = vpop.eup %10667  ;;  %7379 = vst [vmem:[%s11226_s15 + $0x1d0] sm:$0xff] %v7251_v3  ;;  %v7252_v17 = vmul.f32 %v10666_v22, %v14083_v1  ;;  %10687 = vpow2.f32 %v8409_v61  ;;  %v8416_v1 = vmul.f32 -1.442695, %v14228_v23 }
 0x749   : > { %v10670_v10 = vpop.eup %10669  ;;  %7378 = vst [vmem:[%s11226_s15 + $0x1c8] sm:$0xff] %v7250_v60  ;;  %v7253_v9 = vmul.f32 %v10668_v46, %v14091_v59  ;;  %10689 = vpow2.f32 %v8411_v62  ;;  %v8418_v59 = vmul.f32 -1.442695, %v14235_v8 }
 0x74a   : > { %v10672_v28 = vpop.eup %10671  ;;  %7380 = vst [vmem:[%s11226_s15 + $0x1d8] sm:$0xff] %v7252_v17  ;;  %v7255_v58 = vmul.f32 %v10670_v10, %v14097_v7  ;;  %10691 = vpow2.f32 %v8412_v16 }
 0x74b   : > { %v10674_v61 = vpop.eup %10673  ;;  %7381 = vst [vmem:[%s11226_s15 + $0x1e0] sm:$0xff] %v7253_v9  ;;  %v7254_v24 = vmul.f32 %v10672_v28, %v14105_v52  ;;  %10693 = vpow2.f32 %v8414_v33 }
 0x74c   : > { %v10676_v62 = vpop.eup %10675  ;;  %7383 = vst [vmem:[%s11226_s15 + $0x1f0] sm:$0xff] %v7255_v58  ;;  %v7256_v3 = vmul.f32 %v10674_v61, %v14111_v21  ;;  %10695 = vpow2.f32 %v8413_v20 }
 0x74d   : > { %v10678_v54 = vpop.eup %10677  ;;  %7382 = vst [vmem:[%s11226_s15 + $0x1e8] sm:$0xff] %v7254_v24  ;;  %v7257_v7 = vmul.f32 %v10676_v62, %v14122_v63  ;;  %10697 = vpow2.f32 %v8415_v25 }
 0x74e   : > { %v10680_v16 = vpop.eup %10679  ;;  %7384 = vst [vmem:[%s11226_s15 + $0x1f8] sm:$0xff] %v7256_v3  ;;  %v6875_v22 = vadd.f32 1.0, %v10678_v54  ;;  %10699 = vpow2.f32 %v8416_v1  ;;  %v15133_v1 = vld [vmem:[#allocation99_spill] sm:$0xff]  ;;  %v15134_v3 = vld [vmem:[#allocation100_spill] sm:$0xff] }
 0x74f   : > { %v10682_v60 = vpop.eup %10681  ;;  %7385 = vst [vmem:[%s11226_s15 + $0x200] sm:$0xff] %v7257_v7  ;;  %v6874_v52 = vadd.f32 1.0, %v10680_v16  ;;  %10701 = vpow2.f32 %v8418_v59  ;;  %v14257_v61 = vadd.f32 %v15133_v1, %v14215_v27  ;;  %v5276_v59 = vpop.permute.xlu0 %5275  ;;  %v14261_v54 = vadd.f32 %v15134_v3, %v14215_v27 }
 0x750   : > { %v10684_v33 = vpop.eup %10683  ;;  %10703 = vrcp.f32 %v6875_v22  ;;  %v6876_v6 = vadd.f32 1.0, %v10682_v60  ;;  %v15135_v22 = vld [vmem:[#allocation101_spill] sm:$0xff] }
 0x751   : > { %v10686_v46 = vpop.eup %10685  ;;  %10705 = vrcp.f32 %v6874_v52  ;;  %v6877_v21 = vadd.f32 1.0, %v10684_v33  ;;  %v14264_v60 = vadd.f32 %v15135_v22, %v5276_v59 }
 0x752   : > { %v10688_v17 = vpop.eup %10687  ;;  %10707 = vrcp.f32 %v6876_v6  ;;  %v6879_v20 = vadd.f32 1.0, %v10686_v46  ;;  %v14267_v6 = vadd.f32 %v13942_v15, %v5276_v59 }
 0x753   : > { %v10690_v10 = vpop.eup %10689  ;;  %10709 = vrcp.f32 %v6877_v21  ;;  %v6878_v63 = vadd.f32 1.0, %v10688_v17  ;;  %v8417_v17 = vmul.f32 -1.442695, %v14257_v61  ;;  %v8420_v1 = vmul.f32 -1.442695, %v14264_v60 }
 0x754   : > { %v10692_v9 = vpop.eup %10691  ;;  %10711 = vrcp.f32 %v6879_v20  ;;  %v6880_v25 = vadd.f32 1.0, %v10690_v10  ;;  %v15136_v20 = vld [vmem:[#allocation102_spill] sm:$0xff] }
 0x755   : > { %v10694_v28 = vpop.eup %10693  ;;  %10713 = vrcp.f32 %v6878_v63  ;;  %v6881_v58 = vadd.f32 1.0, %v10692_v9  ;;  %v14271_v27 = vadd.f32 %v15136_v20, %v5276_v59  ;;  %v5281_v63 = vpop.permute.xlu1 %5280 }
 0x756   : > { %v10696_v24 = vpop.eup %10695  ;;  %10715 = vrcp.f32 %v6880_v25  ;;  %v6883_v62 = vadd.f32 1.0, %v10694_v28  ;;  %v8419_v25 = vmul.f32 -1.442695, %v14261_v54  ;;  %v14275_v28 = vadd.f32 %v13951_v34, %v5276_v59 }
 0x757   : > { %v10698_v7 = vpop.eup %10697  ;;  %10717 = vrcp.f32 %v6881_v58  ;;  %v6882_v16 = vadd.f32 1.0, %v10696_v24  ;;  %v15137_v24 = vld [vmem:[#allocation103_spill] sm:$0xff]  ;;  %v14285_v34 = vadd.f32 %v13961_v45, %v5281_v63  ;;  %v8421_v22 = vmul.f32 -1.442695, %v14271_v27 }
 0x758   : > { %v10700_v52 = vpop.eup %10699  ;;  %10719 = vrcp.f32 %v6883_v62  ;;  %v6884_v33 = vadd.f32 1.0, %v10698_v7  ;;  %v14280_v62 = vadd.f32 %v15137_v24, %v5281_v63  ;;  %v8423_v45 = vmul.f32 -1.442695, %v14275_v28 }
 0x759   : > { %v10702_v46 = vpop.eup %10701  ;;  %10721 = vrcp.f32 %v6882_v16  ;;  %v6885_v21 = vadd.f32 1.0, %v10700_v52  ;;  %v8422_v16 = vmul.f32 -1.442695, %v14267_v6  ;;  %v14291_v52 = vadd.f32 %v13963_v53, %v5281_v63 }
 0x75a   : > { %v10704_v10 = vpop.eup %10703  ;;  %10723 = vrcp.f32 %v6884_v33  ;;  %v6887_v9 = vadd.f32 1.0, %v10702_v46  ;;  %v8424_v53 = vmul.f32 -1.442695, %v14280_v62 }
 0x75b   : > { %v10706_v15 = vpop.eup %10705  ;;  %v7259_v58 = vmul.f32 %v10704_v10, %v14172_v35  ;;  %10725 = vrcp.f32 %v6885_v21  ;;  %v14299_v21 = vadd.f32 %v13971_v5, %v5281_v63  ;;  %v8426_v5 = vmul.f32 -1.442695, %v14285_v34 }
 0x75c   : > { %v10708_v3 = vpop.eup %10707  ;;  %v7258_v7 = vmul.f32 %v10706_v15, %v14176_v31  ;;  %10727 = vrcp.f32 %v6887_v9  ;;  %v14293_v31 = vpop.permute.xlu0 %5285 }
 0x75d   : > { %v10710_v59 = vpop.eup %10709  ;;  %7387 = vst [vmem:[%s11226_s15 + $0x210] sm:$0xff] %v7259_v58  ;;  %v7260_v35 = vmul.f32 %v10708_v3, %v14180_v57  ;;  %10729 = vpow2.f32 %v8417_v17  ;;  %v14306_v20 = vadd.f32 %v13994_v13, %v14293_v31  ;;  %v14313_v63 = vadd.f32 %v13996_v44, %v14293_v31 }
 0x75e   : > { %v10712_v33 = vpop.eup %10711  ;;  %7386 = vst [vmem:[%s11226_s15 + $0x208] sm:$0xff] %v7258_v7  ;;  %v7261_v46 = vmul.f32 %v10710_v59, %v14183_v11  ;;  %10731 = vpow2.f32 %v8419_v25  ;;  %v8425_v13 = vmul.f32 -1.442695, %v14291_v52  ;;  %v14320_v25 = vadd.f32 %v14001_v47, %v14293_v31 }
 0x75f   : > { %v10714_v57 = vpop.eup %10713  ;;  %7388 = vst [vmem:[%s11226_s15 + $0x218] sm:$0xff] %v7260_v35  ;;  %v7263_v17 = vmul.f32 %v10712_v33, %v14187_v39  ;;  %10733 = vpow2.f32 %v8420_v1  ;;  %v8427_v44 = vmul.f32 -1.442695, %v14299_v21  ;;  %v8428_v1 = vmul.f32 -1.442695, %v14306_v20 }
 0x760   : > { %v10716_v11 = vpop.eup %10715  ;;  %7389 = vst [vmem:[%s11226_s15 + $0x220] sm:$0xff] %v7261_v46  ;;  %v7262_v10 = vmul.f32 %v10714_v57, %v14191_v40  ;;  %10735 = vpow2.f32 %v8422_v16 }
 0x761   : > { %v10718_v39 = vpop.eup %10717  ;;  %7391 = vst [vmem:[%s11226_s15 + $0x230] sm:$0xff] %v7263_v17  ;;  %v7264_v9 = vmul.f32 %v10716_v11, %v14196_v30  ;;  %10737 = vpow2.f32 %v8421_v22 }
 0x762   : > { %v10720_v40 = vpop.eup %10719  ;;  %7390 = vst [vmem:[%s11226_s15 + $0x228] sm:$0xff] %v7262_v10  ;;  %v7265_v15 = vmul.f32 %v10718_v39, %v14201_v2  ;;  %10739 = vpow2.f32 %v8423_v45  ;;  %v8430_v2 = vmul.f32 -1.442695, %v14313_v63 }
 0x763   : > { %v10722_v58 = vpop.eup %10721  ;;  %7392 = vst [vmem:[%s11226_s15 + $0x238] sm:$0xff] %v7264_v9  ;;  %v7267_v30 = vmul.f32 %v10720_v40, %v14207_v32  ;;  %10741 = vpow2.f32 %v8424_v53  ;;  %v8429_v32 = vmul.f32 -1.442695, %v14320_v25 }
 0x764   : > { %v10724_v24 = vpop.eup %10723  ;;  %7393 = vst [vmem:[%s11226_s15 + $0x240] sm:$0xff] %v7265_v15  ;;  %v7266_v47 = vmul.f32 %v10722_v58, %v14213_v12  ;;  %10743 = vpow2.f32 %v8426_v5  ;;  %v14342_v15 = vadd.f32 %v14003_v41, %v14293_v31  ;;  %v5296_v31 = vpop.permute.xlu0 %5295 }
 0x765   : > { %v10726_v3 = vpop.eup %10725  ;;  %7395 = vst [vmem:[%s11226_s15 + $0x250] sm:$0xff] %v7267_v30  ;;  %v7268_v7 = vmul.f32 %v10724_v24, %v14221_v19  ;;  %10745 = vpow2.f32 %v8425_v13  ;;  %v5291_v13 = vpop.permute.xlu1 %5290 }
 0x766   : > { %v10728_v16 = vpop.eup %10727  ;;  %7394 = vst [vmem:[%s11226_s15 + $0x248] sm:$0xff] %v7266_v47  ;;  %v7269_v59 = vmul.f32 %v10726_v3, %v14228_v23  ;;  %10747 = vpow2.f32 %v8427_v44  ;;  %v14345_v30 = vadd.f32 %v14008_v29, %v5291_v13  ;;  %v14348_v47 = vadd.f32 %v14010_v18, %v5291_v13  ;;  %v15139_v29 = vld [vmem:[#allocation105_spill] sm:$0xff] }
 0x767   : > { %v10730_v35 = vpop.eup %10729  ;;  %7396 = vst [vmem:[%s11226_s15 + $0x258] sm:$0xff] %v7268_v7  ;;  %v7271_v12 = vmul.f32 %v10728_v16, %v14235_v8  ;;  %10749 = vpow2.f32 %v8428_v1  ;;  %v15138_v7 = vld [vmem:[#allocation104_spill] sm:$0xff] }
 0x768   : > { %v10732_v22 = vpop.eup %10731  ;;  %7397 = vst [vmem:[%s11226_s15 + $0x260] sm:$0xff] %v7269_v59  ;;  %v6886_v33 = vadd.f32 1.0, %v10730_v35  ;;  %10751 = vpow2.f32 %v8430_v2  ;;  %v8431_v59 = vmul.f32 -1.442695, %v14342_v15  ;;  %v14355_v35 = vadd.f32 %v15139_v29, %v5291_v13 }
 0x769   : > { %v10734_v46 = vpop.eup %10733  ;;  %7399 = vst [vmem:[%s11226_s15 + $0x270] sm:$0xff] %v7271_v12  ;;  %v6888_v19 = vadd.f32 1.0, %v10732_v22  ;;  %10753 = vpow2.f32 %v8429_v32  ;;  %v14351_v32 = vadd.f32 %v15138_v7, %v5291_v13  ;;  %v8432_v22 = vmul.f32 -1.442695, %v14345_v30 }
 0x76a   : > { %v10736_v45 = vpop.eup %10735  ;;  %10755 = vrcp.f32 %v6886_v33  ;;  %v6889_v57 = vadd.f32 1.0, %v10734_v46  ;;  %v14359_v33 = vadd.f32 %v14025_v38, %v5296_v31  ;;  %v14369_v38 = vadd.f32 %v14029_v0, %v5296_v31 }
 0x76b   : > { %v10738_v17 = vpop.eup %10737  ;;  %10757 = vrcp.f32 %v6888_v19  ;;  %v6891_v23 = vadd.f32 1.0, %v10736_v45  ;;  %v8434_v45 = vmul.f32 -1.442695, %v14348_v47 }
 0x76c   : > { %v10740_v53 = vpop.eup %10739  ;;  %10759 = vrcp.f32 %v6889_v57  ;;  %v6890_v11 = vadd.f32 1.0, %v10738_v17  ;;  %v14364_v57 = vadd.f32 %v14027_v43, %v5296_v31  ;;  %v8435_v43 = vmul.f32 -1.442695, %v14355_v35 }
 0x76d   : > { %v10742_v10 = vpop.eup %10741  ;;  %10761 = vrcp.f32 %v6891_v23  ;;  %v6892_v8 = vadd.f32 1.0, %v10740_v53  ;;  %v8433_v53 = vmul.f32 -1.442695, %v14351_v32  ;;  %v8436_v0 = vmul.f32 -1.442695, %v14359_v33 }
 0x76e   : > { %v10744_v5 = vpop.eup %10743  ;;  %10763 = vrcp.f32 %v6890_v11  ;;  %v6893_v39 = vadd.f32 1.0, %v10742_v10  ;;  %v5301_v10 = vpop.permute.xlu1 %5300 }
 0x76f   : > { %v10746_v9 = vpop.eup %10745  ;;  %10765 = vrcp.f32 %v6892_v8  ;;  %v6895_v40 = vadd.f32 1.0, %v10744_v5  ;;  %v15140_v8 = vld [vmem:[#allocation106_spill] sm:$0xff] }
 0x770   : > { %v10748_v44 = vpop.eup %10747  ;;  %10767 = vrcp.f32 %v6893_v39  ;;  %v6894_v58 = vadd.f32 1.0, %v10746_v9  ;;  %v14375_v5 = vadd.f32 %v15140_v8, %v5296_v31  ;;  %v15141_v9 = vld [vmem:[#allocation107_spill] sm:$0xff] }
 0x771   : > { %v10750_v1 = vpop.eup %10749  ;;  %10769 = vrcp.f32 %v6895_v40  ;;  %v6896_v24 = vadd.f32 1.0, %v10748_v44  ;;  %v14381_v13 = vadd.f32 %v15141_v9, %v5301_v10  ;;  %v8438_v44 = vmul.f32 -1.442695, %v14364_v57 }
 0x772   : > { %v10752_v2 = vpop.eup %10751  ;;  %10771 = vrcp.f32 %v6894_v58  ;;  %v6897_v3 = vadd.f32 1.0, %v10750_v1  ;;  %v15142_v58 = vld [vmem:[#allocation108_spill] sm:$0xff]  ;;  %v8439_v31 = vmul.f32 -1.442695, %v14375_v5 }
 0x773   : > { %v10754_v41 = vpop.eup %10753  ;;  %10773 = vrcp.f32 %v6896_v24  ;;  %v6899_v16 = vadd.f32 1.0, %v10752_v2  ;;  %v14387_v1 = vadd.f32 %v15142_v58, %v5301_v10  ;;  %v8437_v2 = vmul.f32 -1.442695, %v14369_v38 }
 0x774   : > { %v10756_v12 = vpop.eup %10755  ;;  %10775 = vrcp.f32 %v6897_v3  ;;  %v6898_v18 = vadd.f32 1.0, %v10754_v41  ;;  %v15143_v3 = vld [vmem:[#allocation109_spill] sm:$0xff] }
 0x775   : > { %v10758_v46 = vpop.eup %10757  ;;  %v7270_v19 = vmul.f32 %v10756_v12, %v14257_v61  ;;  %10777 = vrcp.f32 %v6899_v16  ;;  %v14393_v7 = vadd.f32 %v15143_v3, %v5301_v10  ;;  %v15144_v16 = vld [vmem:[#allocation110_spill] sm:$0xff]  ;;  %v8440_v12 = vmul.f32 -1.442695, %v14381_v13 }
 0x776   : > { %v10760_v17 = vpop.eup %10759  ;;  %v7272_v23 = vmul.f32 %v10758_v46, %v14261_v54  ;;  %10779 = vrcp.f32 %v6898_v18 }
 0x777   : > { %v10762_v11 = vpop.eup %10761  ;;  %7398 = vst [vmem:[%s11226_s15 + $0x268] sm:$0xff] %v7270_v19  ;;  %v7273_v61 = vmul.f32 %v10760_v17, %v14264_v60  ;;  %10781 = vpow2.f32 %v8431_v59  ;;  %v14399_v59 = vadd.f32 %v15144_v16, %v5301_v10 }
 0x778   : > { %v10764_v54 = vpop.eup %10763  ;;  %7400 = vst [vmem:[%s11226_s15 + $0x278] sm:$0xff] %v7272_v23  ;;  %v7275_v39 = vmul.f32 %v10762_v11, %v14267_v6  ;;  %10783 = vpow2.f32 %v8432_v22 }
 0x779   : > { %v10766_v40 = vpop.eup %10765  ;;  %7401 = vst [vmem:[%s11226_s15 + $0x280] sm:$0xff] %v7273_v61  ;;  %v7274_v60 = vmul.f32 %v10764_v54, %v14271_v27  ;;  %10785 = vpow2.f32 %v8434_v45 }
 0x77a   : > { %v10768_v24 = vpop.eup %10767  ;;  %7403 = vst [vmem:[%s11226_s15 + $0x290] sm:$0xff] %v7275_v39  ;;  %v7276_v6 = vmul.f32 %v10766_v40, %v14275_v28  ;;  %10787 = vpow2.f32 %v8433_v53 }
 0x77b   : > { %v10770_v41 = vpop.eup %10769  ;;  %7402 = vst [vmem:[%s11226_s15 + $0x288] sm:$0xff] %v7274_v60  ;;  %v7277_v27 = vmul.f32 %v10768_v24, %v14280_v62  ;;  %10789 = vpow2.f32 %v8435_v43  ;;  %v8442_v62 = vmul.f32 -1.442695, %v14387_v1 }
 0x77c   : > { %v10772_v29 = vpop.eup %10771  ;;  %7404 = vst [vmem:[%s11226_s15 + $0x298] sm:$0xff] %v7276_v6  ;;  %v7279_v28 = vmul.f32 %v10770_v41, %v14285_v34  ;;  %10791 = vpow2.f32 %v8436_v0  ;;  %v8441_v34 = vmul.f32 -1.442695, %v14393_v7 }
 0x77d   : > { %v10774_v18 = vpop.eup %10773  ;;  %7405 = vst [vmem:[%s11226_s15 + $0x2a0] sm:$0xff] %v7277_v27  ;;  %v7278_v22 = vmul.f32 %v10772_v29, %v14291_v52  ;;  %10793 = vpow2.f32 %v8438_v44  ;;  %v8443_v52 = vmul.f32 -1.442695, %v14399_v59  ;;  %v5306_v44 = vpop.permute.xlu0 %5305 }
 0x77e   : > { %v10776_v46 = vpop.eup %10775  ;;  %7407 = vst [vmem:[%s11226_s15 + $0x2b0] sm:$0xff] %v7279_v28  ;;  %v7280_v19 = vmul.f32 %v10774_v18, %v14299_v21  ;;  %10795 = vpow2.f32 %v8437_v2  ;;  %v15145_v2 = vld [vmem:[#allocation111_spill] sm:$0xff] }
 0x77f   : > { %v10778_v45 = vpop.eup %10777  ;;  %7406 = vst [vmem:[%s11226_s15 + $0x2a8] sm:$0xff] %v7278_v22  ;;  %v7281_v17 = vmul.f32 %v10776_v46, %v14306_v20  ;;  %10797 = vpow2.f32 %v8439_v31  ;;  %v14420_v3 = vadd.f32 %v15145_v2, %v5306_v44  ;;  %v15146_v31 = vld [vmem:[#allocation112_spill] sm:$0xff] }
 0x780   : > { %v10780_v23 = vpop.eup %10779  ;;  %7408 = vst [vmem:[%s11226_s15 + $0x2b8] sm:$0xff] %v7280_v19  ;;  %v7283_v53 = vmul.f32 %v10778_v45, %v14313_v63  ;;  %10799 = vpow2.f32 %v8440_v12  ;;  %v14423_v16 = vadd.f32 %v15146_v31, %v5306_v44  ;;  %v15147_v12 = vld [vmem:[#allocation113_spill] sm:$0xff]  ;;  %v15148_v19 = vld [vmem:[#allocation114_spill] sm:$0xff] }
 0x781   : > { %v10782_v11 = vpop.eup %10781  ;;  %7409 = vst [vmem:[%s11226_s15 + $0x2c0] sm:$0xff] %v7281_v17  ;;  %v7282_v21 = vmul.f32 %v10780_v23, %v14320_v25  ;;  %10801 = vpow2.f32 %v8442_v62  ;;  %v14426_v18 = vadd.f32 %v15147_v12, %v5306_v44  ;;  %v5311_v62 = vpop.permute.xlu1 %5310  ;;  %v15149_v23 = vld [vmem:[#allocation115_spill] sm:$0xff] }
 0x782   : > { %v10784_v10 = vpop.eup %10783  ;;  %7411 = vst [vmem:[%s11226_s15 + $0x2d0] sm:$0xff] %v7283_v53  ;;  %v6900_v61 = vadd.f32 1.0, %v10782_v11  ;;  %10803 = vpow2.f32 %v8441_v34  ;;  %v14429_v34 = vadd.f32 %v15148_v19, %v5306_v44  ;;  %v14433_v53 = vadd.f32 %v15149_v23, %v5311_v62 }
 0x783   : > { %v10786_v43 = vpop.eup %10785  ;;  %7410 = vst [vmem:[%s11226_s15 + $0x2c8] sm:$0xff] %v7282_v21  ;;  %v6901_v20 = vadd.f32 1.0, %v10784_v10  ;;  %10805 = vpow2.f32 %v8443_v52  ;;  %v8444_v52 = vmul.f32 -1.442695, %v14420_v3  ;;  %v8446_v10 = vmul.f32 -1.442695, %v14423_v16 }
 0x784   : > { %v10788_v8 = vpop.eup %10787  ;;  %10807 = vrcp.f32 %v6900_v61  ;;  %v6903_v54 = vadd.f32 1.0, %v10786_v43  ;;  %v15150_v61 = vld [vmem:[#allocation116_spill] sm:$0xff] }
 0x785   : > { %v10790_v39 = vpop.eup %10789  ;;  %10809 = vrcp.f32 %v6901_v20  ;;  %v6902_v63 = vadd.f32 1.0, %v10788_v8  ;;  %v14437_v43 = vadd.f32 %v15150_v61, %v5311_v62 }
 0x786   : > { %v10792_v0 = vpop.eup %10791  ;;  %10811 = vrcp.f32 %v6903_v54  ;;  %v6904_v9 = vadd.f32 1.0, %v10790_v39  ;;  %v8445_v54 = vmul.f32 -1.442695, %v14426_v18  ;;  %v15151_v39 = vld [vmem:[#allocation117_spill] sm:$0xff] }
 0x787   : > { %v10794_v40 = vpop.eup %10793  ;;  %10813 = vrcp.f32 %v6902_v63  ;;  %v6905_v25 = vadd.f32 1.0, %v10792_v0  ;;  %v14442_v63 = vadd.f32 %v15151_v39, %v5311_v62  ;;  %v8450_v2 = vmul.f32 -1.442695, %v14437_v43 }
 0x788   : > { %v10796_v60 = vpop.eup %10795  ;;  %10815 = vrcp.f32 %v6904_v9  ;;  %v6907_v58 = vadd.f32 1.0, %v10794_v40  ;;  %v5316_v9 = vpop.permute.xlu0 %5315 }
 0x789   : > { %v10798_v24 = vpop.eup %10797  ;;  %10817 = vrcp.f32 %v6905_v25  ;;  %v6906_v6 = vadd.f32 1.0, %v10796_v60  ;;  %v8447_v25 = vmul.f32 -1.442695, %v14429_v34  ;;  %v14447_v60 = vadd.f32 %v14085_v55, %v5311_v62 }
 0x78a   : > { %v10800_v41 = vpop.eup %10799  ;;  %10819 = vrcp.f32 %v6907_v58  ;;  %v6908_v27 = vadd.f32 1.0, %v10798_v24  ;;  %v8448_v58 = vmul.f32 -1.442695, %v14433_v53  ;;  %v14453_v24 = vadd.f32 %v14113_v26, %v5316_v9 }
 0x78b   : > { %v10802_v29 = vpop.eup %10801  ;;  %10821 = vrcp.f32 %v6906_v6  ;;  %v6909_v28 = vadd.f32 1.0, %v10800_v41  ;;  %v14459_v55 = vadd.f32 %v14115_v14, %v5316_v9  ;;  %v14465_v26 = vadd.f32 %v14124_v56, %v5316_v9 }
 0x78c   : > { %v10804_v22 = vpop.eup %10803  ;;  %10823 = vrcp.f32 %v6908_v27  ;;  %v6911_v46 = vadd.f32 1.0, %v10802_v29  ;;  %v8449_v27 = vmul.f32 -1.442695, %v14442_v63  ;;  %v8451_v14 = vmul.f32 -1.442695, %v14447_v60 }
 0x78d   : > { %v10806_v45 = vpop.eup %10805  ;;  %10825 = vrcp.f32 %v6909_v28  ;;  %v6910_v17 = vadd.f32 1.0, %v10804_v22  ;;  %v14473_v28 = vadd.f32 %v14126_v36, %v5316_v9  ;;  %v8452_v56 = vmul.f32 -1.442695, %v14453_v24 }
 0x78e   : > { %v10808_v11 = vpop.eup %10807  ;;  %10827 = vrcp.f32 %v6911_v46  ;;  %v6912_v21 = vadd.f32 1.0, %v10806_v45  ;;  %v8454_v36 = vmul.f32 -1.442695, %v14459_v55  ;;  %v8453_v19 = vmul.f32 -1.442695, %v14465_v26 }
 0x78f   : > { %v10810_v20 = vpop.eup %10809  ;;  %v7284_v8 = vmul.f32 %v10808_v11, %v14342_v15  ;;  %10829 = vrcp.f32 %v6910_v17 }
 0x790   : > { %v10812_v0 = vpop.eup %10811  ;;  %v7285_v40 = vmul.f32 %v10810_v20, %v14345_v30  ;;  %10831 = vrcp.f32 %v6912_v21 }
 0x791   : > { %v10814_v44 = vpop.eup %10813  ;;  %7412 = vst [vmem:[%s11226_s15 + $0x2d8] sm:$0xff] %v7284_v8  ;;  %v7287_v15 = vmul.f32 %v10812_v0, %v14348_v47  ;;  %10833 = vpow2.f32 %v8444_v52 }
 0x792   : > { %v10816_v6 = vpop.eup %10815  ;;  %7413 = vst [vmem:[%s11226_s15 + $0x2e0] sm:$0xff] %v7285_v40  ;;  %v7286_v30 = vmul.f32 %v10814_v44, %v14351_v32  ;;  %10835 = vpow2.f32 %v8446_v10  ;;  %v14467_v32 = vpop.permute.xlu1 %5320 }
 0x793   : > { %v10818_v41 = vpop.eup %10817  ;;  %7415 = vst [vmem:[%s11226_s15 + $0x2f0] sm:$0xff] %v7287_v15  ;;  %v7288_v47 = vmul.f32 %v10816_v6, %v14355_v35  ;;  %10837 = vpow2.f32 %v8445_v54  ;;  %v14480_v22 = vadd.f32 %v14131_v37, %v14467_v32  ;;  %v14502_v6 = vadd.f32 %v14133_v49, %v14467_v32 }
 0x794   : > { %v10820_v31 = vpop.eup %10819  ;;  %7414 = vst [vmem:[%s11226_s15 + $0x2e8] sm:$0xff] %v7286_v30  ;;  %v7289_v29 = vmul.f32 %v10818_v41, %v14359_v33  ;;  %10839 = vpow2.f32 %v8447_v25  ;;  %v14506_v41 = vadd.f32 %v14138_v42, %v14467_v32 }
 0x795   : > { %v10822_v35 = vpop.eup %10821  ;;  %7416 = vst [vmem:[%s11226_s15 + $0x2f8] sm:$0xff] %v7288_v47  ;;  %v7291_v12 = vmul.f32 %v10820_v31, %v14364_v57  ;;  %10841 = vpow2.f32 %v8448_v58  ;;  %v8458_v42 = vmul.f32 -1.442695, %v14502_v6 }
 0x796   : > { %v10824_v33 = vpop.eup %10823  ;;  %7417 = vst [vmem:[%s11226_s15 + $0x300] sm:$0xff] %v7289_v29  ;;  %v7290_v62 = vmul.f32 %v10822_v35, %v14369_v38  ;;  %10843 = vpow2.f32 %v8450_v2  ;;  %v8455_v38 = vmul.f32 -1.442695, %v14473_v28  ;;  %v14510_v29 = vadd.f32 %v14140_v4, %v14467_v32 }
 0x797   : > { %v10826_v46 = vpop.eup %10825  ;;  %7419 = vst [vmem:[%s11226_s15 + $0x310] sm:$0xff] %v7291_v12  ;;  %v7292_v57 = vmul.f32 %v10824_v33, %v14375_v5  ;;  %10845 = vpow2.f32 %v8449_v27  ;;  %v8456_v5 = vmul.f32 -1.442695, %v14480_v22  ;;  %v5326_v27 = vpop.permute.xlu0 %5325  ;;  %v8457_v4 = vmul.f32 -1.442695, %v14506_v41 }
 0x798   : > { %v10828_v45 = vpop.eup %10827  ;;  %7418 = vst [vmem:[%s11226_s15 + $0x308] sm:$0xff] %v7290_v62  ;;  %v7293_v37 = vmul.f32 %v10826_v46, %v14381_v13  ;;  %10847 = vpow2.f32 %v8451_v14  ;;  %v14513_v49 = vadd.f32 %v14153_v51, %v5326_v27  ;;  %v14517_v33 = vadd.f32 %v14156_v50, %v5326_v27  ;;  %v5331_v51 = vpop.permute.xlu1 %5330 }
 0x799   : > { %v10830_v17 = vpop.eup %10829  ;;  %7420 = vst [vmem:[%s11226_s15 + $0x318] sm:$0xff] %v7292_v57  ;;  %v7295_v52 = vmul.f32 %v10828_v45, %v14387_v1  ;;  %10849 = vpow2.f32 %v8452_v56  ;;  %v14521_v32 = vadd.f32 %v14158_v48, %v5326_v27  ;;  %v15152_v45 = vld [vmem:[#allocation118_spill] sm:$0xff]  ;;  %v15153_v48 = vld [vmem:[#allocation119_spill] sm:$0xff] }
 0x79a   : > { %v10832_v23 = vpop.eup %10831  ;;  %7421 = vst [vmem:[%s11226_s15 + $0x320] sm:$0xff] %v7293_v37  ;;  %v7294_v11 = vmul.f32 %v10830_v17, %v14393_v7  ;;  %10851 = vpow2.f32 %v8454_v36  ;;  %v14526_v50 = vadd.f32 %v15152_v45, %v5326_v27  ;;  %v8460_v17 = vmul.f32 -1.442695, %v14513_v49 }
 0x79b   : > { %v10834_v21 = vpop.eup %10833  ;;  %7423 = vst [vmem:[%s11226_s15 + $0x330] sm:$0xff] %v7295_v52  ;;  %v7296_v13 = vmul.f32 %v10832_v23, %v14399_v59  ;;  %10853 = vpow2.f32 %v8453_v19  ;;  %v8459_v19 = vmul.f32 -1.442695, %v14510_v29  ;;  %v14531_v52 = vadd.f32 %v15153_v48, %v5331_v51 }
 0x79c   : > { %v10836_v10 = vpop.eup %10835  ;;  %7422 = vst [vmem:[%s11226_s15 + $0x328] sm:$0xff] %v7294_v11  ;;  %v6913_v61 = vadd.f32 1.0, %v10834_v21  ;;  %10855 = vpow2.f32 %v8455_v38  ;;  %v8462_v23 = vmul.f32 -1.442695, %v14517_v33  ;;  %v15154_v11 = vld [vmem:[#allocation120_spill] sm:$0xff] }
 0x79d   : > { %v10838_v20 = vpop.eup %10837  ;;  %7424 = vst [vmem:[%s11226_s15 + $0x338] sm:$0xff] %v7296_v13  ;;  %v6915_v1 = vadd.f32 1.0, %v10836_v10  ;;  %10857 = vpow2.f32 %v8456_v5  ;;  %v14537_v21 = vadd.f32 %v15154_v11, %v5331_v51  ;;  %v8461_v10 = vmul.f32 -1.442695, %v14521_v32 }
 0x79e   : > { %v10840_v8 = vpop.eup %10839  ;;  %10859 = vrcp.f32 %v6913_v61  ;;  %v6914_v54 = vadd.f32 1.0, %v10838_v20  ;;  %v15155_v61 = vld [vmem:[#allocation121_spill] sm:$0xff] }
 0x79f   : > { %v10842_v39 = vpop.eup %10841  ;;  %10861 = vrcp.f32 %v6915_v1  ;;  %v6916_v7 = vadd.f32 1.0, %v10840_v8  ;;  %v14543_v20 = vadd.f32 %v15155_v61, %v5331_v51  ;;  %v8463_v8 = vmul.f32 -1.442695, %v14526_v50 }
 0x7a0   : > { %v10844_v0 = vpop.eup %10843  ;;  %10863 = vrcp.f32 %v6914_v54  ;;  %v6917_v9 = vadd.f32 1.0, %v10842_v39  ;;  %v15156_v54 = vld [vmem:[#allocation122_spill] sm:$0xff] }
 0x7a1   : > { %v10846_v40 = vpop.eup %10845  ;;  %10865 = vrcp.f32 %v6916_v7  ;;  %v6919_v59 = vadd.f32 1.0, %v10844_v0  ;;  %v14549_v39 = vadd.f32 %v15156_v54, %v5331_v51  ;;  %v8464_v0 = vmul.f32 -1.442695, %v14531_v52 }
 0x7a2   : > { %v10848_v25 = vpop.eup %10847  ;;  %10867 = vrcp.f32 %v6917_v9  ;;  %v6918_v44 = vadd.f32 1.0, %v10846_v40 }
 0x7a3   : > { %v10850_v15 = vpop.eup %10849  ;;  %10869 = vrcp.f32 %v6919_v59  ;;  %v6920_v58 = vadd.f32 1.0, %v10848_v25 }
 0x7a4   : > { %v10852_v30 = vpop.eup %10851  ;;  %10871 = vrcp.f32 %v6918_v44  ;;  %v6921_v2 = vadd.f32 1.0, %v10850_v15 }
 0x7a5   : > { %v10854_v47 = vpop.eup %10853  ;;  %10873 = vrcp.f32 %v6920_v58  ;;  %v6923_v31 = vadd.f32 1.0, %v10852_v30 }
 0x7a6   : > { %v10856_v14 = vpop.eup %10855  ;;  %10875 = vrcp.f32 %v6921_v2  ;;  %v6922_v35 = vadd.f32 1.0, %v10854_v47 }
 0x7a7   : > { %v10858_v12 = vpop.eup %10857  ;;  %10877 = vrcp.f32 %v6923_v31  ;;  %v6924_v56 = vadd.f32 1.0, %v10856_v14 }
 0x7a8   : > { %v10860_v62 = vpop.eup %10859  ;;  %10879 = vrcp.f32 %v6922_v35  ;;  %v6925_v36 = vadd.f32 1.0, %v10858_v12 }
 0x7a9   : > { %v10862_v46 = vpop.eup %10861  ;;  %v7297_v57 = vmul.f32 %v10860_v62, %v14420_v3  ;;  %10881 = vrcp.f32 %v6924_v56 }
 0x7aa   : > { %v10864_v37 = vpop.eup %10863  ;;  %v7299_v38 = vmul.f32 %v10862_v46, %v14423_v16  ;;  %10883 = vrcp.f32 %v6925_v36 }
 0x7ab   : > { %v10866_v5 = vpop.eup %10865  ;;  %7425 = vst [vmem:[%s11226_s15 + $0x340] sm:$0xff] %v7297_v57  ;;  %v7298_v3 = vmul.f32 %v10864_v37, %v14426_v18  ;;  %10885 = vpow2.f32 %v8458_v42 }
 0x7ac   : > { %v10868_v13 = vpop.eup %10867  ;;  %7427 = vst [vmem:[%s11226_s15 + $0x350] sm:$0xff] %v7299_v38  ;;  %v7300_v16 = vmul.f32 %v10866_v5, %v14429_v34  ;;  %10887 = vpow2.f32 %v8457_v4 }
 0x7ad   : > { %v10870_v1 = vpop.eup %10869  ;;  %7426 = vst [vmem:[%s11226_s15 + $0x348] sm:$0xff] %v7298_v3  ;;  %v7301_v18 = vmul.f32 %v10868_v13, %v14433_v53  ;;  %10889 = vpow2.f32 %v8459_v19  ;;  %v8466_v53 = vmul.f32 -1.442695, %v14537_v21 }
 0x7ae   : > { %v10872_v7 = vpop.eup %10871  ;;  %7428 = vst [vmem:[%s11226_s15 + $0x358] sm:$0xff] %v7300_v16  ;;  %v7303_v34 = vmul.f32 %v10870_v1, %v14437_v43  ;;  %10891 = vpow2.f32 %v8460_v17  ;;  %v8465_v43 = vmul.f32 -1.442695, %v14543_v20 }
 0x7af   : > { %v10874_v9 = vpop.eup %10873  ;;  %7429 = vst [vmem:[%s11226_s15 + $0x360] sm:$0xff] %v7301_v18  ;;  %v7302_v40 = vmul.f32 %v10872_v7, %v14442_v63  ;;  %10893 = vpow2.f32 %v8462_v23  ;;  %v8467_v63 = vmul.f32 -1.442695, %v14549_v39 }
 0x7b0   : > { %v10876_v59 = vpop.eup %10875  ;;  %7431 = vst [vmem:[%s11226_s15 + $0x370] sm:$0xff] %v7303_v34  ;;  %v7304_v25 = vmul.f32 %v10874_v9, %v14447_v60  ;;  %10895 = vpow2.f32 %v8461_v10 }
 0x7b1   : > { %v10878_v44 = vpop.eup %10877  ;;  %7430 = vst [vmem:[%s11226_s15 + $0x368] sm:$0xff] %v7302_v40  ;;  %v7305_v15 = vmul.f32 %v10876_v59, %v14453_v24  ;;  %10897 = vpow2.f32 %v8463_v8  ;;  %v7484_v40 = vld [vmem:[%s11226_s15 + $0x28] sm:$0xff] (%p11118_p9)  ;;  %v7488_v59 = vld [vmem:[%s11226_s15 + $0x38] sm:$0xff] (%p11118_p9) }
 0x7b2   : > { %v10880_v58 = vpop.eup %10879  ;;  %7432 = vst [vmem:[%s11226_s15 + $0x378] sm:$0xff] %v7304_v25  ;;  %v7307_v30 = vmul.f32 %v10878_v44, %v14459_v55  ;;  %10899 = vpow2.f32 %v8464_v0  ;;  %v7490_v25 = vld [vmem:[%s11226_s15 + $0x40] sm:$0xff] (%p11118_p9)  ;;  %v7494_v44 = vld [vmem:[%s11226_s15 + $0x50] sm:$0xff] (%p11118_p9)  ;;  %7485 = vst [vmem:[%s14611_s16 + $0x48] sm:$0xff] (%p11118_p9), %v7484_v40 }
 0x7b3   : > { %v10882_v2 = vpop.eup %10881  ;;  %7433 = vst [vmem:[%s11226_s15 + $0x380] sm:$0xff] %v7305_v15  ;;  %v7306_v60 = vmul.f32 %v10880_v58, %v14465_v26  ;;  %10901 = vpow2.f32 %v8466_v53  ;;  %v7486_v53 = vld [vmem:[%s11226_s15 + $0x30] sm:$0xff] (%p11118_p9)  ;;  %v7496_v15 = vld [vmem:[%s11226_s15 + $0x58] sm:$0xff] (%p11118_p9)  ;;  %7489 = vst [vmem:[%s14611_s16 + $0x58] sm:$0xff] (%p11118_p9), %v7488_v59 }
 0x7b4   : > { %v10884_v47 = vpop.eup %10883  ;;  %7435 = vst [vmem:[%s11226_s15 + $0x390] sm:$0xff] %v7307_v30  ;;  %v7308_v24 = vmul.f32 %v10882_v2, %v14473_v28  ;;  %10903 = vpow2.f32 %v8465_v43  ;;  %v7492_v43 = vld [vmem:[%s11226_s15 + $0x48] sm:$0xff] (%p11118_p9)  ;;  %7487 = vst [vmem:[%s14611_s16 + $0x50] sm:$0xff] (%p11118_p9), %v7486_v53  ;;  %v7502_v30 = vld [vmem:[%s11226_s15 + $0x70] sm:$0xff] (%p11118_p9) }
 0x7b5   : > { %v10886_v27 = vpop.eup %10885  ;;  %7434 = vst [vmem:[%s11226_s15 + $0x388] sm:$0xff] %v7306_v60  ;;  %v7309_v31 = vmul.f32 %v10884_v47, %v14480_v22  ;;  %10905 = vpow2.f32 %v8467_v63  ;;  %7491 = vst [vmem:[%s14611_s16 + $0x80] sm:$0xff] (%p11118_p9), %v7490_v25  ;;  %v7498_v63 = vld [vmem:[%s11226_s15 + $0x60] sm:$0xff] (%p11118_p9)  ;;  %v7500_v58 = vld [vmem:[%s11226_s15 + $0x68] sm:$0xff] (%p11118_p9) }
 0x7b6   : > { %v10888_v14 = vpop.eup %10887  ;;  %7436 = vst [vmem:[%s11226_s15 + $0x398] sm:$0xff] %v7308_v24  ;;  %v6927_v55 = vadd.f32 1.0, %v10886_v27  ;;  %7493 = vst [vmem:[%s14611_s16 + $0x88] sm:$0xff] (%p11118_p9), %v7492_v43  ;;  %v7504_v2 = vld [vmem:[%s11226_s15 + $0x78] sm:$0xff] (%p11118_p9)  ;;  %v7506_v60 = vld [vmem:[%s11226_s15 + $0x80] sm:$0xff] (%p11118_p9) }
 0x7b7   : > { %v10890_v35 = vpop.eup %10889  ;;  %7437 = vst [vmem:[%s11226_s15 + $0x3a0] sm:$0xff] %v7309_v31  ;;  %v6926_v12 = vadd.f32 1.0, %v10888_v14  ;;  %7495 = vst [vmem:[%s14611_s16 + $0x90] sm:$0xff] (%p11118_p9), %v7494_v44  ;;  %v7508_v47 = vld [vmem:[%s11226_s15 + $0x88] sm:$0xff] (%p11118_p9)  ;;  %v7510_v24 = vld [vmem:[%s11226_s15 + $0x90] sm:$0xff] (%p11118_p9) }
 0x7b8   : > { %v10892_v56 = vpop.eup %10891  ;;  %10907 = vrcp.f32 %v6927_v55  ;;  %v6928_v26 = vadd.f32 1.0, %v10890_v35  ;;  %7497 = vst [vmem:[%s14611_s16 + $0x98] sm:$0xff] (%p11118_p9), %v7496_v15  ;;  %7499 = vst [vmem:[%s14611_s16 + $0xc0] sm:$0xff] (%p11118_p9), %v7498_v63  ;;  %v7512_v27 = vld [vmem:[%s11226_s15 + $0x98] sm:$0xff] (%p11118_p9)  ;;  %v7514_v31 = vld [vmem:[%s11226_s15 + $0xa0] sm:$0xff] (%p11118_p9) }
 0x7b9   : > { %v10894_v42 = vpop.eup %10893  ;;  %10909 = vrcp.f32 %v6926_v12  ;;  %v6929_v62 = vadd.f32 1.0, %v10892_v56  ;;  %7501 = vst [vmem:[%s14611_s16 + $0xc8] sm:$0xff] (%p11118_p9), %v7500_v58  ;;  %7503 = vst [vmem:[%s14611_s16 + $0xd0] sm:$0xff] (%p11118_p9), %v7502_v30  ;;  %v7516_v14 = vld [vmem:[%s11226_s15 + $0xa8] sm:$0xff] (%p11118_p9)  ;;  %v7518_v55 = vld [vmem:[%s11226_s15 + $0xb0] sm:$0xff] (%p11118_p9) }
 0x7ba   : > { %v10896_v36 = vpop.eup %10895  ;;  %10911 = vrcp.f32 %v6928_v26  ;;  %v6931_v28 = vadd.f32 1.0, %v10894_v42  ;;  %7505 = vst [vmem:[%s14611_s16 + $0xd8] sm:$0xff] (%p11118_p9), %v7504_v2  ;;  %7507 = vst [vmem:[%s14611_s16 + $0x100] sm:$0xff] (%p11118_p9), %v7506_v60  ;;  %v7520_v35 = vld [vmem:[%s11226_s15 + $0xb8] sm:$0xff] (%p11118_p9)  ;;  %v7522_v12 = vld [vmem:[%s11226_s15 + $0xc0] sm:$0xff] (%p11118_p9) }
 0x7bb   : > { %v10898_v4 = vpop.eup %10897  ;;  %10913 = vrcp.f32 %v6929_v62  ;;  %v6930_v46 = vadd.f32 1.0, %v10896_v36  ;;  %7509 = vst [vmem:[%s14611_s16 + $0x108] sm:$0xff] (%p11118_p9), %v7508_v47  ;;  %7511 = vst [vmem:[%s14611_s16 + $0x110] sm:$0xff] (%p11118_p9), %v7510_v24  ;;  %v7524_v56 = vld [vmem:[%s11226_s15 + $0xc8] sm:$0xff] (%p11118_p9)  ;;  %v7526_v26 = vld [vmem:[%s11226_s15 + $0xd0] sm:$0xff] (%p11118_p9) }
 0x7bc   : > { %v10900_v22 = vpop.eup %10899  ;;  %10915 = vrcp.f32 %v6931_v28  ;;  %v6932_v51 = vadd.f32 1.0, %v10898_v4  ;;  %7513 = vst [vmem:[%s14611_s16 + $0x118] sm:$0xff] (%p11118_p9), %v7512_v27  ;;  %7515 = vst [vmem:[%s14611_s16 + $0x140] sm:$0xff] (%p11118_p9), %v7514_v31  ;;  %v7528_v42 = vld [vmem:[%s11226_s15 + $0xd8] sm:$0xff] (%p11118_p9)  ;;  %v7530_v62 = vld [vmem:[%s11226_s15 + $0xe0] sm:$0xff] (%p11118_p9) }
 0x7bd   : > { %v10902_v57 = vpop.eup %10901  ;;  %10917 = vrcp.f32 %v6930_v46  ;;  %v6933_v19 = vadd.f32 1.0, %v10900_v22  ;;  %7517 = vst [vmem:[%s14611_s16 + $0x148] sm:$0xff] (%p11118_p9), %v7516_v14  ;;  %7519 = vst [vmem:[%s14611_s16 + $0x150] sm:$0xff] (%p11118_p9), %v7518_v55  ;;  %v7532_v36 = vld [vmem:[%s11226_s15 + $0xe8] sm:$0xff] (%p11118_p9)  ;;  %v7534_v28 = vld [vmem:[%s11226_s15 + $0xf0] sm:$0xff] (%p11118_p9) }
 0x7be   : > { %v10904_v45 = vpop.eup %10903  ;;  %10919 = vrcp.f32 %v6932_v51  ;;  %v6935_v37 = vadd.f32 1.0, %v10902_v57  ;;  %7521 = vst [vmem:[%s14611_s16 + $0x158] sm:$0xff] (%p11118_p9), %v7520_v35  ;;  %7523 = vst [vmem:[%s14611_s16 + $0x180] sm:$0xff] (%p11118_p9), %v7522_v12  ;;  %v7536_v4 = vld [vmem:[%s11226_s15 + $0xf8] sm:$0xff] (%p11118_p9)  ;;  %v7538_v46 = vld [vmem:[%s11226_s15 + $0x100] sm:$0xff] (%p11118_p9) }
 0x7bf   : > { %v10906_v38 = vpop.eup %10905  ;;  %10921 = vrcp.f32 %v6933_v19  ;;  %v6934_v17 = vadd.f32 1.0, %v10904_v45  ;;  %7525 = vst [vmem:[%s14611_s16 + $0x188] sm:$0xff] (%p11118_p9), %v7524_v56  ;;  %7527 = vst [vmem:[%s14611_s16 + $0x190] sm:$0xff] (%p11118_p9), %v7526_v26  ;;  %v7540_v22 = vld [vmem:[%s11226_s15 + $0x108] sm:$0xff] (%p11118_p9)  ;;  %v7542_v51 = vld [vmem:[%s11226_s15 + $0x110] sm:$0xff] (%p11118_p9) }
 0x7c0   : > { %10923 = vrcp.f32 %v6935_v37  ;;  %v6936_v48 = vadd.f32 1.0, %v10906_v38  ;;  %7529 = vst [vmem:[%s14611_s16 + $0x198] sm:$0xff] (%p11118_p9), %v7528_v42  ;;  %7531 = vst [vmem:[%s14611_s16 + $0x1c0] sm:$0xff] (%p11118_p9), %v7530_v62  ;;  %v7544_v57 = vld [vmem:[%s11226_s15 + $0x118] sm:$0xff] (%p11118_p9)  ;;  %v7546_v19 = vld [vmem:[%s11226_s15 + $0x120] sm:$0xff] (%p11118_p9) }
 0x7c1   : > { %10925 = vrcp.f32 %v6934_v17  ;;  %7533 = vst [vmem:[%s14611_s16 + $0x1c8] sm:$0xff] (%p11118_p9), %v7532_v36  ;;  %7535 = vst [vmem:[%s14611_s16 + $0x1d0] sm:$0xff] (%p11118_p9), %v7534_v28  ;;  %v7548_v45 = vld [vmem:[%s11226_s15 + $0x128] sm:$0xff] (%p11118_p9)  ;;  %v7550_v37 = vld [vmem:[%s11226_s15 + $0x130] sm:$0xff] (%p11118_p9) }
 0x7c2   : > { %v10908_v5 = vpop.eup %10907  ;;  %10927 = vrcp.f32 %v6936_v48  ;;  %7537 = vst [vmem:[%s14611_s16 + $0x1d8] sm:$0xff] (%p11118_p9), %v7536_v4  ;;  %7539 = vst [vmem:[%s14611_s16 + $0x200] sm:$0xff] (%p11118_p9), %v7538_v46  ;;  %v7552_v38 = vld [vmem:[%s11226_s15 + $0x138] sm:$0xff] (%p11118_p9)  ;;  %v7554_v17 = vld [vmem:[%s11226_s15 + $0x140] sm:$0xff] (%p11118_p9) }
 0x7c3   : > { %v10910_v3 = vpop.eup %10909  ;;  %v7311_v23 = vmul.f32 %v10908_v5, %v14502_v6  ;;  %7541 = vst [vmem:[%s14611_s16 + $0x208] sm:$0xff] (%p11118_p9), %v7540_v22  ;;  %7543 = vst [vmem:[%s14611_s16 + $0x210] sm:$0xff] (%p11118_p9), %v7542_v51  ;;  %v7556_v48 = vld [vmem:[%s11226_s15 + $0x148] sm:$0xff] (%p11118_p9)  ;;  %v7558_v5 = vld [vmem:[%s11226_s15 + $0x150] sm:$0xff] (%p11118_p9) }
 0x7c4   : > { %v10912_v11 = vpop.eup %10911  ;;  %v7310_v13 = vmul.f32 %v10910_v3, %v14506_v41  ;;  %7545 = vst [vmem:[%s14611_s16 + $0x218] sm:$0xff] (%p11118_p9), %v7544_v57  ;;  %7547 = vst [vmem:[%s14611_s16 + $0x240] sm:$0xff] (%p11118_p9), %v7546_v19  ;;  %v7560_v3 = vld [vmem:[%s11226_s15 + $0x158] sm:$0xff] (%p11118_p9)  ;;  %v7612_v40 = vld [vmem:[%s11226_s15 + $0x228] sm:$0xff] (%p11118_p9) }
 0x7c5   : > { %v10914_v16 = vpop.eup %10913  ;;  %7439 = vst [vmem:[%s11226_s15 + $0x3b0] sm:$0xff] %v7311_v23  ;;  %v7312_v10 = vmul.f32 %v10912_v11, %v14510_v29  ;;  %7549 = vst [vmem:[%s14611_s16 + $0x248] sm:$0xff] (%p11118_p9), %v7548_v45  ;;  %v7562_v23 = vld [vmem:[%s11226_s15 + $0x160] sm:$0xff] (%p11118_p9)  ;;  %v7564_v11 = vld [vmem:[%s11226_s15 + $0x168] sm:$0xff] (%p11118_p9) }
 0x7c6   : > { %v10916_v61 = vpop.eup %10915  ;;  %7438 = vst [vmem:[%s11226_s15 + $0x3a8] sm:$0xff] %v7310_v13  ;;  %v7313_v1 = vmul.f32 %v10914_v16, %v14513_v49  ;;  %7551 = vst [vmem:[%s14611_s16 + $0x250] sm:$0xff] (%p11118_p9), %v7550_v37  ;;  %v7566_v13 = vld [vmem:[%s11226_s15 + $0x170] sm:$0xff] (%p11118_p9)  ;;  %v7568_v16 = vld [vmem:[%s11226_s15 + $0x178] sm:$0xff] (%p11118_p9) }
 0x7c7   : > { %v10918_v18 = vpop.eup %10917  ;;  %7440 = vst [vmem:[%s11226_s15 + $0x3b8] sm:$0xff] %v7312_v10  ;;  %v7315_v8 = vmul.f32 %v10916_v61, %v14517_v33  ;;  %7553 = vst [vmem:[%s14611_s16 + $0x258] sm:$0xff] (%p11118_p9), %v7552_v38  ;;  %v7570_v10 = vld [vmem:[%s11226_s15 + $0x180] sm:$0xff] (%p11118_p9)  ;;  %v7572_v61 = vld [vmem:[%s11226_s15 + $0x188] sm:$0xff] (%p11118_p9) }
 0x7c8   : > { %v10920_v6 = vpop.eup %10919  ;;  %7441 = vst [vmem:[%s11226_s15 + $0x3c0] sm:$0xff] %v7313_v1  ;;  %v7314_v41 = vmul.f32 %v10918_v18, %v14521_v32  ;;  %7555 = vst [vmem:[%s14611_s16 + $0x280] sm:$0xff] (%p11118_p9), %v7554_v17  ;;  %v7574_v1 = vld [vmem:[%s11226_s15 + $0x190] sm:$0xff] (%p11118_p9)  ;;  %v7576_v18 = vld [vmem:[%s11226_s15 + $0x198] sm:$0xff] (%p11118_p9) }
 0x7c9   : > { %v10922_v54 = vpop.eup %10921  ;;  %7443 = vst [vmem:[%s11226_s15 + $0x3d0] sm:$0xff] %v7315_v8  ;;  %v7316_v29 = vmul.f32 %v10920_v6, %v14526_v50  ;;  %7455 = sbr.rel (!%p11118_p9) target bundleno = 2043 (0x7fb), region = 85  ;;  %v7474_v50 = vld [vmem:[%s11226_s15] sm:$0xff] (%p11118_p9)  ;;  %7557 = vst [vmem:[%s14611_s16 + $0x288] sm:$0xff] (%p11118_p9), %v7556_v48  ;;  %v7580_v6 = vld [vmem:[%s11226_s15 + $0x1a8] sm:$0xff] (%p11118_p9) }
 0x7ca   : > { %v10924_v7 = vpop.eup %10923  ;;  %7442 = vst [vmem:[%s11226_s15 + $0x3c8] sm:$0xff] %v7314_v41  ;;  %v7317_v49 = vmul.f32 %v10922_v54, %v14531_v52  ;;  %v7476_v52 = vld [vmem:[%s11226_s15 + $0x8] sm:$0xff] (%p11118_p9)  ;;  %7475 = vst [vmem:[%s14611_s16] sm:$0xff] (%p11118_p9), %v7474_v50  ;;  %v7578_v8 = vld [vmem:[%s11226_s15 + $0x1a0] sm:$0xff] (%p11118_p9) }
 0x7cb   : > { %v10926_v34 = vpop.eup %10925  ;;  %7444 = vst [vmem:[%s11226_s15 + $0x3d8] sm:$0xff] %v7316_v29  ;;  %v7319_v0 = vmul.f32 %v10924_v7, %v14537_v21  ;;  %v7478_v21 = vld [vmem:[%s11226_s15 + $0x10] sm:$0xff] (%p11118_p9)  ;;  %7477 = vst [vmem:[%s14611_s16 + $0x8] sm:$0xff] (%p11118_p9), %v7476_v52  ;;  %v7584_v54 = vld [vmem:[%s11226_s15 + $0x1b8] sm:$0xff] (%p11118_p9) }
 0x7cc   : > { %v10928_v33 = vpop.eup %10927  ;;  %7445 = vst [vmem:[%s11226_s15 + $0x3e0] sm:$0xff] %v7317_v49  ;;  %v7318_v9 = vmul.f32 %v10926_v34, %v14543_v20  ;;  %v7480_v20 = vld [vmem:[%s11226_s15 + $0x18] sm:$0xff] (%p11118_p9)  ;;  %7479 = vst [vmem:[%s14611_s16 + $0x10] sm:$0xff] (%p11118_p9), %v7478_v21  ;;  %v7582_v41 = vld [vmem:[%s11226_s15 + $0x1b0] sm:$0xff] (%p11118_p9) }
 0x7cd   : > { %7447 = vst [vmem:[%s11226_s15 + $0x3f0] sm:$0xff] %v7319_v0  ;;  %v7320_v32 = vmul.f32 %v10928_v33, %v14549_v39  ;;  %v7482_v39 = vld [vmem:[%s11226_s15 + $0x20] sm:$0xff] (%p11118_p9)  ;;  %7481 = vst [vmem:[%s14611_s16 + $0x18] sm:$0xff] (%p11118_p9), %v7480_v20  ;;  %v7588_v7 = vld [vmem:[%s11226_s15 + $0x1c8] sm:$0xff] (%p11118_p9) }
 0x7ce   : > { %7446 = vst [vmem:[%s11226_s15 + $0x3e8] sm:$0xff] %v7318_v9  ;;  %7483 = vst [vmem:[%s14611_s16 + $0x40] sm:$0xff] (%p11118_p9), %v7482_v39  ;;  %v7586_v29 = vld [vmem:[%s11226_s15 + $0x1c0] sm:$0xff] (%p11118_p9)  ;;  %v7590_v49 = vld [vmem:[%s11226_s15 + $0x1d0] sm:$0xff] (%p11118_p9) }
 0x7cf   : > { %7448 = vst [vmem:[%s11226_s15 + $0x3f8] sm:$0xff] %v7320_v32  ;;  %7559 = vst [vmem:[%s14611_s16 + $0x290] sm:$0xff] (%p11118_p9), %v7558_v5  ;;  %v7592_v34 = vld [vmem:[%s11226_s15 + $0x1d8] sm:$0xff] (%p11118_p9)  ;;  %v7594_v0 = vld [vmem:[%s11226_s15 + $0x1e0] sm:$0xff] (%p11118_p9) }
 0x7d0   : > { %7561 = vst [vmem:[%s14611_s16 + $0x298] sm:$0xff] %v7560_v3  ;;  %7563 = vst [vmem:[%s14611_s16 + $0x2c0] sm:$0xff] %v7562_v23  ;;  %v7596_v33 = vld [vmem:[%s11226_s15 + $0x1e8] sm:$0xff]  ;;  %v7598_v9 = vld [vmem:[%s11226_s15 + $0x1f0] sm:$0xff] }
 0x7d1   : > { %7565 = vst [vmem:[%s14611_s16 + $0x2c8] sm:$0xff] %v7564_v11  ;;  %7567 = vst [vmem:[%s14611_s16 + $0x2d0] sm:$0xff] %v7566_v13  ;;  %v7600_v32 = vld [vmem:[%s11226_s15 + $0x1f8] sm:$0xff]  ;;  %v7602_v50 = vld [vmem:[%s11226_s15 + $0x200] sm:$0xff] }
 0x7d2   : > { %7569 = vst [vmem:[%s14611_s16 + $0x2d8] sm:$0xff] %v7568_v16  ;;  %7571 = vst [vmem:[%s14611_s16 + $0x300] sm:$0xff] %v7570_v10  ;;  %v7604_v52 = vld [vmem:[%s11226_s15 + $0x208] sm:$0xff]  ;;  %v7606_v21 = vld [vmem:[%s11226_s15 + $0x210] sm:$0xff] }
 0x7d3   : > { %7573 = vst [vmem:[%s14611_s16 + $0x308] sm:$0xff] %v7572_v61  ;;  %7575 = vst [vmem:[%s14611_s16 + $0x310] sm:$0xff] %v7574_v1  ;;  %v7608_v20 = vld [vmem:[%s11226_s15 + $0x218] sm:$0xff]  ;;  %v7610_v39 = vld [vmem:[%s11226_s15 + $0x220] sm:$0xff] }
 0x7d4   : > { %7577 = vst [vmem:[%s14611_s16 + $0x318] sm:$0xff] %v7576_v18  ;;  %7579 = vst [vmem:[%s14611_s16 + $0x340] sm:$0xff] %v7578_v8  ;;  %v7614_v53 = vld [vmem:[%s11226_s15 + $0x230] sm:$0xff]  ;;  %v7616_v59 = vld [vmem:[%s11226_s15 + $0x238] sm:$0xff] }
 0x7d5   : > { %7581 = vst [vmem:[%s14611_s16 + $0x348] sm:$0xff] %v7580_v6  ;;  %7583 = vst [vmem:[%s14611_s16 + $0x350] sm:$0xff] %v7582_v41  ;;  %v7618_v25 = vld [vmem:[%s11226_s15 + $0x240] sm:$0xff]  ;;  %v7620_v43 = vld [vmem:[%s11226_s15 + $0x248] sm:$0xff] }
 0x7d6   : > { %7585 = vst [vmem:[%s14611_s16 + $0x358] sm:$0xff] %v7584_v54  ;;  %7587 = vst [vmem:[%s14611_s16 + $0x380] sm:$0xff] %v7586_v29  ;;  %v7622_v44 = vld [vmem:[%s11226_s15 + $0x250] sm:$0xff]  ;;  %v7624_v15 = vld [vmem:[%s11226_s15 + $0x258] sm:$0xff] }
 0x7d7   : > { %7589 = vst [vmem:[%s14611_s16 + $0x388] sm:$0xff] %v7588_v7  ;;  %7591 = vst [vmem:[%s14611_s16 + $0x390] sm:$0xff] %v7590_v49  ;;  %v7626_v63 = vld [vmem:[%s11226_s15 + $0x260] sm:$0xff]  ;;  %v7628_v58 = vld [vmem:[%s11226_s15 + $0x268] sm:$0xff] }
 0x7d8   : > { %7593 = vst [vmem:[%s14611_s16 + $0x398] sm:$0xff] %v7592_v34  ;;  %7595 = vst [vmem:[%s14611_s16 + $0x3c0] sm:$0xff] %v7594_v0  ;;  %v7630_v30 = vld [vmem:[%s11226_s15 + $0x270] sm:$0xff]  ;;  %v7632_v2 = vld [vmem:[%s11226_s15 + $0x278] sm:$0xff] }
 0x7d9   : > { %7597 = vst [vmem:[%s14611_s16 + $0x3c8] sm:$0xff] %v7596_v33  ;;  %7599 = vst [vmem:[%s14611_s16 + $0x3d0] sm:$0xff] %v7598_v9  ;;  %v7634_v60 = vld [vmem:[%s11226_s15 + $0x280] sm:$0xff]  ;;  %v7636_v47 = vld [vmem:[%s11226_s15 + $0x288] sm:$0xff] }
 0x7da   : > { %7601 = vst [vmem:[%s14611_s16 + $0x3d8] sm:$0xff] %v7600_v32  ;;  %7603 = vst [vmem:[%s14611_s16 + $0x400] sm:$0xff] %v7602_v50  ;;  %v7638_v24 = vld [vmem:[%s11226_s15 + $0x290] sm:$0xff]  ;;  %v7640_v27 = vld [vmem:[%s11226_s15 + $0x298] sm:$0xff] }
 0x7db   : > { %7605 = vst [vmem:[%s14611_s16 + $0x408] sm:$0xff] %v7604_v52  ;;  %7607 = vst [vmem:[%s14611_s16 + $0x410] sm:$0xff] %v7606_v21  ;;  %v7642_v31 = vld [vmem:[%s11226_s15 + $0x2a0] sm:$0xff]  ;;  %v7644_v14 = vld [vmem:[%s11226_s15 + $0x2a8] sm:$0xff] }
 0x7dc   : > { %7609 = vst [vmem:[%s14611_s16 + $0x418] sm:$0xff] %v7608_v20  ;;  %7611 = vst [vmem:[%s14611_s16 + $0x440] sm:$0xff] %v7610_v39  ;;  %v7646_v55 = vld [vmem:[%s11226_s15 + $0x2b0] sm:$0xff]  ;;  %v7648_v35 = vld [vmem:[%s11226_s15 + $0x2b8] sm:$0xff] }
 0x7dd   : > { %7613 = vst [vmem:[%s14611_s16 + $0x448] sm:$0xff] %v7612_v40  ;;  %7615 = vst [vmem:[%s14611_s16 + $0x450] sm:$0xff] %v7614_v53  ;;  %v7650_v12 = vld [vmem:[%s11226_s15 + $0x2c0] sm:$0xff]  ;;  %v7652_v56 = vld [vmem:[%s11226_s15 + $0x2c8] sm:$0xff] }
 0x7de   : > { %7617 = vst [vmem:[%s14611_s16 + $0x458] sm:$0xff] %v7616_v59  ;;  %7619 = vst [vmem:[%s14611_s16 + $0x480] sm:$0xff] %v7618_v25  ;;  %v7654_v26 = vld [vmem:[%s11226_s15 + $0x2d0] sm:$0xff]  ;;  %v7656_v42 = vld [vmem:[%s11226_s15 + $0x2d8] sm:$0xff] }
 0x7df   : > { %7621 = vst [vmem:[%s14611_s16 + $0x488] sm:$0xff] %v7620_v43  ;;  %7623 = vst [vmem:[%s14611_s16 + $0x490] sm:$0xff] %v7622_v44  ;;  %v7658_v62 = vld [vmem:[%s11226_s15 + $0x2e0] sm:$0xff]  ;;  %v7660_v36 = vld [vmem:[%s11226_s15 + $0x2e8] sm:$0xff] }
 0x7e0   : > { %7625 = vst [vmem:[%s14611_s16 + $0x498] sm:$0xff] %v7624_v15  ;;  %7627 = vst [vmem:[%s14611_s16 + $0x4c0] sm:$0xff] %v7626_v63  ;;  %v7662_v28 = vld [vmem:[%s11226_s15 + $0x2f0] sm:$0xff]  ;;  %v7664_v4 = vld [vmem:[%s11226_s15 + $0x2f8] sm:$0xff] }
 0x7e1   : > { %7629 = vst [vmem:[%s14611_s16 + $0x4c8] sm:$0xff] %v7628_v58  ;;  %7631 = vst [vmem:[%s14611_s16 + $0x4d0] sm:$0xff] %v7630_v30  ;;  %v7666_v46 = vld [vmem:[%s11226_s15 + $0x300] sm:$0xff]  ;;  %v7668_v22 = vld [vmem:[%s11226_s15 + $0x308] sm:$0xff] }
 0x7e2   : > { %7633 = vst [vmem:[%s14611_s16 + $0x4d8] sm:$0xff] %v7632_v2  ;;  %7635 = vst [vmem:[%s14611_s16 + $0x500] sm:$0xff] %v7634_v60  ;;  %v7670_v51 = vld [vmem:[%s11226_s15 + $0x310] sm:$0xff]  ;;  %v7672_v57 = vld [vmem:[%s11226_s15 + $0x318] sm:$0xff] }
 0x7e3   : > { %7637 = vst [vmem:[%s14611_s16 + $0x508] sm:$0xff] %v7636_v47  ;;  %7639 = vst [vmem:[%s14611_s16 + $0x510] sm:$0xff] %v7638_v24  ;;  %v7674_v19 = vld [vmem:[%s11226_s15 + $0x320] sm:$0xff]  ;;  %v7676_v45 = vld [vmem:[%s11226_s15 + $0x328] sm:$0xff] }
 0x7e4   : > { %7641 = vst [vmem:[%s14611_s16 + $0x518] sm:$0xff] %v7640_v27  ;;  %7643 = vst [vmem:[%s14611_s16 + $0x540] sm:$0xff] %v7642_v31  ;;  %v7678_v37 = vld [vmem:[%s11226_s15 + $0x330] sm:$0xff]  ;;  %v7680_v38 = vld [vmem:[%s11226_s15 + $0x338] sm:$0xff] }
 0x7e5   : > { %7645 = vst [vmem:[%s14611_s16 + $0x548] sm:$0xff] %v7644_v14  ;;  %7647 = vst [vmem:[%s14611_s16 + $0x550] sm:$0xff] %v7646_v55  ;;  %v7682_v17 = vld [vmem:[%s11226_s15 + $0x340] sm:$0xff]  ;;  %v7684_v48 = vld [vmem:[%s11226_s15 + $0x348] sm:$0xff] }
 0x7e6   : > { %7649 = vst [vmem:[%s14611_s16 + $0x558] sm:$0xff] %v7648_v35  ;;  %7651 = vst [vmem:[%s14611_s16 + $0x580] sm:$0xff] %v7650_v12  ;;  %v7686_v5 = vld [vmem:[%s11226_s15 + $0x350] sm:$0xff]  ;;  %v7688_v3 = vld [vmem:[%s11226_s15 + $0x358] sm:$0xff] }
 0x7e7   : > { %7653 = vst [vmem:[%s14611_s16 + $0x588] sm:$0xff] %v7652_v56  ;;  %7655 = vst [vmem:[%s14611_s16 + $0x590] sm:$0xff] %v7654_v26  ;;  %v7690_v23 = vld [vmem:[%s11226_s15 + $0x360] sm:$0xff]  ;;  %v7692_v11 = vld [vmem:[%s11226_s15 + $0x368] sm:$0xff] }
 0x7e8   : > { %7657 = vst [vmem:[%s14611_s16 + $0x598] sm:$0xff] %v7656_v42  ;;  %7659 = vst [vmem:[%s14611_s16 + $0x5c0] sm:$0xff] %v7658_v62  ;;  %v7694_v13 = vld [vmem:[%s11226_s15 + $0x370] sm:$0xff]  ;;  %v7696_v16 = vld [vmem:[%s11226_s15 + $0x378] sm:$0xff] }
 0x7e9   : > { %7661 = vst [vmem:[%s14611_s16 + $0x5c8] sm:$0xff] %v7660_v36  ;;  %7663 = vst [vmem:[%s14611_s16 + $0x5d0] sm:$0xff] %v7662_v28  ;;  %v7698_v10 = vld [vmem:[%s11226_s15 + $0x380] sm:$0xff]  ;;  %v7700_v61 = vld [vmem:[%s11226_s15 + $0x388] sm:$0xff] }
 0x7ea   : > { %7665 = vst [vmem:[%s14611_s16 + $0x5d8] sm:$0xff] %v7664_v4  ;;  %7667 = vst [vmem:[%s14611_s16 + $0x600] sm:$0xff] %v7666_v46  ;;  %v7702_v1 = vld [vmem:[%s11226_s15 + $0x390] sm:$0xff]  ;;  %v7704_v18 = vld [vmem:[%s11226_s15 + $0x398] sm:$0xff] }
 0x7eb   : > { %7669 = vst [vmem:[%s14611_s16 + $0x608] sm:$0xff] %v7668_v22  ;;  %7671 = vst [vmem:[%s14611_s16 + $0x610] sm:$0xff] %v7670_v51  ;;  %v7706_v8 = vld [vmem:[%s11226_s15 + $0x3a0] sm:$0xff]  ;;  %v7708_v6 = vld [vmem:[%s11226_s15 + $0x3a8] sm:$0xff] }
 0x7ec   : > { %7673 = vst [vmem:[%s14611_s16 + $0x618] sm:$0xff] %v7672_v57  ;;  %7675 = vst [vmem:[%s14611_s16 + $0x640] sm:$0xff] %v7674_v19  ;;  %v7710_v41 = vld [vmem:[%s11226_s15 + $0x3b0] sm:$0xff]  ;;  %v7712_v54 = vld [vmem:[%s11226_s15 + $0x3b8] sm:$0xff] }
 0x7ed   : > { %7677 = vst [vmem:[%s14611_s16 + $0x648] sm:$0xff] %v7676_v45  ;;  %7679 = vst [vmem:[%s14611_s16 + $0x650] sm:$0xff] %v7678_v37  ;;  %v7714_v29 = vld [vmem:[%s11226_s15 + $0x3c0] sm:$0xff]  ;;  %v7716_v7 = vld [vmem:[%s11226_s15 + $0x3c8] sm:$0xff] }
 0x7ee   : > { %7681 = vst [vmem:[%s14611_s16 + $0x658] sm:$0xff] %v7680_v38  ;;  %7683 = vst [vmem:[%s14611_s16 + $0x680] sm:$0xff] %v7682_v17  ;;  %v7718_v49 = vld [vmem:[%s11226_s15 + $0x3d0] sm:$0xff]  ;;  %v7720_v34 = vld [vmem:[%s11226_s15 + $0x3d8] sm:$0xff] }
 0x7ef   : > { %7685 = vst [vmem:[%s14611_s16 + $0x688] sm:$0xff] %v7684_v48  ;;  %7687 = vst [vmem:[%s14611_s16 + $0x690] sm:$0xff] %v7686_v5  ;;  %v7722_v0 = vld [vmem:[%s11226_s15 + $0x3e0] sm:$0xff]  ;;  %v7724_v33 = vld [vmem:[%s11226_s15 + $0x3e8] sm:$0xff] }
 0x7f0   : > { %7689 = vst [vmem:[%s14611_s16 + $0x698] sm:$0xff] %v7688_v3  ;;  %7691 = vst [vmem:[%s14611_s16 + $0x6c0] sm:$0xff] %v7690_v23  ;;  %v7726_v9 = vld [vmem:[%s11226_s15 + $0x3f0] sm:$0xff]  ;;  %v7728_v32 = vld [vmem:[%s11226_s15 + $0x3f8] sm:$0xff] }
 0x7f1   : > { %7693 = vst [vmem:[%s14611_s16 + $0x6c8] sm:$0xff] %v7692_v11  ;;  %7695 = vst [vmem:[%s14611_s16 + $0x6d0] sm:$0xff] %v7694_v13 }
 0x7f2   : > { %7697 = vst [vmem:[%s14611_s16 + $0x6d8] sm:$0xff] %v7696_v16  ;;  %7699 = vst [vmem:[%s14611_s16 + $0x700] sm:$0xff] %v7698_v10 }
 0x7f3   : > { %7701 = vst [vmem:[%s14611_s16 + $0x708] sm:$0xff] %v7700_v61  ;;  %7703 = vst [vmem:[%s14611_s16 + $0x710] sm:$0xff] %v7702_v1 }
 0x7f4   : > { %7705 = vst [vmem:[%s14611_s16 + $0x718] sm:$0xff] %v7704_v18  ;;  %7707 = vst [vmem:[%s14611_s16 + $0x740] sm:$0xff] %v7706_v8 }
 0x7f5   : > { %7709 = vst [vmem:[%s14611_s16 + $0x748] sm:$0xff] %v7708_v6  ;;  %7711 = vst [vmem:[%s14611_s16 + $0x750] sm:$0xff] %v7710_v41 }
 0x7f6   : > { %7713 = vst [vmem:[%s14611_s16 + $0x758] sm:$0xff] %v7712_v54  ;;  %7715 = vst [vmem:[%s14611_s16 + $0x780] sm:$0xff] %v7714_v29 }
 0x7f7   : > { %7717 = vst [vmem:[%s14611_s16 + $0x788] sm:$0xff] %v7716_v7  ;;  %7719 = vst [vmem:[%s14611_s16 + $0x790] sm:$0xff] %v7718_v49 }
 0x7f8   : > { %7721 = vst [vmem:[%s14611_s16 + $0x798] sm:$0xff] %v7720_v34  ;;  %7723 = vst [vmem:[%s14611_s16 + $0x7c0] sm:$0xff] %v7722_v0 }
 0x7f9   : > { %7725 = vst [vmem:[%s14611_s16 + $0x7c8] sm:$0xff] %v7724_v33  ;;  %7727 = vst [vmem:[%s14611_s16 + $0x7d0] sm:$0xff] %v7726_v9 }
 0x7fa   : > { %7729 = vst [vmem:[%s14611_s16 + $0x7d8] sm:$0xff] %v7728_v32 }
 0x7fb PF: > { %s15_s26 = sadd.s32 1, %s11007_s26   ;;  %s15157_s18 = smov %s10979_s19 }
 0x7fc   : > { %p12_p3 = scmp.ge.s32.totalorder %s15_s26, 6   ;;  %s15158_s19 = smov %s11126_s13 }
 0x7fd   : > { %s15159_s20 = smov %s10987_s21  ;;  %s15160_s21 = smov %s11123_s12 }
 0x7fe   : > { %s15161_s22 = smov %s10999_s24  ;;  %s15162_s23 = smov %s11003_s25 }
 0x7ff   : > { %s15163_s24 = smov %s15166_s27  ;;  %s15164_s25 = smov %s15170_s28 }
 0x800   :  { %14 = sbr.rel (!%p12_p3) target bundleno = 5 (0x5), region = 169 }

</bundles_post_ra>
